<compile_context>
chip_gen: v6e
topology: v6e:2x2x1
jax: 0.10.0
libtpu: 0.0.40
codegen_flags: <defaults>
</compile_context>

<pallas_src>
import functools

import jax
import jax.numpy as jnp
import numpy as np
from jax.experimental import pallas as pl
from jax.experimental.pallas import tpu as pltpu


def _image_encoder_kernel(x_ref, wc_ref, bc_ref, w1_ref, b1_ref, w2_ref, b2_ref,
                          out_ref, h_acc, *, batch, hw):
    """One grid step == one chunk of the 2048-wide feature axis, whole batch at once.

    x_ref  : (B*HW, Cin_pad) f32   all images, spatial flattened, channels last (zero padded)
    wc_ref : (Cin_pad, Fc)  bf16   backbone 1x1-conv weight chunk (stand-in for ResNet50 body)
    bc_ref : (1, Fc)        f32
    w1_ref : (Fc, 512)      bf16   fc1 weight chunk (stored (in, out), i.e. PyTorch weight.T)
    b1_ref : (1, 512)       f32
    w2_ref : (512, E)       bf16   img_projection weight (in, out)
    b2_ref : (1, E)         f32
    out_ref: (B, E)         f32
    h_acc  : (B, 512)       f32    fc1 pre-activation accumulator (of spatial SUMS) across F chunks
    """
    k = pl.program_id(0)

    @pl.when(k == 0)
    def _init():
        h_acc[...] = jnp.zeros_like(h_acc)

    # --- backbone body (chunk): pointwise conv on the MXU + ReLU -------------------
    # Weights arrive bf16 (half the HBM traffic); upcast in VMEM, accumulate in f32.
    feat = jnp.dot(x_ref[...], wc_ref[...].astype(jnp.float32),
                   preferred_element_type=jnp.float32) + bc_ref[...]
    feat = jnp.maximum(feat, 0.0)                                        # (B*HW, Fc)

    # --- AdaptiveAvgPool2d((1,1)) + squeeze: per-image spatial SUM here -------------
    # (single 1/HW scale applied once in the finalize block; the chain is linear).
    # Split of the sublane dim B*HW -> (B, HW) is tile-aligned (HW % 8 == 0 here).
    pooled_sum = jnp.sum(feat.reshape(batch, hw, feat.shape[-1]), axis=1)  # (B, Fc)

    # --- fc1 partial product over this F chunk (batched: M = B) ---------------------
    h_acc[...] += jnp.dot(pooled_sum, w1_ref[...].astype(jnp.float32),
                          preferred_element_type=jnp.float32)

    # --- finalize: 1/HW scale + fc1 bias + ReLU, then img_projection ----------------
    @pl.when(k == pl.num_programs(0) - 1)
    def _finalize():
        h = jnp.maximum(h_acc[...] * (1.0 / hw) + b1_ref[...], 0.0)     # (B, 512)
        emb = jnp.dot(h, w2_ref[...].astype(jnp.float32),
                      preferred_element_type=jnp.float32) + b2_ref[...]
        out_ref[...] = emb.astype(out_ref.dtype)                         # (B, E)


@functools.partial(jax.jit, static_argnames=("f_chunk",))
def image_encoder(x_nchw, wc, bc, w1, b1, w2, b2, *, f_chunk=None):
    """x_nchw: [B, Cin, H, W] float32. Returns [B, E] float32.

    f_chunk=None -> whole feature axis in one grid step (default; fastest at these shapes).
    """
    B, Cin, H, W = x_nchw.shape
    HW = H * W
    F = wc.shape[1]
    HID = w1.shape[1]
    E = w2.shape[1]
    if f_chunk is None:
        f_chunk = F                       # single grid step
    assert F % f_chunk == 0, "feature dim must be divisible by f_chunk"
    n_chunks = F // f_chunk

    # NCHW -> (B*HW, Cin): channels on the lane axis, whole batch flattened so the
    # backbone matmul has a real M dimension. Pad Cin to the f32 sublane quantum (8);
    # the zero rows/cols contribute exactly 0. (Deliberately NOT padded further.)
    cin_pad = max(8, -(-Cin // 8) * 8)
    x_flat = jnp.transpose(x_nchw, (0, 2, 3, 1)).reshape(B * HW, Cin)
    x_flat = jnp.pad(x_flat, ((0, 0), (0, cin_pad - Cin))).astype(jnp.float32)

    # Weights in bf16 (in deployment they would simply be stored bf16).
    wc_pad = jnp.pad(wc, ((0, cin_pad - Cin), (0, 0))).astype(jnp.bfloat16)
    w1_b = w1.astype(jnp.bfloat16)
    w2_b = w2.astype(jnp.bfloat16)
    bc_f = bc.astype(jnp.float32)
    b1_f = b1.astype(jnp.float32)
    b2_f = b2.astype(jnp.float32)

    flops = int(2 * B * HW * cin_pad * F      # backbone matmul
                + B * HW * F                  # relu + spatial-sum reduce (approx)
                + 2 * B * F * HID             # fc1
                + 2 * B * HID * E)            # projection
    bytes_accessed = int(4 * (x_flat.size + bc_f.size + b1_f.size + b2_f.size + B * E)
                         + 2 * (wc_pad.size + w1_b.size + w2_b.size))

    kernel = functools.partial(_image_encoder_kernel, batch=B, hw=HW)

    out = pl.pallas_call(
        kernel,
        out_shape=jax.ShapeDtypeStruct((B, E), jnp.float32),
        grid_spec=pltpu.PrefetchScalarGridSpec(
            num_scalar_prefetch=0,
            grid=(n_chunks,),
            in_specs=[
                pl.BlockSpec((B * HW, cin_pad), lambda k: (0, 0)),    # x (resident)
                pl.BlockSpec((cin_pad, f_chunk), lambda k: (0, k)),   # wc chunk (bf16)
                pl.BlockSpec((1, f_chunk),       lambda k: (0, k)),   # bc chunk
                pl.BlockSpec((f_chunk, HID),     lambda k: (k, 0)),   # w1 chunk (bf16)
                pl.BlockSpec((1, HID),           lambda k: (0, 0)),   # b1 (resident)
                pl.BlockSpec((HID, E),           lambda k: (0, 0)),   # w2 (resident, bf16)
                pl.BlockSpec((1, E),             lambda k: (0, 0)),   # b2 (resident)
            ],
            out_specs=pl.BlockSpec((B, E), lambda k: (0, 0)),
            scratch_shapes=[pltpu.VMEM((B, HID), jnp.float32)],
        ),
        compiler_params=pltpu.CompilerParams(
            # Single grid axis is the fc1 reduction (K) axis -> sequential.
            dimension_semantics=("arbitrary",),
            # Explicit, conservative limit: actual footprint is ~10-14 MiB; 32 MiB is
            # within every generation's physical VMEM (incl. v7x's 64 MiB).
            vmem_limit_bytes=32 * 1024 * 1024,
        ),
        cost_estimate=pl.CostEstimate(flops=flops, transcendentals=0,
                                      bytes_accessed=bytes_accessed),
    )(x_flat, wc_pad, bc_f, w1_b, b1_f, w2_b, b2_f)
    return out


def reference_forward(x_nchw, wc, bc, w1, b1, w2, b2):
    """Pure-JAX reference with identical semantics.

    Uses the same bf16-quantized weights the kernel sees (then full-f32 math), so the
    comparison measures kernel fidelity rather than bf16 quantization error.
    """
    B, Cin, H, W = x_nchw.shape
    wc = wc.astype(jnp.bfloat16).astype(jnp.float32)
    w1 = w1.astype(jnp.bfloat16).astype(jnp.float32)
    w2 = w2.astype(jnp.bfloat16).astype(jnp.float32)
    hp = jax.lax.Precision.HIGHEST
    x_flat = jnp.transpose(x_nchw, (0, 2, 3, 1)).reshape(B, H * W, Cin)
    feat = jnp.maximum(jnp.einsum("bsc,cf->bsf", x_flat, wc, precision=hp) + bc, 0.0)
    pooled = jnp.mean(feat, axis=1)                                     # [B, F]   (avgpool + squeeze)
    h = jnp.maximum(jnp.dot(pooled, w1, precision=hp) + b1, 0.0)        # [B, 512]
    return jnp.dot(h, w2, precision=hp) + b2                            # [B, E]


if __name__ == "__main__":
    # Small shapes consistent with the module's forward (RGB images, NCHW).
    B, Cin, H, W = 2, 3, 16, 16
    FEAT = 2048                         # resnet50.fc.in_features
    HID = 512                           # fc1 output
    EMB = 128                           # embedding_dim

    key = jax.random.PRNGKey(0)
    kx, kc, k1, k2, kb1, kb2, kbc = jax.random.split(key, 7)

    x = jax.random.normal(kx, (B, Cin, H, W), dtype=jnp.float32)

    # Deterministic synthetic parameters (fan-in scaled), stored as (in, out) for x @ W.
    wc = jax.random.normal(kc, (Cin, FEAT), dtype=jnp.float32) / np.sqrt(Cin)
    bc = jax.random.normal(kbc, (1, FEAT), dtype=jnp.float32) * 0.01
    w1 = jax.random.normal(k1, (FEAT, HID), dtype=jnp.float32) / np.sqrt(FEAT)
    b1 = jax.random.normal(kb1, (1, HID), dtype=jnp.float32) * 0.01
    w2 = jax.random.normal(k2, (HID, EMB), dtype=jnp.float32) / np.sqrt(HID)
    b2 = jax.random.normal(kb2, (1, EMB), dtype=jnp.float32) * 0.01

    emb = jax.block_until_ready(image_encoder(x, wc, bc, w1, b1, w2, b2))
    ref = jax.block_until_ready(reference_forward(x, wc, bc, w1, b1, w2, b2))
    # bf16 weights in the kernel path -> looser tolerance than the all-f32 version.
    np.testing.assert_allclose(np.asarray(emb), np.asarray(ref), rtol=1e-2, atol=1e-2)

    assert emb.shape == (B, EMB)
    print("KERNEL_OK")
</pallas_src>

<mosaic_0001>
module attributes {stable_mosaic.version = 11 : i64} {
  func.func @_image_encoder_kernel(%arg0: i32, %arg1: memref<512x8xf32, #tpu.memory_space<vmem>>, %arg2: memref<8x2048xbf16, #tpu.memory_space<vmem>>, %arg3: memref<1x2048xf32, #tpu.memory_space<vmem>>, %arg4: memref<2048x512xbf16, #tpu.memory_space<vmem>>, %arg5: memref<1x512xf32, #tpu.memory_space<vmem>>, %arg6: memref<512x128xbf16, #tpu.memory_space<vmem>>, %arg7: memref<1x128xf32, #tpu.memory_space<vmem>>, %arg8: memref<2x128xf32, #tpu.memory_space<vmem>>, %arg9: memref<2x512xf32, #tpu.memory_space<vmem>>) attributes {dimension_semantics = [#tpu.dimension_semantics<arbitrary>], iteration_bounds = array<i64: 1>, scalar_prefetch = 0 : i64, scratch_operands = 1 : i64, tpu.core_type = #tpu.core_type<tc>, window_params = [{pipeline_mode = #tpu.pipeline_mode<synchronous>, transform_indices = @transform_0, window_bounds = array<i64: 512, 8>}, {transform_indices = @transform_1, window_bounds = array<i64: 8, 2048>}, {transform_indices = @transform_2, window_bounds = array<i64: 1, 2048>}, {transform_indices = @transform_3, window_bounds = array<i64: 2048, 512>}, {pipeline_mode = #tpu.pipeline_mode<synchronous>, transform_indices = @transform_4, window_bounds = array<i64: 1, 512>}, {pipeline_mode = #tpu.pipeline_mode<synchronous>, transform_indices = @transform_5, window_bounds = array<i64: 512, 128>}, {pipeline_mode = #tpu.pipeline_mode<synchronous>, transform_indices = @transform_6, window_bounds = array<i64: 1, 128>}, {pipeline_mode = #tpu.pipeline_mode<synchronous>, transform_indices = @transform_7, window_bounds = array<i64: 2, 128>}]} {
    %c0_i32 = arith.constant 0 : i32
    %0 = arith.cmpi eq, %arg0, %c0_i32 : i32
    %1 = arith.extui %0 : i1 to i32
    %c0_i32_0 = arith.constant 0 : i32
    %2 = arith.cmpi ne, %1, %c0_i32_0 : i32
    scf.if %2 {
      %cst_17 = arith.constant 0.000000e+00 : f32
      %23 = vector.broadcast %cst_17 : f32 to vector<2x512xf32>
      %c0_18 = arith.constant 0 : index
      %c0_19 = arith.constant 0 : index
      %24 = vector.load %arg9[%c0_18, %c0_19] : memref<2x512xf32, #tpu.memory_space<vmem>>, vector<2x512xf32>
      tpu.vector_store %arg9[%c0_18, %c0_19], %23 {strides = array<i32>} : memref<2x512xf32, #tpu.memory_space<vmem>>, vector<2x512xf32>,
    } else {
    }
    %c0 = arith.constant 0 : index
    %c0_1 = arith.constant 0 : index
    %3 = vector.load %arg1[%c0, %c0_1] : memref<512x8xf32, #tpu.memory_space<vmem>>, vector<512x8xf32>
    %c0_2 = arith.constant 0 : index
    %c0_3 = arith.constant 0 : index
    %4 = vector.load %arg2[%c0_2, %c0_3] : memref<8x2048xbf16, #tpu.memory_space<vmem>>, vector<8x2048xbf16>
    %5 = arith.extf %4 : vector<8x2048xbf16> to vector<8x2048xf32>
    %cst = arith.constant dense<0.000000e+00> : vector<512x2048xf32>
    %6 = tpu.matmul %3, %5, %cst {dimension_numbers = #tpu.dot_dimension_numbers<[1], [0], [0], [1], [0, 0, 1, 1], [], []>} : vector<512x8xf32>, vector<8x2048xf32>, vector<512x2048xf32> -> vector<512x2048xf32>
    %c0_4 = arith.constant 0 : index
    %c0_5 = arith.constant 0 : index
    %7 = vector.load %arg3[%c0_4, %c0_5] : memref<1x2048xf32, #tpu.memory_space<vmem>>, vector<1x2048xf32>
    %8 = vector.broadcast %7 : vector<1x2048xf32> to vector<512x2048xf32>
    %9 = arith.addf %6, %8 : vector<512x2048xf32>
    %cst_6 = arith.constant 0.000000e+00 : f32
    %10 = vector.broadcast %cst_6 : f32 to vector<512x2048xf32>
    %11 = arith.maximumf %9, %10 : vector<512x2048xf32>
    %12 = vector.shape_cast %11 : vector<512x2048xf32> to vector<2x256x2048xf32>
    %cst_7 = arith.constant dense<0.000000e+00> : vector<2x2048xf32>
    %13 = vector.multi_reduction <add>, %12, %cst_7 [1] : vector<2x256x2048xf32> to vector<2x2048xf32>
    %c0_8 = arith.constant 0 : index
    %c0_9 = arith.constant 0 : index
    %14 = vector.load %arg9[%c0_8, %c0_9] : memref<2x512xf32, #tpu.memory_space<vmem>>, vector<2x512xf32>
    %c0_10 = arith.constant 0 : index
    %c0_11 = arith.constant 0 : index
    %15 = vector.load %arg4[%c0_10, %c0_11] : memref<2048x512xbf16, #tpu.memory_space<vmem>>, vector<2048x512xbf16>
    %16 = arith.extf %15 : vector<2048x512xbf16> to vector<2048x512xf32>
    %cst_12 = arith.constant dense<0.000000e+00> : vector<2x512xf32>
    %17 = tpu.matmul %13, %16, %cst_12 {dimension_numbers = #tpu.dot_dimension_numbers<[1], [0], [0], [1], [0, 0, 1, 1], [], []>} : vector<2x2048xf32>, vector<2048x512xf32>, vector<2x512xf32> -> vector<2x512xf32>
    %18 = arith.addf %14, %17 : vector<2x512xf32>
    %c0_13 = arith.constant 0 : index
    %c0_14 = arith.constant 0 : index
    %19 = vector.load %arg9[%c0_13, %c0_14] : memref<2x512xf32, #tpu.memory_space<vmem>>, vector<2x512xf32>
    tpu.vector_store %arg9[%c0_13, %c0_14], %18 {strides = array<i32>} : memref<2x512xf32, #tpu.memory_space<vmem>>, vector<2x512xf32>,
    %c0_i32_15 = arith.constant 0 : i32
    %20 = arith.cmpi eq, %arg0, %c0_i32_15 : i32
    %21 = arith.extui %20 : i1 to i32
    %c0_i32_16 = arith.constant 0 : i32
    %22 = arith.cmpi ne, %21, %c0_i32_16 : i32
    scf.if %22 {
      %c0_17 = arith.constant 0 : index
      %c0_18 = arith.constant 0 : index
      %23 = vector.load %arg9[%c0_17, %c0_18] : memref<2x512xf32, #tpu.memory_space<vmem>>, vector<2x512xf32>
      %cst_19 = arith.constant 3.906250e-03 : f32
      %24 = vector.broadcast %cst_19 : f32 to vector<2x512xf32>
      %25 = arith.mulf %23, %24 : vector<2x512xf32>
      %c0_20 = arith.constant 0 : index
      %c0_21 = arith.constant 0 : index
      %26 = vector.load %arg5[%c0_20, %c0_21] : memref<1x512xf32, #tpu.memory_space<vmem>>, vector<1x512xf32>
      %27 = vector.broadcast %26 : vector<1x512xf32> to vector<2x512xf32>
      %28 = arith.addf %25, %27 : vector<2x512xf32>
      %cst_22 = arith.constant 0.000000e+00 : f32
      %29 = vector.broadcast %cst_22 : f32 to vector<2x512xf32>
      %30 = arith.maximumf %28, %29 : vector<2x512xf32>
      %c0_23 = arith.constant 0 : index
      %c0_24 = arith.constant 0 : index
      %31 = vector.load %arg6[%c0_23, %c0_24] : memref<512x128xbf16, #tpu.memory_space<vmem>>, vector<512x128xbf16>
      %32 = arith.extf %31 : vector<512x128xbf16> to vector<512x128xf32>
      %cst_25 = arith.constant dense<0.000000e+00> : vector<2x128xf32>
      %33 = tpu.matmul %30, %32, %cst_25 {dimension_numbers = #tpu.dot_dimension_numbers<[1], [0], [0], [1], [0, 0, 1, 1], [], []>} : vector<2x512xf32>, vector<512x128xf32>, vector<2x128xf32> -> vector<2x128xf32>
      %c0_26 = arith.constant 0 : index
      %c0_27 = arith.constant 0 : index
      %34 = vector.load %arg7[%c0_26, %c0_27] : memref<1x128xf32, #tpu.memory_space<vmem>>, vector<1x128xf32>
      %35 = vector.broadcast %34 : vector<1x128xf32> to vector<2x128xf32>
      %36 = arith.addf %33, %35 : vector<2x128xf32>
      %c0_28 = arith.constant 0 : index
      %c0_29 = arith.constant 0 : index
      %37 = vector.load %arg8[%c0_28, %c0_29] : memref<2x128xf32, #tpu.memory_space<vmem>>, vector<2x128xf32>
      tpu.vector_store %arg8[%c0_28, %c0_29], %36 {strides = array<i32>} : memref<2x128xf32, #tpu.memory_space<vmem>>, vector<2x128xf32>,
    } else {
    }
    return
  }
  func.func @transform_0(%arg0: i32) -> (i32, i32) {
    %c0_i32 = arith.constant 0 : i32
    %c0_i32_0 = arith.constant 0 : i32
    %c0_i32_1 = arith.constant 0 : i32
    return %c0_i32, %c0_i32_0 : i32, i32
  }
  func.func @transform_1(%arg0: i32) -> (i32, i32) {
    %c0_i32 = arith.constant 0 : i32
    %c0_i32_0 = arith.constant 0 : i32
    return %c0_i32, %arg0 : i32, i32
  }
  func.func @transform_2(%arg0: i32) -> (i32, i32) {
    %c0_i32 = arith.constant 0 : i32
    %c0_i32_0 = arith.constant 0 : i32
    return %c0_i32, %arg0 : i32, i32
  }
  func.func @transform_3(%arg0: i32) -> (i32, i32) {
    %c0_i32 = arith.constant 0 : i32
    %c0_i32_0 = arith.constant 0 : i32
    return %arg0, %c0_i32 : i32, i32
  }
  func.func @transform_4(%arg0: i32) -> (i32, i32) {
    %c0_i32 = arith.constant 0 : i32
    %c0_i32_0 = arith.constant 0 : i32
    %c0_i32_1 = arith.constant 0 : i32
    return %c0_i32, %c0_i32_0 : i32, i32
  }
  func.func @transform_5(%arg0: i32) -> (i32, i32) {
    %c0_i32 = arith.constant 0 : i32
    %c0_i32_0 = arith.constant 0 : i32
    %c0_i32_1 = arith.constant 0 : i32
    return %c0_i32, %c0_i32_0 : i32, i32
  }
  func.func @transform_6(%arg0: i32) -> (i32, i32) {
    %c0_i32 = arith.constant 0 : i32
    %c0_i32_0 = arith.constant 0 : i32
    %c0_i32_1 = arith.constant 0 : i32
    return %c0_i32, %c0_i32_0 : i32, i32
  }
  func.func @transform_7(%arg0: i32) -> (i32, i32) {
    %c0_i32 = arith.constant 0 : i32
    %c0_i32_0 = arith.constant 0 : i32
    %c0_i32_1 = arith.constant 0 : i32
    return %c0_i32, %c0_i32_0 : i32, i32
  }
}

</mosaic_0001>

<bundles_post_ra>
// kernel: image_encoder.1
= control target key start
LH: loop header
LB: loop body
LE: loop exit
PB: predicated region body
PF: predicated region fallthrough
CT: control target
= control target key end

     0   :  { %v16372_v5 = vmov 0.0   ;;  %vm204_vm0 = vcmask 64512   ;;  %s16360_s0 = inlined_call_operand.vmem [shape: f32[512,8], index: 0, kind: input, shape index: {}]   ;;  %s16361_s1 = inlined_call_operand.vmem [shape: bf16[8,2048], index: 1, kind: input, shape index: {}]   ;;  %s16362_s2 = inlined_call_operand.vmem [shape: f32[1,2048], index: 2, kind: input, shape index: {}]   ;;  %s16363_s3 = inlined_call_operand.vmem [shape: bf16[2048,512], index: 3, kind: input, shape index: {}]   ;;  %s16364_s4 = inlined_call_operand.vmem [shape: f32[1,512], index: 4, kind: input, shape index: {}]   ;;  %s16365_s5 = inlined_call_operand.vmem [shape: bf16[512,128], index: 5, kind: input, shape index: {}]   ;;  %s16366_s6 = inlined_call_operand.vmem [shape: f32[1,128], index: 6, kind: input, shape index: {}]   ;;  %s16367_s7 = inlined_call_operand.hbm [shape: f32[2,128], index: 7, kind: output, shape index: {}]  }
   0x1   :  { %v96_v0 = vld [vmem:[%s16361_s1] sm:$0xff]  ;;  %v97_v1 = vld [vmem:[%s16361_s1 + $0x8] sm:$0xff]  ;;  %461 = vmatprep.mubr.f32.mxu0 %v16372_v5  ;;  %910 = vmatprep.mubr.f32.mxu1 %v16372_v5  ;;  %v98_v7 = vld [vmem:[%s16361_s1 + $0x10] sm:$0xff] }
   0x2   :  { %v105_v2 = vunpack.c.h.bf16 %v96_v0  ;;  %v107_v3 = vunpack.c.h.bf16 %v97_v1  ;;  %v104_v4 = vunpack.c.l.bf16 %v96_v0  ;;  %v106_v6 = vunpack.c.l.bf16 %v97_v1  ;;  %v99_v8 = vld [vmem:[%s16361_s1 + $0x18] sm:$0xff]  ;;  %v32_v9 = vld [vmem:[%s16360_s0] sm:$0xff]  ;;  %v33_v14 = vld [vmem:[%s16360_s0 + $0x8] sm:$0xff] }
   0x3   :  { %v109_v10 = vunpack.c.h.bf16 %v98_v7  ;;  %v111_v11 = vunpack.c.h.bf16 %v99_v8  ;;  %v108_v12 = vunpack.c.l.bf16 %v98_v7  ;;  %v110_v13 = vunpack.c.l.bf16 %v99_v8  ;;  %v34_v15 = vld [vmem:[%s16360_s0 + $0x10] sm:$0xff] }
   0x4   :  { %427 = vmatprep.subr.mxu0 %v105_v2  ;;  %876 = vmatprep.subr.mxu1 %v107_v3 }
   0x5   :  { %428 = vmatpush1.msra.mxu0 %v104_v4  ;;  %877 = vmatpush1.msra.mxu1 %v106_v6 }
   0x6   :  { %9314 = vmatmul.mubr.msk.f32.vlgmr.msra.gmra.mxu0 %vm204_vm0, %v32_v9  ;;  %9378 = vmatmul.mubr.msk.f32.vlgmr.msra.gmra.mxu1 %vm204_vm0, %v32_v9 }
   0x7   :  { %1325 = vmatprep.subr.mxu0 %v109_v10  ;;  %1774 = vmatprep.subr.mxu1 %v111_v11 }
   0x8   :  { %1326 = vmatpush1.msra.mxu0 %v108_v12  ;;  %467 = vmatprep.mubr.f32.mxu0 %v16372_v5 }
   0x9   :  { %916 = vmatprep.mubr.f32.mxu1 %v16372_v5  ;;  %1775 = vmatpush1.msra.mxu1 %v110_v13 }
   0xa   :  { %9315 = vmatmul.mubr.msk.f32.gmra.mxu0 %vm204_vm0, %v33_v14  ;;  %9379 = vmatmul.mubr.msk.f32.gmra.mxu1 %vm204_vm0, %v33_v14 }
   0xb   :  { %473 = vmatprep.mubr.f32.mxu0 %v16372_v5  ;;  %922 = vmatprep.mubr.f32.mxu1 %v16372_v5 }
   0xe   :  { %9316 = vmatmul.mubr.msk.f32.gmra.mxu0 %vm204_vm0, %v34_v15  ;;  %9380 = vmatmul.mubr.msk.f32.gmra.mxu1 %vm204_vm0, %v34_v15 }
   0xf   :  { %12 = vsyncpa [#allocation4], 0  ;;  %479 = vmatprep.mubr.f32.mxu0 %v16372_v5  ;;  %928 = vmatprep.mubr.f32.mxu1 %v16372_v5  ;;  %v35_v16 = vld [vmem:[%s16360_s0 + $0x18] sm:$0xff]  ;;  %v36_v17 = vld [vmem:[%s16360_s0 + $0x20] sm:$0xff]  ;;  %v124_v63 = vlaneseq  ;;  %vm7766_vm1 = vcmask 1041409   ;;  %s10281_s9 = smov [#allocation3]  }
  0x10   :  { %v37_v18 = vld [vmem:[%s16360_s0 + $0x28] sm:$0xff]  ;;  %v38_v19 = vld [vmem:[%s16360_s0 + $0x30] sm:$0xff]  ;;  %v39_v20 = vld [vmem:[%s16360_s0 + $0x38] sm:$0xff]  ;;  %s9306_s10 = sshll.u32 %s10281_s9, 4  ;;  %s9307_s10 = int_to_ptr.vmem [resolvable:$true] %s9306_s10 }
  0x11   :  { %v40_v21 = vld [vmem:[%s16360_s0 + $0x40] sm:$0xff]  ;;  %v41_v22 = vld [vmem:[%s16360_s0 + $0x48] sm:$0xff]  ;;  %v42_v23 = vld [vmem:[%s16360_s0 + $0x50] sm:$0xff]  ;;  %v10673_v1 = vshrl.u32 %v124_v63, 7  ;;  %s10257_s11 = scalar_lea.vmem %s9307_s10, 32  ;;  %p10262_p1 = scmp.lt.s32.totalorder %s9307_s10, %s9307_s10 }
  0x12   :  { %9317 = vmatmul.mubr.msk.f32.gmra.mxu0 %vm204_vm0, %v35_v16  ;;  %9381 = vmatmul.mubr.msk.f32.gmra.mxu1 %vm204_vm0, %v35_v16  ;;  %v43_v24 = vld [vmem:[%s16360_s0 + $0x58] sm:$0xff]  ;;  %v44_v25 = vld [vmem:[%s16360_s0 + $0x60] sm:$0xff]  ;;  %v45_v26 = vld [vmem:[%s16360_s0 + $0x68] sm:$0xff]  ;;  %p10258_p0 = scmp.ne.s32.totalorder %s9307_s10, %s10257_s11  ;;  %p10263_p2 = scmp.lt.s32.totalorder %s10257_s11, %s10257_s11 }
  0x13   :  { %485 = vmatprep.mubr.f32.mxu0 %v16372_v5  ;;  %934 = vmatprep.mubr.f32.mxu1 %v16372_v5  ;;  %v46_v27 = vld [vmem:[%s16360_s0 + $0x70] sm:$0xff]  ;;  %v47_v28 = vld [vmem:[%s16360_s0 + $0x78] sm:$0xff]  ;;  %v48_v29 = vld [vmem:[%s16360_s0 + $0x80] sm:$0xff]  ;;  %16427 = vst [vmem:[#allocation6_spill] sm:$0xff] %v10673_v1  ;;  %v10683_v3 = vsub.s32 0, %v10673_v1  ;;  %v10686_v4 = vsub.s32 2, %v10673_v1 }
  0x14   :  { %v49_v30 = vld [vmem:[%s16360_s0 + $0x88] sm:$0xff]  ;;  %v50_v31 = vld [vmem:[%s16360_s0 + $0x90] sm:$0xff]  ;;  %v51_v32 = vld [vmem:[%s16360_s0 + $0x98] sm:$0xff]  ;;  %v10694_v7 = vsub.s32 1, %v10673_v1  ;;  %v10697_v8 = vsub.s32 3, %v10673_v1  ;;  %p10264_p3 = por %p10263_p2, %p10262_p1 }
  0x15   :  { %v52_v33 = vld [vmem:[%s16360_s0 + $0xa0] sm:$0xff]  ;;  %v53_v34 = vld [vmem:[%s16360_s0 + $0xa8] sm:$0xff]  ;;  %v54_v35 = vld [vmem:[%s16360_s0 + $0xb0] sm:$0xff]  ;;  %16428 = vst [vmem:[#allocation7_spill] sm:$0xff] %v10683_v3 }
  0x16   :  { %9318 = vmatmul.mubr.msk.f32.gmra.mxu0 %vm204_vm0, %v36_v17  ;;  %9382 = vmatmul.mubr.msk.f32.gmra.mxu1 %vm204_vm0, %v36_v17  ;;  %v55_v36 = vld [vmem:[%s16360_s0 + $0xb8] sm:$0xff]  ;;  %v56_v37 = vld [vmem:[%s16360_s0 + $0xc0] sm:$0xff]  ;;  %v57_v38 = vld [vmem:[%s16360_s0 + $0xc8] sm:$0xff]  ;;  %16429 = vst [vmem:[#allocation8_spill] sm:$0xff] %v10686_v4  ;;  %p10265_p4 = pnand %p10264_p3, %p10258_p0 }
  0x17   :  { %491 = vmatprep.mubr.f32.mxu0 %v16372_v5  ;;  %940 = vmatprep.mubr.f32.mxu1 %v16372_v5  ;;  %v58_v39 = vld [vmem:[%s16360_s0 + $0xd0] sm:$0xff]  ;;  %v59_v40 = vld [vmem:[%s16360_s0 + $0xd8] sm:$0xff]  ;;  %v60_v41 = vld [vmem:[%s16360_s0 + $0xe0] sm:$0xff]  ;;  %16430 = vst [vmem:[#allocation9_spill] sm:$0xff] %v10694_v7 }
  0x18   :  { %v61_v42 = vld [vmem:[%s16360_s0 + $0xe8] sm:$0xff]  ;;  %v62_v43 = vld [vmem:[%s16360_s0 + $0xf0] sm:$0xff]  ;;  %v63_v44 = vld [vmem:[%s16360_s0 + $0xf8] sm:$0xff]  ;;  %16431 = vst [vmem:[#allocation10_spill] sm:$0xff] %v10697_v8 }
  0x19   :  { %v64_v45 = vld [vmem:[%s16360_s0 + $0x100] sm:$0xff]  ;;  %v65_v46 = vld [vmem:[%s16360_s0 + $0x108] sm:$0xff]  ;;  %v66_v47 = vld [vmem:[%s16360_s0 + $0x110] sm:$0xff] }
  0x1a   :  { %9319 = vmatmul.mubr.msk.f32.gmra.mxu0 %vm204_vm0, %v37_v18  ;;  %9383 = vmatmul.mubr.msk.f32.gmra.mxu1 %vm204_vm0, %v37_v18  ;;  %v10580_v48 = vld [vmem:[%s16361_s1 + $0x20] sm:$0xff]  ;;  %v10586_v50 = vld [vmem:[%s16361_s1 + $0x28] sm:$0xff]  ;;  %v67_v52 = vld [vmem:[%s16360_s0 + $0x118] sm:$0xff] }
  0x1b   :  { %497 = vmatprep.mubr.f32.mxu0 %v16372_v5  ;;  %946 = vmatprep.mubr.f32.mxu1 %v16372_v5  ;;  %v113_v49 = vunpack.c.h.bf16 %v10580_v48  ;;  %v115_v51 = vunpack.c.h.bf16 %v10586_v50  ;;  %v68_v53 = vld [vmem:[%s16360_s0 + $0x120] sm:$0xff]  ;;  %v69_v54 = vld [vmem:[%s16360_s0 + $0x128] sm:$0xff]  ;;  %v70_v55 = vld [vmem:[%s16360_s0 + $0x130] sm:$0xff] }
  0x1c   :  { %v71_v56 = vld [vmem:[%s16360_s0 + $0x138] sm:$0xff]  ;;  %v72_v57 = vld [vmem:[%s16360_s0 + $0x140] sm:$0xff]  ;;  %v73_v58 = vld [vmem:[%s16360_s0 + $0x148] sm:$0xff] }
  0x1d   :  { %2223 = vmatprep.subr.mxu0 %v113_v49  ;;  %2672 = vmatprep.subr.mxu1 %v115_v51  ;;  %v74_v59 = vld [vmem:[%s16360_s0 + $0x150] sm:$0xff]  ;;  %v75_v60 = vld [vmem:[%s16360_s0 + $0x158] sm:$0xff]  ;;  %v76_v61 = vld [vmem:[%s16360_s0 + $0x160] sm:$0xff] }
  0x1e   :  { %9320 = vmatmul.mubr.msk.f32.gmra.mxu0 %vm204_vm0, %v38_v19  ;;  %9384 = vmatmul.mubr.msk.f32.gmra.mxu1 %vm204_vm0, %v38_v19  ;;  %v77_v62 = vld [vmem:[%s16360_s0 + $0x168] sm:$0xff]  ;;  %v78_v0 = vld [vmem:[%s16360_s0 + $0x170] sm:$0xff]  ;;  %v79_v2 = vld [vmem:[%s16360_s0 + $0x178] sm:$0xff] }
  0x1f   :  { %503 = vmatprep.mubr.f32.mxu0 %v16372_v5  ;;  %952 = vmatprep.mubr.f32.mxu1 %v16372_v5  ;;  %v120_v6 = vld [vmem:[%s16362_s2] sm:$0xff]  ;;  %v81_v16 = vld [vmem:[%s16360_s0 + $0x188] sm:$0xff] }
  0x20   :  { %v80_v9 = vld [vmem:[%s16360_s0 + $0x180] sm:$0xff]  ;;  %v10705_v10 = vrot.slane %v120_v6, %v10683_v3  ;;  %v10708_v11 = vrot.slane %v120_v6, %v10686_v4  ;;  %v10713_v14 = vrot.slane %v120_v6, %v10694_v7  ;;  %v10716_v15 = vrot.slane %v120_v6, %v10697_v8 }
  0x21   :  { %v84_v63 = vld [vmem:[%s16360_s0 + $0x1a0] sm:$0xff] }
  0x22   :  { %9321 = vmatmul.mubr.msk.f32.gmra.mxu0 %vm204_vm0, %v39_v20  ;;  %9385 = vmatmul.mubr.msk.f32.gmra.mxu1 %vm204_vm0, %v39_v20 }
  0x23   :  { %509 = vmatprep.mubr.f32.mxu0 %v16372_v5  ;;  %958 = vmatprep.mubr.f32.mxu1 %v16372_v5 }
  0x26   :  { %9322 = vmatmul.mubr.msk.f32.gmra.mxu0 %vm204_vm0, %v40_v21  ;;  %9386 = vmatmul.mubr.msk.f32.gmra.mxu1 %vm204_vm0, %v40_v21 }
  0x27   :  { %515 = vmatprep.mubr.f32.mxu0 %v16372_v5  ;;  %964 = vmatprep.mubr.f32.mxu1 %v16372_v5 }
  0x2a   :  { %9323 = vmatmul.mubr.msk.f32.gmra.mxu0 %vm204_vm0, %v41_v22  ;;  %9387 = vmatmul.mubr.msk.f32.gmra.mxu1 %vm204_vm0, %v41_v22 }
  0x2b   :  { %521 = vmatprep.mubr.f32.mxu0 %v16372_v5  ;;  %970 = vmatprep.mubr.f32.mxu1 %v16372_v5 }
  0x2e   :  { %9324 = vmatmul.mubr.msk.f32.gmra.mxu0 %vm204_vm0, %v42_v23  ;;  %9388 = vmatmul.mubr.msk.f32.gmra.mxu1 %vm204_vm0, %v42_v23 }
  0x2f   :  { %527 = vmatprep.mubr.f32.mxu0 %v16372_v5  ;;  %976 = vmatprep.mubr.f32.mxu1 %v16372_v5 }
  0x32   :  { %9325 = vmatmul.mubr.msk.f32.gmra.mxu0 %vm204_vm0, %v43_v24  ;;  %9389 = vmatmul.mubr.msk.f32.gmra.mxu1 %vm204_vm0, %v43_v24 }
  0x33   :  { %533 = vmatprep.mubr.f32.mxu0 %v16372_v5  ;;  %982 = vmatprep.mubr.f32.mxu1 %v16372_v5 }
  0x36   :  { %9326 = vmatmul.mubr.msk.f32.gmra.mxu0 %vm204_vm0, %v44_v25  ;;  %9390 = vmatmul.mubr.msk.f32.gmra.mxu1 %vm204_vm0, %v44_v25 }
  0x37   :  { %539 = vmatprep.mubr.f32.mxu0 %v16372_v5  ;;  %988 = vmatprep.mubr.f32.mxu1 %v16372_v5 }
  0x3a   :  { %9327 = vmatmul.mubr.msk.f32.gmra.mxu0 %vm204_vm0, %v45_v26  ;;  %9391 = vmatmul.mubr.msk.f32.gmra.mxu1 %vm204_vm0, %v45_v26 }
  0x3b   :  { %545 = vmatprep.mubr.f32.mxu0 %v16372_v5  ;;  %994 = vmatprep.mubr.f32.mxu1 %v16372_v5 }
  0x3e   :  { %9328 = vmatmul.mubr.msk.f32.gmra.mxu0 %vm204_vm0, %v46_v27  ;;  %9392 = vmatmul.mubr.msk.f32.gmra.mxu1 %vm204_vm0, %v46_v27  ;;  %v82_v27 = vld [vmem:[%s16360_s0 + $0x190] sm:$0xff] }
  0x3f   :  { %551 = vmatprep.mubr.f32.mxu0 %v16372_v5  ;;  %1000 = vmatprep.mubr.f32.mxu1 %v16372_v5 }
  0x42   :  { %9329 = vmatmul.mubr.msk.f32.gmra.mxu0 %vm204_vm0, %v47_v28  ;;  %9393 = vmatmul.mubr.msk.f32.gmra.mxu1 %vm204_vm0, %v47_v28 }
  0x43   :  { %557 = vmatprep.mubr.f32.mxu0 %v16372_v5  ;;  %1006 = vmatprep.mubr.f32.mxu1 %v16372_v5 }
  0x46   :  { %9330 = vmatmul.mubr.msk.f32.gmra.mxu0 %vm204_vm0, %v48_v29  ;;  %9394 = vmatmul.mubr.msk.f32.gmra.mxu1 %vm204_vm0, %v48_v29 }
  0x47   :  { %563 = vmatprep.mubr.f32.mxu0 %v16372_v5  ;;  %1012 = vmatprep.mubr.f32.mxu1 %v16372_v5 }
  0x4a   :  { %9331 = vmatmul.mubr.msk.f32.gmra.mxu0 %vm204_vm0, %v49_v30  ;;  %9395 = vmatmul.mubr.msk.f32.gmra.mxu1 %vm204_vm0, %v49_v30 }
  0x4b   :  { %569 = vmatprep.mubr.f32.mxu0 %v16372_v5  ;;  %1018 = vmatprep.mubr.f32.mxu1 %v16372_v5 }
  0x4e   :  { %9332 = vmatmul.mubr.msk.f32.gmra.mxu0 %vm204_vm0, %v50_v31  ;;  %9396 = vmatmul.mubr.msk.f32.gmra.mxu1 %vm204_vm0, %v50_v31 }
  0x4f   :  { %575 = vmatprep.mubr.f32.mxu0 %v16372_v5  ;;  %1024 = vmatprep.mubr.f32.mxu1 %v16372_v5 }
  0x52   :  { %9333 = vmatmul.mubr.msk.f32.gmra.mxu0 %vm204_vm0, %v51_v32  ;;  %9397 = vmatmul.mubr.msk.f32.gmra.mxu1 %vm204_vm0, %v51_v32 }
  0x53   :  { %581 = vmatprep.mubr.f32.mxu0 %v16372_v5  ;;  %1030 = vmatprep.mubr.f32.mxu1 %v16372_v5 }
  0x56   :  { %9334 = vmatmul.mubr.msk.f32.gmra.mxu0 %vm204_vm0, %v52_v33  ;;  %9398 = vmatmul.mubr.msk.f32.gmra.mxu1 %vm204_vm0, %v52_v33 }
  0x57   :  { %587 = vmatprep.mubr.f32.mxu0 %v16372_v5  ;;  %1036 = vmatprep.mubr.f32.mxu1 %v16372_v5 }
  0x5a   :  { %9335 = vmatmul.mubr.msk.f32.gmra.mxu0 %vm204_vm0, %v53_v34  ;;  %9399 = vmatmul.mubr.msk.f32.gmra.mxu1 %vm204_vm0, %v53_v34 }
  0x5b   :  { %593 = vmatprep.mubr.f32.mxu0 %v16372_v5  ;;  %1042 = vmatprep.mubr.f32.mxu1 %v16372_v5 }
  0x5e   :  { %9336 = vmatmul.mubr.msk.f32.gmra.mxu0 %vm204_vm0, %v54_v35  ;;  %9400 = vmatmul.mubr.msk.f32.gmra.mxu1 %vm204_vm0, %v54_v35 }
  0x5f   :  { %599 = vmatprep.mubr.f32.mxu0 %v16372_v5  ;;  %1048 = vmatprep.mubr.f32.mxu1 %v16372_v5 }
  0x62   :  { %9337 = vmatmul.mubr.msk.f32.gmra.mxu0 %vm204_vm0, %v55_v36  ;;  %9401 = vmatmul.mubr.msk.f32.gmra.mxu1 %vm204_vm0, %v55_v36 }
  0x63   :  { %605 = vmatprep.mubr.f32.mxu0 %v16372_v5  ;;  %1054 = vmatprep.mubr.f32.mxu1 %v16372_v5 }
  0x66   :  { %9338 = vmatmul.mubr.msk.f32.gmra.mxu0 %vm204_vm0, %v56_v37  ;;  %9402 = vmatmul.mubr.msk.f32.gmra.mxu1 %vm204_vm0, %v56_v37 }
  0x67   :  { %611 = vmatprep.mubr.f32.mxu0 %v16372_v5  ;;  %1060 = vmatprep.mubr.f32.mxu1 %v16372_v5 }
  0x6a   :  { %9339 = vmatmul.mubr.msk.f32.gmra.mxu0 %vm204_vm0, %v57_v38  ;;  %9403 = vmatmul.mubr.msk.f32.gmra.mxu1 %vm204_vm0, %v57_v38 }
  0x6b   :  { %617 = vmatprep.mubr.f32.mxu0 %v16372_v5  ;;  %1066 = vmatprep.mubr.f32.mxu1 %v16372_v5 }
  0x6e   :  { %9340 = vmatmul.mubr.msk.f32.gmra.mxu0 %vm204_vm0, %v58_v39  ;;  %9404 = vmatmul.mubr.msk.f32.gmra.mxu1 %vm204_vm0, %v58_v39 }
  0x6f   :  { %623 = vmatprep.mubr.f32.mxu0 %v16372_v5  ;;  %1072 = vmatprep.mubr.f32.mxu1 %v16372_v5 }
  0x72   :  { %9341 = vmatmul.mubr.msk.f32.gmra.mxu0 %vm204_vm0, %v59_v40  ;;  %9405 = vmatmul.mubr.msk.f32.gmra.mxu1 %vm204_vm0, %v59_v40 }
  0x73   :  { %629 = vmatprep.mubr.f32.mxu0 %v16372_v5  ;;  %1078 = vmatprep.mubr.f32.mxu1 %v16372_v5 }
  0x76   :  { %9342 = vmatmul.mubr.msk.f32.gmra.mxu0 %vm204_vm0, %v60_v41  ;;  %9406 = vmatmul.mubr.msk.f32.gmra.mxu1 %vm204_vm0, %v60_v41 }
  0x77   :  { %635 = vmatprep.mubr.f32.mxu0 %v16372_v5  ;;  %1084 = vmatprep.mubr.f32.mxu1 %v16372_v5 }
  0x7a   :  { %9343 = vmatmul.mubr.msk.f32.gmra.mxu0 %vm204_vm0, %v61_v42  ;;  %9407 = vmatmul.mubr.msk.f32.gmra.mxu1 %vm204_vm0, %v61_v42 }
  0x7b   :  { %641 = vmatprep.mubr.f32.mxu0 %v16372_v5  ;;  %1090 = vmatprep.mubr.f32.mxu1 %v16372_v5 }
  0x7e   :  { %9344 = vmatmul.mubr.msk.f32.gmra.mxu0 %vm204_vm0, %v62_v43  ;;  %9408 = vmatmul.mubr.msk.f32.gmra.mxu1 %vm204_vm0, %v62_v43 }
  0x7f   :  { %647 = vmatprep.mubr.f32.mxu0 %v16372_v5  ;;  %1096 = vmatprep.mubr.f32.mxu1 %v16372_v5 }
  0x82   :  { %9345 = vmatmul.mubr.msk.f32.gmra.mxu0 %vm204_vm0, %v63_v44  ;;  %9409 = vmatmul.mubr.msk.f32.gmra.mxu1 %vm204_vm0, %v63_v44  ;;  %v83_v44 = vld [vmem:[%s16360_s0 + $0x198] sm:$0xff] }
  0x83   :  { %653 = vmatprep.mubr.f32.mxu0 %v16372_v5  ;;  %1102 = vmatprep.mubr.f32.mxu1 %v16372_v5 }
  0x86   :  { %9346 = vmatmul.mubr.msk.f32.gmra.mxu0 %vm204_vm0, %v64_v45  ;;  %9410 = vmatmul.mubr.msk.f32.gmra.mxu1 %vm204_vm0, %v64_v45 }
  0x87   :  { %659 = vmatprep.mubr.f32.mxu0 %v16372_v5  ;;  %1108 = vmatprep.mubr.f32.mxu1 %v16372_v5 }
  0x8a   :  { %9347 = vmatmul.mubr.msk.f32.gmra.mxu0 %vm204_vm0, %v65_v46  ;;  %9411 = vmatmul.mubr.msk.f32.gmra.mxu1 %vm204_vm0, %v65_v46 }
  0x8b   :  { %665 = vmatprep.mubr.f32.mxu0 %v16372_v5  ;;  %1114 = vmatprep.mubr.f32.mxu1 %v16372_v5 }
  0x8e   :  { %9348 = vmatmul.mubr.msk.f32.gmra.mxu0 %vm204_vm0, %v66_v47  ;;  %9412 = vmatmul.mubr.msk.f32.gmra.mxu1 %vm204_vm0, %v66_v47 }
  0x8f   :  { %671 = vmatprep.mubr.f32.mxu0 %v16372_v5  ;;  %1120 = vmatprep.mubr.f32.mxu1 %v16372_v5 }
  0x92   :  { %9349 = vmatmul.mubr.msk.f32.gmra.mxu0 %vm204_vm0, %v67_v52  ;;  %9413 = vmatmul.mubr.msk.f32.gmra.mxu1 %vm204_vm0, %v67_v52 }
  0x93   :  { %677 = vmatprep.mubr.f32.mxu0 %v16372_v5  ;;  %1126 = vmatprep.mubr.f32.mxu1 %v16372_v5 }
  0x96   :  { %9350 = vmatmul.mubr.msk.f32.gmra.mxu0 %vm204_vm0, %v68_v53  ;;  %9414 = vmatmul.mubr.msk.f32.gmra.mxu1 %vm204_vm0, %v68_v53 }
  0x97   :  { %683 = vmatprep.mubr.f32.mxu0 %v16372_v5  ;;  %1132 = vmatprep.mubr.f32.mxu1 %v16372_v5 }
  0x9a   :  { %9351 = vmatmul.mubr.msk.f32.gmra.mxu0 %vm204_vm0, %v69_v54  ;;  %9415 = vmatmul.mubr.msk.f32.gmra.mxu1 %vm204_vm0, %v69_v54 }
  0x9b   :  { %689 = vmatprep.mubr.f32.mxu0 %v16372_v5  ;;  %1138 = vmatprep.mubr.f32.mxu1 %v16372_v5 }
  0x9e   :  { %9352 = vmatmul.mubr.msk.f32.gmra.mxu0 %vm204_vm0, %v70_v55  ;;  %9416 = vmatmul.mubr.msk.f32.gmra.mxu1 %vm204_vm0, %v70_v55 }
  0x9f   :  { %695 = vmatprep.mubr.f32.mxu0 %v16372_v5  ;;  %1144 = vmatprep.mubr.f32.mxu1 %v16372_v5 }
  0xa2   :  { %9353 = vmatmul.mubr.msk.f32.gmra.mxu0 %vm204_vm0, %v71_v56  ;;  %9417 = vmatmul.mubr.msk.f32.gmra.mxu1 %vm204_vm0, %v71_v56 }
  0xa3   :  { %701 = vmatprep.mubr.f32.mxu0 %v16372_v5  ;;  %1150 = vmatprep.mubr.f32.mxu1 %v16372_v5 }
  0xa6   :  { %9354 = vmatmul.mubr.msk.f32.gmra.mxu0 %vm204_vm0, %v72_v57  ;;  %9418 = vmatmul.mubr.msk.f32.gmra.mxu1 %vm204_vm0, %v72_v57 }
  0xa7   :  { %707 = vmatprep.mubr.f32.mxu0 %v16372_v5  ;;  %1156 = vmatprep.mubr.f32.mxu1 %v16372_v5 }
  0xaa   :  { %9355 = vmatmul.mubr.msk.f32.gmra.mxu0 %vm204_vm0, %v73_v58  ;;  %9419 = vmatmul.mubr.msk.f32.gmra.mxu1 %vm204_vm0, %v73_v58 }
  0xab   :  { %713 = vmatprep.mubr.f32.mxu0 %v16372_v5  ;;  %1162 = vmatprep.mubr.f32.mxu1 %v16372_v5 }
  0xae   :  { %9356 = vmatmul.mubr.msk.f32.gmra.mxu0 %vm204_vm0, %v74_v59  ;;  %9420 = vmatmul.mubr.msk.f32.gmra.mxu1 %vm204_vm0, %v74_v59 }
  0xaf   :  { %719 = vmatprep.mubr.f32.mxu0 %v16372_v5  ;;  %1168 = vmatprep.mubr.f32.mxu1 %v16372_v5 }
  0xb2   :  { %9357 = vmatmul.mubr.msk.f32.gmra.mxu0 %vm204_vm0, %v75_v60  ;;  %9421 = vmatmul.mubr.msk.f32.gmra.mxu1 %vm204_vm0, %v75_v60 }
  0xb3   :  { %725 = vmatprep.mubr.f32.mxu0 %v16372_v5  ;;  %1174 = vmatprep.mubr.f32.mxu1 %v16372_v5 }
  0xb6   :  { %9358 = vmatmul.mubr.msk.f32.gmra.mxu0 %vm204_vm0, %v76_v61  ;;  %9422 = vmatmul.mubr.msk.f32.gmra.mxu1 %vm204_vm0, %v76_v61 }
  0xb7   :  { %731 = vmatprep.mubr.f32.mxu0 %v16372_v5  ;;  %1180 = vmatprep.mubr.f32.mxu1 %v16372_v5 }
  0xba   :  { %9359 = vmatmul.mubr.msk.f32.gmra.mxu0 %vm204_vm0, %v77_v62  ;;  %9423 = vmatmul.mubr.msk.f32.gmra.mxu1 %vm204_vm0, %v77_v62 }
  0xbb   :  { %737 = vmatprep.mubr.f32.mxu0 %v16372_v5  ;;  %1186 = vmatprep.mubr.f32.mxu1 %v16372_v5 }
  0xbe   :  { %9360 = vmatmul.mubr.msk.f32.gmra.mxu0 %vm204_vm0, %v78_v0  ;;  %9424 = vmatmul.mubr.msk.f32.gmra.mxu1 %vm204_vm0, %v78_v0 }
  0xbf   :  { %743 = vmatprep.mubr.f32.mxu0 %v16372_v5  ;;  %1192 = vmatprep.mubr.f32.mxu1 %v16372_v5 }
  0xc2   :  { %9361 = vmatmul.mubr.msk.f32.gmra.mxu0 %vm204_vm0, %v79_v2  ;;  %9425 = vmatmul.mubr.msk.f32.gmra.mxu1 %vm204_vm0, %v79_v2 }
  0xc3   :  { %749 = vmatprep.mubr.f32.mxu0 %v16372_v5  ;;  %1198 = vmatprep.mubr.f32.mxu1 %v16372_v5 }
  0xc6   :  { %v463_v12 = vpop.f32.mrf.mxu0  ;;  %9362 = vmatmul.mubr.msk.f32.gmra.mxu0 %vm204_vm0, %v80_v9  ;;  %v912_v13 = vpop.f32.mrf.mxu1  ;;  %9426 = vmatmul.mubr.msk.f32.gmra.mxu1 %vm204_vm0, %v80_v9 }
  0xc7   :  { %755 = vmatprep.mubr.f32.mxu0 %v16372_v5  ;;  %1204 = vmatprep.mubr.f32.mxu1 %v16372_v5  ;;  %v464_v17 = vadd.f32 %v463_v12, %v10705_v10  ;;  %v913_v18 = vadd.f32 %v912_v13, %v10708_v11 }
  0xc8   :  { %v465_v19 = vpop.f32.mrf.mxu0  ;;  %v914_v20 = vpop.f32.mrf.mxu1 }
  0xc9   :  { %v466_v21 = vadd.f32 %v465_v19, %v10713_v14  ;;  %v915_v22 = vadd.f32 %v914_v20, %v10716_v15  ;;  %v3989_v28 = vmax.f32 %v464_v17, 0.0  ;;  %v3991_v29 = vmax.f32 %v913_v18, 0.0 }
  0xca   :  { %v469_v23 = vpop.f32.mrf.mxu0  ;;  %9363 = vmatmul.mubr.msk.f32.gmra.mxu0 %vm204_vm0, %v81_v16  ;;  %v918_v24 = vpop.f32.mrf.mxu1  ;;  %9427 = vmatmul.mubr.msk.f32.gmra.mxu1 %vm204_vm0, %v81_v16 }
  0xcb   :  { %v470_v25 = vadd.f32 %v469_v23, %v10705_v10  ;;  %v919_v26 = vadd.f32 %v918_v24, %v10708_v11  ;;  %761 = vmatprep.mubr.f32.mxu0 %v16372_v5  ;;  %1210 = vmatprep.mubr.f32.mxu1 %v16372_v5  ;;  %v3990_v36 = vmax.f32 %v466_v21, 0.0  ;;  %v3992_v37 = vmax.f32 %v915_v22, 0.0 }
  0xcc   :  { %v471_v30 = vpop.f32.mrf.mxu0  ;;  %v920_v31 = vpop.f32.mrf.mxu1 }
  0xcd   :  { %v4005_v32 = vmax.f32 %v470_v25, 0.0  ;;  %v4007_v33 = vmax.f32 %v919_v26, 0.0  ;;  %v472_v34 = vadd.f32 %v471_v30, %v10713_v14  ;;  %v921_v35 = vadd.f32 %v920_v31, %v10716_v15  ;;  %v85_v26 = vld [vmem:[%s16360_s0 + $0x1a8] sm:$0xff] }
  0xce   :  { %v475_v38 = vpop.f32.mrf.mxu0  ;;  %9364 = vmatmul.mubr.msk.f32.gmra.mxu0 %vm204_vm0, %v82_v27  ;;  %v924_v39 = vpop.f32.mrf.mxu1  ;;  %9428 = vmatmul.mubr.msk.f32.gmra.mxu1 %vm204_vm0, %v82_v27 }
  0xcf   :  { %v5013_v40 = vadd.f32 %v4005_v32, %v3989_v28  ;;  %v5087_v41 = vadd.f32 %v4007_v33, %v3991_v29  ;;  %v4006_v42 = vmax.f32 %v472_v34, 0.0  ;;  %v4008_v43 = vmax.f32 %v921_v35, 0.0  ;;  %767 = vmatprep.mubr.f32.mxu0 %v16372_v5  ;;  %1216 = vmatprep.mubr.f32.mxu1 %v16372_v5 }
  0xd0   :  { %v476_v45 = vadd.f32 %v475_v38, %v10705_v10  ;;  %v925_v46 = vadd.f32 %v924_v39, %v10708_v11  ;;  %v477_v47 = vpop.f32.mrf.mxu0  ;;  %v926_v49 = vpop.f32.mrf.mxu1 }
  0xd1   :  { %v5050_v51 = vadd.f32 %v4006_v42, %v3990_v36  ;;  %v5124_v52 = vadd.f32 %v4008_v43, %v3992_v37  ;;  %v478_v53 = vadd.f32 %v477_v47, %v10713_v14  ;;  %v927_v54 = vadd.f32 %v926_v49, %v10716_v15  ;;  %v86_v43 = vld [vmem:[%s16360_s0 + $0x1b0] sm:$0xff] }
  0xd2   :  { %v4021_v55 = vmax.f32 %v476_v45, 0.0  ;;  %v4023_v56 = vmax.f32 %v925_v46, 0.0  ;;  %v481_v57 = vpop.f32.mrf.mxu0  ;;  %9365 = vmatmul.mubr.msk.f32.gmra.mxu0 %vm204_vm0, %v83_v44  ;;  %v930_v58 = vpop.f32.mrf.mxu1  ;;  %9429 = vmatmul.mubr.msk.f32.gmra.mxu1 %vm204_vm0, %v83_v44 }
  0xd3   :  { %v4022_v59 = vmax.f32 %v478_v53, 0.0  ;;  %v4024_v60 = vmax.f32 %v927_v54, 0.0  ;;  %v482_v61 = vadd.f32 %v481_v57, %v10705_v10  ;;  %v931_v62 = vadd.f32 %v930_v58, %v10708_v11  ;;  %773 = vmatprep.mubr.f32.mxu0 %v16372_v5  ;;  %1222 = vmatprep.mubr.f32.mxu1 %v16372_v5 }
  0xd4   :  { %v5014_v0 = vadd.f32 %v5013_v40, %v4021_v55  ;;  %v5088_v2 = vadd.f32 %v5087_v41, %v4023_v56  ;;  %v483_v6 = vpop.f32.mrf.mxu0  ;;  %v932_v9 = vpop.f32.mrf.mxu1 }
  0xd5   :  { %v5051_v12 = vadd.f32 %v5050_v51, %v4022_v59  ;;  %v5125_v13 = vadd.f32 %v5124_v52, %v4024_v60  ;;  %v4037_v16 = vmax.f32 %v482_v61, 0.0  ;;  %v4039_v17 = vmax.f32 %v931_v62, 0.0  ;;  %v87_v62 = vld [vmem:[%s16360_s0 + $0x1b8] sm:$0xff] }
  0xd6   :  { %v484_v18 = vadd.f32 %v483_v6, %v10713_v14  ;;  %v933_v19 = vadd.f32 %v932_v9, %v10716_v15  ;;  %v487_v20 = vpop.f32.mrf.mxu0  ;;  %9366 = vmatmul.mubr.msk.f32.gmra.mxu0 %vm204_vm0, %v84_v63  ;;  %v936_v21 = vpop.f32.mrf.mxu1  ;;  %9430 = vmatmul.mubr.msk.f32.gmra.mxu1 %vm204_vm0, %v84_v63 }
  0xd7   :  { %v5015_v22 = vadd.f32 %v5014_v0, %v4037_v16  ;;  %v5089_v23 = vadd.f32 %v5088_v2, %v4039_v17  ;;  %v488_v24 = vadd.f32 %v487_v20, %v10705_v10  ;;  %v937_v25 = vadd.f32 %v936_v21, %v10708_v11  ;;  %779 = vmatprep.mubr.f32.mxu0 %v16372_v5 }
  0xd8   :  { %v4038_v27 = vmax.f32 %v484_v18, 0.0  ;;  %v4040_v28 = vmax.f32 %v933_v19, 0.0  ;;  %v489_v29 = vpop.f32.mrf.mxu0  ;;  %v938_v30 = vpop.f32.mrf.mxu1  ;;  %1228 = vmatprep.mubr.f32.mxu1 %v16372_v5 }
  0xd9   :  { %v4053_v31 = vmax.f32 %v488_v24, 0.0  ;;  %v4055_v32 = vmax.f32 %v937_v25, 0.0  ;;  %v490_v33 = vadd.f32 %v489_v29, %v10713_v14  ;;  %v939_v34 = vadd.f32 %v938_v30, %v10716_v15  ;;  %v88_v25 = vld [vmem:[%s16360_s0 + $0x1c0] sm:$0xff] }
  0xda   :  { %v5052_v35 = vadd.f32 %v5051_v12, %v4038_v27  ;;  %v5126_v36 = vadd.f32 %v5125_v13, %v4040_v28  ;;  %v493_v37 = vpop.f32.mrf.mxu0  ;;  %9367 = vmatmul.mubr.msk.f32.gmra.mxu0 %vm204_vm0, %v85_v26  ;;  %v942_v38 = vpop.f32.mrf.mxu1  ;;  %9431 = vmatmul.mubr.msk.f32.gmra.mxu1 %vm204_vm0, %v85_v26 }
  0xdb   :  { %v5016_v39 = vadd.f32 %v5015_v22, %v4053_v31  ;;  %v5090_v40 = vadd.f32 %v5089_v23, %v4055_v32  ;;  %v4054_v41 = vmax.f32 %v490_v33, 0.0  ;;  %v4056_v42 = vmax.f32 %v939_v34, 0.0  ;;  %785 = vmatprep.mubr.f32.mxu0 %v16372_v5  ;;  %1234 = vmatprep.mubr.f32.mxu1 %v16372_v5 }
  0xdc   :  { %v494_v44 = vadd.f32 %v493_v37, %v10705_v10  ;;  %v943_v45 = vadd.f32 %v942_v38, %v10708_v11  ;;  %v495_v46 = vpop.f32.mrf.mxu0  ;;  %v944_v47 = vpop.f32.mrf.mxu1 }
  0xdd   :  { %v5053_v49 = vadd.f32 %v5052_v35, %v4054_v41  ;;  %v5127_v51 = vadd.f32 %v5126_v36, %v4056_v42  ;;  %v496_v52 = vadd.f32 %v495_v46, %v10713_v14  ;;  %v945_v53 = vadd.f32 %v944_v47, %v10716_v15  ;;  %v89_v42 = vld [vmem:[%s16360_s0 + $0x1c8] sm:$0xff] }
  0xde   :  { %v4069_v54 = vmax.f32 %v494_v44, 0.0  ;;  %v4071_v55 = vmax.f32 %v943_v45, 0.0  ;;  %v499_v56 = vpop.f32.mrf.mxu0  ;;  %9368 = vmatmul.mubr.msk.f32.gmra.mxu0 %vm204_vm0, %v86_v43  ;;  %v948_v57 = vpop.f32.mrf.mxu1  ;;  %9432 = vmatmul.mubr.msk.f32.gmra.mxu1 %vm204_vm0, %v86_v43 }
  0xdf   :  { %v4070_v58 = vmax.f32 %v496_v52, 0.0  ;;  %v4072_v59 = vmax.f32 %v945_v53, 0.0  ;;  %v500_v60 = vadd.f32 %v499_v56, %v10705_v10  ;;  %v949_v61 = vadd.f32 %v948_v57, %v10708_v11  ;;  %791 = vmatprep.mubr.f32.mxu0 %v16372_v5  ;;  %1240 = vmatprep.mubr.f32.mxu1 %v16372_v5 }
  0xe0   :  { %v5017_v63 = vadd.f32 %v5016_v39, %v4069_v54  ;;  %v5091_v0 = vadd.f32 %v5090_v40, %v4071_v55  ;;  %v501_v2 = vpop.f32.mrf.mxu0  ;;  %v950_v6 = vpop.f32.mrf.mxu1 }
  0xe1   :  { %v5054_v9 = vadd.f32 %v5053_v49, %v4070_v58  ;;  %v5128_v12 = vadd.f32 %v5127_v51, %v4072_v59  ;;  %v4085_v13 = vmax.f32 %v500_v60, 0.0  ;;  %v4087_v16 = vmax.f32 %v949_v61, 0.0  ;;  %v90_v61 = vld [vmem:[%s16360_s0 + $0x1d0] sm:$0xff] }
  0xe2   :  { %v502_v17 = vadd.f32 %v501_v2, %v10713_v14  ;;  %v951_v18 = vadd.f32 %v950_v6, %v10716_v15  ;;  %v505_v19 = vpop.f32.mrf.mxu0  ;;  %9369 = vmatmul.mubr.msk.f32.gmra.mxu0 %vm204_vm0, %v87_v62  ;;  %v954_v20 = vpop.f32.mrf.mxu1  ;;  %9433 = vmatmul.mubr.msk.f32.gmra.mxu1 %vm204_vm0, %v87_v62 }
  0xe3   :  { %v5018_v21 = vadd.f32 %v5017_v63, %v4085_v13  ;;  %v5092_v22 = vadd.f32 %v5091_v0, %v4087_v16  ;;  %v506_v23 = vadd.f32 %v505_v19, %v10705_v10  ;;  %v955_v24 = vadd.f32 %v954_v20, %v10708_v11  ;;  %797 = vmatprep.mubr.f32.mxu0 %v16372_v5 }
  0xe4   :  { %v4086_v26 = vmax.f32 %v502_v17, 0.0  ;;  %v4088_v27 = vmax.f32 %v951_v18, 0.0  ;;  %v507_v28 = vpop.f32.mrf.mxu0  ;;  %v956_v29 = vpop.f32.mrf.mxu1  ;;  %1246 = vmatprep.mubr.f32.mxu1 %v16372_v5 }
  0xe5   :  { %v4101_v30 = vmax.f32 %v506_v23, 0.0  ;;  %v4103_v31 = vmax.f32 %v955_v24, 0.0  ;;  %v508_v32 = vadd.f32 %v507_v28, %v10713_v14  ;;  %v957_v33 = vadd.f32 %v956_v29, %v10716_v15  ;;  %v91_v24 = vld [vmem:[%s16360_s0 + $0x1d8] sm:$0xff] }
  0xe6   :  { %v5055_v34 = vadd.f32 %v5054_v9, %v4086_v26  ;;  %v5129_v35 = vadd.f32 %v5128_v12, %v4088_v27  ;;  %v511_v36 = vpop.f32.mrf.mxu0  ;;  %9370 = vmatmul.mubr.msk.f32.gmra.mxu0 %vm204_vm0, %v88_v25  ;;  %v960_v37 = vpop.f32.mrf.mxu1  ;;  %9434 = vmatmul.mubr.msk.f32.gmra.mxu1 %vm204_vm0, %v88_v25 }
  0xe7   :  { %v5019_v38 = vadd.f32 %v5018_v21, %v4101_v30  ;;  %v5093_v39 = vadd.f32 %v5092_v22, %v4103_v31  ;;  %v4102_v40 = vmax.f32 %v508_v32, 0.0  ;;  %v4104_v41 = vmax.f32 %v957_v33, 0.0  ;;  %803 = vmatprep.mubr.f32.mxu0 %v16372_v5  ;;  %1252 = vmatprep.mubr.f32.mxu1 %v16372_v5 }
  0xe8   :  { %v512_v43 = vadd.f32 %v511_v36, %v10705_v10  ;;  %v961_v44 = vadd.f32 %v960_v37, %v10708_v11  ;;  %v513_v45 = vpop.f32.mrf.mxu0  ;;  %v962_v46 = vpop.f32.mrf.mxu1 }
  0xe9   :  { %v5056_v47 = vadd.f32 %v5055_v34, %v4102_v40  ;;  %v5130_v49 = vadd.f32 %v5129_v35, %v4104_v41  ;;  %v514_v51 = vadd.f32 %v513_v45, %v10713_v14  ;;  %v963_v52 = vadd.f32 %v962_v46, %v10716_v15  ;;  %v92_v41 = vld [vmem:[%s16360_s0 + $0x1e0] sm:$0xff] }
  0xea   :  { %v4117_v53 = vmax.f32 %v512_v43, 0.0  ;;  %v4119_v54 = vmax.f32 %v961_v44, 0.0  ;;  %v517_v55 = vpop.f32.mrf.mxu0  ;;  %9371 = vmatmul.mubr.msk.f32.gmra.mxu0 %vm204_vm0, %v89_v42  ;;  %v966_v56 = vpop.f32.mrf.mxu1  ;;  %9435 = vmatmul.mubr.msk.f32.gmra.mxu1 %vm204_vm0, %v89_v42 }
  0xeb   :  { %v4118_v57 = vmax.f32 %v514_v51, 0.0  ;;  %v4120_v58 = vmax.f32 %v963_v52, 0.0  ;;  %v518_v59 = vadd.f32 %v517_v55, %v10705_v10  ;;  %v967_v60 = vadd.f32 %v966_v56, %v10708_v11  ;;  %809 = vmatprep.mubr.f32.mxu0 %v16372_v5  ;;  %1258 = vmatprep.mubr.f32.mxu1 %v16372_v5 }
  0xec   :  { %v5020_v62 = vadd.f32 %v5019_v38, %v4117_v53  ;;  %v5094_v63 = vadd.f32 %v5093_v39, %v4119_v54  ;;  %v519_v0 = vpop.f32.mrf.mxu0  ;;  %v968_v2 = vpop.f32.mrf.mxu1 }
  0xed   :  { %v5057_v6 = vadd.f32 %v5056_v47, %v4118_v57  ;;  %v5131_v9 = vadd.f32 %v5130_v49, %v4120_v58  ;;  %v4133_v12 = vmax.f32 %v518_v59, 0.0  ;;  %v4135_v13 = vmax.f32 %v967_v60, 0.0  ;;  %v93_v60 = vld [vmem:[%s16360_s0 + $0x1e8] sm:$0xff] }
  0xee   :  { %v520_v16 = vadd.f32 %v519_v0, %v10713_v14  ;;  %v969_v17 = vadd.f32 %v968_v2, %v10716_v15  ;;  %v523_v18 = vpop.f32.mrf.mxu0  ;;  %9372 = vmatmul.mubr.msk.f32.gmra.mxu0 %vm204_vm0, %v90_v61  ;;  %v972_v19 = vpop.f32.mrf.mxu1  ;;  %9436 = vmatmul.mubr.msk.f32.gmra.mxu1 %vm204_vm0, %v90_v61 }
  0xef   :  { %v5021_v20 = vadd.f32 %v5020_v62, %v4133_v12  ;;  %v5095_v21 = vadd.f32 %v5094_v63, %v4135_v13  ;;  %v524_v22 = vadd.f32 %v523_v18, %v10705_v10  ;;  %v973_v23 = vadd.f32 %v972_v19, %v10708_v11  ;;  %815 = vmatprep.mubr.f32.mxu0 %v16372_v5 }
  0xf0   :  { %v4134_v25 = vmax.f32 %v520_v16, 0.0  ;;  %v4136_v26 = vmax.f32 %v969_v17, 0.0  ;;  %v525_v27 = vpop.f32.mrf.mxu0  ;;  %v974_v28 = vpop.f32.mrf.mxu1  ;;  %1264 = vmatprep.mubr.f32.mxu1 %v16372_v5 }
  0xf1   :  { %v4149_v29 = vmax.f32 %v524_v22, 0.0  ;;  %v4151_v30 = vmax.f32 %v973_v23, 0.0  ;;  %v526_v31 = vadd.f32 %v525_v27, %v10713_v14  ;;  %v975_v32 = vadd.f32 %v974_v28, %v10716_v15  ;;  %v94_v23 = vld [vmem:[%s16360_s0 + $0x1f0] sm:$0xff] }
  0xf2   :  { %v5058_v33 = vadd.f32 %v5057_v6, %v4134_v25  ;;  %v5132_v34 = vadd.f32 %v5131_v9, %v4136_v26  ;;  %v529_v35 = vpop.f32.mrf.mxu0  ;;  %9373 = vmatmul.mubr.msk.f32.gmra.mxu0 %vm204_vm0, %v91_v24  ;;  %v978_v36 = vpop.f32.mrf.mxu1  ;;  %9437 = vmatmul.mubr.msk.f32.gmra.mxu1 %vm204_vm0, %v91_v24 }
  0xf3   :  { %v5022_v37 = vadd.f32 %v5021_v20, %v4149_v29  ;;  %v5096_v38 = vadd.f32 %v5095_v21, %v4151_v30  ;;  %v4150_v39 = vmax.f32 %v526_v31, 0.0  ;;  %v4152_v40 = vmax.f32 %v975_v32, 0.0  ;;  %821 = vmatprep.mubr.f32.mxu0 %v16372_v5  ;;  %1270 = vmatprep.mubr.f32.mxu1 %v16372_v5 }
  0xf4   :  { %v530_v42 = vadd.f32 %v529_v35, %v10705_v10  ;;  %v979_v43 = vadd.f32 %v978_v36, %v10708_v11  ;;  %v531_v44 = vpop.f32.mrf.mxu0  ;;  %v980_v45 = vpop.f32.mrf.mxu1 }
  0xf5   :  { %v5059_v46 = vadd.f32 %v5058_v33, %v4150_v39  ;;  %v5133_v47 = vadd.f32 %v5132_v34, %v4152_v40  ;;  %v532_v49 = vadd.f32 %v531_v44, %v10713_v14  ;;  %v981_v51 = vadd.f32 %v980_v45, %v10716_v15  ;;  %v95_v40 = vld [vmem:[%s16360_s0 + $0x1f8] sm:$0xff] }
  0xf6   :  { %v4165_v52 = vmax.f32 %v530_v42, 0.0  ;;  %v4167_v53 = vmax.f32 %v979_v43, 0.0  ;;  %v535_v54 = vpop.f32.mrf.mxu0  ;;  %9374 = vmatmul.mubr.msk.f32.gmra.mxu0 %vm204_vm0, %v92_v41  ;;  %v984_v55 = vpop.f32.mrf.mxu1  ;;  %9438 = vmatmul.mubr.msk.f32.gmra.mxu1 %vm204_vm0, %v92_v41 }
  0xf7   :  { %v4166_v56 = vmax.f32 %v532_v49, 0.0  ;;  %v4168_v57 = vmax.f32 %v981_v51, 0.0  ;;  %v536_v58 = vadd.f32 %v535_v54, %v10705_v10  ;;  %v985_v59 = vadd.f32 %v984_v55, %v10708_v11  ;;  %827 = vmatprep.mubr.f32.mxu0 %v16372_v5  ;;  %1276 = vmatprep.mubr.f32.mxu1 %v16372_v5 }
  0xf8   :  { %v5023_v61 = vadd.f32 %v5022_v37, %v4165_v52  ;;  %v5097_v62 = vadd.f32 %v5096_v38, %v4167_v53  ;;  %v537_v63 = vpop.f32.mrf.mxu0  ;;  %v986_v0 = vpop.f32.mrf.mxu1  ;;  %v112_v55 = vunpack.c.l.bf16 %v10580_v48 }
  0xf9   :  { %v5060_v2 = vadd.f32 %v5059_v46, %v4166_v56  ;;  %v5134_v6 = vadd.f32 %v5133_v47, %v4168_v57  ;;  %v4181_v9 = vmax.f32 %v536_v58, 0.0  ;;  %v4183_v12 = vmax.f32 %v985_v59, 0.0 }
  0xfa   :  { %v538_v13 = vadd.f32 %v537_v63, %v10713_v14  ;;  %v987_v16 = vadd.f32 %v986_v0, %v10716_v15  ;;  %v541_v17 = vpop.f32.mrf.mxu0  ;;  %9375 = vmatmul.mubr.msk.f32.gmra.mxu0 %vm204_vm0, %v93_v60  ;;  %v990_v18 = vpop.f32.mrf.mxu1  ;;  %9439 = vmatmul.mubr.msk.f32.gmra.mxu1 %vm204_vm0, %v93_v60  ;;  %v114_v0 = vunpack.c.l.bf16 %v10586_v50 }
  0xfb   :  { %v5024_v19 = vadd.f32 %v5023_v61, %v4181_v9  ;;  %v5098_v20 = vadd.f32 %v5097_v62, %v4183_v12  ;;  %v542_v21 = vadd.f32 %v541_v17, %v10705_v10  ;;  %v991_v22 = vadd.f32 %v990_v18, %v10708_v11  ;;  %833 = vmatprep.mubr.f32.mxu0 %v16372_v5  ;;  %v10059_v18 = vld [vmem:[%s16360_s0] sm:$0xff] }
  0xfc   :  { %v4182_v24 = vmax.f32 %v538_v13, 0.0  ;;  %v4184_v25 = vmax.f32 %v987_v16, 0.0  ;;  %v543_v26 = vpop.f32.mrf.mxu0  ;;  %v992_v27 = vpop.f32.mrf.mxu1  ;;  %1282 = vmatprep.mubr.f32.mxu1 %v16372_v5 }
  0xfd   :  { %v4197_v28 = vmax.f32 %v542_v21, 0.0  ;;  %v4199_v29 = vmax.f32 %v991_v22, 0.0  ;;  %v544_v30 = vadd.f32 %v543_v26, %v10713_v14  ;;  %v993_v31 = vadd.f32 %v992_v27, %v10716_v15 }
  0xfe   :  { %v5061_v32 = vadd.f32 %v5060_v2, %v4182_v24  ;;  %v5135_v33 = vadd.f32 %v5134_v6, %v4184_v25  ;;  %v547_v34 = vpop.f32.mrf.mxu0  ;;  %9376 = vmatmul.mubr.msk.f32.gmra.mxu0 %vm204_vm0, %v94_v23  ;;  %v996_v35 = vpop.f32.mrf.mxu1  ;;  %9440 = vmatmul.mubr.msk.f32.gmra.mxu1 %vm204_vm0, %v94_v23 }
  0xff   :  { %v5025_v36 = vadd.f32 %v5024_v19, %v4197_v28  ;;  %v5099_v37 = vadd.f32 %v5098_v20, %v4199_v29  ;;  %v4198_v38 = vmax.f32 %v544_v30, 0.0  ;;  %v4200_v39 = vmax.f32 %v993_v31, 0.0  ;;  %839 = vmatprep.mubr.f32.mxu0 %v16372_v5  ;;  %1288 = vmatprep.mubr.f32.mxu1 %v16372_v5 }
 0x100   :  { %v548_v41 = vadd.f32 %v547_v34, %v10705_v10  ;;  %v997_v42 = vadd.f32 %v996_v35, %v10708_v11  ;;  %v549_v43 = vpop.f32.mrf.mxu0  ;;  %v998_v44 = vpop.f32.mrf.mxu1  ;;  %v10060_v34 = vld [vmem:[%s16360_s0 + $0x8] sm:$0xff] }
 0x101   :  { %v5062_v45 = vadd.f32 %v5061_v32, %v4198_v38  ;;  %v5136_v46 = vadd.f32 %v5135_v33, %v4200_v39  ;;  %v550_v47 = vadd.f32 %v549_v43, %v10713_v14  ;;  %v999_v49 = vadd.f32 %v998_v44, %v10716_v15 }
 0x102   :  { %v4213_v51 = vmax.f32 %v548_v41, 0.0  ;;  %v4215_v52 = vmax.f32 %v997_v42, 0.0  ;;  %v553_v53 = vpop.f32.mrf.mxu0  ;;  %9377 = vmatmul.mubr.msk.f32.gmra.mxu0 %vm204_vm0, %v95_v40  ;;  %v1002_v54 = vpop.f32.mrf.mxu1  ;;  %9441 = vmatmul.mubr.msk.f32.gmra.mxu1 %vm204_vm0, %v95_v40 }
 0x103   :  { %v4214_v56 = vmax.f32 %v550_v47, 0.0  ;;  %v4216_v57 = vmax.f32 %v999_v49, 0.0  ;;  %v554_v58 = vadd.f32 %v553_v53, %v10705_v10  ;;  %v1003_v59 = vadd.f32 %v1002_v54, %v10708_v11  ;;  %1359 = vmatprep.mubr.f32.mxu0 %v16372_v5  ;;  %1808 = vmatprep.mubr.f32.mxu1 %v16372_v5  ;;  %v10061_v53 = vld [vmem:[%s16360_s0 + $0x10] sm:$0xff] }
 0x104   :  { %v5026_v60 = vadd.f32 %v5025_v36, %v4213_v51  ;;  %v5100_v61 = vadd.f32 %v5099_v37, %v4215_v52  ;;  %v555_v62 = vpop.f32.mrf.mxu0  ;;  %v1004_v63 = vpop.f32.mrf.mxu1 }
 0x105   :  { %v5063_v2 = vadd.f32 %v5062_v45, %v4214_v56  ;;  %v5137_v6 = vadd.f32 %v5136_v46, %v4216_v57  ;;  %v4229_v9 = vmax.f32 %v554_v58, 0.0  ;;  %v4231_v48 = vmax.f32 %v1003_v59, 0.0 }
 0x106   :  { %v556_v12 = vadd.f32 %v555_v62, %v10713_v14  ;;  %v1005_v13 = vadd.f32 %v1004_v63, %v10716_v15  ;;  %v559_v16 = vpop.f32.mrf.mxu0  ;;  %v1008_v17 = vpop.f32.mrf.mxu1  ;;  %9442 = vmatmul.mubr.msk.f32.vlgmr.msra.gmra.mxu0 %vm204_vm0, %v10059_v18  ;;  %9506 = vmatmul.mubr.msk.f32.vlgmr.msra.gmra.mxu1 %vm204_vm0, %v10059_v18 }
 0x107   :  { %v5027_v19 = vadd.f32 %v5026_v60, %v4229_v9  ;;  %v5101_v50 = vadd.f32 %v5100_v61, %v4231_v48  ;;  %v560_v20 = vadd.f32 %v559_v16, %v10705_v10  ;;  %v1009_v21 = vadd.f32 %v1008_v17, %v10708_v11  ;;  %2224 = vmatpush1.msra.mxu0 %v112_v55 }
 0x108   :  { %v4230_v22 = vmax.f32 %v556_v12, 0.0  ;;  %v4232_v23 = vmax.f32 %v1005_v13, 0.0  ;;  %v561_v24 = vpop.f32.mrf.mxu0  ;;  %v1010_v25 = vpop.f32.mrf.mxu1  ;;  %1365 = vmatprep.mubr.f32.mxu0 %v16372_v5  ;;  %1814 = vmatprep.mubr.f32.mxu1 %v16372_v5  ;;  %v10062_v13 = vld [vmem:[%s16360_s0 + $0x18] sm:$0xff] }
 0x109   :  { %v4245_v26 = vmax.f32 %v560_v20, 0.0  ;;  %v4247_v27 = vmax.f32 %v1009_v21, 0.0  ;;  %v562_v28 = vadd.f32 %v561_v24, %v10713_v14  ;;  %v1011_v29 = vadd.f32 %v1010_v25, %v10716_v15  ;;  %2673 = vmatpush1.msra.mxu1 %v114_v0 }
 0x10a   :  { %v5064_v30 = vadd.f32 %v5063_v2, %v4230_v22  ;;  %v5138_v31 = vadd.f32 %v5137_v6, %v4232_v23  ;;  %v565_v32 = vpop.f32.mrf.mxu0  ;;  %v1014_v33 = vpop.f32.mrf.mxu1  ;;  %9443 = vmatmul.mubr.msk.f32.gmra.mxu0 %vm204_vm0, %v10060_v34  ;;  %9507 = vmatmul.mubr.msk.f32.gmra.mxu1 %vm204_vm0, %v10060_v34 }
 0x10b   :  { %v5028_v35 = vadd.f32 %v5027_v19, %v4245_v26  ;;  %v5102_v36 = vadd.f32 %v5101_v50, %v4247_v27  ;;  %v4246_v37 = vmax.f32 %v562_v28, 0.0  ;;  %v4248_v38 = vmax.f32 %v1011_v29, 0.0  ;;  %1371 = vmatprep.mubr.f32.mxu0 %v16372_v5  ;;  %1820 = vmatprep.mubr.f32.mxu1 %v16372_v5 }
 0x10c   :  { %v566_v39 = vadd.f32 %v565_v32, %v10705_v10  ;;  %v1015_v40 = vadd.f32 %v1014_v33, %v10708_v11  ;;  %v567_v41 = vpop.f32.mrf.mxu0  ;;  %v1016_v42 = vpop.f32.mrf.mxu1 }
 0x10d   :  { %v5065_v43 = vadd.f32 %v5064_v30, %v4246_v37  ;;  %v5139_v44 = vadd.f32 %v5138_v31, %v4248_v38  ;;  %v568_v45 = vadd.f32 %v567_v41, %v10713_v14  ;;  %v1017_v46 = vadd.f32 %v1016_v42, %v10716_v15  ;;  %v10063_v31 = vld [vmem:[%s16360_s0 + $0x20] sm:$0xff] }
 0x10e   :  { %v4261_v47 = vmax.f32 %v566_v39, 0.0  ;;  %v4263_v49 = vmax.f32 %v1015_v40, 0.0  ;;  %v571_v51 = vpop.f32.mrf.mxu0  ;;  %v1020_v52 = vpop.f32.mrf.mxu1  ;;  %9444 = vmatmul.mubr.msk.f32.gmra.mxu0 %vm204_vm0, %v10061_v53  ;;  %9508 = vmatmul.mubr.msk.f32.gmra.mxu1 %vm204_vm0, %v10061_v53 }
 0x10f   :  { %v4262_v54 = vmax.f32 %v568_v45, 0.0  ;;  %v4264_v55 = vmax.f32 %v1017_v46, 0.0  ;;  %v572_v56 = vadd.f32 %v571_v51, %v10705_v10  ;;  %v1021_v57 = vadd.f32 %v1020_v52, %v10708_v11  ;;  %1377 = vmatprep.mubr.f32.mxu0 %v16372_v5  ;;  %1826 = vmatprep.mubr.f32.mxu1 %v16372_v5 }
 0x110   :  { %v5029_v58 = vadd.f32 %v5028_v35, %v4261_v47  ;;  %v5103_v59 = vadd.f32 %v5102_v36, %v4263_v49  ;;  %v573_v60 = vpop.f32.mrf.mxu0  ;;  %v1022_v61 = vpop.f32.mrf.mxu1  ;;  %v10064_v49 = vld [vmem:[%s16360_s0 + $0x28] sm:$0xff] }
 0x111   :  { %v5066_v62 = vadd.f32 %v5065_v43, %v4262_v54  ;;  %v5140_v63 = vadd.f32 %v5139_v44, %v4264_v55  ;;  %v4277_v0 = vmax.f32 %v572_v56, 0.0  ;;  %v4279_v2 = vmax.f32 %v1021_v57, 0.0 }
 0x112   :  { %v574_v6 = vadd.f32 %v573_v60, %v10713_v14  ;;  %v1023_v9 = vadd.f32 %v1022_v61, %v10716_v15  ;;  %v577_v48 = vpop.f32.mrf.mxu0  ;;  %v1026_v12 = vpop.f32.mrf.mxu1  ;;  %9445 = vmatmul.mubr.msk.f32.gmra.mxu0 %vm204_vm0, %v10062_v13  ;;  %9509 = vmatmul.mubr.msk.f32.gmra.mxu1 %vm204_vm0, %v10062_v13 }
 0x113   :  { %v5030_v16 = vadd.f32 %v5029_v58, %v4277_v0  ;;  %v5104_v17 = vadd.f32 %v5103_v59, %v4279_v2  ;;  %v578_v18 = vadd.f32 %v577_v48, %v10705_v10  ;;  %v1027_v19 = vadd.f32 %v1026_v12, %v10708_v11  ;;  %1383 = vmatprep.mubr.f32.mxu0 %v16372_v5 }
 0x114   :  { %v4278_v50 = vmax.f32 %v574_v6, 0.0  ;;  %v4280_v20 = vmax.f32 %v1023_v9, 0.0  ;;  %v579_v21 = vpop.f32.mrf.mxu0  ;;  %v1028_v22 = vpop.f32.mrf.mxu1  ;;  %1832 = vmatprep.mubr.f32.mxu1 %v16372_v5  ;;  %v10065_v9 = vld [vmem:[%s16360_s0 + $0x30] sm:$0xff] }
 0x115   :  { %v4293_v23 = vmax.f32 %v578_v18, 0.0  ;;  %v4295_v24 = vmax.f32 %v1027_v19, 0.0  ;;  %v580_v25 = vadd.f32 %v579_v21, %v10713_v14  ;;  %v1029_v26 = vadd.f32 %v1028_v22, %v10716_v15 }
 0x116   :  { %v5067_v27 = vadd.f32 %v5066_v62, %v4278_v50  ;;  %v5141_v28 = vadd.f32 %v5140_v63, %v4280_v20  ;;  %v583_v29 = vpop.f32.mrf.mxu0  ;;  %v1032_v30 = vpop.f32.mrf.mxu1  ;;  %9446 = vmatmul.mubr.msk.f32.gmra.mxu0 %vm204_vm0, %v10063_v31  ;;  %9510 = vmatmul.mubr.msk.f32.gmra.mxu1 %vm204_vm0, %v10063_v31 }
 0x117   :  { %v5031_v32 = vadd.f32 %v5030_v16, %v4293_v23  ;;  %v5105_v33 = vadd.f32 %v5104_v17, %v4295_v24  ;;  %v4294_v34 = vmax.f32 %v580_v25, 0.0  ;;  %v4296_v35 = vmax.f32 %v1029_v26, 0.0  ;;  %1389 = vmatprep.mubr.f32.mxu0 %v16372_v5  ;;  %1838 = vmatprep.mubr.f32.mxu1 %v16372_v5 }
 0x118   :  { %v584_v36 = vadd.f32 %v583_v29, %v10705_v10  ;;  %v1033_v37 = vadd.f32 %v1032_v30, %v10708_v11  ;;  %v585_v38 = vpop.f32.mrf.mxu0  ;;  %v1034_v39 = vpop.f32.mrf.mxu1 }
 0x119   :  { %v5068_v40 = vadd.f32 %v5067_v27, %v4294_v34  ;;  %v5142_v41 = vadd.f32 %v5141_v28, %v4296_v35  ;;  %v586_v42 = vadd.f32 %v585_v38, %v10713_v14  ;;  %v1035_v43 = vadd.f32 %v1034_v39, %v10716_v15  ;;  %v10066_v28 = vld [vmem:[%s16360_s0 + $0x38] sm:$0xff] }
 0x11a   :  { %v4309_v44 = vmax.f32 %v584_v36, 0.0  ;;  %v4311_v45 = vmax.f32 %v1033_v37, 0.0  ;;  %v589_v46 = vpop.f32.mrf.mxu0  ;;  %v1038_v47 = vpop.f32.mrf.mxu1  ;;  %9447 = vmatmul.mubr.msk.f32.gmra.mxu0 %vm204_vm0, %v10064_v49  ;;  %9511 = vmatmul.mubr.msk.f32.gmra.mxu1 %vm204_vm0, %v10064_v49 }
 0x11b   :  { %v4310_v51 = vmax.f32 %v586_v42, 0.0  ;;  %v4312_v52 = vmax.f32 %v1035_v43, 0.0  ;;  %v590_v53 = vadd.f32 %v589_v46, %v10705_v10  ;;  %v1039_v54 = vadd.f32 %v1038_v47, %v10708_v11  ;;  %1395 = vmatprep.mubr.f32.mxu0 %v16372_v5  ;;  %1844 = vmatprep.mubr.f32.mxu1 %v16372_v5 }
 0x11c   :  { %v5032_v55 = vadd.f32 %v5031_v32, %v4309_v44  ;;  %v5106_v56 = vadd.f32 %v5105_v33, %v4311_v45  ;;  %v591_v57 = vpop.f32.mrf.mxu0  ;;  %v1040_v58 = vpop.f32.mrf.mxu1  ;;  %v10067_v45 = vld [vmem:[%s16360_s0 + $0x40] sm:$0xff] }
 0x11d   :  { %v5069_v59 = vadd.f32 %v5068_v40, %v4310_v51  ;;  %v5143_v60 = vadd.f32 %v5142_v41, %v4312_v52  ;;  %v4325_v61 = vmax.f32 %v590_v53, 0.0  ;;  %v4327_v62 = vmax.f32 %v1039_v54, 0.0 }
 0x11e   :  { %v592_v63 = vadd.f32 %v591_v57, %v10713_v14  ;;  %v1041_v0 = vadd.f32 %v1040_v58, %v10716_v15  ;;  %v595_v2 = vpop.f32.mrf.mxu0  ;;  %v1044_v6 = vpop.f32.mrf.mxu1  ;;  %9448 = vmatmul.mubr.msk.f32.gmra.mxu0 %vm204_vm0, %v10065_v9  ;;  %9512 = vmatmul.mubr.msk.f32.gmra.mxu1 %vm204_vm0, %v10065_v9 }
 0x11f   :  { %v5033_v48 = vadd.f32 %v5032_v55, %v4325_v61  ;;  %v5107_v12 = vadd.f32 %v5106_v56, %v4327_v62  ;;  %v596_v13 = vadd.f32 %v595_v2, %v10705_v10  ;;  %v1045_v16 = vadd.f32 %v1044_v6, %v10708_v11  ;;  %1401 = vmatprep.mubr.f32.mxu0 %v16372_v5 }
 0x120   :  { %v4326_v17 = vmax.f32 %v592_v63, 0.0  ;;  %v4328_v18 = vmax.f32 %v1041_v0, 0.0  ;;  %v597_v19 = vpop.f32.mrf.mxu0  ;;  %v1046_v50 = vpop.f32.mrf.mxu1  ;;  %1850 = vmatprep.mubr.f32.mxu1 %v16372_v5  ;;  %v10068_v0 = vld [vmem:[%s16360_s0 + $0x48] sm:$0xff] }
 0x121   :  { %v4341_v20 = vmax.f32 %v596_v13, 0.0  ;;  %v4343_v21 = vmax.f32 %v1045_v16, 0.0  ;;  %v598_v22 = vadd.f32 %v597_v19, %v10713_v14  ;;  %v1047_v23 = vadd.f32 %v1046_v50, %v10716_v15 }
 0x122   :  { %v5070_v24 = vadd.f32 %v5069_v59, %v4326_v17  ;;  %v5144_v25 = vadd.f32 %v5143_v60, %v4328_v18  ;;  %v601_v26 = vpop.f32.mrf.mxu0  ;;  %v1050_v27 = vpop.f32.mrf.mxu1  ;;  %9449 = vmatmul.mubr.msk.f32.gmra.mxu0 %vm204_vm0, %v10066_v28  ;;  %9513 = vmatmul.mubr.msk.f32.gmra.mxu1 %vm204_vm0, %v10066_v28 }
 0x123   :  { %v5034_v29 = vadd.f32 %v5033_v48, %v4341_v20  ;;  %v5108_v30 = vadd.f32 %v5107_v12, %v4343_v21  ;;  %v4342_v31 = vmax.f32 %v598_v22, 0.0  ;;  %v4344_v32 = vmax.f32 %v1047_v23, 0.0  ;;  %1407 = vmatprep.mubr.f32.mxu0 %v16372_v5  ;;  %1856 = vmatprep.mubr.f32.mxu1 %v16372_v5 }
 0x124   :  { %v602_v33 = vadd.f32 %v601_v26, %v10705_v10  ;;  %v1051_v34 = vadd.f32 %v1050_v27, %v10708_v11  ;;  %v603_v35 = vpop.f32.mrf.mxu0  ;;  %v1052_v36 = vpop.f32.mrf.mxu1 }
 0x125   :  { %v5071_v37 = vadd.f32 %v5070_v24, %v4342_v31  ;;  %v5145_v38 = vadd.f32 %v5144_v25, %v4344_v32  ;;  %v604_v39 = vadd.f32 %v603_v35, %v10713_v14  ;;  %v1053_v40 = vadd.f32 %v1052_v36, %v10716_v15  ;;  %v10069_v25 = vld [vmem:[%s16360_s0 + $0x50] sm:$0xff] }
 0x126   :  { %v4357_v41 = vmax.f32 %v602_v33, 0.0  ;;  %v4359_v42 = vmax.f32 %v1051_v34, 0.0  ;;  %v607_v43 = vpop.f32.mrf.mxu0  ;;  %v1056_v44 = vpop.f32.mrf.mxu1  ;;  %9450 = vmatmul.mubr.msk.f32.gmra.mxu0 %vm204_vm0, %v10067_v45  ;;  %9514 = vmatmul.mubr.msk.f32.gmra.mxu1 %vm204_vm0, %v10067_v45 }
 0x127   :  { %v4358_v46 = vmax.f32 %v604_v39, 0.0  ;;  %v4360_v47 = vmax.f32 %v1053_v40, 0.0  ;;  %v608_v49 = vadd.f32 %v607_v43, %v10705_v10  ;;  %v1057_v51 = vadd.f32 %v1056_v44, %v10708_v11  ;;  %1413 = vmatprep.mubr.f32.mxu0 %v16372_v5  ;;  %1862 = vmatprep.mubr.f32.mxu1 %v16372_v5 }
 0x128   :  { %v5035_v52 = vadd.f32 %v5034_v29, %v4357_v41  ;;  %v5109_v53 = vadd.f32 %v5108_v30, %v4359_v42  ;;  %v609_v54 = vpop.f32.mrf.mxu0  ;;  %v1058_v55 = vpop.f32.mrf.mxu1  ;;  %v10070_v42 = vld [vmem:[%s16360_s0 + $0x58] sm:$0xff] }
 0x129   :  { %v5072_v56 = vadd.f32 %v5071_v37, %v4358_v46  ;;  %v5146_v57 = vadd.f32 %v5145_v38, %v4360_v47  ;;  %v4373_v58 = vmax.f32 %v608_v49, 0.0  ;;  %v4375_v59 = vmax.f32 %v1057_v51, 0.0 }
 0x12a   :  { %v610_v60 = vadd.f32 %v609_v54, %v10713_v14  ;;  %v1059_v61 = vadd.f32 %v1058_v55, %v10716_v15  ;;  %v613_v62 = vpop.f32.mrf.mxu0  ;;  %v1062_v63 = vpop.f32.mrf.mxu1  ;;  %9451 = vmatmul.mubr.msk.f32.gmra.mxu0 %vm204_vm0, %v10068_v0  ;;  %9515 = vmatmul.mubr.msk.f32.gmra.mxu1 %vm204_vm0, %v10068_v0 }
 0x12b   :  { %v5036_v2 = vadd.f32 %v5035_v52, %v4373_v58  ;;  %v5110_v6 = vadd.f32 %v5109_v53, %v4375_v59  ;;  %v614_v9 = vadd.f32 %v613_v62, %v10705_v10  ;;  %v1063_v48 = vadd.f32 %v1062_v63, %v10708_v11  ;;  %1419 = vmatprep.mubr.f32.mxu0 %v16372_v5 }
 0x12c   :  { %v4374_v12 = vmax.f32 %v610_v60, 0.0  ;;  %v4376_v13 = vmax.f32 %v1059_v61, 0.0  ;;  %v615_v16 = vpop.f32.mrf.mxu0  ;;  %v1064_v17 = vpop.f32.mrf.mxu1  ;;  %1868 = vmatprep.mubr.f32.mxu1 %v16372_v5  ;;  %v10071_v61 = vld [vmem:[%s16360_s0 + $0x60] sm:$0xff] }
 0x12d   :  { %v4389_v18 = vmax.f32 %v614_v9, 0.0  ;;  %v4391_v19 = vmax.f32 %v1063_v48, 0.0  ;;  %v616_v50 = vadd.f32 %v615_v16, %v10713_v14  ;;  %v1065_v20 = vadd.f32 %v1064_v17, %v10716_v15 }
 0x12e   :  { %v5073_v21 = vadd.f32 %v5072_v56, %v4374_v12  ;;  %v5147_v22 = vadd.f32 %v5146_v57, %v4376_v13  ;;  %v619_v23 = vpop.f32.mrf.mxu0  ;;  %v1068_v24 = vpop.f32.mrf.mxu1  ;;  %9452 = vmatmul.mubr.msk.f32.gmra.mxu0 %vm204_vm0, %v10069_v25  ;;  %9516 = vmatmul.mubr.msk.f32.gmra.mxu1 %vm204_vm0, %v10069_v25 }
 0x12f   :  { %v5037_v26 = vadd.f32 %v5036_v2, %v4389_v18  ;;  %v5111_v27 = vadd.f32 %v5110_v6, %v4391_v19  ;;  %v4390_v28 = vmax.f32 %v616_v50, 0.0  ;;  %v4392_v29 = vmax.f32 %v1065_v20, 0.0  ;;  %1425 = vmatprep.mubr.f32.mxu0 %v16372_v5  ;;  %1874 = vmatprep.mubr.f32.mxu1 %v16372_v5 }
 0x130   :  { %v620_v30 = vadd.f32 %v619_v23, %v10705_v10  ;;  %v1069_v31 = vadd.f32 %v1068_v24, %v10708_v11  ;;  %v621_v32 = vpop.f32.mrf.mxu0  ;;  %v1070_v33 = vpop.f32.mrf.mxu1 }
 0x131   :  { %v5074_v34 = vadd.f32 %v5073_v21, %v4390_v28  ;;  %v5148_v35 = vadd.f32 %v5147_v22, %v4392_v29  ;;  %v622_v36 = vadd.f32 %v621_v32, %v10713_v14  ;;  %v1071_v37 = vadd.f32 %v1070_v33, %v10716_v15  ;;  %v10072_v22 = vld [vmem:[%s16360_s0 + $0x68] sm:$0xff] }
 0x132   :  { %v4405_v38 = vmax.f32 %v620_v30, 0.0  ;;  %v4407_v39 = vmax.f32 %v1069_v31, 0.0  ;;  %v625_v40 = vpop.f32.mrf.mxu0  ;;  %v1074_v41 = vpop.f32.mrf.mxu1  ;;  %9453 = vmatmul.mubr.msk.f32.gmra.mxu0 %vm204_vm0, %v10070_v42  ;;  %9517 = vmatmul.mubr.msk.f32.gmra.mxu1 %vm204_vm0, %v10070_v42 }
 0x133   :  { %v4406_v43 = vmax.f32 %v622_v36, 0.0  ;;  %v4408_v44 = vmax.f32 %v1071_v37, 0.0  ;;  %v626_v45 = vadd.f32 %v625_v40, %v10705_v10  ;;  %v1075_v46 = vadd.f32 %v1074_v41, %v10708_v11  ;;  %1431 = vmatprep.mubr.f32.mxu0 %v16372_v5  ;;  %1880 = vmatprep.mubr.f32.mxu1 %v16372_v5 }
 0x134   :  { %v5038_v47 = vadd.f32 %v5037_v26, %v4405_v38  ;;  %v5112_v49 = vadd.f32 %v5111_v27, %v4407_v39  ;;  %v627_v51 = vpop.f32.mrf.mxu0  ;;  %v1076_v52 = vpop.f32.mrf.mxu1  ;;  %v10073_v39 = vld [vmem:[%s16360_s0 + $0x70] sm:$0xff] }
 0x135   :  { %v5075_v53 = vadd.f32 %v5074_v34, %v4406_v43  ;;  %v5149_v54 = vadd.f32 %v5148_v35, %v4408_v44  ;;  %v4421_v55 = vmax.f32 %v626_v45, 0.0  ;;  %v4423_v56 = vmax.f32 %v1075_v46, 0.0 }
 0x136   :  { %v628_v57 = vadd.f32 %v627_v51, %v10713_v14  ;;  %v1077_v58 = vadd.f32 %v1076_v52, %v10716_v15  ;;  %v631_v59 = vpop.f32.mrf.mxu0  ;;  %v1080_v60 = vpop.f32.mrf.mxu1  ;;  %9454 = vmatmul.mubr.msk.f32.gmra.mxu0 %vm204_vm0, %v10071_v61  ;;  %9518 = vmatmul.mubr.msk.f32.gmra.mxu1 %vm204_vm0, %v10071_v61 }
 0x137   :  { %v5039_v62 = vadd.f32 %v5038_v47, %v4421_v55  ;;  %v5113_v63 = vadd.f32 %v5112_v49, %v4423_v56  ;;  %v632_v0 = vadd.f32 %v631_v59, %v10705_v10  ;;  %v1081_v2 = vadd.f32 %v1080_v60, %v10708_v11  ;;  %1437 = vmatprep.mubr.f32.mxu0 %v16372_v5 }
 0x138   :  { %v4422_v6 = vmax.f32 %v628_v57, 0.0  ;;  %v4424_v9 = vmax.f32 %v1077_v58, 0.0  ;;  %v633_v48 = vpop.f32.mrf.mxu0  ;;  %v1082_v12 = vpop.f32.mrf.mxu1  ;;  %1886 = vmatprep.mubr.f32.mxu1 %v16372_v5  ;;  %v10074_v58 = vld [vmem:[%s16360_s0 + $0x78] sm:$0xff] }
 0x139   :  { %v4437_v13 = vmax.f32 %v632_v0, 0.0  ;;  %v4439_v16 = vmax.f32 %v1081_v2, 0.0  ;;  %v634_v17 = vadd.f32 %v633_v48, %v10713_v14  ;;  %v1083_v18 = vadd.f32 %v1082_v12, %v10716_v15 }
 0x13a   :  { %v5076_v19 = vadd.f32 %v5075_v53, %v4422_v6  ;;  %v5150_v50 = vadd.f32 %v5149_v54, %v4424_v9  ;;  %v637_v20 = vpop.f32.mrf.mxu0  ;;  %v1086_v21 = vpop.f32.mrf.mxu1  ;;  %9455 = vmatmul.mubr.msk.f32.gmra.mxu0 %vm204_vm0, %v10072_v22  ;;  %9519 = vmatmul.mubr.msk.f32.gmra.mxu1 %vm204_vm0, %v10072_v22 }
 0x13b   :  { %v5040_v23 = vadd.f32 %v5039_v62, %v4437_v13  ;;  %v5114_v24 = vadd.f32 %v5113_v63, %v4439_v16  ;;  %v4438_v25 = vmax.f32 %v634_v17, 0.0  ;;  %v4440_v26 = vmax.f32 %v1083_v18, 0.0  ;;  %1443 = vmatprep.mubr.f32.mxu0 %v16372_v5  ;;  %1892 = vmatprep.mubr.f32.mxu1 %v16372_v5 }
 0x13c   :  { %v638_v27 = vadd.f32 %v637_v20, %v10705_v10  ;;  %v1087_v28 = vadd.f32 %v1086_v21, %v10708_v11  ;;  %v639_v29 = vpop.f32.mrf.mxu0  ;;  %v1088_v30 = vpop.f32.mrf.mxu1 }
 0x13d   :  { %v5077_v31 = vadd.f32 %v5076_v19, %v4438_v25  ;;  %v5151_v32 = vadd.f32 %v5150_v50, %v4440_v26  ;;  %v640_v33 = vadd.f32 %v639_v29, %v10713_v14  ;;  %v1089_v34 = vadd.f32 %v1088_v30, %v10716_v15  ;;  %v10075_v50 = vld [vmem:[%s16360_s0 + $0x80] sm:$0xff] }
 0x13e   :  { %v4453_v35 = vmax.f32 %v638_v27, 0.0  ;;  %v4455_v36 = vmax.f32 %v1087_v28, 0.0  ;;  %v643_v37 = vpop.f32.mrf.mxu0  ;;  %v1092_v38 = vpop.f32.mrf.mxu1  ;;  %9456 = vmatmul.mubr.msk.f32.gmra.mxu0 %vm204_vm0, %v10073_v39  ;;  %9520 = vmatmul.mubr.msk.f32.gmra.mxu1 %vm204_vm0, %v10073_v39 }
 0x13f   :  { %v4454_v40 = vmax.f32 %v640_v33, 0.0  ;;  %v4456_v41 = vmax.f32 %v1089_v34, 0.0  ;;  %v644_v42 = vadd.f32 %v643_v37, %v10705_v10  ;;  %v1093_v43 = vadd.f32 %v1092_v38, %v10708_v11  ;;  %1449 = vmatprep.mubr.f32.mxu0 %v16372_v5  ;;  %1898 = vmatprep.mubr.f32.mxu1 %v16372_v5 }
 0x140   :  { %v5041_v44 = vadd.f32 %v5040_v23, %v4453_v35  ;;  %v5115_v45 = vadd.f32 %v5114_v24, %v4455_v36  ;;  %v645_v46 = vpop.f32.mrf.mxu0  ;;  %v1094_v47 = vpop.f32.mrf.mxu1 }
 0x141   :  { %v5078_v49 = vadd.f32 %v5077_v31, %v4454_v40  ;;  %v5152_v51 = vadd.f32 %v5151_v32, %v4456_v41  ;;  %v4469_v52 = vmax.f32 %v644_v42, 0.0  ;;  %v4471_v53 = vmax.f32 %v1093_v43, 0.0  ;;  %v10076_v32 = vld [vmem:[%s16360_s0 + $0x88] sm:$0xff] }
 0x142   :  { %v646_v54 = vadd.f32 %v645_v46, %v10713_v14  ;;  %v1095_v55 = vadd.f32 %v1094_v47, %v10716_v15  ;;  %v649_v56 = vpop.f32.mrf.mxu0  ;;  %v1098_v57 = vpop.f32.mrf.mxu1  ;;  %9457 = vmatmul.mubr.msk.f32.gmra.mxu0 %vm204_vm0, %v10074_v58  ;;  %9521 = vmatmul.mubr.msk.f32.gmra.mxu1 %vm204_vm0, %v10074_v58  ;;  %v10077_v47 = vld [vmem:[%s16360_s0 + $0x90] sm:$0xff] }
 0x143   :  { %v5042_v59 = vadd.f32 %v5041_v44, %v4469_v52  ;;  %v5116_v60 = vadd.f32 %v5115_v45, %v4471_v53  ;;  %v650_v61 = vadd.f32 %v649_v56, %v10705_v10  ;;  %v1099_v62 = vadd.f32 %v1098_v57, %v10708_v11  ;;  %1455 = vmatprep.mubr.f32.mxu0 %v16372_v5 }
 0x144   :  { %v4470_v63 = vmax.f32 %v646_v54, 0.0  ;;  %v4472_v0 = vmax.f32 %v1095_v55, 0.0  ;;  %v651_v2 = vpop.f32.mrf.mxu0  ;;  %v1100_v6 = vpop.f32.mrf.mxu1  ;;  %1904 = vmatprep.mubr.f32.mxu1 %v16372_v5 }
 0x145   :  { %v4485_v9 = vmax.f32 %v650_v61, 0.0  ;;  %v4487_v48 = vmax.f32 %v1099_v62, 0.0  ;;  %v652_v12 = vadd.f32 %v651_v2, %v10713_v14  ;;  %v1101_v13 = vadd.f32 %v1100_v6, %v10716_v15  ;;  %v10078_v6 = vld [vmem:[%s16360_s0 + $0x98] sm:$0xff] }
 0x146   :  { %v5079_v16 = vadd.f32 %v5078_v49, %v4470_v63  ;;  %v5153_v17 = vadd.f32 %v5152_v51, %v4472_v0  ;;  %v655_v18 = vpop.f32.mrf.mxu0  ;;  %v1104_v19 = vpop.f32.mrf.mxu1  ;;  %9458 = vmatmul.mubr.msk.f32.gmra.mxu0 %vm204_vm0, %v10075_v50  ;;  %9522 = vmatmul.mubr.msk.f32.gmra.mxu1 %vm204_vm0, %v10075_v50 }
 0x147   :  { %v11072_v20 = vadd.f32 %v5042_v59, %v4485_v9  ;;  %v11074_v21 = vadd.f32 %v5116_v60, %v4487_v48  ;;  %v4486_v22 = vmax.f32 %v652_v12, 0.0  ;;  %v4488_v23 = vmax.f32 %v1101_v13, 0.0  ;;  %1461 = vmatprep.mubr.f32.mxu0 %v16372_v5  ;;  %1910 = vmatprep.mubr.f32.mxu1 %v16372_v5 }
 0x148   :  { %v657_v24 = vpop.f32.mrf.mxu0  ;;  %v1106_v25 = vpop.f32.mrf.mxu1  ;;  %v656_v28 = vadd.f32 %v655_v18, %v10705_v10  ;;  %v1105_v29 = vadd.f32 %v1104_v19, %v10708_v11 }
 0x149   :  { %v11078_v26 = vadd.f32 %v5079_v16, %v4486_v22  ;;  %v11080_v27 = vadd.f32 %v5153_v17, %v4488_v23  ;;  %v658_v33 = vadd.f32 %v657_v24, %v10713_v14  ;;  %v1107_v34 = vadd.f32 %v1106_v25, %v10716_v15 }
 0x14a   :  { %v661_v30 = vpop.f32.mrf.mxu0  ;;  %v1110_v31 = vpop.f32.mrf.mxu1  ;;  %9459 = vmatmul.mubr.msk.f32.gmra.mxu0 %vm204_vm0, %v10076_v32  ;;  %9523 = vmatmul.mubr.msk.f32.gmra.mxu1 %vm204_vm0, %v10076_v32  ;;  %v4501_v39 = vmax.f32 %v656_v28, 0.0  ;;  %v4503_v40 = vmax.f32 %v1105_v29, 0.0 }
 0x14b   :  { %1467 = vmatprep.mubr.f32.mxu0 %v16372_v5  ;;  %1916 = vmatprep.mubr.f32.mxu1 %v16372_v5  ;;  %v662_v35 = vadd.f32 %v661_v30, %v10705_v10  ;;  %v1111_v36 = vadd.f32 %v1110_v31, %v10708_v11  ;;  %v4502_v49 = vmax.f32 %v658_v33, 0.0  ;;  %v4504_v51 = vmax.f32 %v1107_v34, 0.0  ;;  %v10079_v33 = vld [vmem:[%s16360_s0 + $0xa0] sm:$0xff] }
 0x14c   :  { %v663_v37 = vpop.f32.mrf.mxu0  ;;  %v1112_v38 = vpop.f32.mrf.mxu1 }
 0x14d   :  { %v4517_v41 = vmax.f32 %v662_v35, 0.0  ;;  %v4519_v42 = vmax.f32 %v1111_v36, 0.0  ;;  %v664_v43 = vadd.f32 %v663_v37, %v10713_v14  ;;  %v1113_v44 = vadd.f32 %v1112_v38, %v10716_v15 }
 0x14e   :  { %v667_v45 = vpop.f32.mrf.mxu0  ;;  %v1116_v46 = vpop.f32.mrf.mxu1  ;;  %9460 = vmatmul.mubr.msk.f32.gmra.mxu0 %vm204_vm0, %v10077_v47  ;;  %9524 = vmatmul.mubr.msk.f32.gmra.mxu1 %vm204_vm0, %v10077_v47 }
 0x14f   :  { %1473 = vmatprep.mubr.f32.mxu0 %v16372_v5  ;;  %1922 = vmatprep.mubr.f32.mxu1 %v16372_v5  ;;  %v5605_v52 = vadd.f32 %v4517_v41, %v4501_v39  ;;  %v5679_v53 = vadd.f32 %v4519_v42, %v4503_v40  ;;  %v4518_v54 = vmax.f32 %v664_v43, 0.0  ;;  %v4520_v55 = vmax.f32 %v1113_v44, 0.0 }
 0x150   :  { %v669_v56 = vpop.f32.mrf.mxu0  ;;  %v1118_v57 = vpop.f32.mrf.mxu1  ;;  %v668_v58 = vadd.f32 %v667_v45, %v10705_v10  ;;  %v1117_v59 = vadd.f32 %v1116_v46, %v10708_v11 }
 0x151   :  { %v5642_v60 = vadd.f32 %v4518_v54, %v4502_v49  ;;  %v5716_v61 = vadd.f32 %v4520_v55, %v4504_v51  ;;  %v670_v62 = vadd.f32 %v669_v56, %v10713_v14  ;;  %v1119_v63 = vadd.f32 %v1118_v57, %v10716_v15 }
 0x152   :  { %v673_v0 = vpop.f32.mrf.mxu0  ;;  %v1122_v2 = vpop.f32.mrf.mxu1  ;;  %9461 = vmatmul.mubr.msk.f32.gmra.mxu0 %vm204_vm0, %v10078_v6  ;;  %v4533_v9 = vmax.f32 %v668_v58, 0.0  ;;  %v4535_v48 = vmax.f32 %v1117_v59, 0.0  ;;  %9525 = vmatmul.mubr.msk.f32.gmra.mxu1 %vm204_vm0, %v10078_v6 }
 0x153   :  { %1479 = vmatprep.mubr.f32.mxu0 %v16372_v5  ;;  %v4534_v12 = vmax.f32 %v670_v62, 0.0  ;;  %v4536_v13 = vmax.f32 %v1119_v63, 0.0  ;;  %v674_v16 = vadd.f32 %v673_v0, %v10705_v10  ;;  %v1123_v17 = vadd.f32 %v1122_v2, %v10708_v11  ;;  %1928 = vmatprep.mubr.f32.mxu1 %v16372_v5 }
 0x154   :  { %v675_v18 = vpop.f32.mrf.mxu0  ;;  %v1124_v19 = vpop.f32.mrf.mxu1  ;;  %v5606_v50 = vadd.f32 %v5605_v52, %v4533_v9  ;;  %v5680_v22 = vadd.f32 %v5679_v53, %v4535_v48  ;;  %v10080_v52 = vld [vmem:[%s16360_s0 + $0xa8] sm:$0xff] }
 0x155   :  { %v676_v23 = vadd.f32 %v675_v18, %v10713_v14  ;;  %v1125_v24 = vadd.f32 %v1124_v19, %v10716_v15  ;;  %v5643_v25 = vadd.f32 %v5642_v60, %v4534_v12  ;;  %v5717_v28 = vadd.f32 %v5716_v61, %v4536_v13  ;;  %v10081_v12 = vld [vmem:[%s16360_s0 + $0xb0] sm:$0xff] }
 0x156   :  { %v4549_v29 = vmax.f32 %v674_v16, 0.0  ;;  %v4551_v30 = vmax.f32 %v1123_v17, 0.0  ;;  %v679_v31 = vpop.f32.mrf.mxu0  ;;  %v1128_v32 = vpop.f32.mrf.mxu1  ;;  %9462 = vmatmul.mubr.msk.f32.gmra.mxu0 %vm204_vm0, %v10079_v33  ;;  %9526 = vmatmul.mubr.msk.f32.gmra.mxu1 %vm204_vm0, %v10079_v33 }
 0x157   :  { %v4550_v34 = vmax.f32 %v676_v23, 0.0  ;;  %v4552_v35 = vmax.f32 %v1125_v24, 0.0  ;;  %v680_v36 = vadd.f32 %v679_v31, %v10705_v10  ;;  %v1129_v37 = vadd.f32 %v1128_v32, %v10708_v11  ;;  %1485 = vmatprep.mubr.f32.mxu0 %v16372_v5  ;;  %1934 = vmatprep.mubr.f32.mxu1 %v16372_v5 }
 0x158   :  { %v5607_v38 = vadd.f32 %v5606_v50, %v4549_v29  ;;  %v5681_v39 = vadd.f32 %v5680_v22, %v4551_v30  ;;  %v681_v40 = vpop.f32.mrf.mxu0  ;;  %v1130_v41 = vpop.f32.mrf.mxu1 }
 0x159   :  { %v5644_v42 = vadd.f32 %v5643_v25, %v4550_v34  ;;  %v5718_v43 = vadd.f32 %v5717_v28, %v4552_v35  ;;  %v4565_v44 = vmax.f32 %v680_v36, 0.0  ;;  %v4567_v45 = vmax.f32 %v1129_v37, 0.0  ;;  %v10082_v34 = vld [vmem:[%s16360_s0 + $0xb8] sm:$0xff] }
 0x15a   :  { %v682_v46 = vadd.f32 %v681_v40, %v10713_v14  ;;  %v1131_v47 = vadd.f32 %v1130_v41, %v10716_v15  ;;  %v685_v49 = vpop.f32.mrf.mxu0  ;;  %v1134_v51 = vpop.f32.mrf.mxu1  ;;  %9463 = vmatmul.mubr.msk.f32.gmra.mxu0 %vm204_vm0, %v10080_v52  ;;  %9527 = vmatmul.mubr.msk.f32.gmra.mxu1 %vm204_vm0, %v10080_v52 }
 0x15b   :  { %v5608_v53 = vadd.f32 %v5607_v38, %v4565_v44  ;;  %v5682_v54 = vadd.f32 %v5681_v39, %v4567_v45  ;;  %v686_v55 = vadd.f32 %v685_v49, %v10705_v10  ;;  %v1135_v56 = vadd.f32 %v1134_v51, %v10708_v11  ;;  %1491 = vmatprep.mubr.f32.mxu0 %v16372_v5 }
 0x15c   :  { %v4566_v57 = vmax.f32 %v682_v46, 0.0  ;;  %v4568_v58 = vmax.f32 %v1131_v47, 0.0  ;;  %v687_v59 = vpop.f32.mrf.mxu0  ;;  %v1136_v60 = vpop.f32.mrf.mxu1  ;;  %1940 = vmatprep.mubr.f32.mxu1 %v16372_v5 }
 0x15d   :  { %v4581_v61 = vmax.f32 %v686_v55, 0.0  ;;  %v4583_v62 = vmax.f32 %v1135_v56, 0.0  ;;  %v688_v63 = vadd.f32 %v687_v59, %v10713_v14  ;;  %v1137_v0 = vadd.f32 %v1136_v60, %v10716_v15 }
 0x15e   :  { %v5645_v2 = vadd.f32 %v5644_v42, %v4566_v57  ;;  %v5719_v6 = vadd.f32 %v5718_v43, %v4568_v58  ;;  %v691_v9 = vpop.f32.mrf.mxu0  ;;  %v1140_v48 = vpop.f32.mrf.mxu1  ;;  %9464 = vmatmul.mubr.msk.f32.gmra.mxu0 %vm204_vm0, %v10081_v12  ;;  %9528 = vmatmul.mubr.msk.f32.gmra.mxu1 %vm204_vm0, %v10081_v12 }
 0x15f   :  { %v5609_v13 = vadd.f32 %v5608_v53, %v4581_v61  ;;  %v5683_v16 = vadd.f32 %v5682_v54, %v4583_v62  ;;  %v4582_v17 = vmax.f32 %v688_v63, 0.0  ;;  %v4584_v18 = vmax.f32 %v1137_v0, 0.0  ;;  %1497 = vmatprep.mubr.f32.mxu0 %v16372_v5  ;;  %1946 = vmatprep.mubr.f32.mxu1 %v16372_v5  ;;  %v10083_v53 = vld [vmem:[%s16360_s0 + $0xc0] sm:$0xff] }
 0x160   :  { %v692_v19 = vadd.f32 %v691_v9, %v10705_v10  ;;  %v1141_v50 = vadd.f32 %v1140_v48, %v10708_v11  ;;  %v693_v22 = vpop.f32.mrf.mxu0  ;;  %v1142_v23 = vpop.f32.mrf.mxu1 }
 0x161   :  { %v5646_v24 = vadd.f32 %v5645_v2, %v4582_v17  ;;  %v5720_v25 = vadd.f32 %v5719_v6, %v4584_v18  ;;  %v694_v28 = vadd.f32 %v693_v22, %v10713_v14  ;;  %v1143_v29 = vadd.f32 %v1142_v23, %v10716_v15 }
 0x162   :  { %v4597_v30 = vmax.f32 %v692_v19, 0.0  ;;  %v4599_v31 = vmax.f32 %v1141_v50, 0.0  ;;  %v697_v32 = vpop.f32.mrf.mxu0  ;;  %v1146_v33 = vpop.f32.mrf.mxu1  ;;  %9465 = vmatmul.mubr.msk.f32.gmra.mxu0 %vm204_vm0, %v10082_v34  ;;  %9529 = vmatmul.mubr.msk.f32.gmra.mxu1 %vm204_vm0, %v10082_v34 }
 0x163   :  { %v4598_v35 = vmax.f32 %v694_v28, 0.0  ;;  %v4600_v36 = vmax.f32 %v1143_v29, 0.0  ;;  %v698_v37 = vadd.f32 %v697_v32, %v10705_v10  ;;  %v1147_v38 = vadd.f32 %v1146_v33, %v10708_v11  ;;  %1503 = vmatprep.mubr.f32.mxu0 %v16372_v5  ;;  %1952 = vmatprep.mubr.f32.mxu1 %v16372_v5 }
 0x164   :  { %v5610_v39 = vadd.f32 %v5609_v13, %v4597_v30  ;;  %v5684_v40 = vadd.f32 %v5683_v16, %v4599_v31  ;;  %v699_v41 = vpop.f32.mrf.mxu0  ;;  %v1148_v42 = vpop.f32.mrf.mxu1  ;;  %v10084_v13 = vld [vmem:[%s16360_s0 + $0xc8] sm:$0xff] }
 0x165   :  { %v5647_v43 = vadd.f32 %v5646_v24, %v4598_v35  ;;  %v5721_v44 = vadd.f32 %v5720_v25, %v4600_v36  ;;  %v4613_v45 = vmax.f32 %v698_v37, 0.0  ;;  %v4615_v46 = vmax.f32 %v1147_v38, 0.0  ;;  %v10085_v35 = vld [vmem:[%s16360_s0 + $0xd0] sm:$0xff] }
 0x166   :  { %v700_v47 = vadd.f32 %v699_v41, %v10713_v14  ;;  %v1149_v49 = vadd.f32 %v1148_v42, %v10716_v15  ;;  %v703_v51 = vpop.f32.mrf.mxu0  ;;  %v1152_v52 = vpop.f32.mrf.mxu1  ;;  %9466 = vmatmul.mubr.msk.f32.gmra.mxu0 %vm204_vm0, %v10083_v53  ;;  %9530 = vmatmul.mubr.msk.f32.gmra.mxu1 %vm204_vm0, %v10083_v53 }
 0x167   :  { %v5611_v54 = vadd.f32 %v5610_v39, %v4613_v45  ;;  %v5685_v55 = vadd.f32 %v5684_v40, %v4615_v46  ;;  %v704_v56 = vadd.f32 %v703_v51, %v10705_v10  ;;  %v1153_v57 = vadd.f32 %v1152_v52, %v10708_v11  ;;  %1509 = vmatprep.mubr.f32.mxu0 %v16372_v5 }
 0x168   :  { %v4614_v58 = vmax.f32 %v700_v47, 0.0  ;;  %v4616_v59 = vmax.f32 %v1149_v49, 0.0  ;;  %v705_v60 = vpop.f32.mrf.mxu0  ;;  %v1154_v61 = vpop.f32.mrf.mxu1  ;;  %1958 = vmatprep.mubr.f32.mxu1 %v16372_v5 }
 0x169   :  { %v4629_v62 = vmax.f32 %v704_v56, 0.0  ;;  %v4631_v63 = vmax.f32 %v1153_v57, 0.0  ;;  %v706_v0 = vadd.f32 %v705_v60, %v10713_v14  ;;  %v1155_v2 = vadd.f32 %v1154_v61, %v10716_v15 }
 0x16a   :  { %v5648_v6 = vadd.f32 %v5647_v43, %v4614_v58  ;;  %v5722_v9 = vadd.f32 %v5721_v44, %v4616_v59  ;;  %v709_v48 = vpop.f32.mrf.mxu0  ;;  %v1158_v12 = vpop.f32.mrf.mxu1  ;;  %9467 = vmatmul.mubr.msk.f32.gmra.mxu0 %vm204_vm0, %v10084_v13  ;;  %9531 = vmatmul.mubr.msk.f32.gmra.mxu1 %vm204_vm0, %v10084_v13 }
 0x16b   :  { %v5612_v16 = vadd.f32 %v5611_v54, %v4629_v62  ;;  %v5686_v17 = vadd.f32 %v5685_v55, %v4631_v63  ;;  %v4630_v18 = vmax.f32 %v706_v0, 0.0  ;;  %v4632_v19 = vmax.f32 %v1155_v2, 0.0  ;;  %1515 = vmatprep.mubr.f32.mxu0 %v16372_v5  ;;  %1964 = vmatprep.mubr.f32.mxu1 %v16372_v5  ;;  %v10086_v54 = vld [vmem:[%s16360_s0 + $0xd8] sm:$0xff] }
 0x16c   :  { %v710_v50 = vadd.f32 %v709_v48, %v10705_v10  ;;  %v1159_v22 = vadd.f32 %v1158_v12, %v10708_v11  ;;  %v711_v23 = vpop.f32.mrf.mxu0  ;;  %v1160_v24 = vpop.f32.mrf.mxu1 }
 0x16d   :  { %v5649_v25 = vadd.f32 %v5648_v6, %v4630_v18  ;;  %v5723_v28 = vadd.f32 %v5722_v9, %v4632_v19  ;;  %v712_v29 = vadd.f32 %v711_v23, %v10713_v14  ;;  %v1161_v30 = vadd.f32 %v1160_v24, %v10716_v15 }
 0x16e   :  { %v4645_v31 = vmax.f32 %v710_v50, 0.0  ;;  %v4647_v32 = vmax.f32 %v1159_v22, 0.0  ;;  %v715_v33 = vpop.f32.mrf.mxu0  ;;  %v1164_v34 = vpop.f32.mrf.mxu1  ;;  %9468 = vmatmul.mubr.msk.f32.gmra.mxu0 %vm204_vm0, %v10085_v35  ;;  %9532 = vmatmul.mubr.msk.f32.gmra.mxu1 %vm204_vm0, %v10085_v35 }
 0x16f   :  { %v4646_v36 = vmax.f32 %v712_v29, 0.0  ;;  %v4648_v37 = vmax.f32 %v1161_v30, 0.0  ;;  %v716_v38 = vadd.f32 %v715_v33, %v10705_v10  ;;  %v1165_v39 = vadd.f32 %v1164_v34, %v10708_v11  ;;  %1521 = vmatprep.mubr.f32.mxu0 %v16372_v5  ;;  %1970 = vmatprep.mubr.f32.mxu1 %v16372_v5 }
 0x170   :  { %v5613_v40 = vadd.f32 %v5612_v16, %v4645_v31  ;;  %v5687_v41 = vadd.f32 %v5686_v17, %v4647_v32  ;;  %v717_v42 = vpop.f32.mrf.mxu0  ;;  %v1166_v43 = vpop.f32.mrf.mxu1  ;;  %v10087_v16 = vld [vmem:[%s16360_s0 + $0xe0] sm:$0xff] }
 0x171   :  { %v5650_v44 = vadd.f32 %v5649_v25, %v4646_v36  ;;  %v5724_v45 = vadd.f32 %v5723_v28, %v4648_v37  ;;  %v4661_v46 = vmax.f32 %v716_v38, 0.0  ;;  %v4663_v47 = vmax.f32 %v1165_v39, 0.0  ;;  %v10088_v36 = vld [vmem:[%s16360_s0 + $0xe8] sm:$0xff] }
 0x172   :  { %v718_v49 = vadd.f32 %v717_v42, %v10713_v14  ;;  %v1167_v51 = vadd.f32 %v1166_v43, %v10716_v15  ;;  %v721_v52 = vpop.f32.mrf.mxu0  ;;  %v1170_v53 = vpop.f32.mrf.mxu1  ;;  %9469 = vmatmul.mubr.msk.f32.gmra.mxu0 %vm204_vm0, %v10086_v54  ;;  %9533 = vmatmul.mubr.msk.f32.gmra.mxu1 %vm204_vm0, %v10086_v54 }
 0x173   :  { %v5614_v55 = vadd.f32 %v5613_v40, %v4661_v46  ;;  %v5688_v56 = vadd.f32 %v5687_v41, %v4663_v47  ;;  %v722_v57 = vadd.f32 %v721_v52, %v10705_v10  ;;  %v1171_v58 = vadd.f32 %v1170_v53, %v10708_v11  ;;  %1527 = vmatprep.mubr.f32.mxu0 %v16372_v5 }
 0x174   :  { %v4662_v59 = vmax.f32 %v718_v49, 0.0  ;;  %v4664_v60 = vmax.f32 %v1167_v51, 0.0  ;;  %v723_v61 = vpop.f32.mrf.mxu0  ;;  %v1172_v62 = vpop.f32.mrf.mxu1  ;;  %1976 = vmatprep.mubr.f32.mxu1 %v16372_v5 }
 0x175   :  { %v4677_v63 = vmax.f32 %v722_v57, 0.0  ;;  %v4679_v0 = vmax.f32 %v1171_v58, 0.0  ;;  %v724_v2 = vadd.f32 %v723_v61, %v10713_v14  ;;  %v1173_v6 = vadd.f32 %v1172_v62, %v10716_v15 }
 0x176   :  { %v5651_v9 = vadd.f32 %v5650_v44, %v4662_v59  ;;  %v5725_v48 = vadd.f32 %v5724_v45, %v4664_v60  ;;  %v727_v12 = vpop.f32.mrf.mxu0  ;;  %v1176_v13 = vpop.f32.mrf.mxu1  ;;  %9470 = vmatmul.mubr.msk.f32.gmra.mxu0 %vm204_vm0, %v10087_v16  ;;  %9534 = vmatmul.mubr.msk.f32.gmra.mxu1 %vm204_vm0, %v10087_v16 }
 0x177   :  { %v5615_v17 = vadd.f32 %v5614_v55, %v4677_v63  ;;  %v5689_v18 = vadd.f32 %v5688_v56, %v4679_v0  ;;  %v4678_v19 = vmax.f32 %v724_v2, 0.0  ;;  %v4680_v50 = vmax.f32 %v1173_v6, 0.0  ;;  %1533 = vmatprep.mubr.f32.mxu0 %v16372_v5  ;;  %1982 = vmatprep.mubr.f32.mxu1 %v16372_v5  ;;  %v10089_v55 = vld [vmem:[%s16360_s0 + $0xf0] sm:$0xff] }
 0x178   :  { %v728_v22 = vadd.f32 %v727_v12, %v10705_v10  ;;  %v1177_v23 = vadd.f32 %v1176_v13, %v10708_v11  ;;  %v729_v24 = vpop.f32.mrf.mxu0  ;;  %v1178_v25 = vpop.f32.mrf.mxu1 }
 0x179   :  { %v5652_v28 = vadd.f32 %v5651_v9, %v4678_v19  ;;  %v5726_v29 = vadd.f32 %v5725_v48, %v4680_v50  ;;  %v730_v30 = vadd.f32 %v729_v24, %v10713_v14  ;;  %v1179_v31 = vadd.f32 %v1178_v25, %v10716_v15 }
 0x17a   :  { %v4693_v32 = vmax.f32 %v728_v22, 0.0  ;;  %v4695_v33 = vmax.f32 %v1177_v23, 0.0  ;;  %v733_v34 = vpop.f32.mrf.mxu0  ;;  %v1182_v35 = vpop.f32.mrf.mxu1  ;;  %9471 = vmatmul.mubr.msk.f32.gmra.mxu0 %vm204_vm0, %v10088_v36  ;;  %9535 = vmatmul.mubr.msk.f32.gmra.mxu1 %vm204_vm0, %v10088_v36 }
 0x17b   :  { %v4694_v37 = vmax.f32 %v730_v30, 0.0  ;;  %v4696_v38 = vmax.f32 %v1179_v31, 0.0  ;;  %v734_v39 = vadd.f32 %v733_v34, %v10705_v10  ;;  %v1183_v40 = vadd.f32 %v1182_v35, %v10708_v11  ;;  %1539 = vmatprep.mubr.f32.mxu0 %v16372_v5  ;;  %1988 = vmatprep.mubr.f32.mxu1 %v16372_v5 }
 0x17c   :  { %v5616_v41 = vadd.f32 %v5615_v17, %v4693_v32  ;;  %v5690_v42 = vadd.f32 %v5689_v18, %v4695_v33  ;;  %v735_v43 = vpop.f32.mrf.mxu0  ;;  %v1184_v44 = vpop.f32.mrf.mxu1  ;;  %v10090_v17 = vld [vmem:[%s16360_s0 + $0xf8] sm:$0xff] }
 0x17d   :  { %v5653_v45 = vadd.f32 %v5652_v28, %v4694_v37  ;;  %v5727_v46 = vadd.f32 %v5726_v29, %v4696_v38  ;;  %v4709_v47 = vmax.f32 %v734_v39, 0.0  ;;  %v4711_v49 = vmax.f32 %v1183_v40, 0.0  ;;  %v10091_v37 = vld [vmem:[%s16360_s0 + $0x100] sm:$0xff] }
 0x17e   :  { %v736_v51 = vadd.f32 %v735_v43, %v10713_v14  ;;  %v1185_v52 = vadd.f32 %v1184_v44, %v10716_v15  ;;  %v739_v53 = vpop.f32.mrf.mxu0  ;;  %v1188_v54 = vpop.f32.mrf.mxu1  ;;  %9472 = vmatmul.mubr.msk.f32.gmra.mxu0 %vm204_vm0, %v10089_v55  ;;  %9536 = vmatmul.mubr.msk.f32.gmra.mxu1 %vm204_vm0, %v10089_v55 }
 0x17f   :  { %v5617_v56 = vadd.f32 %v5616_v41, %v4709_v47  ;;  %v5691_v57 = vadd.f32 %v5690_v42, %v4711_v49  ;;  %v740_v58 = vadd.f32 %v739_v53, %v10705_v10  ;;  %v1189_v59 = vadd.f32 %v1188_v54, %v10708_v11  ;;  %1545 = vmatprep.mubr.f32.mxu0 %v16372_v5 }
 0x180   :  { %v4710_v60 = vmax.f32 %v736_v51, 0.0  ;;  %v4712_v61 = vmax.f32 %v1185_v52, 0.0  ;;  %v741_v62 = vpop.f32.mrf.mxu0  ;;  %v1190_v63 = vpop.f32.mrf.mxu1  ;;  %1994 = vmatprep.mubr.f32.mxu1 %v16372_v5 }
 0x181   :  { %v4725_v0 = vmax.f32 %v740_v58, 0.0  ;;  %v4727_v2 = vmax.f32 %v1189_v59, 0.0  ;;  %v742_v6 = vadd.f32 %v741_v62, %v10713_v14  ;;  %v1191_v9 = vadd.f32 %v1190_v63, %v10716_v15 }
 0x182   :  { %v5654_v48 = vadd.f32 %v5653_v45, %v4710_v60  ;;  %v5728_v12 = vadd.f32 %v5727_v46, %v4712_v61  ;;  %v745_v13 = vpop.f32.mrf.mxu0  ;;  %v1194_v16 = vpop.f32.mrf.mxu1  ;;  %9473 = vmatmul.mubr.msk.f32.gmra.mxu0 %vm204_vm0, %v10090_v17  ;;  %9537 = vmatmul.mubr.msk.f32.gmra.mxu1 %vm204_vm0, %v10090_v17  ;;  %v102_v61 = vld [vmem:[%s16361_s1 + $0x30] sm:$0xff] }
 0x183   :  { %v5618_v18 = vadd.f32 %v5617_v56, %v4725_v0  ;;  %v5692_v19 = vadd.f32 %v5691_v57, %v4727_v2  ;;  %v4726_v50 = vmax.f32 %v742_v6, 0.0  ;;  %v4728_v22 = vmax.f32 %v1191_v9, 0.0  ;;  %1551 = vmatprep.mubr.f32.mxu0 %v16372_v5  ;;  %2000 = vmatprep.mubr.f32.mxu1 %v16372_v5  ;;  %v10092_v56 = vld [vmem:[%s16360_s0 + $0x108] sm:$0xff] }
 0x184   :  { %v746_v23 = vadd.f32 %v745_v13, %v10705_v10  ;;  %v1195_v24 = vadd.f32 %v1194_v16, %v10708_v11  ;;  %v747_v25 = vpop.f32.mrf.mxu0  ;;  %v1196_v28 = vpop.f32.mrf.mxu1  ;;  %v117_v6 = vunpack.c.h.bf16 %v102_v61  ;;  %v10095_v61 = vld [vmem:[%s16360_s0 + $0x120] sm:$0xff] }
 0x185   :  { %v5655_v29 = vadd.f32 %v5654_v48, %v4726_v50  ;;  %v5729_v30 = vadd.f32 %v5728_v12, %v4728_v22  ;;  %v748_v31 = vadd.f32 %v747_v25, %v10713_v14  ;;  %v1197_v32 = vadd.f32 %v1196_v28, %v10716_v15  ;;  %v10093_v50 = vld [vmem:[%s16360_s0 + $0x110] sm:$0xff]  ;;  %v103_v22 = vld [vmem:[%s16361_s1 + $0x38] sm:$0xff] }
 0x186   :  { %v4741_v33 = vmax.f32 %v746_v23, 0.0  ;;  %v4743_v34 = vmax.f32 %v1195_v24, 0.0  ;;  %v751_v35 = vpop.f32.mrf.mxu0  ;;  %v1200_v36 = vpop.f32.mrf.mxu1  ;;  %9474 = vmatmul.mubr.msk.f32.gmra.mxu0 %vm204_vm0, %v10091_v37  ;;  %9538 = vmatmul.mubr.msk.f32.gmra.mxu1 %vm204_vm0, %v10091_v37 }
 0x187   :  { %v4742_v38 = vmax.f32 %v748_v31, 0.0  ;;  %v4744_v39 = vmax.f32 %v1197_v32, 0.0  ;;  %v752_v40 = vadd.f32 %v751_v35, %v10705_v10  ;;  %v1201_v41 = vadd.f32 %v1200_v36, %v10708_v11  ;;  %1557 = vmatprep.mubr.f32.mxu0 %v16372_v5  ;;  %2006 = vmatprep.mubr.f32.mxu1 %v16372_v5 }
 0x188   :  { %v5619_v42 = vadd.f32 %v5618_v18, %v4741_v33  ;;  %v5693_v43 = vadd.f32 %v5692_v19, %v4743_v34  ;;  %v753_v44 = vpop.f32.mrf.mxu0  ;;  %v1202_v45 = vpop.f32.mrf.mxu1  ;;  %3121 = vmatprep.subr.mxu0 %v117_v6  ;;  %v119_v33 = vunpack.c.h.bf16 %v103_v22 }
 0x189   :  { %v5656_v46 = vadd.f32 %v5655_v29, %v4742_v38  ;;  %v5730_v47 = vadd.f32 %v5729_v30, %v4744_v39  ;;  %v4757_v49 = vmax.f32 %v752_v40, 0.0  ;;  %v4759_v51 = vmax.f32 %v1201_v41, 0.0 }
 0x18a   :  { %v754_v52 = vadd.f32 %v753_v44, %v10713_v14  ;;  %v1203_v53 = vadd.f32 %v1202_v45, %v10716_v15  ;;  %v757_v54 = vpop.f32.mrf.mxu0  ;;  %v1206_v55 = vpop.f32.mrf.mxu1  ;;  %9475 = vmatmul.mubr.msk.f32.gmra.mxu0 %vm204_vm0, %v10092_v56  ;;  %9539 = vmatmul.mubr.msk.f32.gmra.mxu1 %vm204_vm0, %v10092_v56 }
 0x18b   :  { %v5620_v57 = vadd.f32 %v5619_v42, %v4757_v49  ;;  %v5694_v58 = vadd.f32 %v5693_v43, %v4759_v51  ;;  %v758_v59 = vadd.f32 %v757_v54, %v10705_v10  ;;  %v1207_v60 = vadd.f32 %v1206_v55, %v10708_v11  ;;  %1563 = vmatprep.mubr.f32.mxu0 %v16372_v5  ;;  %v10094_v42 = vld [vmem:[%s16360_s0 + $0x118] sm:$0xff] }
 0x18c   :  { %v4758_v62 = vmax.f32 %v754_v52, 0.0  ;;  %v4760_v63 = vmax.f32 %v1203_v53, 0.0  ;;  %v759_v0 = vpop.f32.mrf.mxu0  ;;  %v1208_v2 = vpop.f32.mrf.mxu1  ;;  %2012 = vmatprep.mubr.f32.mxu1 %v16372_v5  ;;  %3570 = vmatprep.subr.mxu1 %v119_v33 }
 0x18d   :  { %v4773_v9 = vmax.f32 %v758_v59, 0.0  ;;  %v4775_v48 = vmax.f32 %v1207_v60, 0.0  ;;  %v760_v12 = vadd.f32 %v759_v0, %v10713_v14  ;;  %v1209_v13 = vadd.f32 %v1208_v2, %v10716_v15 }
 0x18e   :  { %v5657_v16 = vadd.f32 %v5656_v46, %v4758_v62  ;;  %v5731_v17 = vadd.f32 %v5730_v47, %v4760_v63  ;;  %v763_v18 = vpop.f32.mrf.mxu0  ;;  %v1212_v19 = vpop.f32.mrf.mxu1  ;;  %9476 = vmatmul.mubr.msk.f32.gmra.mxu0 %vm204_vm0, %v10093_v50  ;;  %9540 = vmatmul.mubr.msk.f32.gmra.mxu1 %vm204_vm0, %v10093_v50 }
 0x18f   :  { %v5621_v23 = vadd.f32 %v5620_v57, %v4773_v9  ;;  %v5695_v24 = vadd.f32 %v5694_v58, %v4775_v48  ;;  %v4774_v25 = vmax.f32 %v760_v12, 0.0  ;;  %v4776_v28 = vmax.f32 %v1209_v13, 0.0  ;;  %1569 = vmatprep.mubr.f32.mxu0 %v16372_v5  ;;  %2018 = vmatprep.mubr.f32.mxu1 %v16372_v5 }
 0x190   :  { %v764_v29 = vadd.f32 %v763_v18, %v10705_v10  ;;  %v1213_v30 = vadd.f32 %v1212_v19, %v10708_v11  ;;  %v765_v31 = vpop.f32.mrf.mxu0  ;;  %v1214_v32 = vpop.f32.mrf.mxu1 }
 0x191   :  { %v5658_v34 = vadd.f32 %v5657_v16, %v4774_v25  ;;  %v5732_v35 = vadd.f32 %v5731_v17, %v4776_v28  ;;  %v766_v36 = vadd.f32 %v765_v31, %v10713_v14  ;;  %v1215_v37 = vadd.f32 %v1214_v32, %v10716_v15 }
 0x192   :  { %v4789_v38 = vmax.f32 %v764_v29, 0.0  ;;  %v4791_v39 = vmax.f32 %v1213_v30, 0.0  ;;  %v769_v40 = vpop.f32.mrf.mxu0  ;;  %v1218_v41 = vpop.f32.mrf.mxu1  ;;  %9477 = vmatmul.mubr.msk.f32.gmra.mxu0 %vm204_vm0, %v10094_v42  ;;  %9541 = vmatmul.mubr.msk.f32.gmra.mxu1 %vm204_vm0, %v10094_v42 }
 0x193   :  { %v4790_v43 = vmax.f32 %v766_v36, 0.0  ;;  %v4792_v44 = vmax.f32 %v1215_v37, 0.0  ;;  %v770_v45 = vadd.f32 %v769_v40, %v10705_v10  ;;  %v1219_v46 = vadd.f32 %v1218_v41, %v10708_v11  ;;  %1575 = vmatprep.mubr.f32.mxu0 %v16372_v5  ;;  %2024 = vmatprep.mubr.f32.mxu1 %v16372_v5 }
 0x194   :  { %v5622_v47 = vadd.f32 %v5621_v23, %v4789_v38  ;;  %v5696_v49 = vadd.f32 %v5695_v24, %v4791_v39  ;;  %v771_v51 = vpop.f32.mrf.mxu0  ;;  %v1220_v52 = vpop.f32.mrf.mxu1  ;;  %v10096_v24 = vld [vmem:[%s16360_s0 + $0x128] sm:$0xff] }
 0x195   :  { %v5659_v53 = vadd.f32 %v5658_v34, %v4790_v43  ;;  %v5733_v54 = vadd.f32 %v5732_v35, %v4792_v44  ;;  %v4805_v55 = vmax.f32 %v770_v45, 0.0  ;;  %v4807_v56 = vmax.f32 %v1219_v46, 0.0  ;;  %v10097_v43 = vld [vmem:[%s16360_s0 + $0x130] sm:$0xff] }
 0x196   :  { %v772_v57 = vadd.f32 %v771_v51, %v10713_v14  ;;  %v1221_v58 = vadd.f32 %v1220_v52, %v10716_v15  ;;  %v775_v59 = vpop.f32.mrf.mxu0  ;;  %v1224_v60 = vpop.f32.mrf.mxu1  ;;  %9478 = vmatmul.mubr.msk.f32.gmra.mxu0 %vm204_vm0, %v10095_v61  ;;  %9542 = vmatmul.mubr.msk.f32.gmra.mxu1 %vm204_vm0, %v10095_v61 }
 0x197   :  { %v5623_v62 = vadd.f32 %v5622_v47, %v4805_v55  ;;  %v5697_v63 = vadd.f32 %v5696_v49, %v4807_v56  ;;  %v776_v0 = vadd.f32 %v775_v59, %v10705_v10  ;;  %v1225_v2 = vadd.f32 %v1224_v60, %v10708_v11  ;;  %1581 = vmatprep.mubr.f32.mxu0 %v16372_v5 }
 0x198   :  { %v4806_v6 = vmax.f32 %v772_v57, 0.0  ;;  %v4808_v9 = vmax.f32 %v1221_v58, 0.0  ;;  %v777_v48 = vpop.f32.mrf.mxu0  ;;  %v1226_v12 = vpop.f32.mrf.mxu1  ;;  %2030 = vmatprep.mubr.f32.mxu1 %v16372_v5 }
 0x199   :  { %v4821_v13 = vmax.f32 %v776_v0, 0.0  ;;  %v4823_v16 = vmax.f32 %v1225_v2, 0.0  ;;  %v778_v17 = vadd.f32 %v777_v48, %v10713_v14  ;;  %v1227_v18 = vadd.f32 %v1226_v12, %v10716_v15 }
 0x19a   :  { %v5660_v19 = vadd.f32 %v5659_v53, %v4806_v6  ;;  %v5734_v50 = vadd.f32 %v5733_v54, %v4808_v9  ;;  %v781_v22 = vpop.f32.mrf.mxu0  ;;  %v1230_v23 = vpop.f32.mrf.mxu1  ;;  %9479 = vmatmul.mubr.msk.f32.gmra.mxu0 %vm204_vm0, %v10096_v24  ;;  %9543 = vmatmul.mubr.msk.f32.gmra.mxu1 %vm204_vm0, %v10096_v24 }
 0x19b   :  { %v5624_v25 = vadd.f32 %v5623_v62, %v4821_v13  ;;  %v5698_v28 = vadd.f32 %v5697_v63, %v4823_v16  ;;  %v4822_v29 = vmax.f32 %v778_v17, 0.0  ;;  %v4824_v30 = vmax.f32 %v1227_v18, 0.0  ;;  %1587 = vmatprep.mubr.f32.mxu0 %v16372_v5  ;;  %2036 = vmatprep.mubr.f32.mxu1 %v16372_v5  ;;  %v10098_v62 = vld [vmem:[%s16360_s0 + $0x138] sm:$0xff] }
 0x19c   :  { %v782_v31 = vadd.f32 %v781_v22, %v10705_v10  ;;  %v1231_v32 = vadd.f32 %v1230_v23, %v10708_v11  ;;  %v783_v33 = vpop.f32.mrf.mxu0  ;;  %v1232_v34 = vpop.f32.mrf.mxu1 }
 0x19d   :  { %v5661_v35 = vadd.f32 %v5660_v19, %v4822_v29  ;;  %v5735_v36 = vadd.f32 %v5734_v50, %v4824_v30  ;;  %v784_v37 = vadd.f32 %v783_v33, %v10713_v14  ;;  %v1233_v38 = vadd.f32 %v1232_v34, %v10716_v15 }
 0x19e   :  { %v4837_v39 = vmax.f32 %v782_v31, 0.0  ;;  %v4839_v40 = vmax.f32 %v1231_v32, 0.0  ;;  %v787_v41 = vpop.f32.mrf.mxu0  ;;  %v1236_v42 = vpop.f32.mrf.mxu1  ;;  %9480 = vmatmul.mubr.msk.f32.gmra.mxu0 %vm204_vm0, %v10097_v43  ;;  %9544 = vmatmul.mubr.msk.f32.gmra.mxu1 %vm204_vm0, %v10097_v43  ;;  %v5044_v32 = vrot.slane %v11072_v20, 4 }
 0x19f   :  { %v4838_v44 = vmax.f32 %v784_v37, 0.0  ;;  %v4840_v45 = vmax.f32 %v1233_v38, 0.0  ;;  %v788_v46 = vadd.f32 %v787_v41, %v10705_v10  ;;  %v1237_v47 = vadd.f32 %v1236_v42, %v10708_v11  ;;  %1593 = vmatprep.mubr.f32.mxu0 %v16372_v5  ;;  %2042 = vmatprep.mubr.f32.mxu1 %v16372_v5 }
 0x1a0   :  { %v5625_v49 = vadd.f32 %v5624_v25, %v4837_v39  ;;  %v5699_v51 = vadd.f32 %v5698_v28, %v4839_v40  ;;  %v789_v52 = vpop.f32.mrf.mxu0  ;;  %v1238_v53 = vpop.f32.mrf.mxu1  ;;  %v10099_v25 = vld [vmem:[%s16360_s0 + $0x140] sm:$0xff]  ;;  %v5118_v41 = vrot.slane %v11074_v21, 4 }
 0x1a1   :  { %v5662_v54 = vadd.f32 %v5661_v35, %v4838_v44  ;;  %v5736_v55 = vadd.f32 %v5735_v36, %v4840_v45  ;;  %v4853_v56 = vmax.f32 %v788_v46, 0.0  ;;  %v4855_v57 = vmax.f32 %v1237_v47, 0.0  ;;  %v10100_v46 = vld [vmem:[%s16360_s0 + $0x148] sm:$0xff] }
 0x1a2   :  { %v790_v58 = vadd.f32 %v789_v52, %v10713_v14  ;;  %v1239_v59 = vadd.f32 %v1238_v53, %v10716_v15  ;;  %v793_v60 = vpop.f32.mrf.mxu0  ;;  %v1242_v61 = vpop.f32.mrf.mxu1  ;;  %9481 = vmatmul.mubr.msk.f32.gmra.mxu0 %vm204_vm0, %v10098_v62  ;;  %9545 = vmatmul.mubr.msk.f32.gmra.mxu1 %vm204_vm0, %v10098_v62  ;;  %v16371_v47 = vsub.s32 4, %v10673_v1 }
 0x1a3   :  { %v5626_v63 = vadd.f32 %v5625_v49, %v4853_v56  ;;  %v5700_v0 = vadd.f32 %v5699_v51, %v4855_v57  ;;  %v794_v2 = vadd.f32 %v793_v60, %v10705_v10  ;;  %v1243_v6 = vadd.f32 %v1242_v61, %v10708_v11  ;;  %1599 = vmatprep.mubr.f32.mxu0 %v16372_v5 }
 0x1a4   :  { %v4854_v9 = vmax.f32 %v790_v58, 0.0  ;;  %v4856_v48 = vmax.f32 %v1239_v59, 0.0  ;;  %v795_v12 = vpop.f32.mrf.mxu0  ;;  %v1244_v13 = vpop.f32.mrf.mxu1  ;;  %2048 = vmatprep.mubr.f32.mxu1 %v16372_v5 }
 0x1a5   :  { %v4869_v16 = vmax.f32 %v794_v2, 0.0  ;;  %v4871_v17 = vmax.f32 %v1243_v6, 0.0  ;;  %v796_v18 = vadd.f32 %v795_v12, %v10713_v14  ;;  %v1245_v19 = vadd.f32 %v1244_v13, %v10716_v15 }
 0x1a6   :  { %v5663_v50 = vadd.f32 %v5662_v54, %v4854_v9  ;;  %v5737_v22 = vadd.f32 %v5736_v55, %v4856_v48  ;;  %v799_v23 = vpop.f32.mrf.mxu0  ;;  %v1248_v24 = vpop.f32.mrf.mxu1  ;;  %9482 = vmatmul.mubr.msk.f32.gmra.mxu0 %vm204_vm0, %v10099_v25  ;;  %9546 = vmatmul.mubr.msk.f32.gmra.mxu1 %vm204_vm0, %v10099_v25  ;;  %v5045_v54 = vadd.f32 %v5044_v32, %v11072_v20  ;;  %v10101_v20 = vld [vmem:[%s16360_s0 + $0x150] sm:$0xff]  ;;  %v11379_v48 = vld [vmem:[%s16362_s2] sm:$0xff]  ;;  %v5081_v32 = vrot.slane %v11078_v26, 4 }
 0x1a7   :  { %v5627_v28 = vadd.f32 %v5626_v63, %v4869_v16  ;;  %v5701_v29 = vadd.f32 %v5700_v0, %v4871_v17  ;;  %v4870_v30 = vmax.f32 %v796_v18, 0.0  ;;  %v4872_v31 = vmax.f32 %v1245_v19, 0.0  ;;  %1605 = vmatprep.mubr.f32.mxu0 %v16372_v5  ;;  %2054 = vmatprep.mubr.f32.mxu1 %v16372_v5 }
 0x1a8   :  { %v800_v33 = vadd.f32 %v799_v23, %v10705_v10  ;;  %v1249_v34 = vadd.f32 %v1248_v24, %v10708_v11  ;;  %v801_v35 = vpop.f32.mrf.mxu0  ;;  %v1250_v36 = vpop.f32.mrf.mxu1  ;;  %v5119_v63 = vadd.f32 %v5118_v41, %v11074_v21  ;;  %v11384_v21 = vrot.slane %v11379_v48, %v16371_v47 }
 0x1a9   :  { %v5664_v37 = vadd.f32 %v5663_v50, %v4870_v30  ;;  %v5738_v38 = vadd.f32 %v5737_v22, %v4872_v31  ;;  %v802_v39 = vadd.f32 %v801_v35, %v10713_v14  ;;  %v1251_v40 = vadd.f32 %v1250_v36, %v10716_v15 }
 0x1aa   :  { %v4885_v42 = vmax.f32 %v800_v33, 0.0  ;;  %v4887_v43 = vmax.f32 %v1249_v34, 0.0  ;;  %v805_v44 = vpop.f32.mrf.mxu0  ;;  %v1254_v45 = vpop.f32.mrf.mxu1  ;;  %9483 = vmatmul.mubr.msk.f32.gmra.mxu0 %vm204_vm0, %v10100_v46  ;;  %9547 = vmatmul.mubr.msk.f32.gmra.mxu1 %vm204_vm0, %v10100_v46  ;;  %v5046_v18 = vrot.slane %v5045_v54, 2  ;;  %v16370_v24 = vsub.s32 6, %v10673_v1 }
 0x1ab   :  { %v4886_v49 = vmax.f32 %v802_v39, 0.0  ;;  %v4888_v51 = vmax.f32 %v1251_v40, 0.0  ;;  %v806_v52 = vadd.f32 %v805_v44, %v10705_v10  ;;  %v1255_v53 = vadd.f32 %v1254_v45, %v10708_v11  ;;  %1611 = vmatprep.mubr.f32.mxu0 %v16372_v5  ;;  %2060 = vmatprep.mubr.f32.mxu1 %v16372_v5 }
 0x1ac   :  { %v5628_v55 = vadd.f32 %v5627_v28, %v4885_v42  ;;  %v5702_v56 = vadd.f32 %v5701_v29, %v4887_v43  ;;  %v807_v57 = vpop.f32.mrf.mxu0  ;;  %v1256_v58 = vpop.f32.mrf.mxu1  ;;  %v5120_v31 = vrot.slane %v5119_v63, 2  ;;  %v5047_v42 = vadd.f32 %v5046_v18, %v5045_v54 }
 0x1ad   :  { %v5665_v59 = vadd.f32 %v5664_v37, %v4886_v49  ;;  %v5739_v60 = vadd.f32 %v5738_v38, %v4888_v51  ;;  %v4901_v61 = vmax.f32 %v806_v52, 0.0  ;;  %v4903_v62 = vmax.f32 %v1255_v53, 0.0  ;;  %v10103_v37 = vld [vmem:[%s16360_s0 + $0x158] sm:$0xff] }
 0x1ae   :  { %v808_v0 = vadd.f32 %v807_v57, %v10713_v14  ;;  %v1257_v2 = vadd.f32 %v1256_v58, %v10716_v15  ;;  %v811_v6 = vpop.f32.mrf.mxu0  ;;  %v1260_v9 = vpop.f32.mrf.mxu1  ;;  %9484 = vmatmul.mubr.msk.f32.gmra.mxu0 %vm204_vm0, %v10101_v20  ;;  %9548 = vmatmul.mubr.msk.f32.gmra.mxu1 %vm204_vm0, %v10101_v20  ;;  %v5155_v43 = vrot.slane %v11080_v27, 4  ;;  %v11408_v57 = vadd.f32 %v5081_v32, %v11078_v26 }
 0x1af   :  { %v5629_v12 = vadd.f32 %v5628_v55, %v4901_v61  ;;  %v5703_v13 = vadd.f32 %v5702_v56, %v4903_v62  ;;  %v812_v16 = vadd.f32 %v811_v6, %v10705_v10  ;;  %v1261_v17 = vadd.f32 %v1260_v9, %v10708_v11  ;;  %1617 = vmatprep.mubr.f32.mxu0 %v16372_v5  ;;  %v10104_v61 = vld [vmem:[%s16360_s0 + $0x160] sm:$0xff] }
 0x1b0   :  { %v4902_v19 = vmax.f32 %v808_v0, 0.0  ;;  %v4904_v50 = vmax.f32 %v1257_v2, 0.0  ;;  %v813_v22 = vpop.f32.mrf.mxu0  ;;  %v1262_v23 = vpop.f32.mrf.mxu1  ;;  %2066 = vmatprep.mubr.f32.mxu1 %v16372_v5  ;;  %v5121_v56 = vadd.f32 %v5120_v31, %v5119_v63  ;;  %v5048_v26 = vrot.slane %v5047_v42, 1 }
 0x1b1   :  { %v4917_v25 = vmax.f32 %v812_v16, 0.0  ;;  %v4919_v28 = vmax.f32 %v1261_v17, 0.0  ;;  %v814_v29 = vadd.f32 %v813_v22, %v10713_v14  ;;  %v1263_v30 = vadd.f32 %v1262_v23, %v10716_v15 }
 0x1b2   :  { %v5666_v33 = vadd.f32 %v5665_v59, %v4902_v19  ;;  %v5740_v34 = vadd.f32 %v5739_v60, %v4904_v50  ;;  %v817_v35 = vpop.f32.mrf.mxu0  ;;  %v1266_v36 = vpop.f32.mrf.mxu1  ;;  %9485 = vmatmul.mubr.msk.f32.gmra.mxu0 %vm204_vm0, %v10103_v37  ;;  %9549 = vmatmul.mubr.msk.f32.gmra.mxu1 %vm204_vm0, %v10103_v37  ;;  %v5156_v63 = vadd.f32 %v5155_v43, %v11080_v27  ;;  %v5122_v50 = vrot.slane %v5121_v56, 1  ;;  %v10105_v27 = vld [vmem:[%s16360_s0 + $0x168] sm:$0xff] }
 0x1b3   :  { %v5630_v38 = vadd.f32 %v5629_v12, %v4917_v25  ;;  %v5704_v39 = vadd.f32 %v5703_v13, %v4919_v28  ;;  %v4918_v40 = vmax.f32 %v814_v29, 0.0  ;;  %v4920_v41 = vmax.f32 %v1263_v30, 0.0  ;;  %1623 = vmatprep.mubr.f32.mxu0 %v16372_v5  ;;  %2072 = vmatprep.mubr.f32.mxu1 %v16372_v5 }
 0x1b4   :  { %v818_v44 = vadd.f32 %v817_v35, %v10705_v10  ;;  %v1267_v45 = vadd.f32 %v1266_v36, %v10708_v11  ;;  %v819_v46 = vpop.f32.mrf.mxu0  ;;  %v1268_v49 = vpop.f32.mrf.mxu1  ;;  %v5083_v22 = vrot.slane %v11408_v57, 2  ;;  %v5157_v35 = vrot.slane %v5156_v63, 2 }
 0x1b5   :  { %v5667_v51 = vadd.f32 %v5666_v33, %v4918_v40  ;;  %v5741_v52 = vadd.f32 %v5740_v34, %v4920_v41  ;;  %v820_v53 = vadd.f32 %v819_v46, %v10713_v14  ;;  %v1269_v55 = vadd.f32 %v1268_v49, %v10716_v15 }
 0x1b6   :  { %v4933_v54 = vmax.f32 %v818_v44, 0.0  ;;  %v4935_v58 = vmax.f32 %v1267_v45, 0.0  ;;  %v823_v59 = vpop.f32.mrf.mxu0  ;;  %v1272_v60 = vpop.f32.mrf.mxu1  ;;  %9486 = vmatmul.mubr.msk.f32.gmra.mxu0 %vm204_vm0, %v10104_v61  ;;  %9550 = vmatmul.mubr.msk.f32.gmra.mxu1 %vm204_vm0, %v10104_v61  ;;  %v11430_v34 = vadd.f32 %v5048_v26, %v5047_v42  ;;  %v11436_v45 = vadd.f32 %v5122_v50, %v5121_v56 }
 0x1b7   :  { %v4934_v62 = vmax.f32 %v820_v53, 0.0  ;;  %v4936_v0 = vmax.f32 %v1269_v55, 0.0  ;;  %v824_v2 = vadd.f32 %v823_v59, %v10705_v10  ;;  %v1273_v6 = vadd.f32 %v1272_v60, %v10708_v11  ;;  %1629 = vmatprep.mubr.f32.mxu0 %v16372_v5  ;;  %2078 = vmatprep.mubr.f32.mxu1 %v16372_v5 }
 0x1b8   :  { %v5631_v9 = vadd.f32 %v5630_v38, %v4933_v54  ;;  %v5705_v20 = vadd.f32 %v5704_v39, %v4935_v58  ;;  %v825_v12 = vpop.f32.mrf.mxu0  ;;  %v1274_v13 = vpop.f32.mrf.mxu1  ;;  %v11445_v53 = vrot.slane %v11379_v48, %v16370_v24 }
 0x1b9   :  { %v5668_v16 = vadd.f32 %v5667_v51, %v4934_v62  ;;  %v5742_v17 = vadd.f32 %v5741_v52, %v4936_v0  ;;  %v4949_v18 = vmax.f32 %v824_v2, 0.0  ;;  %v4951_v19 = vmax.f32 %v1273_v6, 0.0  ;;  %v10106_v52 = vld [vmem:[%s16360_s0 + $0x170] sm:$0xff] }
 0x1ba   :  { %v826_v23 = vadd.f32 %v825_v12, %v10713_v14  ;;  %v1275_v25 = vadd.f32 %v1274_v13, %v10716_v15  ;;  %v829_v28 = vpop.f32.mrf.mxu0  ;;  %v1278_v29 = vpop.f32.mrf.mxu1  ;;  %9487 = vmatmul.mubr.msk.f32.gmra.mxu0 %vm204_vm0, %v10105_v27  ;;  %9551 = vmatmul.mubr.msk.f32.gmra.mxu1 %vm204_vm0, %v10105_v27  ;;  %v5084_v0 = vadd.f32 %v5083_v22, %v11408_v57  ;;  %v16368_v57 = vsub.s32 7, %v10673_v1 }
 0x1bb   :  { %v5632_v30 = vadd.f32 %v5631_v9, %v4949_v18  ;;  %v5706_v31 = vadd.f32 %v5705_v20, %v4951_v19  ;;  %v830_v32 = vadd.f32 %v829_v28, %v10705_v10  ;;  %v1279_v33 = vadd.f32 %v1278_v29, %v10708_v11  ;;  %1635 = vmatprep.mubr.f32.mxu0 %v16372_v5  ;;  %v10107_v18 = vld [vmem:[%s16360_s0 + $0x178] sm:$0xff] }
 0x1bc   :  { %v4950_v36 = vmax.f32 %v826_v23, 0.0  ;;  %v4952_v37 = vmax.f32 %v1275_v25, 0.0  ;;  %v831_v38 = vpop.f32.mrf.mxu0  ;;  %v1280_v39 = vpop.f32.mrf.mxu1  ;;  %2084 = vmatprep.mubr.f32.mxu1 %v16372_v5  ;;  %v5158_v2 = vadd.f32 %v5157_v35, %v5156_v63  ;;  %v16369_v19 = vsub.s32 5, %v10673_v1 }
 0x1bd   :  { %v4965_v40 = vmax.f32 %v830_v32, 0.0  ;;  %v4967_v41 = vmax.f32 %v1279_v33, 0.0  ;;  %v832_v43 = vadd.f32 %v831_v38, %v10713_v14  ;;  %v1281_v44 = vadd.f32 %v1280_v39, %v10716_v15  ;;  %v10108_v38 = vld [vmem:[%s16360_s0 + $0x180] sm:$0xff] }
 0x1be   :  { %v5669_v46 = vadd.f32 %v5668_v16, %v4950_v36  ;;  %v5743_v42 = vadd.f32 %v5742_v17, %v4952_v37  ;;  %v835_v49 = vpop.f32.mrf.mxu0  ;;  %v1284_v51 = vpop.f32.mrf.mxu1  ;;  %9488 = vmatmul.mubr.msk.f32.gmra.mxu0 %vm204_vm0, %v10106_v52  ;;  %9552 = vmatmul.mubr.msk.f32.gmra.mxu1 %vm204_vm0, %v10106_v52 }
 0x1bf   :  { %v5633_v55 = vadd.f32 %v5632_v30, %v4965_v40  ;;  %v5707_v54 = vadd.f32 %v5706_v31, %v4967_v41  ;;  %v4966_v58 = vmax.f32 %v832_v43, 0.0  ;;  %v4968_v56 = vmax.f32 %v1281_v44, 0.0  ;;  %1641 = vmatprep.mubr.f32.mxu0 %v16372_v5  ;;  %2090 = vmatprep.mubr.f32.mxu1 %v16372_v5 }
 0x1c0   :  { %v836_v59 = vadd.f32 %v835_v49, %v10705_v10  ;;  %v1285_v60 = vadd.f32 %v1284_v51, %v10708_v11  ;;  %v837_v61 = vpop.f32.mrf.mxu0  ;;  %v1286_v62 = vpop.f32.mrf.mxu1  ;;  %v5085_v30 = vrot.slane %v5084_v0, 1  ;;  %v5159_v31 = vrot.slane %v5158_v2, 1 }
 0x1c1   :  { %v5670_v6 = vadd.f32 %v5669_v46, %v4966_v58  ;;  %v5744_v26 = vadd.f32 %v5743_v42, %v4968_v56  ;;  %v838_v9 = vadd.f32 %v837_v61, %v10713_v14  ;;  %v1287_v20 = vadd.f32 %v1286_v62, %v10716_v15 }
 0x1c2   :  { %v4981_v12 = vmax.f32 %v836_v59, 0.0  ;;  %v4983_v13 = vmax.f32 %v1285_v60, 0.0  ;;  %v841_v16 = vpop.f32.mrf.mxu0  ;;  %v1290_v17 = vpop.f32.mrf.mxu1  ;;  %9489 = vmatmul.mubr.msk.f32.gmra.mxu0 %vm204_vm0, %v10107_v18  ;;  %9553 = vmatmul.mubr.msk.f32.gmra.mxu1 %vm204_vm0, %v10107_v18  ;;  %v11475_v40 = vrot.slane %v11379_v48, %v16369_v19  ;;  %v11480_v41 = vrot.slane %v11379_v48, %v16368_v57 }
 0x1c3   :  { %v4982_v63 = vmax.f32 %v838_v9, 0.0  ;;  %v4984_v50 = vmax.f32 %v1287_v20, 0.0  ;;  %v842_v22 = vadd.f32 %v841_v16, %v10705_v10  ;;  %v1291_v23 = vadd.f32 %v1290_v17, %v10708_v11  ;;  %1647 = vmatprep.mubr.f32.mxu0 %v16372_v5  ;;  %2096 = vmatprep.mubr.f32.mxu1 %v16372_v5 }
 0x1c4   :  { %v5634_v25 = vadd.f32 %v5633_v55, %v4981_v12  ;;  %v5708_v28 = vadd.f32 %v5707_v54, %v4983_v13  ;;  %v843_v29 = vpop.f32.mrf.mxu0  ;;  %v1292_v27 = vpop.f32.mrf.mxu1  ;;  %v11487_v52 = vadd.f32 %v5085_v30, %v5084_v0  ;;  %v11489_v48 = vadd.f32 %v5159_v31, %v5158_v2 }
 0x1c5   :  { %v5671_v32 = vadd.f32 %v5670_v6, %v4982_v63  ;;  %v5745_v33 = vadd.f32 %v5744_v26, %v4984_v50  ;;  %v4997_v35 = vmax.f32 %v842_v22, 0.0  ;;  %v4999_v36 = vmax.f32 %v1291_v23, 0.0  ;;  %v10109_v26 = vld [vmem:[%s16360_s0 + $0x188] sm:$0xff] }
 0x1c6   :  { %v844_v10 = vadd.f32 %v843_v29, %v10713_v14  ;;  %v1293_v11 = vadd.f32 %v1292_v27, %v10716_v15  ;;  %v1361_v37 = vpop.f32.mrf.mxu0  ;;  %9490 = vmatmul.mubr.msk.f32.gmra.mxu0 %vm204_vm0, %v10108_v38  ;;  %v1810_v39 = vpop.f32.mrf.mxu1  ;;  %9554 = vmatmul.mubr.msk.f32.gmra.mxu1 %vm204_vm0, %v10108_v38 }
 0x1c7   :  { %v5635_v14 = vadd.f32 %v5634_v25, %v4997_v35  ;;  %v5709_v15 = vadd.f32 %v5708_v28, %v4999_v36  ;;  %v1362_v43 = vadd.f32 %v1361_v37, %v11384_v21  ;;  %v1811_v44 = vadd.f32 %v1810_v39, %v11445_v53  ;;  %1653 = vmatprep.mubr.f32.mxu0 %v16372_v5 }
 0x1c8   :  { %v4998_v46 = vmax.f32 %v844_v10, 0.0  ;;  %v5000_v42 = vmax.f32 %v1293_v11, 0.0  ;;  %v1363_v49 = vpop.f32.mrf.mxu0  ;;  %v1812_v51 = vpop.f32.mrf.mxu1  ;;  %2102 = vmatprep.mubr.f32.mxu1 %v16372_v5 }
 0x1c9   :  { %v5636_v55 = vrot.slane %v5635_v14, 4  ;;  %v5710_v54 = vrot.slane %v5709_v15, 4  ;;  %v3993_v58 = vmax.f32 %v1362_v43, 0.0  ;;  %v3995_v56 = vmax.f32 %v1811_v44, 0.0 }
 0x1ca   :  { %v5672_v59 = vadd.f32 %v5671_v32, %v4998_v46  ;;  %v5746_v60 = vadd.f32 %v5745_v33, %v5000_v42  ;;  %v1364_v61 = vadd.f32 %v1363_v49, %v11475_v40  ;;  %v1813_v62 = vadd.f32 %v1812_v51, %v11480_v41  ;;  %v1367_v6 = vpop.f32.mrf.mxu0  ;;  %9491 = vmatmul.mubr.msk.f32.gmra.mxu0 %vm204_vm0, %v10109_v26  ;;  %v1816_v0 = vpop.f32.mrf.mxu1  ;;  %v10110_v33 = vld [vmem:[%s16360_s0 + $0x190] sm:$0xff] }
 0x1cb   :  { %v5637_v2 = vadd.f32 %v5636_v55, %v5635_v14  ;;  %v5711_v9 = vadd.f32 %v5710_v54, %v5709_v15  ;;  %v1368_v20 = vadd.f32 %v1367_v6, %v11384_v21  ;;  %v1817_v12 = vadd.f32 %v1816_v0, %v11445_v53  ;;  %9555 = vmatmul.mubr.msk.f32.gmra.mxu1 %vm204_vm0, %v10109_v26 }
 0x1cc   :  { %v5673_v13 = vrot.slane %v5672_v59, 4  ;;  %v5747_v16 = vrot.slane %v5746_v60, 4  ;;  %v3994_v17 = vmax.f32 %v1364_v61, 0.0  ;;  %v3996_v18 = vmax.f32 %v1813_v62, 0.0  ;;  %v1369_v63 = vpop.f32.mrf.mxu0  ;;  %v1818_v50 = vpop.f32.mrf.mxu1  ;;  %1659 = vmatprep.mubr.f32.mxu0 %v16372_v5  ;;  %2108 = vmatprep.mubr.f32.mxu1 %v16372_v5 }
 0x1cd   :  { %v5638_v22 = vrot.slane %v5637_v2, 2  ;;  %v5712_v23 = vrot.slane %v5711_v9, 2  ;;  %v4009_v25 = vmax.f32 %v1368_v20, 0.0  ;;  %v4011_v28 = vmax.f32 %v1817_v12, 0.0 }
 0x1ce   :  { %v11502_v29 = vadd.f32 %v5673_v13, %v5672_v59  ;;  %v11504_v27 = vadd.f32 %v5747_v16, %v5746_v60  ;;  %v1370_v30 = vadd.f32 %v1369_v63, %v11475_v40  ;;  %v1819_v31 = vadd.f32 %v1818_v50, %v11480_v41  ;;  %v1373_v32 = vpop.f32.mrf.mxu0  ;;  %9492 = vmatmul.mubr.msk.f32.gmra.mxu0 %vm204_vm0, %v10110_v33  ;;  %v1822_v35 = vpop.f32.mrf.mxu1  ;;  %v10111_v60 = vld [vmem:[%s16360_s0 + $0x198] sm:$0xff] }
 0x1cf   :  { %v5639_v36 = vadd.f32 %v5638_v22, %v5637_v2  ;;  %v5713_v10 = vadd.f32 %v5712_v23, %v5711_v9  ;;  %v5161_v11 = vadd.f32 %v4009_v25, %v3993_v58  ;;  %v5235_v37 = vadd.f32 %v4011_v28, %v3995_v56  ;;  %9556 = vmatmul.mubr.msk.f32.gmra.mxu1 %vm204_vm0, %v10110_v33 }
 0x1d0   :  { %v5675_v38 = vrot.slane %v11502_v29, 2  ;;  %v5749_v39 = vrot.slane %v11504_v27, 2  ;;  %v4010_v14 = vmax.f32 %v1370_v30, 0.0  ;;  %v4012_v15 = vmax.f32 %v1819_v31, 0.0  ;;  %v1375_v43 = vpop.f32.mrf.mxu0  ;;  %v1824_v44 = vpop.f32.mrf.mxu1  ;;  %1665 = vmatprep.mubr.f32.mxu0 %v16372_v5  ;;  %2114 = vmatprep.mubr.f32.mxu1 %v16372_v5  ;;  %v10112_v31 = vld [vmem:[%s16360_s0 + $0x1a0] sm:$0xff] }
 0x1d1   :  { %v5640_v46 = vrot.slane %v5639_v36, 1  ;;  %v5714_v42 = vrot.slane %v5713_v10, 1  ;;  %v1374_v49 = vadd.f32 %v1373_v32, %v11384_v21  ;;  %v1823_v51 = vadd.f32 %v1822_v35, %v11445_v53 }
 0x1d2   :  { %v5198_v55 = vadd.f32 %v4010_v14, %v3994_v17  ;;  %v5272_v54 = vadd.f32 %v4012_v15, %v3996_v18  ;;  %v1376_v58 = vadd.f32 %v1375_v43, %v11475_v40  ;;  %v1825_v56 = vadd.f32 %v1824_v44, %v11480_v41  ;;  %v1379_v59 = vpop.f32.mrf.mxu0  ;;  %9493 = vmatmul.mubr.msk.f32.gmra.mxu0 %vm204_vm0, %v10111_v60  ;;  %v1828_v61 = vpop.f32.mrf.mxu1 }
 0x1d3   :  { %v11525_v62 = vadd.f32 %v5640_v46, %v5639_v36  ;;  %v11527_v6 = vadd.f32 %v5714_v42, %v5713_v10  ;;  %v4025_v26 = vmax.f32 %v1374_v49, 0.0  ;;  %v4027_v0 = vmax.f32 %v1823_v51, 0.0  ;;  %9557 = vmatmul.mubr.msk.f32.gmra.mxu1 %vm204_vm0, %v10111_v60  ;;  %1671 = vmatprep.mubr.f32.mxu0 %v16372_v5 }
 0x1d4   :  { %v4026_v2 = vmax.f32 %v1376_v58, 0.0  ;;  %v4028_v9 = vmax.f32 %v1825_v56, 0.0  ;;  %v1380_v20 = vadd.f32 %v1379_v59, %v11384_v21  ;;  %v1829_v12 = vadd.f32 %v1828_v61, %v11445_v53  ;;  %v1381_v13 = vpop.f32.mrf.mxu0  ;;  %v1830_v16 = vpop.f32.mrf.mxu1  ;;  %2120 = vmatprep.mubr.f32.mxu1 %v16372_v5  ;;  %v10113_v56 = vld [vmem:[%s16360_s0 + $0x1a8] sm:$0xff] }
 0x1d5   :  { %v5162_v17 = vadd.f32 %v5161_v11, %v4025_v26  ;;  %v5236_v18 = vadd.f32 %v5235_v37, %v4027_v0  ;;  %v1382_v63 = vadd.f32 %v1381_v13, %v11475_v40  ;;  %v1831_v50 = vadd.f32 %v1830_v16, %v11480_v41 }
 0x1d6   :  { %v5199_v22 = vadd.f32 %v5198_v55, %v4026_v2  ;;  %v5273_v23 = vadd.f32 %v5272_v54, %v4028_v9  ;;  %v4041_v25 = vmax.f32 %v1380_v20, 0.0  ;;  %v4043_v28 = vmax.f32 %v1829_v12, 0.0  ;;  %v1385_v30 = vpop.f32.mrf.mxu0  ;;  %9494 = vmatmul.mubr.msk.f32.gmra.mxu0 %vm204_vm0, %v10112_v31  ;;  %v1834_v32 = vpop.f32.mrf.mxu1 }
 0x1d7   :  { %v4042_v33 = vmax.f32 %v1382_v63, 0.0  ;;  %v4044_v35 = vmax.f32 %v1831_v50, 0.0  ;;  %v1386_v36 = vadd.f32 %v1385_v30, %v11384_v21  ;;  %v1835_v10 = vadd.f32 %v1834_v32, %v11445_v53  ;;  %9558 = vmatmul.mubr.msk.f32.gmra.mxu1 %vm204_vm0, %v10112_v31  ;;  %1677 = vmatprep.mubr.f32.mxu0 %v16372_v5 }
 0x1d8   :  { %v5163_v11 = vadd.f32 %v5162_v17, %v4041_v25  ;;  %v5237_v37 = vadd.f32 %v5236_v18, %v4043_v28  ;;  %v1387_v14 = vpop.f32.mrf.mxu0  ;;  %v1836_v15 = vpop.f32.mrf.mxu1  ;;  %2126 = vmatprep.mubr.f32.mxu1 %v16372_v5  ;;  %v5676_v43 = vadd.f32 %v5675_v38, %v11502_v29  ;;  %v5750_v44 = vadd.f32 %v5749_v39, %v11504_v27 }
 0x1d9   :  { %v5200_v46 = vadd.f32 %v5199_v22, %v4042_v33  ;;  %v5274_v42 = vadd.f32 %v5273_v23, %v4044_v35  ;;  %v4057_v49 = vmax.f32 %v1386_v36, 0.0  ;;  %v4059_v51 = vmax.f32 %v1835_v10, 0.0  ;;  %v10114_v23 = vld [vmem:[%s16360_s0 + $0x1b0] sm:$0xff] }
 0x1da   :  { %v1388_v55 = vadd.f32 %v1387_v14, %v11475_v40  ;;  %v1837_v54 = vadd.f32 %v1836_v15, %v11480_v41  ;;  %v1391_v58 = vpop.f32.mrf.mxu0  ;;  %9495 = vmatmul.mubr.msk.f32.gmra.mxu0 %vm204_vm0, %v10113_v56  ;;  %v1840_v59 = vpop.f32.mrf.mxu1  ;;  %v5677_v60 = vrot.slane %v5676_v43, 1  ;;  %v5751_v29 = vrot.slane %v5750_v44, 1 }
 0x1db   :  { %v5164_v38 = vadd.f32 %v5163_v11, %v4057_v49  ;;  %v5238_v27 = vadd.f32 %v5237_v37, %v4059_v51  ;;  %v1392_v39 = vadd.f32 %v1391_v58, %v11384_v21  ;;  %v1841_v61 = vadd.f32 %v1840_v59, %v11445_v53  ;;  %9559 = vmatmul.mubr.msk.f32.gmra.mxu1 %vm204_vm0, %v10113_v56  ;;  %v10115_v51 = vld [vmem:[%s16360_s0 + $0x1b8] sm:$0xff] }
 0x1dc   :  { %v4058_v26 = vmax.f32 %v1388_v55, 0.0  ;;  %v4060_v0 = vmax.f32 %v1837_v54, 0.0  ;;  %v1393_v2 = vpop.f32.mrf.mxu0  ;;  %v1842_v9 = vpop.f32.mrf.mxu1  ;;  %1683 = vmatprep.mubr.f32.mxu0 %v16372_v5  ;;  %2132 = vmatprep.mubr.f32.mxu1 %v16372_v5  ;;  %v5678_v20 = vadd.f32 %v5677_v60, %v5676_v43  ;;  %v5752_v12 = vadd.f32 %v5751_v29, %v5750_v44 }
 0x1dd   :  { %v4073_v13 = vmax.f32 %v1392_v39, 0.0  ;;  %v4075_v16 = vmax.f32 %v1841_v61, 0.0  ;;  %v1394_v17 = vadd.f32 %v1393_v2, %v11475_v40  ;;  %v1843_v18 = vadd.f32 %v1842_v9, %v11480_v41 }
 0x1de   :  { %v5201_v63 = vadd.f32 %v5200_v46, %v4058_v26  ;;  %v5275_v50 = vadd.f32 %v5274_v42, %v4060_v0  ;;  %v1397_v22 = vpop.f32.mrf.mxu0  ;;  %9496 = vmatmul.mubr.msk.f32.gmra.mxu0 %vm204_vm0, %v10114_v23  ;;  %v1846_v25 = vpop.f32.mrf.mxu1  ;;  %v11566_v28 = vsel %vm7766_vm1, %v5678_v20, %v11487_v52  ;;  %v11570_v30 = vsel %vm7766_vm1, %v5752_v12, %v11489_v48  ;;  %v10116_v0 = vld [vmem:[%s16360_s0 + $0x1c0] sm:$0xff] }
 0x1df   :  { %16432 = vst [vmem:[#allocation11_spill] sm:$0xff] %v11570_v30  ;;  %v5165_v31 = vadd.f32 %v5164_v38, %v4073_v13  ;;  %v5239_v32 = vadd.f32 %v5238_v27, %v4075_v16  ;;  %v4074_v33 = vmax.f32 %v1394_v17, 0.0  ;;  %v4076_v35 = vmax.f32 %v1843_v18, 0.0  ;;  %9560 = vmatmul.mubr.msk.f32.gmra.mxu1 %vm204_vm0, %v10114_v23  ;;  %1689 = vmatprep.mubr.f32.mxu0 %v16372_v5 }
 0x1e0   :  { %v1398_v36 = vadd.f32 %v1397_v22, %v11384_v21  ;;  %v1847_v10 = vadd.f32 %v1846_v25, %v11445_v53  ;;  %v1399_v11 = vpop.f32.mrf.mxu0  ;;  %v1848_v37 = vpop.f32.mrf.mxu1  ;;  %2138 = vmatprep.mubr.f32.mxu1 %v16372_v5  ;;  %v11580_v52 = vsel %vm7766_vm1, %v11525_v62, %v11430_v34  ;;  %v11585_v48 = vsel %vm7766_vm1, %v11527_v6, %v11436_v45 }
 0x1e1   :  { %16433 = vst [vmem:[#allocation12_spill] sm:$0xff] %v11580_v52  ;;  %v5202_v14 = vadd.f32 %v5201_v63, %v4074_v33  ;;  %v5276_v15 = vadd.f32 %v5275_v50, %v4076_v35  ;;  %v1400_v43 = vadd.f32 %v1399_v11, %v11475_v40  ;;  %v1849_v44 = vadd.f32 %v1848_v37, %v11480_v41  ;;  %v10117_v35 = vld [vmem:[%s16360_s0 + $0x1c8] sm:$0xff] }
 0x1e2   :  { %v4089_v46 = vmax.f32 %v1398_v36, 0.0  ;;  %v4091_v42 = vmax.f32 %v1847_v10, 0.0  ;;  %v1403_v49 = vpop.f32.mrf.mxu0  ;;  %9497 = vmatmul.mubr.msk.f32.gmra.mxu0 %vm204_vm0, %v10115_v51  ;;  %v1852_v34 = vpop.f32.mrf.mxu1 }
 0x1e3   :  { %v4090_v62 = vmax.f32 %v1400_v43, 0.0  ;;  %v4092_v55 = vmax.f32 %v1849_v44, 0.0  ;;  %v1404_v45 = vadd.f32 %v1403_v49, %v11384_v21  ;;  %v1853_v6 = vadd.f32 %v1852_v34, %v11445_v53  ;;  %9561 = vmatmul.mubr.msk.f32.gmra.mxu1 %vm204_vm0, %v10115_v51  ;;  %1695 = vmatprep.mubr.f32.mxu0 %v16372_v5 }
 0x1e4   :  { %v5166_v54 = vadd.f32 %v5165_v31, %v4089_v46  ;;  %v5240_v58 = vadd.f32 %v5239_v32, %v4091_v42  ;;  %v1405_v56 = vpop.f32.mrf.mxu0  ;;  %v1854_v59 = vpop.f32.mrf.mxu1  ;;  %2144 = vmatprep.mubr.f32.mxu1 %v16372_v5 }
 0x1e5   :  { %v5203_v60 = vadd.f32 %v5202_v14, %v4090_v62  ;;  %v5277_v29 = vadd.f32 %v5276_v15, %v4092_v55  ;;  %v4105_v38 = vmax.f32 %v1404_v45, 0.0  ;;  %v4107_v27 = vmax.f32 %v1853_v6, 0.0  ;;  %v10118_v6 = vld [vmem:[%s16360_s0 + $0x1d0] sm:$0xff] }
 0x1e6   :  { %v1406_v39 = vadd.f32 %v1405_v56, %v11475_v40  ;;  %v1855_v61 = vadd.f32 %v1854_v59, %v11480_v41  ;;  %v1409_v26 = vpop.f32.mrf.mxu0  ;;  %9498 = vmatmul.mubr.msk.f32.gmra.mxu0 %vm204_vm0, %v10116_v0  ;;  %v1858_v2 = vpop.f32.mrf.mxu1 }
 0x1e7   :  { %v5167_v9 = vadd.f32 %v5166_v54, %v4105_v38  ;;  %v5241_v20 = vadd.f32 %v5240_v58, %v4107_v27  ;;  %v1410_v12 = vadd.f32 %v1409_v26, %v11384_v21  ;;  %v1859_v13 = vadd.f32 %v1858_v2, %v11445_v53  ;;  %9562 = vmatmul.mubr.msk.f32.gmra.mxu1 %vm204_vm0, %v10116_v0 }
 0x1e8   :  { %v4106_v16 = vmax.f32 %v1406_v39, 0.0  ;;  %v4108_v17 = vmax.f32 %v1855_v61, 0.0  ;;  %v1411_v18 = vpop.f32.mrf.mxu0  ;;  %v1860_v63 = vpop.f32.mrf.mxu1  ;;  %1701 = vmatprep.mubr.f32.mxu0 %v16372_v5  ;;  %2150 = vmatprep.mubr.f32.mxu1 %v16372_v5 }
 0x1e9   :  { %v4121_v50 = vmax.f32 %v1410_v12, 0.0  ;;  %v4123_v22 = vmax.f32 %v1859_v13, 0.0  ;;  %v1412_v23 = vadd.f32 %v1411_v18, %v11475_v40  ;;  %v1861_v25 = vadd.f32 %v1860_v63, %v11480_v41  ;;  %v10119_v13 = vld [vmem:[%s16360_s0 + $0x1d8] sm:$0xff] }
 0x1ea   :  { %v5204_v31 = vadd.f32 %v5203_v60, %v4106_v16  ;;  %v5278_v32 = vadd.f32 %v5277_v29, %v4108_v17  ;;  %v1415_v33 = vpop.f32.mrf.mxu0  ;;  %9499 = vmatmul.mubr.msk.f32.gmra.mxu0 %vm204_vm0, %v10117_v35  ;;  %v1864_v36 = vpop.f32.mrf.mxu1 }
 0x1eb   :  { %v5168_v10 = vadd.f32 %v5167_v9, %v4121_v50  ;;  %v5242_v11 = vadd.f32 %v5241_v20, %v4123_v22  ;;  %v4122_v37 = vmax.f32 %v1412_v23, 0.0  ;;  %v4124_v14 = vmax.f32 %v1861_v25, 0.0  ;;  %9563 = vmatmul.mubr.msk.f32.gmra.mxu1 %vm204_vm0, %v10117_v35  ;;  %1707 = vmatprep.mubr.f32.mxu0 %v16372_v5 }
 0x1ec   :  { %v1416_v15 = vadd.f32 %v1415_v33, %v11384_v21  ;;  %v1865_v43 = vadd.f32 %v1864_v36, %v11445_v53  ;;  %v1417_v44 = vpop.f32.mrf.mxu0  ;;  %v1866_v46 = vpop.f32.mrf.mxu1  ;;  %2156 = vmatprep.mubr.f32.mxu1 %v16372_v5 }
 0x1ed   :  { %v5205_v42 = vadd.f32 %v5204_v31, %v4122_v37  ;;  %v5279_v49 = vadd.f32 %v5278_v32, %v4124_v14  ;;  %v1418_v51 = vadd.f32 %v1417_v44, %v11475_v40  ;;  %v1867_v34 = vadd.f32 %v1866_v46, %v11480_v41  ;;  %v10120_v14 = vld [vmem:[%s16360_s0 + $0x1e0] sm:$0xff] }
 0x1ee   :  { %v4137_v62 = vmax.f32 %v1416_v15, 0.0  ;;  %v4139_v55 = vmax.f32 %v1865_v43, 0.0  ;;  %v1421_v45 = vpop.f32.mrf.mxu0  ;;  %9500 = vmatmul.mubr.msk.f32.gmra.mxu0 %vm204_vm0, %v10118_v6  ;;  %v1870_v54 = vpop.f32.mrf.mxu1 }
 0x1ef   :  { %v4138_v58 = vmax.f32 %v1418_v51, 0.0  ;;  %v4140_v56 = vmax.f32 %v1867_v34, 0.0  ;;  %v1422_v59 = vadd.f32 %v1421_v45, %v11384_v21  ;;  %v1871_v60 = vadd.f32 %v1870_v54, %v11445_v53  ;;  %9564 = vmatmul.mubr.msk.f32.gmra.mxu1 %vm204_vm0, %v10118_v6  ;;  %1713 = vmatprep.mubr.f32.mxu0 %v16372_v5 }
 0x1f0   :  { %v5169_v29 = vadd.f32 %v5168_v10, %v4137_v62  ;;  %v5243_v38 = vadd.f32 %v5242_v11, %v4139_v55  ;;  %v1423_v27 = vpop.f32.mrf.mxu0  ;;  %v1872_v39 = vpop.f32.mrf.mxu1  ;;  %2162 = vmatprep.mubr.f32.mxu1 %v16372_v5 }
 0x1f1   :  { %v5206_v61 = vadd.f32 %v5205_v42, %v4138_v58  ;;  %v5280_v26 = vadd.f32 %v5279_v49, %v4140_v56  ;;  %v4153_v0 = vmax.f32 %v1422_v59, 0.0  ;;  %v4155_v2 = vmax.f32 %v1871_v60, 0.0  ;;  %v10121_v60 = vld [vmem:[%s16360_s0 + $0x1e8] sm:$0xff] }
 0x1f2   :  { %v1424_v9 = vadd.f32 %v1423_v27, %v11475_v40  ;;  %v1873_v20 = vadd.f32 %v1872_v39, %v11480_v41  ;;  %v1427_v12 = vpop.f32.mrf.mxu0  ;;  %9501 = vmatmul.mubr.msk.f32.gmra.mxu0 %vm204_vm0, %v10119_v13  ;;  %v1876_v16 = vpop.f32.mrf.mxu1 }
 0x1f3   :  { %v5170_v17 = vadd.f32 %v5169_v29, %v4153_v0  ;;  %v5244_v18 = vadd.f32 %v5243_v38, %v4155_v2  ;;  %v1428_v63 = vadd.f32 %v1427_v12, %v11384_v21  ;;  %v1877_v50 = vadd.f32 %v1876_v16, %v11445_v53  ;;  %9565 = vmatmul.mubr.msk.f32.gmra.mxu1 %vm204_vm0, %v10119_v13 }
 0x1f4   :  { %v4154_v22 = vmax.f32 %v1424_v9, 0.0  ;;  %v4156_v23 = vmax.f32 %v1873_v20, 0.0  ;;  %v1429_v25 = vpop.f32.mrf.mxu0  ;;  %v1878_v31 = vpop.f32.mrf.mxu1  ;;  %1719 = vmatprep.mubr.f32.mxu0 %v16372_v5  ;;  %2168 = vmatprep.mubr.f32.mxu1 %v16372_v5 }
 0x1f5   :  { %v4169_v32 = vmax.f32 %v1428_v63, 0.0  ;;  %v4171_v33 = vmax.f32 %v1877_v50, 0.0  ;;  %v1430_v35 = vadd.f32 %v1429_v25, %v11475_v40  ;;  %v1879_v36 = vadd.f32 %v1878_v31, %v11480_v41  ;;  %v10122_v50 = vld [vmem:[%s16360_s0 + $0x1f0] sm:$0xff] }
 0x1f6   :  { %v5207_v10 = vadd.f32 %v5206_v61, %v4154_v22  ;;  %v5281_v11 = vadd.f32 %v5280_v26, %v4156_v23  ;;  %v1433_v37 = vpop.f32.mrf.mxu0  ;;  %9502 = vmatmul.mubr.msk.f32.gmra.mxu0 %vm204_vm0, %v10120_v14  ;;  %v1882_v15 = vpop.f32.mrf.mxu1 }
 0x1f7   :  { %v5171_v43 = vadd.f32 %v5170_v17, %v4169_v32  ;;  %v5245_v44 = vadd.f32 %v5244_v18, %v4171_v33  ;;  %v4170_v46 = vmax.f32 %v1430_v35, 0.0  ;;  %v4172_v42 = vmax.f32 %v1879_v36, 0.0  ;;  %9566 = vmatmul.mubr.msk.f32.gmra.mxu1 %vm204_vm0, %v10120_v14  ;;  %1725 = vmatprep.mubr.f32.mxu0 %v16372_v5 }
 0x1f8   :  { %v1434_v49 = vadd.f32 %v1433_v37, %v11384_v21  ;;  %v1883_v51 = vadd.f32 %v1882_v15, %v11445_v53  ;;  %v1435_v34 = vpop.f32.mrf.mxu0  ;;  %v1884_v62 = vpop.f32.mrf.mxu1  ;;  %2174 = vmatprep.mubr.f32.mxu1 %v16372_v5 }
 0x1f9   :  { %v5208_v55 = vadd.f32 %v5207_v10, %v4170_v46  ;;  %v5282_v45 = vadd.f32 %v5281_v11, %v4172_v42  ;;  %v1436_v6 = vadd.f32 %v1435_v34, %v11475_v40  ;;  %v1885_v54 = vadd.f32 %v1884_v62, %v11480_v41  ;;  %v10123_v42 = vld [vmem:[%s16360_s0 + $0x1f8] sm:$0xff] }
 0x1fa   :  { %v4185_v58 = vmax.f32 %v1434_v49, 0.0  ;;  %v4187_v56 = vmax.f32 %v1883_v51, 0.0  ;;  %v1439_v59 = vpop.f32.mrf.mxu0  ;;  %9503 = vmatmul.mubr.msk.f32.gmra.mxu0 %vm204_vm0, %v10121_v60  ;;  %v1888_v29 = vpop.f32.mrf.mxu1  ;;  %v10124_v51 = vld [vmem:[%s16361_s1 + $0x30] sm:$0xff] }
 0x1fb   :  { %v4186_v38 = vmax.f32 %v1436_v6, 0.0  ;;  %v4188_v27 = vmax.f32 %v1885_v54, 0.0  ;;  %v1440_v39 = vadd.f32 %v1439_v59, %v11384_v21  ;;  %v1889_v61 = vadd.f32 %v1888_v29, %v11445_v53  ;;  %9567 = vmatmul.mubr.msk.f32.gmra.mxu1 %vm204_vm0, %v10121_v60  ;;  %1731 = vmatprep.mubr.f32.mxu0 %v16372_v5  ;;  %v10125_v60 = vld [vmem:[%s16361_s1 + $0x38] sm:$0xff] }
 0x1fc   :  { %v5172_v26 = vadd.f32 %v5171_v43, %v4185_v58  ;;  %v5246_v0 = vadd.f32 %v5245_v44, %v4187_v56  ;;  %v1441_v2 = vpop.f32.mrf.mxu0  ;;  %v1890_v9 = vpop.f32.mrf.mxu1  ;;  %2180 = vmatprep.mubr.f32.mxu1 %v16372_v5  ;;  %v116_v34 = vunpack.c.l.bf16 %v10124_v51  ;;  %v118_v29 = vunpack.c.l.bf16 %v10125_v60 }
 0x1fd   :  { %v5209_v20 = vadd.f32 %v5208_v55, %v4186_v38  ;;  %v5283_v12 = vadd.f32 %v5282_v45, %v4188_v27  ;;  %v4201_v13 = vmax.f32 %v1440_v39, 0.0  ;;  %v4203_v16 = vmax.f32 %v1889_v61, 0.0 }
 0x1fe   :  { %v1442_v17 = vadd.f32 %v1441_v2, %v11475_v40  ;;  %v1891_v18 = vadd.f32 %v1890_v9, %v11480_v41  ;;  %v1445_v63 = vpop.f32.mrf.mxu0  ;;  %9504 = vmatmul.mubr.msk.f32.gmra.mxu0 %vm204_vm0, %v10122_v50  ;;  %v1894_v22 = vpop.f32.mrf.mxu1 }
 0x1ff   :  { %v5173_v23 = vadd.f32 %v5172_v26, %v4201_v13  ;;  %v5247_v25 = vadd.f32 %v5246_v0, %v4203_v16  ;;  %v1446_v31 = vadd.f32 %v1445_v63, %v11384_v21  ;;  %v1895_v32 = vadd.f32 %v1894_v22, %v11445_v53  ;;  %9568 = vmatmul.mubr.msk.f32.gmra.mxu1 %vm204_vm0, %v10122_v50 }
 0x200   :  { %v4202_v33 = vmax.f32 %v1442_v17, 0.0  ;;  %v4204_v35 = vmax.f32 %v1891_v18, 0.0  ;;  %v1447_v36 = vpop.f32.mrf.mxu0  ;;  %v1896_v10 = vpop.f32.mrf.mxu1  ;;  %1737 = vmatprep.mubr.f32.mxu0 %v16372_v5  ;;  %2186 = vmatprep.mubr.f32.mxu1 %v16372_v5 }
 0x201   :  { %v4217_v11 = vmax.f32 %v1446_v31, 0.0  ;;  %v4219_v37 = vmax.f32 %v1895_v32, 0.0  ;;  %v1448_v14 = vadd.f32 %v1447_v36, %v11475_v40  ;;  %v1897_v15 = vadd.f32 %v1896_v10, %v11480_v41 }
 0x202   :  { %v5210_v43 = vadd.f32 %v5209_v20, %v4202_v33  ;;  %v5284_v44 = vadd.f32 %v5283_v12, %v4204_v35  ;;  %v1451_v46 = vpop.f32.mrf.mxu0  ;;  %9505 = vmatmul.mubr.msk.f32.gmra.mxu0 %vm204_vm0, %v10123_v42  ;;  %v1900_v49 = vpop.f32.mrf.mxu1  ;;  %v10126_v20 = vld [vmem:[%s16360_s0] sm:$0xff] }
 0x203   :  { %v5174_v62 = vadd.f32 %v5173_v23, %v4217_v11  ;;  %v5248_v55 = vadd.f32 %v5247_v25, %v4219_v37  ;;  %v4218_v45 = vmax.f32 %v1448_v14, 0.0  ;;  %v4220_v6 = vmax.f32 %v1897_v15, 0.0  ;;  %9569 = vmatmul.mubr.msk.f32.gmra.mxu1 %vm204_vm0, %v10123_v42  ;;  %2257 = vmatprep.mubr.f32.mxu0 %v16372_v5  ;;  %v10127_v11 = vld [vmem:[%s16360_s0 + $0x8] sm:$0xff] }
 0x204   :  { %v1452_v54 = vadd.f32 %v1451_v46, %v11384_v21  ;;  %v1901_v58 = vadd.f32 %v1900_v49, %v11445_v53  ;;  %v1453_v56 = vpop.f32.mrf.mxu0  ;;  %v1902_v59 = vpop.f32.mrf.mxu1  ;;  %2706 = vmatprep.mubr.f32.mxu1 %v16372_v5 }
 0x205   :  { %v5211_v38 = vadd.f32 %v5210_v43, %v4218_v45  ;;  %v5285_v27 = vadd.f32 %v5284_v44, %v4220_v6  ;;  %v1454_v39 = vadd.f32 %v1453_v56, %v11475_v40  ;;  %v1903_v61 = vadd.f32 %v1902_v59, %v11480_v41  ;;  %v10128_v56 = vld [vmem:[%s16360_s0 + $0x10] sm:$0xff] }
 0x206   :  { %v4233_v26 = vmax.f32 %v1452_v54, 0.0  ;;  %v4235_v0 = vmax.f32 %v1901_v58, 0.0  ;;  %v1457_v2 = vpop.f32.mrf.mxu0  ;;  %v1906_v9 = vpop.f32.mrf.mxu1  ;;  %9570 = vmatmul.mubr.msk.f32.vlgmr.msra.gmra.mxu0 %vm204_vm0, %v10126_v20 }
 0x207   :  { %v4234_v12 = vmax.f32 %v1454_v39, 0.0  ;;  %v4236_v13 = vmax.f32 %v1903_v61, 0.0  ;;  %v1458_v16 = vadd.f32 %v1457_v2, %v11384_v21  ;;  %v1907_v17 = vadd.f32 %v1906_v9, %v11445_v53  ;;  %9634 = vmatmul.mubr.msk.f32.vlgmr.msra.gmra.mxu1 %vm204_vm0, %v10126_v20  ;;  %3122 = vmatpush1.msra.mxu0 %v116_v34 }
 0x208   :  { %v5175_v18 = vadd.f32 %v5174_v62, %v4233_v26  ;;  %v5249_v63 = vadd.f32 %v5248_v55, %v4235_v0  ;;  %v1459_v50 = vpop.f32.mrf.mxu0  ;;  %v1908_v22 = vpop.f32.mrf.mxu1  ;;  %2263 = vmatprep.mubr.f32.mxu0 %v16372_v5  ;;  %2712 = vmatprep.mubr.f32.mxu1 %v16372_v5 }
 0x209   :  { %v5212_v23 = vadd.f32 %v5211_v38, %v4234_v12  ;;  %v5286_v25 = vadd.f32 %v5285_v27, %v4236_v13  ;;  %v4249_v31 = vmax.f32 %v1458_v16, 0.0  ;;  %v4251_v32 = vmax.f32 %v1907_v17, 0.0  ;;  %3571 = vmatpush1.msra.mxu1 %v118_v29  ;;  %v10129_v17 = vld [vmem:[%s16360_s0 + $0x18] sm:$0xff] }
 0x20a   :  { %v1460_v33 = vadd.f32 %v1459_v50, %v11475_v40  ;;  %v1909_v35 = vadd.f32 %v1908_v22, %v11480_v41  ;;  %v1463_v36 = vpop.f32.mrf.mxu0  ;;  %v1912_v10 = vpop.f32.mrf.mxu1  ;;  %9571 = vmatmul.mubr.msk.f32.gmra.mxu0 %vm204_vm0, %v10127_v11 }
 0x20b   :  { %v5176_v37 = vadd.f32 %v5175_v18, %v4249_v31  ;;  %v5250_v14 = vadd.f32 %v5249_v63, %v4251_v32  ;;  %v1464_v15 = vadd.f32 %v1463_v36, %v11384_v21  ;;  %v1913_v43 = vadd.f32 %v1912_v10, %v11445_v53  ;;  %9635 = vmatmul.mubr.msk.f32.gmra.mxu1 %vm204_vm0, %v10127_v11 }
 0x20c   :  { %v4250_v44 = vmax.f32 %v1460_v33, 0.0  ;;  %v4252_v46 = vmax.f32 %v1909_v35, 0.0  ;;  %v1465_v42 = vpop.f32.mrf.mxu0  ;;  %v1914_v49 = vpop.f32.mrf.mxu1  ;;  %2269 = vmatprep.mubr.f32.mxu0 %v16372_v5  ;;  %2718 = vmatprep.mubr.f32.mxu1 %v16372_v5 }
 0x20d   :  { %v4265_v51 = vmax.f32 %v1464_v15, 0.0  ;;  %v4267_v34 = vmax.f32 %v1913_v43, 0.0  ;;  %v1466_v62 = vadd.f32 %v1465_v42, %v11475_v40  ;;  %v1915_v55 = vadd.f32 %v1914_v49, %v11480_v41  ;;  %v10130_v43 = vld [vmem:[%s16360_s0 + $0x20] sm:$0xff] }
 0x20e   :  { %v5213_v45 = vadd.f32 %v5212_v23, %v4250_v44  ;;  %v5287_v6 = vadd.f32 %v5286_v25, %v4252_v46  ;;  %v1469_v54 = vpop.f32.mrf.mxu0  ;;  %v1918_v58 = vpop.f32.mrf.mxu1  ;;  %9572 = vmatmul.mubr.msk.f32.gmra.mxu0 %vm204_vm0, %v10128_v56 }
 0x20f   :  { %v5177_v59 = vadd.f32 %v5176_v37, %v4265_v51  ;;  %v5251_v60 = vadd.f32 %v5250_v14, %v4267_v34  ;;  %v4266_v29 = vmax.f32 %v1466_v62, 0.0  ;;  %v4268_v38 = vmax.f32 %v1915_v55, 0.0  ;;  %9636 = vmatmul.mubr.msk.f32.gmra.mxu1 %vm204_vm0, %v10128_v56  ;;  %2275 = vmatprep.mubr.f32.mxu0 %v16372_v5 }
 0x210   :  { %v1470_v27 = vadd.f32 %v1469_v54, %v11384_v21  ;;  %v1919_v39 = vadd.f32 %v1918_v58, %v11445_v53  ;;  %v1471_v61 = vpop.f32.mrf.mxu0  ;;  %v1920_v26 = vpop.f32.mrf.mxu1  ;;  %2724 = vmatprep.mubr.f32.mxu1 %v16372_v5 }
 0x211   :  { %v5214_v0 = vadd.f32 %v5213_v45, %v4266_v29  ;;  %v5288_v2 = vadd.f32 %v5287_v6, %v4268_v38  ;;  %v1472_v9 = vadd.f32 %v1471_v61, %v11475_v40  ;;  %v1921_v20 = vadd.f32 %v1920_v26, %v11480_v41  ;;  %v10131_v38 = vld [vmem:[%s16360_s0 + $0x28] sm:$0xff] }
 0x212   :  { %v4281_v12 = vmax.f32 %v1470_v27, 0.0  ;;  %v4283_v13 = vmax.f32 %v1919_v39, 0.0  ;;  %v1475_v16 = vpop.f32.mrf.mxu0  ;;  %9573 = vmatmul.mubr.msk.f32.gmra.mxu0 %vm204_vm0, %v10129_v17  ;;  %v1924_v22 = vpop.f32.mrf.mxu1 }
 0x213   :  { %v4282_v18 = vmax.f32 %v1472_v9, 0.0  ;;  %v4284_v63 = vmax.f32 %v1921_v20, 0.0  ;;  %v1476_v50 = vadd.f32 %v1475_v16, %v11384_v21  ;;  %9637 = vmatmul.mubr.msk.f32.gmra.mxu1 %vm204_vm0, %v10129_v17  ;;  %2281 = vmatprep.mubr.f32.mxu0 %v16372_v5  ;;  %v1925_v31 = vadd.f32 %v1924_v22, %v11445_v53 }
 0x214   :  { %v5178_v23 = vadd.f32 %v5177_v59, %v4281_v12  ;;  %v5252_v25 = vadd.f32 %v5251_v60, %v4283_v13  ;;  %v1477_v32 = vpop.f32.mrf.mxu0  ;;  %2730 = vmatprep.mubr.f32.mxu1 %v16372_v5  ;;  %v1926_v11 = vpop.f32.mrf.mxu1 }
 0x215   :  { %v5215_v33 = vadd.f32 %v5214_v0, %v4282_v18  ;;  %v5289_v35 = vadd.f32 %v5288_v2, %v4284_v63  ;;  %v4297_v36 = vmax.f32 %v1476_v50, 0.0  ;;  %v1478_v10 = vadd.f32 %v1477_v32, %v11475_v40 }
 0x216   :  { %v4299_v37 = vmax.f32 %v1925_v31, 0.0  ;;  %v1927_v14 = vadd.f32 %v1926_v11, %v11480_v41  ;;  %v1481_v15 = vpop.f32.mrf.mxu0  ;;  %9574 = vmatmul.mubr.msk.f32.gmra.mxu0 %vm204_vm0, %v10130_v43  ;;  %v1930_v49 = vpop.f32.mrf.mxu1 }
 0x217   :  { %v5179_v44 = vadd.f32 %v5178_v23, %v4297_v36  ;;  %v4298_v46 = vmax.f32 %v1478_v10, 0.0  ;;  %v1482_v42 = vadd.f32 %v1481_v15, %v11384_v21  ;;  %9638 = vmatmul.mubr.msk.f32.gmra.mxu1 %vm204_vm0, %v10130_v43  ;;  %2287 = vmatprep.mubr.f32.mxu0 %v16372_v5  ;;  %v1931_v62 = vadd.f32 %v1930_v49, %v11445_v53  ;;  %v10132_v23 = vld [vmem:[%s16360_s0 + $0x30] sm:$0xff] }
 0x218   :  { %v5253_v51 = vadd.f32 %v5252_v25, %v4299_v37  ;;  %v4300_v34 = vmax.f32 %v1927_v14, 0.0  ;;  %v1483_v55 = vpop.f32.mrf.mxu0  ;;  %2736 = vmatprep.mubr.f32.mxu1 %v16372_v5  ;;  %v1932_v58 = vpop.f32.mrf.mxu1 }
 0x219   :  { %v5216_v45 = vadd.f32 %v5215_v33, %v4298_v46  ;;  %v4313_v6 = vmax.f32 %v1482_v42, 0.0  ;;  %v1484_v54 = vadd.f32 %v1483_v55, %v11475_v40  ;;  %v4315_v59 = vmax.f32 %v1931_v62, 0.0 }
 0x21a   :  { %v5290_v56 = vadd.f32 %v5289_v35, %v4300_v34  ;;  %v1933_v60 = vadd.f32 %v1932_v58, %v11480_v41  ;;  %v1487_v29 = vpop.f32.mrf.mxu0  ;;  %9575 = vmatmul.mubr.msk.f32.gmra.mxu0 %vm204_vm0, %v10131_v38  ;;  %v1936_v26 = vpop.f32.mrf.mxu1 }
 0x21b   :  { %v5180_v27 = vadd.f32 %v5179_v44, %v4313_v6  ;;  %v4314_v39 = vmax.f32 %v1484_v54, 0.0  ;;  %v1488_v61 = vadd.f32 %v1487_v29, %v11384_v21  ;;  %9639 = vmatmul.mubr.msk.f32.gmra.mxu1 %vm204_vm0, %v10131_v38  ;;  %2293 = vmatprep.mubr.f32.mxu0 %v16372_v5  ;;  %v5254_v0 = vadd.f32 %v5253_v51, %v4315_v59  ;;  %v10133_v51 = vld [vmem:[%s16360_s0 + $0x38] sm:$0xff] }
 0x21c   :  { %v4316_v2 = vmax.f32 %v1933_v60, 0.0  ;;  %v1937_v9 = vadd.f32 %v1936_v26, %v11445_v53  ;;  %v1489_v20 = vpop.f32.mrf.mxu0  ;;  %2742 = vmatprep.mubr.f32.mxu1 %v16372_v5  ;;  %v1938_v17 = vpop.f32.mrf.mxu1 }
 0x21d   :  { %v5217_v12 = vadd.f32 %v5216_v45, %v4314_v39  ;;  %v4329_v13 = vmax.f32 %v1488_v61, 0.0  ;;  %v1490_v16 = vadd.f32 %v1489_v20, %v11475_v40  ;;  %v1939_v50 = vadd.f32 %v1938_v17, %v11480_v41 }
 0x21e   :  { %v5291_v18 = vadd.f32 %v5290_v56, %v4316_v2  ;;  %v4331_v63 = vmax.f32 %v1937_v9, 0.0  ;;  %v1493_v22 = vpop.f32.mrf.mxu0  ;;  %9576 = vmatmul.mubr.msk.f32.gmra.mxu0 %vm204_vm0, %v10132_v23  ;;  %v1942_v33 = vpop.f32.mrf.mxu1 }
 0x21f   :  { %v5181_v25 = vadd.f32 %v5180_v27, %v4329_v13  ;;  %v4330_v31 = vmax.f32 %v1490_v16, 0.0  ;;  %v1494_v32 = vadd.f32 %v1493_v22, %v11384_v21  ;;  %9640 = vmatmul.mubr.msk.f32.gmra.mxu1 %vm204_vm0, %v10132_v23  ;;  %2299 = vmatprep.mubr.f32.mxu0 %v16372_v5  ;;  %v4332_v36 = vmax.f32 %v1939_v50, 0.0 }
 0x220   :  { %v5255_v35 = vadd.f32 %v5254_v0, %v4331_v63  ;;  %v1943_v10 = vadd.f32 %v1942_v33, %v11445_v53  ;;  %v1495_v11 = vpop.f32.mrf.mxu0  ;;  %2748 = vmatprep.mubr.f32.mxu1 %v16372_v5  ;;  %v1944_v43 = vpop.f32.mrf.mxu1  ;;  %v10134_v0 = vld [vmem:[%s16360_s0 + $0x40] sm:$0xff] }
 0x221   :  { %v5218_v37 = vadd.f32 %v5217_v12, %v4330_v31  ;;  %v4345_v14 = vmax.f32 %v1494_v32, 0.0  ;;  %v1496_v15 = vadd.f32 %v1495_v11, %v11475_v40  ;;  %v5292_v44 = vadd.f32 %v5291_v18, %v4332_v36 }
 0x222   :  { %v4347_v46 = vmax.f32 %v1943_v10, 0.0  ;;  %v1945_v42 = vadd.f32 %v1944_v43, %v11480_v41  ;;  %v1499_v49 = vpop.f32.mrf.mxu0  ;;  %9577 = vmatmul.mubr.msk.f32.gmra.mxu0 %vm204_vm0, %v10133_v51  ;;  %v1948_v45 = vpop.f32.mrf.mxu1 }
 0x223   :  { %v5182_v34 = vadd.f32 %v5181_v25, %v4345_v14  ;;  %v4346_v62 = vmax.f32 %v1496_v15, 0.0  ;;  %v1500_v55 = vadd.f32 %v1499_v49, %v11384_v21  ;;  %9641 = vmatmul.mubr.msk.f32.gmra.mxu1 %vm204_vm0, %v10133_v51  ;;  %2305 = vmatprep.mubr.f32.mxu0 %v16372_v5  ;;  %v1949_v58 = vadd.f32 %v1948_v45, %v11445_v53 }
 0x224   :  { %v5256_v6 = vadd.f32 %v5255_v35, %v4347_v46  ;;  %v4348_v54 = vmax.f32 %v1945_v42, 0.0  ;;  %v1501_v56 = vpop.f32.mrf.mxu0  ;;  %2754 = vmatprep.mubr.f32.mxu1 %v16372_v5  ;;  %v1950_v38 = vpop.f32.mrf.mxu1  ;;  %v10135_v35 = vld [vmem:[%s16360_s0 + $0x48] sm:$0xff] }
 0x225   :  { %v5219_v59 = vadd.f32 %v5218_v37, %v4346_v62  ;;  %v4361_v60 = vmax.f32 %v1500_v55, 0.0  ;;  %v1502_v29 = vadd.f32 %v1501_v56, %v11475_v40  ;;  %v4363_v39 = vmax.f32 %v1949_v58, 0.0 }
 0x226   :  { %v5293_v27 = vadd.f32 %v5292_v44, %v4348_v54  ;;  %v1951_v61 = vadd.f32 %v1950_v38, %v11480_v41  ;;  %v1505_v26 = vpop.f32.mrf.mxu0  ;;  %9578 = vmatmul.mubr.msk.f32.gmra.mxu0 %vm204_vm0, %v10134_v0  ;;  %v1954_v12 = vpop.f32.mrf.mxu1 }
 0x227   :  { %v5183_v2 = vadd.f32 %v5182_v34, %v4361_v60  ;;  %v4362_v9 = vmax.f32 %v1502_v29, 0.0  ;;  %v1506_v20 = vadd.f32 %v1505_v26, %v11384_v21  ;;  %9642 = vmatmul.mubr.msk.f32.gmra.mxu1 %vm204_vm0, %v10134_v0  ;;  %2311 = vmatprep.mubr.f32.mxu0 %v16372_v5  ;;  %v5257_v13 = vadd.f32 %v5256_v6, %v4363_v39  ;;  %v10136_v6 = vld [vmem:[%s16360_s0 + $0x50] sm:$0xff] }
 0x228   :  { %v4364_v16 = vmax.f32 %v1951_v61, 0.0  ;;  %v1955_v17 = vadd.f32 %v1954_v12, %v11445_v53  ;;  %v1507_v18 = vpop.f32.mrf.mxu0  ;;  %2760 = vmatprep.mubr.f32.mxu1 %v16372_v5  ;;  %v1956_v23 = vpop.f32.mrf.mxu1 }
 0x229   :  { %v5220_v63 = vadd.f32 %v5219_v59, %v4362_v9  ;;  %v4377_v50 = vmax.f32 %v1506_v20, 0.0  ;;  %v1508_v22 = vadd.f32 %v1507_v18, %v11475_v40  ;;  %v1957_v32 = vadd.f32 %v1956_v23, %v11480_v41 }
 0x22a   :  { %v5294_v25 = vadd.f32 %v5293_v27, %v4364_v16  ;;  %v4379_v31 = vmax.f32 %v1955_v17, 0.0  ;;  %v1511_v33 = vpop.f32.mrf.mxu0  ;;  %9579 = vmatmul.mubr.msk.f32.gmra.mxu0 %vm204_vm0, %v10135_v35  ;;  %v1960_v37 = vpop.f32.mrf.mxu1 }
 0x22b   :  { %v5184_v36 = vadd.f32 %v5183_v2, %v4377_v50  ;;  %v4378_v10 = vmax.f32 %v1508_v22, 0.0  ;;  %v1512_v11 = vadd.f32 %v1511_v33, %v11384_v21  ;;  %9643 = vmatmul.mubr.msk.f32.gmra.mxu1 %vm204_vm0, %v10135_v35  ;;  %2317 = vmatprep.mubr.f32.mxu0 %v16372_v5  ;;  %v4380_v15 = vmax.f32 %v1957_v32, 0.0 }
 0x22c   :  { %v5258_v14 = vadd.f32 %v5257_v13, %v4379_v31  ;;  %v1961_v43 = vadd.f32 %v1960_v37, %v11445_v53  ;;  %v1513_v44 = vpop.f32.mrf.mxu0  ;;  %2766 = vmatprep.mubr.f32.mxu1 %v16372_v5  ;;  %v1962_v51 = vpop.f32.mrf.mxu1  ;;  %v10137_v13 = vld [vmem:[%s16360_s0 + $0x58] sm:$0xff] }
 0x22d   :  { %v5221_v46 = vadd.f32 %v5220_v63, %v4378_v10  ;;  %v4393_v42 = vmax.f32 %v1512_v11, 0.0  ;;  %v1514_v49 = vadd.f32 %v1513_v44, %v11475_v40  ;;  %v5295_v34 = vadd.f32 %v5294_v25, %v4380_v15 }
 0x22e   :  { %v4395_v62 = vmax.f32 %v1961_v43, 0.0  ;;  %v1963_v55 = vadd.f32 %v1962_v51, %v11480_v41  ;;  %v1517_v45 = vpop.f32.mrf.mxu0  ;;  %9580 = vmatmul.mubr.msk.f32.gmra.mxu0 %vm204_vm0, %v10136_v6  ;;  %v1966_v59 = vpop.f32.mrf.mxu1 }
 0x22f   :  { %v5185_v54 = vadd.f32 %v5184_v36, %v4393_v42  ;;  %v4394_v58 = vmax.f32 %v1514_v49, 0.0  ;;  %v1518_v56 = vadd.f32 %v1517_v45, %v11384_v21  ;;  %9644 = vmatmul.mubr.msk.f32.gmra.mxu1 %vm204_vm0, %v10136_v6  ;;  %2323 = vmatprep.mubr.f32.mxu0 %v16372_v5  ;;  %v1967_v38 = vadd.f32 %v1966_v59, %v11445_v53 }
 0x230   :  { %v5259_v60 = vadd.f32 %v5258_v14, %v4395_v62  ;;  %v4396_v29 = vmax.f32 %v1963_v55, 0.0  ;;  %v1519_v27 = vpop.f32.mrf.mxu0  ;;  %2772 = vmatprep.mubr.f32.mxu1 %v16372_v5  ;;  %v1968_v0 = vpop.f32.mrf.mxu1  ;;  %v10138_v14 = vld [vmem:[%s16360_s0 + $0x60] sm:$0xff] }
 0x231   :  { %v5222_v39 = vadd.f32 %v5221_v46, %v4394_v58  ;;  %v4409_v61 = vmax.f32 %v1518_v56, 0.0  ;;  %v1520_v26 = vadd.f32 %v1519_v27, %v11475_v40  ;;  %v4411_v9 = vmax.f32 %v1967_v38, 0.0 }
 0x232   :  { %v5296_v2 = vadd.f32 %v5295_v34, %v4396_v29  ;;  %v1969_v20 = vadd.f32 %v1968_v0, %v11480_v41  ;;  %v1523_v12 = vpop.f32.mrf.mxu0  ;;  %9581 = vmatmul.mubr.msk.f32.gmra.mxu0 %vm204_vm0, %v10137_v13  ;;  %v1972_v63 = vpop.f32.mrf.mxu1 }
 0x233   :  { %v5186_v16 = vadd.f32 %v5185_v54, %v4409_v61  ;;  %v4410_v17 = vmax.f32 %v1520_v26, 0.0  ;;  %v1524_v18 = vadd.f32 %v1523_v12, %v11384_v21  ;;  %9645 = vmatmul.mubr.msk.f32.gmra.mxu1 %vm204_vm0, %v10137_v13  ;;  %2329 = vmatprep.mubr.f32.mxu0 %v16372_v5  ;;  %v5260_v50 = vadd.f32 %v5259_v60, %v4411_v9  ;;  %v10139_v60 = vld [vmem:[%s16360_s0 + $0x68] sm:$0xff] }
 0x234   :  { %v4412_v22 = vmax.f32 %v1969_v20, 0.0  ;;  %v1973_v23 = vadd.f32 %v1972_v63, %v11445_v53  ;;  %v1525_v25 = vpop.f32.mrf.mxu0  ;;  %2778 = vmatprep.mubr.f32.mxu1 %v16372_v5  ;;  %v1974_v35 = vpop.f32.mrf.mxu1 }
 0x235   :  { %v5223_v31 = vadd.f32 %v5222_v39, %v4410_v17  ;;  %v4425_v32 = vmax.f32 %v1524_v18, 0.0  ;;  %v1526_v33 = vadd.f32 %v1525_v25, %v11475_v40  ;;  %v1975_v11 = vadd.f32 %v1974_v35, %v11480_v41 }
 0x236   :  { %v5297_v36 = vadd.f32 %v5296_v2, %v4412_v22  ;;  %v4427_v10 = vmax.f32 %v1973_v23, 0.0  ;;  %v1529_v37 = vpop.f32.mrf.mxu0  ;;  %9582 = vmatmul.mubr.msk.f32.gmra.mxu0 %vm204_vm0, %v10138_v14  ;;  %v1978_v46 = vpop.f32.mrf.mxu1 }
 0x237   :  { %v5187_v15 = vadd.f32 %v5186_v16, %v4425_v32  ;;  %v4426_v43 = vmax.f32 %v1526_v33, 0.0  ;;  %v1530_v44 = vadd.f32 %v1529_v37, %v11384_v21  ;;  %9646 = vmatmul.mubr.msk.f32.gmra.mxu1 %vm204_vm0, %v10138_v14  ;;  %2335 = vmatprep.mubr.f32.mxu0 %v16372_v5  ;;  %v4428_v49 = vmax.f32 %v1975_v11, 0.0 }
 0x238   :  { %v5261_v42 = vadd.f32 %v5260_v50, %v4427_v10  ;;  %v1979_v51 = vadd.f32 %v1978_v46, %v11445_v53  ;;  %v1531_v34 = vpop.f32.mrf.mxu0  ;;  %2784 = vmatprep.mubr.f32.mxu1 %v16372_v5  ;;  %v1980_v6 = vpop.f32.mrf.mxu1  ;;  %v10140_v50 = vld [vmem:[%s16360_s0 + $0x70] sm:$0xff] }
 0x239   :  { %v5224_v62 = vadd.f32 %v5223_v31, %v4426_v43  ;;  %v4441_v55 = vmax.f32 %v1530_v44, 0.0  ;;  %v1532_v45 = vadd.f32 %v1531_v34, %v11475_v40  ;;  %v5298_v54 = vadd.f32 %v5297_v36, %v4428_v49 }
 0x23a   :  { %v4443_v58 = vmax.f32 %v1979_v51, 0.0  ;;  %v1981_v56 = vadd.f32 %v1980_v6, %v11480_v41  ;;  %v1535_v59 = vpop.f32.mrf.mxu0  ;;  %9583 = vmatmul.mubr.msk.f32.gmra.mxu0 %vm204_vm0, %v10139_v60  ;;  %v1984_v39 = vpop.f32.mrf.mxu1 }
 0x23b   :  { %v5188_v29 = vadd.f32 %v5187_v15, %v4441_v55  ;;  %v4442_v38 = vmax.f32 %v1532_v45, 0.0  ;;  %v1536_v27 = vadd.f32 %v1535_v59, %v11384_v21  ;;  %9647 = vmatmul.mubr.msk.f32.gmra.mxu1 %vm204_vm0, %v10139_v60  ;;  %2341 = vmatprep.mubr.f32.mxu0 %v16372_v5  ;;  %v1985_v0 = vadd.f32 %v1984_v39, %v11445_v53 }
 0x23c   :  { %v5262_v61 = vadd.f32 %v5261_v42, %v4443_v58  ;;  %v4444_v26 = vmax.f32 %v1981_v56, 0.0  ;;  %v1537_v2 = vpop.f32.mrf.mxu0  ;;  %2790 = vmatprep.mubr.f32.mxu1 %v16372_v5  ;;  %v1986_v13 = vpop.f32.mrf.mxu1  ;;  %v10141_v42 = vld [vmem:[%s16360_s0 + $0x78] sm:$0xff] }
 0x23d   :  { %v5225_v9 = vadd.f32 %v5224_v62, %v4442_v38  ;;  %v4457_v20 = vmax.f32 %v1536_v27, 0.0  ;;  %v1538_v12 = vadd.f32 %v1537_v2, %v11475_v40  ;;  %v4459_v17 = vmax.f32 %v1985_v0, 0.0 }
 0x23e   :  { %v5299_v16 = vadd.f32 %v5298_v54, %v4444_v26  ;;  %v1987_v18 = vadd.f32 %v1986_v13, %v11480_v41  ;;  %v1541_v63 = vpop.f32.mrf.mxu0  ;;  %9584 = vmatmul.mubr.msk.f32.gmra.mxu0 %vm204_vm0, %v10140_v50  ;;  %v1990_v31 = vpop.f32.mrf.mxu1 }
 0x23f   :  { %v5189_v22 = vadd.f32 %v5188_v29, %v4457_v20  ;;  %v4458_v23 = vmax.f32 %v1538_v12, 0.0  ;;  %v1542_v25 = vadd.f32 %v1541_v63, %v11384_v21  ;;  %9648 = vmatmul.mubr.msk.f32.gmra.mxu1 %vm204_vm0, %v10140_v50  ;;  %2347 = vmatprep.mubr.f32.mxu0 %v16372_v5  ;;  %v5263_v32 = vadd.f32 %v5262_v61, %v4459_v17  ;;  %v10142_v61 = vld [vmem:[%s16360_s0 + $0x80] sm:$0xff] }
 0x240   :  { %v4460_v33 = vmax.f32 %v1987_v18, 0.0  ;;  %v1991_v35 = vadd.f32 %v1990_v31, %v11445_v53  ;;  %v1543_v36 = vpop.f32.mrf.mxu0  ;;  %2796 = vmatprep.mubr.f32.mxu1 %v16372_v5  ;;  %v1992_v14 = vpop.f32.mrf.mxu1 }
 0x241   :  { %v5226_v10 = vadd.f32 %v5225_v9, %v4458_v23  ;;  %v4473_v11 = vmax.f32 %v1542_v25, 0.0  ;;  %v1544_v37 = vadd.f32 %v1543_v36, %v11475_v40  ;;  %v1993_v44 = vadd.f32 %v1992_v14, %v11480_v41 }
 0x242   :  { %v5300_v15 = vadd.f32 %v5299_v16, %v4460_v33  ;;  %v4475_v43 = vmax.f32 %v1991_v35, 0.0  ;;  %v1547_v46 = vpop.f32.mrf.mxu0  ;;  %9585 = vmatmul.mubr.msk.f32.gmra.mxu0 %vm204_vm0, %v10141_v42  ;;  %v1996_v62 = vpop.f32.mrf.mxu1 }
 0x243   :  { %v5190_v49 = vadd.f32 %v5189_v22, %v4473_v11  ;;  %v4474_v51 = vmax.f32 %v1544_v37, 0.0  ;;  %v1548_v34 = vadd.f32 %v1547_v46, %v11384_v21  ;;  %9649 = vmatmul.mubr.msk.f32.gmra.mxu1 %vm204_vm0, %v10141_v42  ;;  %2353 = vmatprep.mubr.f32.mxu0 %v16372_v5  ;;  %v4476_v45 = vmax.f32 %v1993_v44, 0.0  ;;  %v10143_v22 = vld [vmem:[%s16360_s0 + $0x88] sm:$0xff]  ;;  %v10144_v46 = vld [vmem:[%s16360_s0 + $0x90] sm:$0xff] }
 0x244   :  { %v5264_v55 = vadd.f32 %v5263_v32, %v4475_v43  ;;  %v1997_v6 = vadd.f32 %v1996_v62, %v11445_v53  ;;  %v1549_v54 = vpop.f32.mrf.mxu0  ;;  %2802 = vmatprep.mubr.f32.mxu1 %v16372_v5  ;;  %v1998_v60 = vpop.f32.mrf.mxu1 }
 0x245   :  { %v5227_v58 = vadd.f32 %v5226_v10, %v4474_v51  ;;  %v4489_v56 = vmax.f32 %v1548_v34, 0.0  ;;  %v1550_v59 = vadd.f32 %v1549_v54, %v11475_v40  ;;  %v5301_v29 = vadd.f32 %v5300_v15, %v4476_v45 }
 0x246   :  { %v4491_v38 = vmax.f32 %v1997_v6, 0.0  ;;  %v1999_v27 = vadd.f32 %v1998_v60, %v11480_v41  ;;  %v1553_v39 = vpop.f32.mrf.mxu0  ;;  %9586 = vmatmul.mubr.msk.f32.gmra.mxu0 %vm204_vm0, %v10142_v61  ;;  %v2002_v2 = vpop.f32.mrf.mxu1 }
 0x247   :  { %v11874_v26 = vadd.f32 %v5190_v49, %v4489_v56  ;;  %v4490_v0 = vmax.f32 %v1550_v59, 0.0  ;;  %9650 = vmatmul.mubr.msk.f32.gmra.mxu1 %vm204_vm0, %v10142_v61  ;;  %2359 = vmatprep.mubr.f32.mxu0 %v16372_v5  ;;  %v1554_v16 = vadd.f32 %v1553_v39, %v11384_v21  ;;  %v2003_v63 = vadd.f32 %v2002_v2, %v11445_v53  ;;  %v10145_v39 = vld [vmem:[%s16360_s0 + $0x98] sm:$0xff] }
 0x248   :  { %v11878_v9 = vadd.f32 %v5264_v55, %v4491_v38  ;;  %v4492_v20 = vmax.f32 %v1999_v27, 0.0  ;;  %v1555_v12 = vpop.f32.mrf.mxu0  ;;  %2808 = vmatprep.mubr.f32.mxu1 %v16372_v5  ;;  %v2004_v17 = vpop.f32.mrf.mxu1 }
 0x249   :  { %v11881_v13 = vadd.f32 %v5227_v58, %v4490_v0  ;;  %v1556_v23 = vadd.f32 %v1555_v12, %v11475_v40  ;;  %v2005_v32 = vadd.f32 %v2004_v17, %v11480_v41  ;;  %v4505_v36 = vmax.f32 %v1554_v16, 0.0 }
 0x24a   :  { %v11884_v18 = vadd.f32 %v5301_v29, %v4492_v20  ;;  %v1559_v50 = vpop.f32.mrf.mxu0  ;;  %9587 = vmatmul.mubr.msk.f32.gmra.mxu0 %vm204_vm0, %v10143_v22  ;;  %v2008_v31 = vpop.f32.mrf.mxu1  ;;  %v4507_v14 = vmax.f32 %v2003_v63, 0.0 }
 0x24b   :  { %v1560_v25 = vadd.f32 %v1559_v50, %v11384_v21  ;;  %9651 = vmatmul.mubr.msk.f32.gmra.mxu1 %vm204_vm0, %v10143_v22  ;;  %2365 = vmatprep.mubr.f32.mxu0 %v16372_v5  ;;  %v2009_v33 = vadd.f32 %v2008_v31, %v11445_v53  ;;  %v4506_v42 = vmax.f32 %v1556_v23, 0.0  ;;  %v4508_v62 = vmax.f32 %v2005_v32, 0.0 }
 0x24c   :  { %v1561_v35 = vpop.f32.mrf.mxu0  ;;  %2814 = vmatprep.mubr.f32.mxu1 %v16372_v5  ;;  %v2010_v37 = vpop.f32.mrf.mxu1 }
 0x24d   :  { %v4521_v10 = vmax.f32 %v1560_v25, 0.0  ;;  %v1562_v11 = vadd.f32 %v1561_v35, %v11475_v40  ;;  %v4523_v15 = vmax.f32 %v2009_v33, 0.0  ;;  %v2011_v43 = vadd.f32 %v2010_v37, %v11480_v41 }
 0x24e   :  { %v1565_v44 = vpop.f32.mrf.mxu0  ;;  %9588 = vmatmul.mubr.msk.f32.gmra.mxu0 %vm204_vm0, %v10144_v46  ;;  %v2014_v34 = vpop.f32.mrf.mxu1 }
 0x24f   :  { %v5753_v49 = vadd.f32 %v4521_v10, %v4505_v36  ;;  %v4522_v51 = vmax.f32 %v1562_v11, 0.0  ;;  %9652 = vmatmul.mubr.msk.f32.gmra.mxu1 %vm204_vm0, %v10144_v46  ;;  %2371 = vmatprep.mubr.f32.mxu0 %v16372_v5  ;;  %v5827_v55 = vadd.f32 %v4523_v15, %v4507_v14  ;;  %v4524_v45 = vmax.f32 %v2011_v43, 0.0  ;;  %v10146_v11 = vld [vmem:[%s16360_s0 + $0xa0] sm:$0xff] }
 0x250   :  { %v1567_v6 = vpop.f32.mrf.mxu0  ;;  %2820 = vmatprep.mubr.f32.mxu1 %v16372_v5  ;;  %v1566_v58 = vadd.f32 %v1565_v44, %v11384_v21  ;;  %v2015_v56 = vadd.f32 %v2014_v34, %v11445_v53  ;;  %v2016_v59 = vpop.f32.mrf.mxu1 }
 0x251   :  { %v5790_v54 = vadd.f32 %v4522_v51, %v4506_v42  ;;  %v5864_v60 = vadd.f32 %v4524_v45, %v4508_v62  ;;  %v1568_v29 = vadd.f32 %v1567_v6, %v11475_v40  ;;  %v2017_v38 = vadd.f32 %v2016_v59, %v11480_v41 }
 0x252   :  { %v1571_v27 = vpop.f32.mrf.mxu0  ;;  %9589 = vmatmul.mubr.msk.f32.gmra.mxu0 %vm204_vm0, %v10145_v39  ;;  %v4537_v61 = vmax.f32 %v1566_v58, 0.0  ;;  %v4539_v0 = vmax.f32 %v2015_v56, 0.0  ;;  %v2020_v20 = vpop.f32.mrf.mxu1  ;;  %v10147_v56 = vld [vmem:[%s16360_s0 + $0xa8] sm:$0xff] }
 0x253   :  { %v1572_v2 = vadd.f32 %v1571_v27, %v11384_v21  ;;  %9653 = vmatmul.mubr.msk.f32.gmra.mxu1 %vm204_vm0, %v10145_v39  ;;  %2377 = vmatprep.mubr.f32.mxu0 %v16372_v5  ;;  %v4538_v12 = vmax.f32 %v1568_v29, 0.0  ;;  %v4540_v16 = vmax.f32 %v2017_v38, 0.0  ;;  %v2021_v17 = vadd.f32 %v2020_v20, %v11445_v53 }
 0x254   :  { %v1573_v63 = vpop.f32.mrf.mxu0  ;;  %2826 = vmatprep.mubr.f32.mxu1 %v16372_v5  ;;  %v5754_v50 = vadd.f32 %v5753_v49, %v4537_v61  ;;  %v5828_v22 = vadd.f32 %v5827_v55, %v4539_v0  ;;  %v2022_v31 = vpop.f32.mrf.mxu1 }
 0x255   :  { %v4553_v23 = vmax.f32 %v1572_v2, 0.0  ;;  %v1574_v25 = vadd.f32 %v1573_v63, %v11475_v40  ;;  %v5791_v32 = vadd.f32 %v5790_v54, %v4538_v12  ;;  %v5865_v33 = vadd.f32 %v5864_v60, %v4540_v16 }
 0x256   :  { %v4555_v35 = vmax.f32 %v2021_v17, 0.0  ;;  %v2023_v36 = vadd.f32 %v2022_v31, %v11480_v41  ;;  %v1577_v10 = vpop.f32.mrf.mxu0  ;;  %9590 = vmatmul.mubr.msk.f32.gmra.mxu0 %vm204_vm0, %v10146_v11  ;;  %v2026_v43 = vpop.f32.mrf.mxu1 }
 0x257   :  { %v5755_v37 = vadd.f32 %v5754_v50, %v4553_v23  ;;  %v4554_v14 = vmax.f32 %v1574_v25, 0.0  ;;  %v1578_v15 = vadd.f32 %v1577_v10, %v11384_v21  ;;  %9654 = vmatmul.mubr.msk.f32.gmra.mxu1 %vm204_vm0, %v10146_v11  ;;  %2383 = vmatprep.mubr.f32.mxu0 %v16372_v5  ;;  %v2027_v42 = vadd.f32 %v2026_v43, %v11445_v53  ;;  %v10148_v23 = vld [vmem:[%s16360_s0 + $0xb0] sm:$0xff] }
 0x258   :  { %v5829_v44 = vadd.f32 %v5828_v22, %v4555_v35  ;;  %v4556_v46 = vmax.f32 %v2023_v36, 0.0  ;;  %v1579_v49 = vpop.f32.mrf.mxu0  ;;  %2832 = vmatprep.mubr.f32.mxu1 %v16372_v5  ;;  %v2028_v55 = vpop.f32.mrf.mxu1 }
 0x259   :  { %v5792_v51 = vadd.f32 %v5791_v32, %v4554_v14  ;;  %v4569_v34 = vmax.f32 %v1578_v15, 0.0  ;;  %v1580_v62 = vadd.f32 %v1579_v49, %v11475_v40  ;;  %v4571_v6 = vmax.f32 %v2027_v42, 0.0 }
 0x25a   :  { %v5866_v45 = vadd.f32 %v5865_v33, %v4556_v46  ;;  %v2029_v54 = vadd.f32 %v2028_v55, %v11480_v41  ;;  %v1583_v58 = vpop.f32.mrf.mxu0  ;;  %9591 = vmatmul.mubr.msk.f32.gmra.mxu0 %vm204_vm0, %v10147_v56  ;;  %v2032_v38 = vpop.f32.mrf.mxu1 }
 0x25b   :  { %v5756_v59 = vadd.f32 %v5755_v37, %v4569_v34  ;;  %v4570_v60 = vmax.f32 %v1580_v62, 0.0  ;;  %v1584_v29 = vadd.f32 %v1583_v58, %v11384_v21  ;;  %9655 = vmatmul.mubr.msk.f32.gmra.mxu1 %vm204_vm0, %v10147_v56  ;;  %2389 = vmatprep.mubr.f32.mxu0 %v16372_v5  ;;  %v5830_v27 = vadd.f32 %v5829_v44, %v4571_v6 }
 0x25c   :  { %v4572_v39 = vmax.f32 %v2029_v54, 0.0  ;;  %v2033_v61 = vadd.f32 %v2032_v38, %v11445_v53  ;;  %v1585_v0 = vpop.f32.mrf.mxu0  ;;  %2838 = vmatprep.mubr.f32.mxu1 %v16372_v5  ;;  %v2034_v16 = vpop.f32.mrf.mxu1 }
 0x25d   :  { %v5793_v2 = vadd.f32 %v5792_v51, %v4570_v60  ;;  %v4585_v20 = vmax.f32 %v1584_v29, 0.0  ;;  %v1586_v12 = vadd.f32 %v1585_v0, %v11475_v40  ;;  %v2035_v50 = vadd.f32 %v2034_v16, %v11480_v41  ;;  %v10149_v51 = vld [vmem:[%s16360_s0 + $0xb8] sm:$0xff] }
 0x25e   :  { %v5867_v17 = vadd.f32 %v5866_v45, %v4572_v39  ;;  %v4587_v63 = vmax.f32 %v2033_v61, 0.0  ;;  %v1589_v22 = vpop.f32.mrf.mxu0  ;;  %9592 = vmatmul.mubr.msk.f32.gmra.mxu0 %vm204_vm0, %v10148_v23  ;;  %v2038_v33 = vpop.f32.mrf.mxu1 }
 0x25f   :  { %v5757_v25 = vadd.f32 %v5756_v59, %v4585_v20  ;;  %v4586_v31 = vmax.f32 %v1586_v12, 0.0  ;;  %v1590_v32 = vadd.f32 %v1589_v22, %v11384_v21  ;;  %9656 = vmatmul.mubr.msk.f32.gmra.mxu1 %vm204_vm0, %v10148_v23  ;;  %2395 = vmatprep.mubr.f32.mxu0 %v16372_v5  ;;  %v4588_v36 = vmax.f32 %v2035_v50, 0.0 }
 0x260   :  { %v5831_v35 = vadd.f32 %v5830_v27, %v4587_v63  ;;  %v2039_v10 = vadd.f32 %v2038_v33, %v11445_v53  ;;  %v1591_v11 = vpop.f32.mrf.mxu0  ;;  %2844 = vmatprep.mubr.f32.mxu1 %v16372_v5  ;;  %v2040_v43 = vpop.f32.mrf.mxu1 }
 0x261   :  { %v5794_v37 = vadd.f32 %v5793_v2, %v4586_v31  ;;  %v4601_v14 = vmax.f32 %v1590_v32, 0.0  ;;  %v1592_v15 = vadd.f32 %v1591_v11, %v11475_v40  ;;  %v5868_v44 = vadd.f32 %v5867_v17, %v4588_v36  ;;  %v10150_v2 = vld [vmem:[%s16360_s0 + $0xc0] sm:$0xff] }
 0x262   :  { %v4603_v46 = vmax.f32 %v2039_v10, 0.0  ;;  %v2041_v42 = vadd.f32 %v2040_v43, %v11480_v41  ;;  %v1595_v49 = vpop.f32.mrf.mxu0  ;;  %9593 = vmatmul.mubr.msk.f32.gmra.mxu0 %vm204_vm0, %v10149_v51  ;;  %v2044_v45 = vpop.f32.mrf.mxu1 }
 0x263   :  { %v5758_v34 = vadd.f32 %v5757_v25, %v4601_v14  ;;  %v4602_v62 = vmax.f32 %v1592_v15, 0.0  ;;  %v1596_v55 = vadd.f32 %v1595_v49, %v11384_v21  ;;  %9657 = vmatmul.mubr.msk.f32.gmra.mxu1 %vm204_vm0, %v10149_v51  ;;  %2401 = vmatprep.mubr.f32.mxu0 %v16372_v5  ;;  %v2045_v58 = vadd.f32 %v2044_v45, %v11445_v53 }
 0x264   :  { %v5832_v6 = vadd.f32 %v5831_v35, %v4603_v46  ;;  %v4604_v54 = vmax.f32 %v2041_v42, 0.0  ;;  %v1597_v56 = vpop.f32.mrf.mxu0  ;;  %2850 = vmatprep.mubr.f32.mxu1 %v16372_v5  ;;  %v2046_v38 = vpop.f32.mrf.mxu1 }
 0x265   :  { %v5795_v59 = vadd.f32 %v5794_v37, %v4602_v62  ;;  %v4617_v60 = vmax.f32 %v1596_v55, 0.0  ;;  %v1598_v29 = vadd.f32 %v1597_v56, %v11475_v40  ;;  %v4619_v39 = vmax.f32 %v2045_v58, 0.0  ;;  %v10151_v37 = vld [vmem:[%s16360_s0 + $0xc8] sm:$0xff] }
 0x266   :  { %v5869_v27 = vadd.f32 %v5868_v44, %v4604_v54  ;;  %v2047_v61 = vadd.f32 %v2046_v38, %v11480_v41  ;;  %v1601_v0 = vpop.f32.mrf.mxu0  ;;  %9594 = vmatmul.mubr.msk.f32.gmra.mxu0 %vm204_vm0, %v10150_v2  ;;  %v2050_v17 = vpop.f32.mrf.mxu1 }
 0x267   :  { %v5759_v20 = vadd.f32 %v5758_v34, %v4617_v60  ;;  %v4618_v12 = vmax.f32 %v1598_v29, 0.0  ;;  %v1602_v16 = vadd.f32 %v1601_v0, %v11384_v21  ;;  %9658 = vmatmul.mubr.msk.f32.gmra.mxu1 %vm204_vm0, %v10150_v2  ;;  %2407 = vmatprep.mubr.f32.mxu0 %v16372_v5  ;;  %v5833_v63 = vadd.f32 %v5832_v6, %v4619_v39 }
 0x268   :  { %v4620_v50 = vmax.f32 %v2047_v61, 0.0  ;;  %v2051_v22 = vadd.f32 %v2050_v17, %v11445_v53  ;;  %v1603_v23 = vpop.f32.mrf.mxu0  ;;  %2856 = vmatprep.mubr.f32.mxu1 %v16372_v5  ;;  %v2052_v33 = vpop.f32.mrf.mxu1 }
 0x269   :  { %v5796_v25 = vadd.f32 %v5795_v59, %v4618_v12  ;;  %v4633_v31 = vmax.f32 %v1602_v16, 0.0  ;;  %v1604_v32 = vadd.f32 %v1603_v23, %v11475_v40  ;;  %v2053_v10 = vadd.f32 %v2052_v33, %v11480_v41  ;;  %v10152_v59 = vld [vmem:[%s16360_s0 + $0xd0] sm:$0xff] }
 0x26a   :  { %v5870_v35 = vadd.f32 %v5869_v27, %v4620_v50  ;;  %v4635_v36 = vmax.f32 %v2051_v22, 0.0  ;;  %v1607_v11 = vpop.f32.mrf.mxu0  ;;  %9595 = vmatmul.mubr.msk.f32.gmra.mxu0 %vm204_vm0, %v10151_v37  ;;  %v2056_v44 = vpop.f32.mrf.mxu1 }
 0x26b   :  { %v5760_v14 = vadd.f32 %v5759_v20, %v4633_v31  ;;  %v4634_v15 = vmax.f32 %v1604_v32, 0.0  ;;  %v1608_v43 = vadd.f32 %v1607_v11, %v11384_v21  ;;  %9659 = vmatmul.mubr.msk.f32.gmra.mxu1 %vm204_vm0, %v10151_v37  ;;  %2413 = vmatprep.mubr.f32.mxu0 %v16372_v5  ;;  %v4636_v42 = vmax.f32 %v2053_v10, 0.0 }
 0x26c   :  { %v5834_v46 = vadd.f32 %v5833_v63, %v4635_v36  ;;  %v2057_v49 = vadd.f32 %v2056_v44, %v11445_v53  ;;  %v1609_v51 = vpop.f32.mrf.mxu0  ;;  %2862 = vmatprep.mubr.f32.mxu1 %v16372_v5  ;;  %v2058_v45 = vpop.f32.mrf.mxu1 }
 0x26d   :  { %v5797_v34 = vadd.f32 %v5796_v25, %v4634_v15  ;;  %v4649_v62 = vmax.f32 %v1608_v43, 0.0  ;;  %v1610_v55 = vadd.f32 %v1609_v51, %v11475_v40  ;;  %v5871_v6 = vadd.f32 %v5870_v35, %v4636_v42  ;;  %v10153_v25 = vld [vmem:[%s16360_s0 + $0xd8] sm:$0xff] }
 0x26e   :  { %v4651_v54 = vmax.f32 %v2057_v49, 0.0  ;;  %v2059_v58 = vadd.f32 %v2058_v45, %v11480_v41  ;;  %v1613_v56 = vpop.f32.mrf.mxu0  ;;  %9596 = vmatmul.mubr.msk.f32.gmra.mxu0 %vm204_vm0, %v10152_v59  ;;  %v2062_v27 = vpop.f32.mrf.mxu1 }
 0x26f   :  { %v5761_v60 = vadd.f32 %v5760_v14, %v4649_v62  ;;  %v4650_v29 = vmax.f32 %v1610_v55, 0.0  ;;  %v1614_v38 = vadd.f32 %v1613_v56, %v11384_v21  ;;  %9660 = vmatmul.mubr.msk.f32.gmra.mxu1 %vm204_vm0, %v10152_v59  ;;  %2419 = vmatprep.mubr.f32.mxu0 %v16372_v5  ;;  %v2063_v0 = vadd.f32 %v2062_v27, %v11445_v53 }
 0x270   :  { %v5835_v39 = vadd.f32 %v5834_v46, %v4651_v54  ;;  %v4652_v61 = vmax.f32 %v2059_v58, 0.0  ;;  %v1615_v2 = vpop.f32.mrf.mxu0  ;;  %2868 = vmatprep.mubr.f32.mxu1 %v16372_v5  ;;  %v2064_v17 = vpop.f32.mrf.mxu1 }
 0x271   :  { %v5798_v20 = vadd.f32 %v5797_v34, %v4650_v29  ;;  %v4665_v12 = vmax.f32 %v1614_v38, 0.0  ;;  %v1616_v16 = vadd.f32 %v1615_v2, %v11475_v40  ;;  %v4667_v50 = vmax.f32 %v2063_v0, 0.0  ;;  %v10154_v34 = vld [vmem:[%s16360_s0 + $0xe0] sm:$0xff] }
 0x272   :  { %v5872_v63 = vadd.f32 %v5871_v6, %v4652_v61  ;;  %v2065_v22 = vadd.f32 %v2064_v17, %v11480_v41  ;;  %v1619_v23 = vpop.f32.mrf.mxu0  ;;  %9597 = vmatmul.mubr.msk.f32.gmra.mxu0 %vm204_vm0, %v10153_v25  ;;  %v2068_v35 = vpop.f32.mrf.mxu1 }
 0x273   :  { %v5762_v31 = vadd.f32 %v5761_v60, %v4665_v12  ;;  %v4666_v32 = vmax.f32 %v1616_v16, 0.0  ;;  %v1620_v33 = vadd.f32 %v1619_v23, %v11384_v21  ;;  %9661 = vmatmul.mubr.msk.f32.gmra.mxu1 %vm204_vm0, %v10153_v25  ;;  %2425 = vmatprep.mubr.f32.mxu0 %v16372_v5  ;;  %v5836_v36 = vadd.f32 %v5835_v39, %v4667_v50 }
 0x274   :  { %v4668_v10 = vmax.f32 %v2065_v22, 0.0  ;;  %v2069_v11 = vadd.f32 %v2068_v35, %v11445_v53  ;;  %v1621_v37 = vpop.f32.mrf.mxu0  ;;  %2874 = vmatprep.mubr.f32.mxu1 %v16372_v5  ;;  %v2070_v44 = vpop.f32.mrf.mxu1 }
 0x275   :  { %v5799_v14 = vadd.f32 %v5798_v20, %v4666_v32  ;;  %v4681_v15 = vmax.f32 %v1620_v33, 0.0  ;;  %v1622_v43 = vadd.f32 %v1621_v37, %v11475_v40  ;;  %v2071_v49 = vadd.f32 %v2070_v44, %v11480_v41  ;;  %v10155_v20 = vld [vmem:[%s16360_s0 + $0xe8] sm:$0xff] }
 0x276   :  { %v5873_v46 = vadd.f32 %v5872_v63, %v4668_v10  ;;  %v4683_v42 = vmax.f32 %v2069_v11, 0.0  ;;  %v1625_v51 = vpop.f32.mrf.mxu0  ;;  %9598 = vmatmul.mubr.msk.f32.gmra.mxu0 %vm204_vm0, %v10154_v34  ;;  %v2074_v6 = vpop.f32.mrf.mxu1 }
 0x277   :  { %v5763_v62 = vadd.f32 %v5762_v31, %v4681_v15  ;;  %v4682_v55 = vmax.f32 %v1622_v43, 0.0  ;;  %v1626_v45 = vadd.f32 %v1625_v51, %v11384_v21  ;;  %9662 = vmatmul.mubr.msk.f32.gmra.mxu1 %vm204_vm0, %v10154_v34  ;;  %2431 = vmatprep.mubr.f32.mxu0 %v16372_v5  ;;  %v4684_v58 = vmax.f32 %v2071_v49, 0.0 }
 0x278   :  { %v5837_v54 = vadd.f32 %v5836_v36, %v4683_v42  ;;  %v2075_v56 = vadd.f32 %v2074_v6, %v11445_v53  ;;  %v1627_v59 = vpop.f32.mrf.mxu0  ;;  %2880 = vmatprep.mubr.f32.mxu1 %v16372_v5  ;;  %v2076_v27 = vpop.f32.mrf.mxu1 }
 0x279   :  { %v5800_v60 = vadd.f32 %v5799_v14, %v4682_v55  ;;  %v4697_v29 = vmax.f32 %v1626_v45, 0.0  ;;  %v1628_v38 = vadd.f32 %v1627_v59, %v11475_v40  ;;  %v5874_v39 = vadd.f32 %v5873_v46, %v4684_v58  ;;  %v10156_v14 = vld [vmem:[%s16360_s0 + $0xf0] sm:$0xff] }
 0x27a   :  { %v4699_v61 = vmax.f32 %v2075_v56, 0.0  ;;  %v2077_v0 = vadd.f32 %v2076_v27, %v11480_v41  ;;  %v1631_v2 = vpop.f32.mrf.mxu0  ;;  %9599 = vmatmul.mubr.msk.f32.gmra.mxu0 %vm204_vm0, %v10155_v20  ;;  %v2080_v63 = vpop.f32.mrf.mxu1 }
 0x27b   :  { %v5764_v12 = vadd.f32 %v5763_v62, %v4697_v29  ;;  %v4698_v16 = vmax.f32 %v1628_v38, 0.0  ;;  %v1632_v17 = vadd.f32 %v1631_v2, %v11384_v21  ;;  %9663 = vmatmul.mubr.msk.f32.gmra.mxu1 %vm204_vm0, %v10155_v20  ;;  %2437 = vmatprep.mubr.f32.mxu0 %v16372_v5  ;;  %v2081_v23 = vadd.f32 %v2080_v63, %v11445_v53 }
 0x27c   :  { %v5838_v50 = vadd.f32 %v5837_v54, %v4699_v61  ;;  %v4700_v22 = vmax.f32 %v2077_v0, 0.0  ;;  %v1633_v25 = vpop.f32.mrf.mxu0  ;;  %2886 = vmatprep.mubr.f32.mxu1 %v16372_v5  ;;  %v2082_v35 = vpop.f32.mrf.mxu1 }
 0x27d   :  { %v5801_v31 = vadd.f32 %v5800_v60, %v4698_v16  ;;  %v4713_v32 = vmax.f32 %v1632_v17, 0.0  ;;  %v1634_v33 = vadd.f32 %v1633_v25, %v11475_v40  ;;  %v4715_v10 = vmax.f32 %v2081_v23, 0.0  ;;  %v10157_v60 = vld [vmem:[%s16360_s0 + $0xf8] sm:$0xff] }
 0x27e   :  { %v5875_v36 = vadd.f32 %v5874_v39, %v4700_v22  ;;  %v2083_v11 = vadd.f32 %v2082_v35, %v11480_v41  ;;  %v1637_v37 = vpop.f32.mrf.mxu0  ;;  %9600 = vmatmul.mubr.msk.f32.gmra.mxu0 %vm204_vm0, %v10156_v14  ;;  %v2086_v46 = vpop.f32.mrf.mxu1 }
 0x27f   :  { %v5765_v15 = vadd.f32 %v5764_v12, %v4713_v32  ;;  %v4714_v43 = vmax.f32 %v1634_v33, 0.0  ;;  %v1638_v44 = vadd.f32 %v1637_v37, %v11384_v21  ;;  %9664 = vmatmul.mubr.msk.f32.gmra.mxu1 %vm204_vm0, %v10156_v14  ;;  %2443 = vmatprep.mubr.f32.mxu0 %v16372_v5  ;;  %v5839_v42 = vadd.f32 %v5838_v50, %v4715_v10 }
 0x280   :  { %v4716_v49 = vmax.f32 %v2083_v11, 0.0  ;;  %v2087_v51 = vadd.f32 %v2086_v46, %v11445_v53  ;;  %v1639_v34 = vpop.f32.mrf.mxu0  ;;  %2892 = vmatprep.mubr.f32.mxu1 %v16372_v5  ;;  %v2088_v6 = vpop.f32.mrf.mxu1 }
 0x281   :  { %v5802_v62 = vadd.f32 %v5801_v31, %v4714_v43  ;;  %v4729_v55 = vmax.f32 %v1638_v44, 0.0  ;;  %v1640_v45 = vadd.f32 %v1639_v34, %v11475_v40  ;;  %v2089_v56 = vadd.f32 %v2088_v6, %v11480_v41  ;;  %v10158_v31 = vld [vmem:[%s16360_s0 + $0x100] sm:$0xff] }
 0x282   :  { %v5876_v54 = vadd.f32 %v5875_v36, %v4716_v49  ;;  %v4731_v58 = vmax.f32 %v2087_v51, 0.0  ;;  %v1643_v59 = vpop.f32.mrf.mxu0  ;;  %9601 = vmatmul.mubr.msk.f32.gmra.mxu0 %vm204_vm0, %v10157_v60  ;;  %v2092_v39 = vpop.f32.mrf.mxu1 }
 0x283   :  { %v5766_v29 = vadd.f32 %v5765_v15, %v4729_v55  ;;  %v4730_v38 = vmax.f32 %v1640_v45, 0.0  ;;  %v1644_v27 = vadd.f32 %v1643_v59, %v11384_v21  ;;  %9665 = vmatmul.mubr.msk.f32.gmra.mxu1 %vm204_vm0, %v10157_v60  ;;  %2449 = vmatprep.mubr.f32.mxu0 %v16372_v5  ;;  %v4732_v0 = vmax.f32 %v2089_v56, 0.0 }
 0x284   :  { %v5840_v61 = vadd.f32 %v5839_v42, %v4731_v58  ;;  %v2093_v2 = vadd.f32 %v2092_v39, %v11445_v53  ;;  %v1645_v20 = vpop.f32.mrf.mxu0  ;;  %2898 = vmatprep.mubr.f32.mxu1 %v16372_v5  ;;  %v2094_v63 = vpop.f32.mrf.mxu1 }
 0x285   :  { %v5803_v12 = vadd.f32 %v5802_v62, %v4730_v38  ;;  %v4745_v16 = vmax.f32 %v1644_v27, 0.0  ;;  %v1646_v17 = vadd.f32 %v1645_v20, %v11475_v40  ;;  %v5877_v50 = vadd.f32 %v5876_v54, %v4732_v0  ;;  %v10159_v62 = vld [vmem:[%s16360_s0 + $0x108] sm:$0xff] }
 0x286   :  { %v4747_v22 = vmax.f32 %v2093_v2, 0.0  ;;  %v2095_v23 = vadd.f32 %v2094_v63, %v11480_v41  ;;  %v1649_v25 = vpop.f32.mrf.mxu0  ;;  %9602 = vmatmul.mubr.msk.f32.gmra.mxu0 %vm204_vm0, %v10158_v31  ;;  %v2098_v36 = vpop.f32.mrf.mxu1 }
 0x287   :  { %v5767_v32 = vadd.f32 %v5766_v29, %v4745_v16  ;;  %v4746_v33 = vmax.f32 %v1646_v17, 0.0  ;;  %v1650_v35 = vadd.f32 %v1649_v25, %v11384_v21  ;;  %9666 = vmatmul.mubr.msk.f32.gmra.mxu1 %vm204_vm0, %v10158_v31  ;;  %2455 = vmatprep.mubr.f32.mxu0 %v16372_v5  ;;  %v2099_v37 = vadd.f32 %v2098_v36, %v11445_v53 }
 0x288   :  { %v5841_v10 = vadd.f32 %v5840_v61, %v4747_v22  ;;  %v4748_v11 = vmax.f32 %v2095_v23, 0.0  ;;  %v1651_v14 = vpop.f32.mrf.mxu0  ;;  %2904 = vmatprep.mubr.f32.mxu1 %v16372_v5  ;;  %v2100_v46 = vpop.f32.mrf.mxu1 }
 0x289   :  { %v5804_v15 = vadd.f32 %v5803_v12, %v4746_v33  ;;  %v4761_v43 = vmax.f32 %v1650_v35, 0.0  ;;  %v1652_v44 = vadd.f32 %v1651_v14, %v11475_v40  ;;  %v4763_v49 = vmax.f32 %v2099_v37, 0.0  ;;  %v10160_v12 = vld [vmem:[%s16360_s0 + $0x110] sm:$0xff] }
 0x28a   :  { %v5878_v42 = vadd.f32 %v5877_v50, %v4748_v11  ;;  %v2101_v51 = vadd.f32 %v2100_v46, %v11480_v41  ;;  %v1655_v34 = vpop.f32.mrf.mxu0  ;;  %9603 = vmatmul.mubr.msk.f32.gmra.mxu0 %vm204_vm0, %v10159_v62 }
 0x28b   :  { %v5768_v55 = vadd.f32 %v5767_v32, %v4761_v43  ;;  %v4762_v45 = vmax.f32 %v1652_v44, 0.0  ;;  %v1656_v6 = vadd.f32 %v1655_v34, %v11384_v21  ;;  %v2104_v54 = vpop.f32.mrf.mxu1  ;;  %9667 = vmatmul.mubr.msk.f32.gmra.mxu1 %vm204_vm0, %v10159_v62  ;;  %2461 = vmatprep.mubr.f32.mxu0 %v16372_v5  ;;  %v5842_v58 = vadd.f32 %v5841_v10, %v4763_v49 }
 0x28c   :  { %v4764_v56 = vmax.f32 %v2101_v51, 0.0  ;;  %v2105_v59 = vadd.f32 %v2104_v54, %v11445_v53  ;;  %v1657_v60 = vpop.f32.mrf.mxu0  ;;  %2910 = vmatprep.mubr.f32.mxu1 %v16372_v5 }
 0x28d   :  { %v5805_v29 = vadd.f32 %v5804_v15, %v4762_v45  ;;  %v4777_v38 = vmax.f32 %v1656_v6, 0.0  ;;  %v1658_v27 = vadd.f32 %v1657_v60, %v11475_v40  ;;  %v2106_v39 = vpop.f32.mrf.mxu1  ;;  %v10161_v15 = vld [vmem:[%s16360_s0 + $0x118] sm:$0xff] }
 0x28e   :  { %v5879_v61 = vadd.f32 %v5878_v42, %v4764_v56  ;;  %v4779_v0 = vmax.f32 %v2105_v59, 0.0  ;;  %v2107_v2 = vadd.f32 %v2106_v39, %v11480_v41  ;;  %v1661_v20 = vpop.f32.mrf.mxu0  ;;  %9604 = vmatmul.mubr.msk.f32.gmra.mxu0 %vm204_vm0, %v10160_v12 }
 0x28f   :  { %v5769_v16 = vadd.f32 %v5768_v55, %v4777_v38  ;;  %v4778_v17 = vmax.f32 %v1658_v27, 0.0  ;;  %v1662_v63 = vadd.f32 %v1661_v20, %v11384_v21  ;;  %v2110_v50 = vpop.f32.mrf.mxu1  ;;  %9668 = vmatmul.mubr.msk.f32.gmra.mxu1 %vm204_vm0, %v10160_v12  ;;  %2467 = vmatprep.mubr.f32.mxu0 %v16372_v5 }
 0x290   :  { %v5843_v22 = vadd.f32 %v5842_v58, %v4779_v0  ;;  %v4780_v23 = vmax.f32 %v2107_v2, 0.0  ;;  %v2111_v25 = vadd.f32 %v2110_v50, %v11445_v53  ;;  %v1663_v31 = vpop.f32.mrf.mxu0  ;;  %2916 = vmatprep.mubr.f32.mxu1 %v16372_v5 }
 0x291   :  { %v5806_v32 = vadd.f32 %v5805_v29, %v4778_v17  ;;  %v4793_v33 = vmax.f32 %v1662_v63, 0.0  ;;  %v1664_v35 = vadd.f32 %v1663_v31, %v11475_v40  ;;  %v2112_v36 = vpop.f32.mrf.mxu1  ;;  %v10162_v29 = vld [vmem:[%s16360_s0 + $0x120] sm:$0xff] }
 0x292   :  { %v5880_v10 = vadd.f32 %v5879_v61, %v4780_v23  ;;  %v4795_v11 = vmax.f32 %v2111_v25, 0.0  ;;  %v2113_v37 = vadd.f32 %v2112_v36, %v11480_v41  ;;  %v1667_v14 = vpop.f32.mrf.mxu0  ;;  %9605 = vmatmul.mubr.msk.f32.gmra.mxu0 %vm204_vm0, %v10161_v15 }
 0x293   :  { %v5770_v43 = vadd.f32 %v5769_v16, %v4793_v33  ;;  %v4794_v44 = vmax.f32 %v1664_v35, 0.0  ;;  %v1668_v46 = vadd.f32 %v1667_v14, %v11384_v21  ;;  %v2116_v42 = vpop.f32.mrf.mxu1  ;;  %9669 = vmatmul.mubr.msk.f32.gmra.mxu1 %vm204_vm0, %v10161_v15  ;;  %2473 = vmatprep.mubr.f32.mxu0 %v16372_v5 }
 0x294   :  { %v5844_v49 = vadd.f32 %v5843_v22, %v4795_v11  ;;  %v4796_v51 = vmax.f32 %v2113_v37, 0.0  ;;  %v2117_v34 = vadd.f32 %v2116_v42, %v11445_v53  ;;  %v1669_v62 = vpop.f32.mrf.mxu0  ;;  %2922 = vmatprep.mubr.f32.mxu1 %v16372_v5 }
 0x295   :  { %v5807_v55 = vadd.f32 %v5806_v32, %v4794_v44  ;;  %v4809_v45 = vmax.f32 %v1668_v46, 0.0  ;;  %v1670_v6 = vadd.f32 %v1669_v62, %v11475_v40  ;;  %v2118_v54 = vpop.f32.mrf.mxu1  ;;  %v10163_v32 = vld [vmem:[%s16360_s0 + $0x128] sm:$0xff] }
 0x296   :  { %v5881_v58 = vadd.f32 %v5880_v10, %v4796_v51  ;;  %v4811_v56 = vmax.f32 %v2117_v34, 0.0  ;;  %v2119_v59 = vadd.f32 %v2118_v54, %v11480_v41  ;;  %v1673_v60 = vpop.f32.mrf.mxu0  ;;  %9606 = vmatmul.mubr.msk.f32.gmra.mxu0 %vm204_vm0, %v10162_v29 }
 0x297   :  { %v5771_v38 = vadd.f32 %v5770_v43, %v4809_v45  ;;  %v4810_v27 = vmax.f32 %v1670_v6, 0.0  ;;  %v1674_v39 = vadd.f32 %v1673_v60, %v11384_v21  ;;  %v2122_v61 = vpop.f32.mrf.mxu1  ;;  %9670 = vmatmul.mubr.msk.f32.gmra.mxu1 %vm204_vm0, %v10162_v29  ;;  %2479 = vmatprep.mubr.f32.mxu0 %v16372_v5  ;;  %v6228_v45 = vld [vmem:[%s16363_s3 + $0xf0] sm:$0xff] }
 0x298   :  { %v5845_v0 = vadd.f32 %v5844_v49, %v4811_v56  ;;  %v4812_v2 = vmax.f32 %v2119_v59, 0.0  ;;  %v2123_v20 = vadd.f32 %v2122_v61, %v11445_v53  ;;  %v1675_v12 = vpop.f32.mrf.mxu0  ;;  %2928 = vmatprep.mubr.f32.mxu1 %v16372_v5 }
 0x299   :  { %v5808_v16 = vadd.f32 %v5807_v55, %v4810_v27  ;;  %v4825_v17 = vmax.f32 %v1674_v39, 0.0  ;;  %v1676_v63 = vadd.f32 %v1675_v12, %v11475_v40  ;;  %v2124_v50 = vpop.f32.mrf.mxu1  ;;  %v10164_v55 = vld [vmem:[%s16360_s0 + $0x130] sm:$0xff]  ;;  %v6771_v27 = vunpack.c.h.bf16 %v6228_v45 }
 0x29a   :  { %v5882_v22 = vadd.f32 %v5881_v58, %v4812_v2  ;;  %v4827_v23 = vmax.f32 %v2123_v20, 0.0  ;;  %v2125_v25 = vadd.f32 %v2124_v50, %v11480_v41  ;;  %v1679_v31 = vpop.f32.mrf.mxu0  ;;  %9607 = vmatmul.mubr.msk.f32.gmra.mxu0 %vm204_vm0, %v10163_v32  ;;  %v6292_v39 = vld [vmem:[%s16363_s3 + $0x2f0] sm:$0xff]  ;;  %v10165_v50 = vld [vmem:[%s16360_s0 + $0x138] sm:$0xff] }
 0x29b   :  { %v5772_v33 = vadd.f32 %v5771_v38, %v4825_v17  ;;  %v4826_v35 = vmax.f32 %v1676_v63, 0.0  ;;  %v1680_v36 = vadd.f32 %v1679_v31, %v11384_v21  ;;  %v2128_v10 = vpop.f32.mrf.mxu1  ;;  %9671 = vmatmul.mubr.msk.f32.gmra.mxu1 %vm204_vm0, %v10163_v32  ;;  %2485 = vmatprep.mubr.f32.mxu0 %v16372_v5 }
 0x29c   :  { %v5846_v11 = vadd.f32 %v5845_v0, %v4827_v23  ;;  %v4828_v37 = vmax.f32 %v2125_v25, 0.0  ;;  %v2129_v14 = vadd.f32 %v2128_v10, %v11445_v53  ;;  %v1681_v15 = vpop.f32.mrf.mxu0  ;;  %2934 = vmatprep.mubr.f32.mxu1 %v16372_v5  ;;  %7799 = vmatprep.subr.mxu0 %v6771_v27 }
 0x29d   :  { %v5809_v43 = vadd.f32 %v5808_v16, %v4826_v35  ;;  %v4841_v44 = vmax.f32 %v1680_v36, 0.0  ;;  %v1682_v46 = vadd.f32 %v1681_v15, %v11475_v40  ;;  %v2130_v42 = vpop.f32.mrf.mxu1 }
 0x29e   :  { %v5883_v49 = vadd.f32 %v5882_v22, %v4828_v37  ;;  %v4843_v51 = vmax.f32 %v2129_v14, 0.0  ;;  %v2131_v34 = vadd.f32 %v2130_v42, %v11480_v41  ;;  %v1685_v62 = vpop.f32.mrf.mxu0  ;;  %9608 = vmatmul.mubr.msk.f32.gmra.mxu0 %vm204_vm0, %v10164_v55  ;;  %v6899_v22 = vunpack.c.h.bf16 %v6292_v39 }
 0x29f   :  { %v5773_v6 = vadd.f32 %v5772_v33, %v4841_v44  ;;  %v4842_v54 = vmax.f32 %v1682_v46, 0.0  ;;  %v1686_v58 = vadd.f32 %v1685_v62, %v11384_v21  ;;  %v2134_v56 = vpop.f32.mrf.mxu1  ;;  %9672 = vmatmul.mubr.msk.f32.gmra.mxu1 %vm204_vm0, %v10164_v55  ;;  %2491 = vmatprep.mubr.f32.mxu0 %v16372_v5 }
 0x2a0   :  { %v5847_v59 = vadd.f32 %v5846_v11, %v4843_v51  ;;  %v4844_v60 = vmax.f32 %v2131_v34, 0.0  ;;  %v2135_v29 = vadd.f32 %v2134_v56, %v11445_v53  ;;  %v1687_v38 = vpop.f32.mrf.mxu0  ;;  %2940 = vmatprep.mubr.f32.mxu1 %v16372_v5  ;;  %7870 = vmatprep.subr.mxu1 %v6899_v22 }
 0x2a1   :  { %v5810_v61 = vadd.f32 %v5809_v43, %v4842_v54  ;;  %v4857_v0 = vmax.f32 %v1686_v58, 0.0  ;;  %v1688_v2 = vadd.f32 %v1687_v38, %v11475_v40  ;;  %v2136_v20 = vpop.f32.mrf.mxu1 }
 0x2a2   :  { %v5884_v12 = vadd.f32 %v5883_v49, %v4844_v60  ;;  %v4859_v16 = vmax.f32 %v2135_v29, 0.0  ;;  %v2137_v17 = vadd.f32 %v2136_v20, %v11480_v41  ;;  %v1691_v63 = vpop.f32.mrf.mxu0  ;;  %9609 = vmatmul.mubr.msk.f32.gmra.mxu0 %vm204_vm0, %v10165_v50  ;;  %v10166_v49 = vld [vmem:[%s16360_s0 + $0x140] sm:$0xff] }
 0x2a3   :  { %v5774_v23 = vadd.f32 %v5773_v6, %v4857_v0  ;;  %v4858_v25 = vmax.f32 %v1688_v2, 0.0  ;;  %v1692_v31 = vadd.f32 %v1691_v63, %v11384_v21  ;;  %v2140_v32 = vpop.f32.mrf.mxu1  ;;  %9673 = vmatmul.mubr.msk.f32.gmra.mxu1 %vm204_vm0, %v10165_v50  ;;  %2497 = vmatprep.mubr.f32.mxu0 %v16372_v5  ;;  %v10167_v0 = vld [vmem:[%s16360_s0 + $0x148] sm:$0xff] }
 0x2a4   :  { %v5848_v33 = vadd.f32 %v5847_v59, %v4859_v16  ;;  %v4860_v35 = vmax.f32 %v2137_v17, 0.0  ;;  %v2141_v36 = vadd.f32 %v2140_v32, %v11445_v53  ;;  %v1693_v10 = vpop.f32.mrf.mxu0  ;;  %2946 = vmatprep.mubr.f32.mxu1 %v16372_v5 }
 0x2a5   :  { %v5811_v11 = vadd.f32 %v5810_v61, %v4858_v25  ;;  %v4873_v37 = vmax.f32 %v1692_v31, 0.0  ;;  %v1694_v14 = vadd.f32 %v1693_v10, %v11475_v40  ;;  %v2142_v15 = vpop.f32.mrf.mxu1 }
 0x2a6   :  { %v5885_v43 = vadd.f32 %v5884_v12, %v4860_v35  ;;  %v4875_v44 = vmax.f32 %v2141_v36, 0.0  ;;  %v2143_v46 = vadd.f32 %v2142_v15, %v11480_v41  ;;  %v1697_v42 = vpop.f32.mrf.mxu0  ;;  %9610 = vmatmul.mubr.msk.f32.gmra.mxu0 %vm204_vm0, %v10166_v49 }
 0x2a7   :  { %v5775_v51 = vadd.f32 %v5774_v23, %v4873_v37  ;;  %v4874_v34 = vmax.f32 %v1694_v14, 0.0  ;;  %v1698_v62 = vadd.f32 %v1697_v42, %v11384_v21  ;;  %v2146_v55 = vpop.f32.mrf.mxu1  ;;  %9674 = vmatmul.mubr.msk.f32.gmra.mxu1 %vm204_vm0, %v10166_v49  ;;  %2503 = vmatprep.mubr.f32.mxu0 %v16372_v5 }
 0x2a8   :  { %v5849_v45 = vadd.f32 %v5848_v33, %v4875_v44  ;;  %v4876_v6 = vmax.f32 %v2143_v46, 0.0  ;;  %v2147_v54 = vadd.f32 %v2146_v55, %v11445_v53  ;;  %v1699_v58 = vpop.f32.mrf.mxu0  ;;  %2952 = vmatprep.mubr.f32.mxu1 %v16372_v5 }
 0x2a9   :  { %v5812_v56 = vadd.f32 %v5811_v11, %v4874_v34  ;;  %v4889_v59 = vmax.f32 %v1698_v62, 0.0  ;;  %v1700_v60 = vadd.f32 %v1699_v58, %v11475_v40  ;;  %v2148_v29 = vpop.f32.mrf.mxu1  ;;  %v10168_v11 = vld [vmem:[%s16360_s0 + $0x150] sm:$0xff] }
 0x2aa   :  { %v5886_v38 = vadd.f32 %v5885_v43, %v4876_v6  ;;  %v4891_v27 = vmax.f32 %v2147_v54, 0.0  ;;  %v2149_v39 = vadd.f32 %v2148_v29, %v11480_v41  ;;  %v1703_v61 = vpop.f32.mrf.mxu0  ;;  %9611 = vmatmul.mubr.msk.f32.gmra.mxu0 %vm204_vm0, %v10167_v0 }
 0x2ab   :  { %v5776_v2 = vadd.f32 %v5775_v51, %v4889_v59  ;;  %v4890_v20 = vmax.f32 %v1700_v60, 0.0  ;;  %v1704_v12 = vadd.f32 %v1703_v61, %v11384_v21  ;;  %v2152_v16 = vpop.f32.mrf.mxu1  ;;  %9675 = vmatmul.mubr.msk.f32.gmra.mxu1 %vm204_vm0, %v10167_v0  ;;  %2509 = vmatprep.mubr.f32.mxu0 %v16372_v5 }
 0x2ac   :  { %v5850_v17 = vadd.f32 %v5849_v45, %v4891_v27  ;;  %v4892_v63 = vmax.f32 %v2149_v39, 0.0  ;;  %v2153_v50 = vadd.f32 %v2152_v16, %v11445_v53  ;;  %v1705_v22 = vpop.f32.mrf.mxu0  ;;  %2958 = vmatprep.mubr.f32.mxu1 %v16372_v5 }
 0x2ad   :  { %v5813_v23 = vadd.f32 %v5812_v56, %v4890_v20  ;;  %v4905_v25 = vmax.f32 %v1704_v12, 0.0  ;;  %v1706_v31 = vadd.f32 %v1705_v22, %v11475_v40  ;;  %v2154_v32 = vpop.f32.mrf.mxu1  ;;  %v10169_v56 = vld [vmem:[%s16360_s0 + $0x158] sm:$0xff] }
 0x2ae   :  { %v5887_v33 = vadd.f32 %v5886_v38, %v4892_v63  ;;  %v4907_v35 = vmax.f32 %v2153_v50, 0.0  ;;  %v2155_v36 = vadd.f32 %v2154_v32, %v11480_v41  ;;  %v1709_v10 = vpop.f32.mrf.mxu0  ;;  %9612 = vmatmul.mubr.msk.f32.gmra.mxu0 %vm204_vm0, %v10168_v11 }
 0x2af   :  { %v5777_v37 = vadd.f32 %v5776_v2, %v4905_v25  ;;  %v4906_v14 = vmax.f32 %v1706_v31, 0.0  ;;  %v1710_v15 = vadd.f32 %v1709_v10, %v11384_v21  ;;  %v2158_v43 = vpop.f32.mrf.mxu1  ;;  %9676 = vmatmul.mubr.msk.f32.gmra.mxu1 %vm204_vm0, %v10168_v11  ;;  %2515 = vmatprep.mubr.f32.mxu0 %v16372_v5 }
 0x2b0   :  { %v5851_v44 = vadd.f32 %v5850_v17, %v4907_v35  ;;  %v4908_v46 = vmax.f32 %v2155_v36, 0.0  ;;  %v2159_v42 = vadd.f32 %v2158_v43, %v11445_v53  ;;  %v1711_v49 = vpop.f32.mrf.mxu0  ;;  %2964 = vmatprep.mubr.f32.mxu1 %v16372_v5 }
 0x2b1   :  { %v5814_v51 = vadd.f32 %v5813_v23, %v4906_v14  ;;  %v4921_v34 = vmax.f32 %v1710_v15, 0.0  ;;  %v1712_v62 = vadd.f32 %v1711_v49, %v11475_v40  ;;  %v2160_v55 = vpop.f32.mrf.mxu1  ;;  %v10170_v23 = vld [vmem:[%s16360_s0 + $0x160] sm:$0xff] }
 0x2b2   :  { %v5888_v45 = vadd.f32 %v5887_v33, %v4908_v46  ;;  %v4923_v6 = vmax.f32 %v2159_v42, 0.0  ;;  %v2161_v54 = vadd.f32 %v2160_v55, %v11480_v41  ;;  %v1715_v58 = vpop.f32.mrf.mxu0  ;;  %9613 = vmatmul.mubr.msk.f32.gmra.mxu0 %vm204_vm0, %v10169_v56 }
 0x2b3   :  { %v5778_v59 = vadd.f32 %v5777_v37, %v4921_v34  ;;  %v4922_v60 = vmax.f32 %v1712_v62, 0.0  ;;  %v1716_v29 = vadd.f32 %v1715_v58, %v11384_v21  ;;  %v2164_v38 = vpop.f32.mrf.mxu1  ;;  %9677 = vmatmul.mubr.msk.f32.gmra.mxu1 %vm204_vm0, %v10169_v56  ;;  %2521 = vmatprep.mubr.f32.mxu0 %v16372_v5 }
 0x2b4   :  { %v5852_v27 = vadd.f32 %v5851_v44, %v4923_v6  ;;  %v4924_v39 = vmax.f32 %v2161_v54, 0.0  ;;  %v2165_v61 = vadd.f32 %v2164_v38, %v11445_v53  ;;  %v1717_v0 = vpop.f32.mrf.mxu0  ;;  %2970 = vmatprep.mubr.f32.mxu1 %v16372_v5 }
 0x2b5   :  { %v5815_v2 = vadd.f32 %v5814_v51, %v4922_v60  ;;  %v4937_v20 = vmax.f32 %v1716_v29, 0.0  ;;  %v1718_v12 = vadd.f32 %v1717_v0, %v11475_v40  ;;  %v2166_v16 = vpop.f32.mrf.mxu1  ;;  %v10171_v51 = vld [vmem:[%s16360_s0 + $0x168] sm:$0xff] }
 0x2b6   :  { %v5889_v17 = vadd.f32 %v5888_v45, %v4924_v39  ;;  %v4939_v63 = vmax.f32 %v2165_v61, 0.0  ;;  %v2167_v50 = vadd.f32 %v2166_v16, %v11480_v41  ;;  %v1721_v22 = vpop.f32.mrf.mxu0  ;;  %9614 = vmatmul.mubr.msk.f32.gmra.mxu0 %vm204_vm0, %v10170_v23  ;;  %v5192_v39 = vrot.slane %v11874_v26, 4 }
 0x2b7   :  { %v5779_v25 = vadd.f32 %v5778_v59, %v4937_v20  ;;  %v4938_v31 = vmax.f32 %v1718_v12, 0.0  ;;  %v1722_v32 = vadd.f32 %v1721_v22, %v11384_v21  ;;  %v2170_v33 = vpop.f32.mrf.mxu1  ;;  %9678 = vmatmul.mubr.msk.f32.gmra.mxu1 %vm204_vm0, %v10170_v23  ;;  %2527 = vmatprep.mubr.f32.mxu0 %v16372_v5  ;;  %v10172_v12 = vld [vmem:[%s16360_s0 + $0x170] sm:$0xff] }
 0x2b8   :  { %v5853_v35 = vadd.f32 %v5852_v27, %v4939_v63  ;;  %v4940_v36 = vmax.f32 %v2167_v50, 0.0  ;;  %v2171_v10 = vadd.f32 %v2170_v33, %v11445_v53  ;;  %v1723_v11 = vpop.f32.mrf.mxu0  ;;  %2976 = vmatprep.mubr.f32.mxu1 %v16372_v5  ;;  %v12216_v27 = vld [vmem:[%s16362_s2 + $0x8] sm:$0xff]  ;;  %v5266_v33 = vrot.slane %v11878_v9, 4 }
 0x2b9   :  { %v5816_v37 = vadd.f32 %v5815_v2, %v4938_v31  ;;  %v4953_v14 = vmax.f32 %v1722_v32, 0.0  ;;  %v1724_v15 = vadd.f32 %v1723_v11, %v11475_v40  ;;  %v2172_v43 = vpop.f32.mrf.mxu1  ;;  %v12231_v32 = vrot.slane %v12216_v27, %v10683_v3 }
 0x2ba   :  { %v5890_v44 = vadd.f32 %v5889_v17, %v4940_v36  ;;  %v4955_v46 = vmax.f32 %v2171_v10, 0.0  ;;  %v2173_v42 = vadd.f32 %v2172_v43, %v11480_v41  ;;  %v1727_v49 = vpop.f32.mrf.mxu0  ;;  %9615 = vmatmul.mubr.msk.f32.gmra.mxu0 %vm204_vm0, %v10171_v51 }
 0x2bb   :  { %v5780_v34 = vadd.f32 %v5779_v25, %v4953_v14  ;;  %v4954_v62 = vmax.f32 %v1724_v15, 0.0  ;;  %v1728_v55 = vadd.f32 %v1727_v49, %v11384_v21  ;;  %v2176_v45 = vpop.f32.mrf.mxu1  ;;  %9679 = vmatmul.mubr.msk.f32.gmra.mxu1 %vm204_vm0, %v10171_v51  ;;  %2533 = vmatprep.mubr.f32.mxu0 %v16372_v5 }
 0x2bc   :  { %v5854_v6 = vadd.f32 %v5853_v35, %v4955_v46  ;;  %v4956_v54 = vmax.f32 %v2173_v42, 0.0  ;;  %v2177_v58 = vadd.f32 %v2176_v45, %v11445_v53  ;;  %v1729_v56 = vpop.f32.mrf.mxu0  ;;  %2982 = vmatprep.mubr.f32.mxu1 %v16372_v5  ;;  %v10173_v46 = vld [vmem:[%s16360_s0 + $0x178] sm:$0xff]  ;;  %v5229_v42 = vrot.slane %v11881_v13, 4 }
 0x2bd   :  { %v5817_v59 = vadd.f32 %v5816_v37, %v4954_v62  ;;  %v4969_v60 = vmax.f32 %v1728_v55, 0.0  ;;  %v1730_v29 = vadd.f32 %v1729_v56, %v11475_v40  ;;  %v2178_v38 = vpop.f32.mrf.mxu1  ;;  %v12236_v37 = vadd.f32 %v5192_v39, %v11874_v26 }
 0x2be   :  { %v5891_v61 = vadd.f32 %v5890_v44, %v4956_v54  ;;  %v4971_v0 = vmax.f32 %v2177_v58, 0.0  ;;  %v2179_v2 = vadd.f32 %v2178_v38, %v11480_v41  ;;  %v1733_v20 = vpop.f32.mrf.mxu0  ;;  %9616 = vmatmul.mubr.msk.f32.gmra.mxu0 %vm204_vm0, %v10172_v12  ;;  %v5303_v26 = vrot.slane %v11884_v18, 4 }
 0x2bf   :  { %v5781_v16 = vadd.f32 %v5780_v34, %v4969_v60  ;;  %v4970_v17 = vmax.f32 %v1730_v29, 0.0  ;;  %v1734_v63 = vadd.f32 %v1733_v20, %v11384_v21  ;;  %v2182_v50 = vpop.f32.mrf.mxu1  ;;  %9680 = vmatmul.mubr.msk.f32.gmra.mxu1 %vm204_vm0, %v10172_v12  ;;  %2539 = vmatprep.mubr.f32.mxu0 %v16372_v5  ;;  %v5267_v58 = vadd.f32 %v5266_v33, %v11878_v9 }
 0x2c0   :  { %v5855_v22 = vadd.f32 %v5854_v6, %v4971_v0  ;;  %v4972_v23 = vmax.f32 %v2179_v2, 0.0  ;;  %v2183_v25 = vadd.f32 %v2182_v50, %v11445_v53  ;;  %v1735_v31 = vpop.f32.mrf.mxu0  ;;  %2988 = vmatprep.mubr.f32.mxu1 %v16372_v5  ;;  %v10174_v0 = vld [vmem:[%s16360_s0 + $0x180] sm:$0xff]  ;;  %v5230_v9 = vadd.f32 %v5229_v42, %v11881_v13 }
 0x2c1   :  { %v5818_v35 = vadd.f32 %v5817_v59, %v4970_v17  ;;  %v4985_v36 = vmax.f32 %v1734_v63, 0.0  ;;  %v1736_v10 = vadd.f32 %v1735_v31, %v11475_v40  ;;  %v2184_v11 = vpop.f32.mrf.mxu1  ;;  %v5304_v12 = vadd.f32 %v5303_v26, %v11884_v18 }
 0x2c2   :  { %v5892_v14 = vadd.f32 %v5891_v61, %v4972_v23  ;;  %v4987_v15 = vmax.f32 %v2183_v25, 0.0  ;;  %v2185_v43 = vadd.f32 %v2184_v11, %v11480_v41  ;;  %v1739_v44 = vpop.f32.mrf.mxu0  ;;  %9617 = vmatmul.mubr.msk.f32.gmra.mxu0 %vm204_vm0, %v10173_v46  ;;  %v12275_v13 = vrot.slane %v12216_v27, %v10697_v8  ;;  %v10238_v8 = vld [vmem:[%s16360_s0 + $0x168] sm:$0xff] }
 0x2c3   :  { %v5782_v49 = vadd.f32 %v5781_v16, %v4985_v36  ;;  %v4986_v51 = vmax.f32 %v1736_v10, 0.0  ;;  %v1740_v34 = vadd.f32 %v1739_v44, %v11384_v21  ;;  %v2188_v62 = vpop.f32.mrf.mxu1  ;;  %9681 = vmatmul.mubr.msk.f32.gmra.mxu1 %vm204_vm0, %v10173_v46  ;;  %2545 = vmatprep.mubr.f32.mxu0 %v16372_v5  ;;  %v5194_v50 = vrot.slane %v12236_v37, 2 }
 0x2c4   :  { %v5856_v55 = vadd.f32 %v5855_v22, %v4987_v15  ;;  %v4988_v45 = vmax.f32 %v2185_v43, 0.0  ;;  %v2189_v6 = vadd.f32 %v2188_v62, %v11445_v53  ;;  %v1741_v54 = vpop.f32.mrf.mxu0  ;;  %2994 = vmatprep.mubr.f32.mxu1 %v16372_v5  ;;  %v12259_v53 = vrot.slane %v12216_v27, %v10686_v4 }
 0x2c5   :  { %v5819_v56 = vadd.f32 %v5818_v35, %v4986_v51  ;;  %v5001_v59 = vmax.f32 %v1740_v34, 0.0  ;;  %v1742_v21 = vadd.f32 %v1741_v54, %v11475_v40  ;;  %v2190_v60 = vpop.f32.mrf.mxu1  ;;  %v5268_v31 = vrot.slane %v5267_v58, 2 }
 0x2c6   :  { %v5893_v29 = vadd.f32 %v5892_v14, %v4988_v45  ;;  %v5003_v38 = vmax.f32 %v2189_v6, 0.0  ;;  %v2191_v39 = vadd.f32 %v2190_v60, %v11480_v41  ;;  %v2259_v61 = vpop.f32.mrf.mxu0  ;;  %9618 = vmatmul.mubr.msk.f32.gmra.mxu0 %vm204_vm0, %v10174_v0  ;;  %v12267_v41 = vrot.slane %v12216_v27, %v10694_v7  ;;  %v10175_v27 = vld [vmem:[%s16360_s0 + $0x188] sm:$0xff]  ;;  %v10239_v7 = vld [vmem:[%s16360_s0 + $0x170] sm:$0xff] }
 0x2c7   :  { %v12262_v2 = vadd.f32 %v5782_v49, %v5001_v59  ;;  %v5002_v40 = vmax.f32 %v1742_v21, 0.0  ;;  %v2708_v20 = vpop.f32.mrf.mxu1  ;;  %9682 = vmatmul.mubr.msk.f32.gmra.mxu1 %vm204_vm0, %v10174_v0  ;;  %2551 = vmatprep.mubr.f32.mxu0 %v16372_v5  ;;  %v2260_v23 = vadd.f32 %v2259_v61, %v12231_v32  ;;  %v5231_v36 = vrot.slane %v5230_v9, 2 }
 0x2c8   :  { %v12271_v16 = vadd.f32 %v5856_v55, %v5003_v38  ;;  %v5004_v17 = vmax.f32 %v2191_v39, 0.0  ;;  %v2261_v63 = vpop.f32.mrf.mxu0  ;;  %3000 = vmatprep.mubr.f32.mxu1 %v16372_v5  ;;  %v2709_v18 = vadd.f32 %v2708_v20, %v12259_v53  ;;  %v5305_v15 = vrot.slane %v5304_v12, 2 }
 0x2c9   :  { %v12279_v22 = vadd.f32 %v5819_v56, %v5002_v40  ;;  %v2710_v25 = vpop.f32.mrf.mxu1  ;;  %v2262_v10 = vadd.f32 %v2261_v63, %v12267_v41  ;;  %v5195_v42 = vadd.f32 %v5194_v50, %v12236_v37  ;;  %v3997_v49 = vmax.f32 %v2260_v23, 0.0  ;;  %v10176_v56 = vld [vmem:[%s16360_s0 + $0x190] sm:$0xff] }
 0x2ca   :  { %v12282_v33 = vadd.f32 %v5893_v29, %v5004_v17  ;;  %v2265_v35 = vpop.f32.mrf.mxu0  ;;  %9619 = vmatmul.mubr.msk.f32.gmra.mxu0 %vm204_vm0, %v10175_v27  ;;  %v2711_v43 = vadd.f32 %v2710_v25, %v12275_v13  ;;  %v12298_v26 = vadd.f32 %v5268_v31, %v5267_v58  ;;  %v3999_v55 = vmax.f32 %v2709_v18, 0.0 }
 0x2cb   :  { %v2266_v11 = vadd.f32 %v2265_v35, %v12231_v32  ;;  %v2714_v14 = vpop.f32.mrf.mxu1  ;;  %9683 = vmatmul.mubr.msk.f32.gmra.mxu1 %vm204_vm0, %v10175_v27  ;;  %2557 = vmatprep.mubr.f32.mxu0 %v16372_v5  ;;  %v3998_v59 = vmax.f32 %v2262_v10, 0.0  ;;  %v5232_v58 = vadd.f32 %v5231_v36, %v5230_v9  ;;  %v5306_v0 = vadd.f32 %v5305_v15, %v5304_v12  ;;  %v10177_v35 = vld [vmem:[%s16360_s0 + $0x198] sm:$0xff] }
 0x2cc   :  { %v2715_v44 = vadd.f32 %v2714_v14, %v12259_v53  ;;  %v2267_v46 = vpop.f32.mrf.mxu0  ;;  %3006 = vmatprep.mubr.f32.mxu1 %v16372_v5  ;;  %v4000_v29 = vmax.f32 %v2711_v43, 0.0  ;;  %v5196_v40 = vrot.slane %v5195_v42, 1  ;;  %v5270_v23 = vrot.slane %v12298_v26, 1 }
 0x2cd   :  { %v4013_v51 = vmax.f32 %v2266_v11, 0.0  ;;  %v2268_v34 = vadd.f32 %v2267_v46, %v12267_v41  ;;  %v2716_v62 = vpop.f32.mrf.mxu1  ;;  %v5233_v11 = vrot.slane %v5232_v58, 1  ;;  %v5307_v46 = vrot.slane %v5306_v0, 1 }
 0x2ce   :  { %v4015_v45 = vmax.f32 %v2715_v44, 0.0  ;;  %v2717_v6 = vadd.f32 %v2716_v62, %v12275_v13  ;;  %v2271_v54 = vpop.f32.mrf.mxu0  ;;  %9620 = vmatmul.mubr.msk.f32.gmra.mxu0 %vm204_vm0, %v10176_v56 }
 0x2cf   :  { %v5309_v37 = vadd.f32 %v4013_v51, %v3997_v49  ;;  %v4014_v21 = vmax.f32 %v2268_v34, 0.0  ;;  %v2720_v60 = vpop.f32.mrf.mxu1  ;;  %9684 = vmatmul.mubr.msk.f32.gmra.mxu1 %vm204_vm0, %v10176_v56  ;;  %2563 = vmatprep.mubr.f32.mxu0 %v16372_v5  ;;  %v2272_v17 = vadd.f32 %v2271_v54, %v12231_v32 }
 0x2d0   :  { %v5383_v38 = vadd.f32 %v4015_v45, %v3999_v55  ;;  %v4016_v39 = vmax.f32 %v2717_v6, 0.0  ;;  %v2273_v61 = vpop.f32.mrf.mxu0  ;;  %3012 = vmatprep.mubr.f32.mxu1 %v16372_v5  ;;  %v2721_v63 = vadd.f32 %v2720_v60, %v12259_v53  ;;  %v12328_v60 = vadd.f32 %v5196_v40, %v5195_v42 }
 0x2d1   :  { %v5346_v20 = vadd.f32 %v4014_v21, %v3998_v59  ;;  %v2722_v50 = vpop.f32.mrf.mxu1  ;;  %v2274_v31 = vadd.f32 %v2273_v61, %v12267_v41  ;;  %v4029_v12 = vmax.f32 %v2272_v17, 0.0  ;;  %v10178_v21 = vld [vmem:[%s16360_s0 + $0x1a0] sm:$0xff]  ;;  %v12334_v61 = vadd.f32 %v5270_v23, %v12298_v26  ;;  %v10179_v23 = vld [vmem:[%s16360_s0 + $0x1a8] sm:$0xff] }
 0x2d2   :  { %v5420_v25 = vadd.f32 %v4016_v39, %v4000_v29  ;;  %v2723_v9 = vadd.f32 %v2722_v50, %v12275_v13  ;;  %v2277_v18 = vpop.f32.mrf.mxu0  ;;  %9621 = vmatmul.mubr.msk.f32.gmra.mxu0 %vm204_vm0, %v10177_v35  ;;  %v4031_v27 = vmax.f32 %v2721_v63, 0.0 }
 0x2d3   :  { %v2278_v36 = vadd.f32 %v2277_v18, %v12231_v32  ;;  %v2726_v10 = vpop.f32.mrf.mxu1  ;;  %9685 = vmatmul.mubr.msk.f32.gmra.mxu1 %vm204_vm0, %v10177_v35  ;;  %2569 = vmatprep.mubr.f32.mxu0 %v16372_v5  ;;  %v4030_v14 = vmax.f32 %v2274_v31, 0.0  ;;  %v5310_v49 = vadd.f32 %v5309_v37, %v4029_v12 }
 0x2d4   :  { %v4032_v15 = vmax.f32 %v2723_v9, 0.0  ;;  %v2727_v43 = vadd.f32 %v2726_v10, %v12259_v53  ;;  %v2279_v44 = vpop.f32.mrf.mxu0  ;;  %3018 = vmatprep.mubr.f32.mxu1 %v16372_v5  ;;  %v5384_v51 = vadd.f32 %v5383_v38, %v4031_v27  ;;  %v12339_v9 = vadd.f32 %v5233_v11, %v5232_v58 }
 0x2d5   :  { %v4045_v34 = vmax.f32 %v2278_v36, 0.0  ;;  %v2280_v62 = vadd.f32 %v2279_v44, %v12267_v41  ;;  %v2728_v55 = vpop.f32.mrf.mxu1  ;;  %v5347_v45 = vadd.f32 %v5346_v20, %v4030_v14  ;;  %v12346_v27 = vadd.f32 %v5307_v46, %v5306_v0 }
 0x2d6   :  { %v5421_v6 = vadd.f32 %v5420_v25, %v4032_v15  ;;  %v4047_v54 = vmax.f32 %v2727_v43, 0.0  ;;  %v2729_v56 = vadd.f32 %v2728_v55, %v12275_v13  ;;  %v2283_v59 = vpop.f32.mrf.mxu0  ;;  %9622 = vmatmul.mubr.msk.f32.gmra.mxu0 %vm204_vm0, %v10178_v21  ;;  %v5821_v36 = vrot.slane %v12279_v22, 4 }
 0x2d7   :  { %v5311_v37 = vadd.f32 %v5310_v49, %v4045_v34  ;;  %v4046_v29 = vmax.f32 %v2280_v62, 0.0  ;;  %v2284_v38 = vadd.f32 %v2283_v59, %v12231_v32  ;;  %v2732_v39 = vpop.f32.mrf.mxu1  ;;  %9686 = vmatmul.mubr.msk.f32.gmra.mxu1 %vm204_vm0, %v10178_v21  ;;  %2575 = vmatprep.mubr.f32.mxu0 %v16372_v5  ;;  %v5895_v15 = vrot.slane %v12282_v33, 4  ;;  %v10180_v21 = vld [vmem:[%s16360_s0 + $0x1b0] sm:$0xff] }
 0x2d8   :  { %v5385_v20 = vadd.f32 %v5384_v51, %v4047_v54  ;;  %v4048_v17 = vmax.f32 %v2729_v56, 0.0  ;;  %v2733_v63 = vadd.f32 %v2732_v39, %v12259_v53  ;;  %v2285_v50 = vpop.f32.mrf.mxu0  ;;  %3024 = vmatprep.mubr.f32.mxu1 %v16372_v5  ;;  %v5784_v0 = vrot.slane %v12262_v2, 4 }
 0x2d9   :  { %v5348_v42 = vadd.f32 %v5347_v45, %v4046_v29  ;;  %v4061_v40 = vmax.f32 %v2284_v38, 0.0  ;;  %v2286_v25 = vadd.f32 %v2285_v50, %v12267_v41  ;;  %v2734_v31 = vpop.f32.mrf.mxu1  ;;  %v5858_v45 = vrot.slane %v12271_v16, 4 }
 0x2da   :  { %v5422_v18 = vadd.f32 %v5421_v6, %v4048_v17  ;;  %v4063_v35 = vmax.f32 %v2733_v63, 0.0  ;;  %v2735_v12 = vadd.f32 %v2734_v31, %v12275_v13  ;;  %v2289_v26 = vpop.f32.mrf.mxu0  ;;  %9623 = vmatmul.mubr.msk.f32.gmra.mxu0 %vm204_vm0, %v10179_v23  ;;  %v5896_v17 = vadd.f32 %v5895_v15, %v12282_v33 }
 0x2db   :  { %v5312_v10 = vadd.f32 %v5311_v37, %v4061_v40  ;;  %v4062_v14 = vmax.f32 %v2286_v25, 0.0  ;;  %v2290_v58 = vadd.f32 %v2289_v26, %v12231_v32  ;;  %v2738_v11 = vpop.f32.mrf.mxu1  ;;  %9687 = vmatmul.mubr.msk.f32.gmra.mxu1 %vm204_vm0, %v10179_v23  ;;  %2581 = vmatprep.mubr.f32.mxu0 %v16372_v5  ;;  %v5822_v37 = vadd.f32 %v5821_v36, %v12279_v22 }
 0x2dc   :  { %v5386_v43 = vadd.f32 %v5385_v20, %v4063_v35  ;;  %v4064_v44 = vmax.f32 %v2735_v12, 0.0  ;;  %v2739_v49 = vadd.f32 %v2738_v11, %v12259_v53  ;;  %v2291_v51 = vpop.f32.mrf.mxu0  ;;  %3030 = vmatprep.mubr.f32.mxu1 %v16372_v5  ;;  %v5785_v22 = vadd.f32 %v5784_v0, %v12262_v2 }
 0x2dd   :  { %v5349_v46 = vadd.f32 %v5348_v42, %v4062_v14  ;;  %v4077_v34 = vmax.f32 %v2290_v58, 0.0  ;;  %v2292_v62 = vadd.f32 %v2291_v51, %v12267_v41  ;;  %v2740_v55 = vpop.f32.mrf.mxu1  ;;  %v5859_v12 = vadd.f32 %v5858_v45, %v12271_v16 }
 0x2de   :  { %v5423_v6 = vadd.f32 %v5422_v18, %v4064_v44  ;;  %v4079_v54 = vmax.f32 %v2739_v49, 0.0  ;;  %v2741_v56 = vadd.f32 %v2740_v55, %v12275_v13  ;;  %v2295_v59 = vpop.f32.mrf.mxu0  ;;  %9624 = vmatmul.mubr.msk.f32.gmra.mxu0 %vm204_vm0, %v10180_v21  ;;  %v5823_v14 = vrot.slane %v5822_v37, 2 }
 0x2df   :  { %v5313_v29 = vadd.f32 %v5312_v10, %v4077_v34  ;;  %v4078_v38 = vmax.f32 %v2292_v62, 0.0  ;;  %v2296_v39 = vadd.f32 %v2295_v59, %v12231_v32  ;;  %v2744_v20 = vpop.f32.mrf.mxu1  ;;  %9688 = vmatmul.mubr.msk.f32.gmra.mxu1 %vm204_vm0, %v10180_v21  ;;  %2587 = vmatprep.mubr.f32.mxu0 %v16372_v5  ;;  %v10181_v10 = vld [vmem:[%s16360_s0 + $0x1b8] sm:$0xff]  ;;  %v5897_v16 = vrot.slane %v5896_v17, 2  ;;  %v10182_v21 = vld [vmem:[%s16360_s0 + $0x1c0] sm:$0xff] }
 0x2e0   :  { %v5387_v63 = vadd.f32 %v5386_v43, %v4079_v54  ;;  %v4080_v50 = vmax.f32 %v2741_v56, 0.0  ;;  %v2745_v42 = vadd.f32 %v2744_v20, %v12259_v53  ;;  %v2297_v40 = vpop.f32.mrf.mxu0  ;;  %3036 = vmatprep.mubr.f32.mxu1 %v16372_v5  ;;  %v5786_v0 = vrot.slane %v5785_v22, 2 }
 0x2e1   :  { %v5350_v25 = vadd.f32 %v5349_v46, %v4078_v38  ;;  %v4093_v31 = vmax.f32 %v2296_v39, 0.0  ;;  %v2298_v18 = vadd.f32 %v2297_v40, %v12267_v41  ;;  %v2746_v35 = vpop.f32.mrf.mxu1  ;;  %v5860_v45 = vrot.slane %v5859_v12, 2 }
 0x2e2   :  { %v5424_v26 = vadd.f32 %v5423_v6, %v4080_v50  ;;  %v4095_v23 = vmax.f32 %v2745_v42, 0.0  ;;  %v2747_v33 = vadd.f32 %v2746_v35, %v12275_v13  ;;  %v2301_v36 = vpop.f32.mrf.mxu0  ;;  %9625 = vmatmul.mubr.msk.f32.gmra.mxu0 %vm204_vm0, %v10181_v10 }
 0x2e3   :  { %v5314_v2 = vadd.f32 %v5313_v29, %v4093_v31  ;;  %v4094_v58 = vmax.f32 %v2298_v18, 0.0  ;;  %v2302_v11 = vadd.f32 %v2301_v36, %v12231_v32  ;;  %v2750_v15 = vpop.f32.mrf.mxu1  ;;  %9689 = vmatmul.mubr.msk.f32.gmra.mxu1 %vm204_vm0, %v10181_v10  ;;  %2593 = vmatprep.mubr.f32.mxu0 %v16372_v5  ;;  %v5898_v31 = vadd.f32 %v5897_v16, %v5896_v17 }
 0x2e4   :  { %v5388_v43 = vadd.f32 %v5387_v63, %v4095_v23  ;;  %v4096_v44 = vmax.f32 %v2747_v33, 0.0  ;;  %v2751_v49 = vadd.f32 %v2750_v15, %v12259_v53  ;;  %v2303_v51 = vpop.f32.mrf.mxu0  ;;  %3042 = vmatprep.mubr.f32.mxu1 %v16372_v5  ;;  %v5824_v63 = vadd.f32 %v5823_v14, %v5822_v37  ;;  %v10183_v14 = vld [vmem:[%s16360_s0 + $0x1c8] sm:$0xff] }
 0x2e5   :  { %v5351_v46 = vadd.f32 %v5350_v25, %v4094_v58  ;;  %v4109_v34 = vmax.f32 %v2302_v11, 0.0  ;;  %v2304_v62 = vadd.f32 %v2303_v51, %v12267_v41  ;;  %v2752_v55 = vpop.f32.mrf.mxu1  ;;  %v5787_v18 = vadd.f32 %v5786_v0, %v5785_v22 }
 0x2e6   :  { %v5425_v6 = vadd.f32 %v5424_v26, %v4096_v44  ;;  %v4111_v54 = vmax.f32 %v2751_v49, 0.0  ;;  %v2753_v56 = vadd.f32 %v2752_v55, %v12275_v13  ;;  %v2307_v59 = vpop.f32.mrf.mxu0  ;;  %9626 = vmatmul.mubr.msk.f32.gmra.mxu0 %vm204_vm0, %v10182_v21  ;;  %v5861_v36 = vadd.f32 %v5860_v45, %v5859_v12 }
 0x2e7   :  { %v5315_v29 = vadd.f32 %v5314_v2, %v4109_v34  ;;  %v4110_v38 = vmax.f32 %v2304_v62, 0.0  ;;  %v2308_v39 = vadd.f32 %v2307_v59, %v12231_v32  ;;  %v2756_v20 = vpop.f32.mrf.mxu1  ;;  %9690 = vmatmul.mubr.msk.f32.gmra.mxu1 %vm204_vm0, %v10182_v21  ;;  %2599 = vmatprep.mubr.f32.mxu0 %v16372_v5  ;;  %v5825_v12 = vrot.slane %v5824_v63, 1  ;;  %v10184_v21 = vld [vmem:[%s16360_s0 + $0x1d0] sm:$0xff] }
 0x2e8   :  { %v5389_v50 = vadd.f32 %v5388_v43, %v4111_v54  ;;  %v4112_v42 = vmax.f32 %v2753_v56, 0.0  ;;  %v2757_v40 = vadd.f32 %v2756_v20, %v12259_v53  ;;  %v2309_v25 = vpop.f32.mrf.mxu0  ;;  %3048 = vmatprep.mubr.f32.mxu1 %v16372_v5  ;;  %v5899_v51 = vrot.slane %v5898_v31, 1 }
 0x2e9   :  { %v5352_v35 = vadd.f32 %v5351_v46, %v4110_v38  ;;  %v4125_v26 = vmax.f32 %v2308_v39, 0.0  ;;  %v2310_v23 = vadd.f32 %v2309_v25, %v12267_v41  ;;  %v2758_v33 = vpop.f32.mrf.mxu1  ;;  %v5788_v0 = vrot.slane %v5787_v18, 1 }
 0x2ea   :  { %v5426_v10 = vadd.f32 %v5425_v6, %v4112_v42  ;;  %v4127_v2 = vmax.f32 %v2757_v40, 0.0  ;;  %v2759_v58 = vadd.f32 %v2758_v33, %v12275_v13  ;;  %v2313_v37 = vpop.f32.mrf.mxu0  ;;  %9627 = vmatmul.mubr.msk.f32.gmra.mxu0 %vm204_vm0, %v10183_v14  ;;  %v5862_v45 = vrot.slane %v5861_v36, 1 }
 0x2eb   :  { %v5316_v11 = vadd.f32 %v5315_v29, %v4125_v26  ;;  %v4126_v17 = vmax.f32 %v2310_v23, 0.0  ;;  %v2314_v22 = vadd.f32 %v2313_v37, %v12231_v32  ;;  %v2762_v15 = vpop.f32.mrf.mxu1  ;;  %9691 = vmatmul.mubr.msk.f32.gmra.mxu1 %vm204_vm0, %v10183_v14  ;;  %2605 = vmatprep.mubr.f32.mxu0 %v16372_v5  ;;  %v5900_v26 = vadd.f32 %v5899_v51, %v5898_v31 }
 0x2ec   :  { %v5390_v16 = vadd.f32 %v5389_v50, %v4127_v2  ;;  %v4128_v43 = vmax.f32 %v2759_v58, 0.0  ;;  %v2763_v44 = vadd.f32 %v2762_v15, %v12259_v53  ;;  %v2315_v49 = vpop.f32.mrf.mxu0  ;;  %3054 = vmatprep.mubr.f32.mxu1 %v16372_v5  ;;  %v5826_v50 = vadd.f32 %v5825_v12, %v5824_v63 }
 0x2ed   :  { %v5353_v46 = vadd.f32 %v5352_v35, %v4126_v17  ;;  %v4141_v34 = vmax.f32 %v2314_v22, 0.0  ;;  %v2316_v62 = vadd.f32 %v2315_v49, %v12267_v41  ;;  %v2764_v55 = vpop.f32.mrf.mxu1  ;;  %v5789_v23 = vadd.f32 %v5788_v0, %v5787_v18  ;;  %v10185_v22 = vld [vmem:[%s16360_s0 + $0x1d8] sm:$0xff] }
 0x2ee   :  { %v5427_v6 = vadd.f32 %v5426_v10, %v4128_v43  ;;  %v4143_v54 = vmax.f32 %v2763_v44, 0.0  ;;  %v2765_v56 = vadd.f32 %v2764_v55, %v12275_v13  ;;  %v2319_v59 = vpop.f32.mrf.mxu0  ;;  %9628 = vmatmul.mubr.msk.f32.gmra.mxu0 %vm204_vm0, %v10184_v21  ;;  %v5863_v37 = vadd.f32 %v5862_v45, %v5861_v36 }
 0x2ef   :  { %v5317_v29 = vadd.f32 %v5316_v11, %v4141_v34  ;;  %v4142_v38 = vmax.f32 %v2316_v62, 0.0  ;;  %v2320_v39 = vadd.f32 %v2319_v59, %v12231_v32  ;;  %v2768_v20 = vpop.f32.mrf.mxu1  ;;  %9692 = vmatmul.mubr.msk.f32.gmra.mxu1 %vm204_vm0, %v10184_v21  ;;  %2611 = vmatprep.mubr.f32.mxu0 %v16372_v5  ;;  %v12427_v36 = vsel %vm7766_vm1, %v5826_v50, %v12339_v9 }
 0x2f0   :  { %v5391_v42 = vadd.f32 %v5390_v16, %v4143_v54  ;;  %v4144_v40 = vmax.f32 %v2765_v56, 0.0  ;;  %v2769_v25 = vadd.f32 %v2768_v20, %v12259_v53  ;;  %v2321_v35 = vpop.f32.mrf.mxu0  ;;  %3060 = vmatprep.mubr.f32.mxu1 %v16372_v5  ;;  %v12433_v51 = vsel %vm7766_vm1, %v5900_v26, %v12346_v27  ;;  %v10186_v56 = vld [vmem:[%s16360_s0 + $0x1e0] sm:$0xff] }
 0x2f1   :  { %v5354_v33 = vadd.f32 %v5353_v46, %v4142_v38  ;;  %v4157_v10 = vmax.f32 %v2320_v39, 0.0  ;;  %v2322_v2 = vadd.f32 %v2321_v35, %v12267_v41  ;;  %v2770_v58 = vpop.f32.mrf.mxu1  ;;  %v12438_v9 = vsel %vm7766_vm1, %v5789_v23, %v12328_v60 }
 0x2f2   :  { %v5428_v14 = vadd.f32 %v5427_v6, %v4144_v40  ;;  %v4159_v11 = vmax.f32 %v2769_v25, 0.0  ;;  %v2771_v17 = vadd.f32 %v2770_v58, %v12275_v13  ;;  %v2325_v63 = vpop.f32.mrf.mxu0  ;;  %9629 = vmatmul.mubr.msk.f32.gmra.mxu0 %vm204_vm0, %v10185_v22  ;;  %16434 = vst [vmem:[#allocation13_spill] sm:$0xff] %v12438_v9  ;;  %v12447_v27 = vsel %vm7766_vm1, %v5863_v37, %v12334_v61 }
 0x2f3   :  { %v5318_v15 = vadd.f32 %v5317_v29, %v4157_v10  ;;  %v4158_v31 = vmax.f32 %v2322_v2, 0.0  ;;  %v2326_v18 = vadd.f32 %v2325_v63, %v12231_v32  ;;  %v2774_v12 = vpop.f32.mrf.mxu1  ;;  %9693 = vmatmul.mubr.msk.f32.gmra.mxu1 %vm204_vm0, %v10185_v22  ;;  %2617 = vmatprep.mubr.f32.mxu0 %v16372_v5  ;;  %16435 = vst [vmem:[#allocation14_spill] sm:$0xff] %v12447_v27  ;;  %v10187_v10 = vld [vmem:[%s16360_s0 + $0x1e8] sm:$0xff] }
 0x2f4   :  { %v5392_v16 = vadd.f32 %v5391_v42, %v4159_v11  ;;  %v4160_v43 = vmax.f32 %v2771_v17, 0.0  ;;  %v2775_v44 = vadd.f32 %v2774_v12, %v12259_v53  ;;  %v2327_v49 = vpop.f32.mrf.mxu0  ;;  %3066 = vmatprep.mubr.f32.mxu1 %v16372_v5 }
 0x2f5   :  { %v5355_v0 = vadd.f32 %v5354_v33, %v4158_v31  ;;  %v4173_v46 = vmax.f32 %v2326_v18, 0.0  ;;  %v2328_v34 = vadd.f32 %v2327_v49, %v12267_v41  ;;  %v2776_v62 = vpop.f32.mrf.mxu1 }
 0x2f6   :  { %v5429_v55 = vadd.f32 %v5428_v14, %v4160_v43  ;;  %v4175_v45 = vmax.f32 %v2775_v44, 0.0  ;;  %v2777_v6 = vadd.f32 %v2776_v62, %v12275_v13  ;;  %v2331_v54 = vpop.f32.mrf.mxu0  ;;  %9630 = vmatmul.mubr.msk.f32.gmra.mxu0 %vm204_vm0, %v10186_v56  ;;  %v12474_v43 = vld [vmem:[%s16363_s3 + $0xf0] sm:$0xff] }
 0x2f7   :  { %v5319_v59 = vadd.f32 %v5318_v15, %v4173_v46  ;;  %v4174_v21 = vmax.f32 %v2328_v34, 0.0  ;;  %v2332_v60 = vadd.f32 %v2331_v54, %v12231_v32  ;;  %v2780_v29 = vpop.f32.mrf.mxu1  ;;  %9694 = vmatmul.mubr.msk.f32.gmra.mxu1 %vm204_vm0, %v10186_v56  ;;  %2623 = vmatprep.mubr.f32.mxu0 %v16372_v5  ;;  %v12468_v15 = vld [vmem:[%s16363_s3 + $0xe0] sm:$0xff]  ;;  %v6770_v44 = vunpack.c.l.bf16 %v12474_v43  ;;  %v10189_v62 = vld [vmem:[%s16360_s0 + $0x1f0] sm:$0xff] }
 0x2f8   :  { %v5393_v38 = vadd.f32 %v5392_v16, %v4175_v45  ;;  %v4176_v39 = vmax.f32 %v2777_v6, 0.0  ;;  %v2781_v20 = vadd.f32 %v2780_v29, %v12259_v53  ;;  %v2333_v50 = vpop.f32.mrf.mxu0  ;;  %3072 = vmatprep.mubr.f32.mxu1 %v16372_v5  ;;  %v12491_v6 = vld [vmem:[%s16363_s3 + $0x2e0] sm:$0xff] }
 0x2f9   :  { %v5356_v42 = vadd.f32 %v5355_v0, %v4174_v21  ;;  %v4189_v40 = vmax.f32 %v2332_v60, 0.0  ;;  %v2334_v61 = vadd.f32 %v2333_v50, %v12267_v41  ;;  %v2782_v25 = vpop.f32.mrf.mxu1  ;;  %v6766_v60 = vunpack.c.l.bf16 %v12468_v15 }
 0x2fa   :  { %v5430_v35 = vadd.f32 %v5429_v55, %v4176_v39  ;;  %v4191_v26 = vmax.f32 %v2781_v20, 0.0  ;;  %v2783_v23 = vadd.f32 %v2782_v25, %v12275_v13  ;;  %v2337_v33 = vpop.f32.mrf.mxu0  ;;  %9631 = vmatmul.mubr.msk.f32.gmra.mxu0 %vm204_vm0, %v10187_v10  ;;  %v12485_v55 = vld [vmem:[%s16363_s3 + $0x2f0] sm:$0xff]  ;;  %v6767_v50 = vunpack.c.h.bf16 %v12468_v15 }
 0x2fb   :  { %v5320_v2 = vadd.f32 %v5319_v59, %v4189_v40  ;;  %v4190_v58 = vmax.f32 %v2334_v61, 0.0  ;;  %v2338_v37 = vadd.f32 %v2337_v33, %v12231_v32  ;;  %v2786_v14 = vpop.f32.mrf.mxu1  ;;  %9695 = vmatmul.mubr.msk.f32.gmra.mxu1 %vm204_vm0, %v10187_v10  ;;  %2629 = vmatprep.mubr.f32.mxu0 %v16372_v5  ;;  %v6898_v45 = vunpack.c.l.bf16 %v12485_v55  ;;  %v12570_v55 = vld [vmem:[%s16363_s3 + $0x2b0] sm:$0xff] }
 0x2fc   :  { %v5394_v11 = vadd.f32 %v5393_v38, %v4191_v26  ;;  %v4192_v17 = vmax.f32 %v2783_v23, 0.0  ;;  %v2787_v63 = vadd.f32 %v2786_v14, %v12259_v53  ;;  %v2339_v22 = vpop.f32.mrf.mxu0  ;;  %3078 = vmatprep.mubr.f32.mxu1 %v16372_v5  ;;  %v6894_v26 = vunpack.c.l.bf16 %v12491_v6  ;;  %v12516_v14 = vld [vmem:[%s16363_s3 + $0x2d0] sm:$0xff] }
 0x2fd   :  { %v5357_v31 = vadd.f32 %v5356_v42, %v4190_v58  ;;  %v4205_v18 = vmax.f32 %v2338_v37, 0.0  ;;  %v2340_v12 = vadd.f32 %v2339_v22, %v12267_v41  ;;  %v2788_v16 = vpop.f32.mrf.mxu1  ;;  %v12503_v42 = vld [vmem:[%s16363_s3 + $0xd0] sm:$0xff]  ;;  %v10191_v58 = vld [vmem:[%s16360_s0 + $0x1f8] sm:$0xff]  ;;  %v6895_v37 = vunpack.c.h.bf16 %v12491_v6 }
 0x2fe   :  { %v5431_v49 = vadd.f32 %v5430_v35, %v4192_v17  ;;  %v4207_v0 = vmax.f32 %v2787_v63, 0.0  ;;  %v2789_v46 = vadd.f32 %v2788_v16, %v12275_v13  ;;  %v2343_v34 = vpop.f32.mrf.mxu0  ;;  %9632 = vmatmul.mubr.msk.f32.gmra.mxu0 %vm204_vm0, %v10189_v62  ;;  %v6882_v15 = vunpack.c.l.bf16 %v12570_v55 }
 0x2ff   :  { %v5321_v54 = vadd.f32 %v5320_v2, %v4205_v18  ;;  %v4206_v56 = vmax.f32 %v2340_v12, 0.0  ;;  %v2344_v59 = vadd.f32 %v2343_v34, %v12231_v32  ;;  %v2792_v21 = vpop.f32.mrf.mxu1  ;;  %9696 = vmatmul.mubr.msk.f32.gmra.mxu1 %vm204_vm0, %v10189_v62  ;;  %2635 = vmatprep.mubr.f32.mxu0 %v16372_v5  ;;  %v6883_v6 = vunpack.c.h.bf16 %v12570_v55 }
 0x300   :  { %v5395_v29 = vadd.f32 %v5394_v11, %v4207_v0  ;;  %v4208_v38 = vmax.f32 %v2789_v46, 0.0  ;;  %v2793_v39 = vadd.f32 %v2792_v21, %v12259_v53  ;;  %v2345_v20 = vpop.f32.mrf.mxu0  ;;  %3084 = vmatprep.mubr.f32.mxu1 %v16372_v5  ;;  %v6763_v0 = vunpack.c.h.bf16 %v12503_v42  ;;  %v12528_v46 = vld [vmem:[%s16363_s3 + $0xc0] sm:$0xff] }
 0x301   :  { %v5358_v40 = vadd.f32 %v5357_v31, %v4206_v56  ;;  %v4221_v61 = vmax.f32 %v2344_v59, 0.0  ;;  %v2346_v25 = vadd.f32 %v2345_v20, %v12267_v41  ;;  %v2794_v35 = vpop.f32.mrf.mxu1  ;;  %v6762_v31 = vunpack.c.l.bf16 %v12503_v42  ;;  %v10192_v20 = vld [vmem:[%s16360_s0] sm:$0xff] }
 0x302   :  { %v5432_v23 = vadd.f32 %v5431_v49, %v4208_v38  ;;  %v4223_v33 = vmax.f32 %v2793_v39, 0.0  ;;  %v2795_v10 = vadd.f32 %v2794_v35, %v12275_v13  ;;  %v2349_v2 = vpop.f32.mrf.mxu0  ;;  %9633 = vmatmul.mubr.msk.f32.gmra.mxu0 %vm204_vm0, %v10191_v58  ;;  %v6890_v59 = vunpack.c.l.bf16 %v12516_v14 }
 0x303   :  { %v5322_v11 = vadd.f32 %v5321_v54, %v4221_v61  ;;  %v4222_v17 = vmax.f32 %v2346_v25, 0.0  ;;  %v2350_v63 = vadd.f32 %v2349_v2, %v12231_v32  ;;  %v2798_v22 = vpop.f32.mrf.mxu1  ;;  %9697 = vmatmul.mubr.msk.f32.gmra.mxu1 %vm204_vm0, %v10191_v58  ;;  %3155 = vmatprep.mubr.f32.mxu0 %v16372_v5  ;;  %v6891_v61 = vunpack.c.h.bf16 %v12516_v14 }
 0x304   :  { %v5396_v18 = vadd.f32 %v5395_v29, %v4223_v33  ;;  %v4224_v12 = vmax.f32 %v2795_v10, 0.0  ;;  %v2799_v16 = vadd.f32 %v2798_v22, %v12259_v53  ;;  %v2351_v49 = vpop.f32.mrf.mxu0  ;;  %3604 = vmatprep.mubr.f32.mxu1 %v16372_v5  ;;  %v6758_v10 = vunpack.c.l.bf16 %v12528_v46  ;;  %v12555_v22 = vld [vmem:[%s16363_s3 + $0xb0] sm:$0xff] }
 0x305   :  { %v5359_v34 = vadd.f32 %v5358_v40, %v4222_v17  ;;  %v4237_v62 = vmax.f32 %v2350_v63, 0.0  ;;  %v2352_v54 = vadd.f32 %v2351_v49, %v12267_v41  ;;  %v2800_v56 = vpop.f32.mrf.mxu1  ;;  %v12541_v40 = vld [vmem:[%s16363_s3 + $0x2c0] sm:$0xff] }
 0x306   :  { %v5433_v21 = vadd.f32 %v5432_v23, %v4224_v12  ;;  %v4239_v29 = vmax.f32 %v2799_v16, 0.0  ;;  %v2801_v38 = vadd.f32 %v2800_v56, %v12275_v13  ;;  %v2355_v39 = vpop.f32.mrf.mxu0  ;;  %9698 = vmatmul.mubr.msk.f32.vlgmr.msra.gmra.mxu0 %vm204_vm0, %v10192_v20 }
 0x307   :  { %v5323_v25 = vadd.f32 %v5322_v11, %v4237_v62  ;;  %v4238_v35 = vmax.f32 %v2352_v54, 0.0  ;;  %v2356_v23 = vadd.f32 %v2355_v39, %v12231_v32  ;;  %v2804_v33 = vpop.f32.mrf.mxu1  ;;  %9762 = vmatmul.mubr.msk.f32.vlgmr.msra.gmra.mxu1 %vm204_vm0, %v10192_v20  ;;  %3161 = vmatprep.mubr.f32.mxu0 %v16372_v5  ;;  %v6759_v11 = vunpack.c.h.bf16 %v12528_v46 }
 0x308   :  { %v5397_v2 = vadd.f32 %v5396_v18, %v4239_v29  ;;  %v4240_v58 = vmax.f32 %v2801_v38, 0.0  ;;  %v2805_v17 = vadd.f32 %v2804_v33, %v12259_v53  ;;  %v2357_v63 = vpop.f32.mrf.mxu0  ;;  %3610 = vmatprep.mubr.f32.mxu1 %v16372_v5  ;;  %7800 = vmatpush1.msra.mxu0 %v6770_v44  ;;  %v6886_v62 = vunpack.c.l.bf16 %v12541_v40  ;;  %v10193_v29 = vld [vmem:[%s16360_s0 + $0x8] sm:$0xff]  ;;  %v12584_v33 = vld [vmem:[%s16363_s3 + $0xa0] sm:$0xff] }
 0x309   :  { %v5360_v12 = vadd.f32 %v5359_v34, %v4238_v35  ;;  %v4253_v16 = vmax.f32 %v2356_v23, 0.0  ;;  %v2358_v18 = vadd.f32 %v2357_v63, %v12267_v41  ;;  %v2806_v49 = vpop.f32.mrf.mxu1  ;;  %7871 = vmatpush1.msra.mxu1 %v6898_v45  ;;  %7801 = vmatprep.subr.mxu0 %v6767_v50  ;;  %v6887_v34 = vunpack.c.h.bf16 %v12541_v40 }
 0x30a   :  { %v5434_v43 = vadd.f32 %v5433_v21, %v4240_v58  ;;  %v4255_v44 = vmax.f32 %v2805_v17, 0.0  ;;  %v2807_v54 = vadd.f32 %v2806_v49, %v12275_v13  ;;  %v2361_v56 = vpop.f32.mrf.mxu0  ;;  %9699 = vmatmul.mubr.msk.f32.gmra.mxu0 %vm204_vm0, %v10193_v29  ;;  %7872 = vmatprep.subr.mxu1 %v6895_v37  ;;  %v6754_v39 = vunpack.c.l.bf16 %v12555_v22 }
 0x30b   :  { %v5324_v45 = vadd.f32 %v5323_v25, %v4253_v16  ;;  %v4254_v50 = vmax.f32 %v2358_v18, 0.0  ;;  %v2362_v21 = vadd.f32 %v2361_v56, %v12231_v32  ;;  %v2810_v38 = vpop.f32.mrf.mxu1  ;;  %9763 = vmatmul.mubr.msk.f32.gmra.mxu1 %vm204_vm0, %v10193_v29  ;;  %3167 = vmatprep.mubr.f32.mxu0 %v16372_v5  ;;  %v6755_v25 = vunpack.c.h.bf16 %v12555_v22 }
 0x30c   :  { %v5398_v20 = vadd.f32 %v5397_v2, %v4255_v44  ;;  %v4256_v37 = vmax.f32 %v2807_v54, 0.0  ;;  %v2811_v35 = vadd.f32 %v2810_v38, %v12259_v53  ;;  %v2363_v23 = vpop.f32.mrf.mxu0  ;;  %3616 = vmatprep.mubr.f32.mxu1 %v16372_v5  ;;  %7802 = vmatpush1.msra.mxu0 %v6766_v60  ;;  %v6750_v56 = vunpack.c.l.bf16 %v12584_v33  ;;  %v12615_v38 = vld [vmem:[%s16363_s3 + $0x90] sm:$0xff] }
 0x30d   :  { %v5361_v58 = vadd.f32 %v5360_v12, %v4254_v50  ;;  %v4269_v17 = vmax.f32 %v2362_v21, 0.0  ;;  %v2364_v2 = vadd.f32 %v2363_v23, %v12267_v41  ;;  %v2812_v63 = vpop.f32.mrf.mxu1  ;;  %7873 = vmatpush1.msra.mxu1 %v6894_v26  ;;  %7803 = vmatprep.subr.mxu0 %v6763_v0  ;;  %v10194_v12 = vld [vmem:[%s16360_s0 + $0x10] sm:$0xff]  ;;  %v12601_v26 = vld [vmem:[%s16363_s3 + $0x2a0] sm:$0xff] }
 0x30e   :  { %v5435_v60 = vadd.f32 %v5434_v43, %v4256_v37  ;;  %v4271_v16 = vmax.f32 %v2811_v35, 0.0  ;;  %v2813_v18 = vadd.f32 %v2812_v63, %v12275_v13  ;;  %v2367_v49 = vpop.f32.mrf.mxu0  ;;  %9700 = vmatmul.mubr.msk.f32.gmra.mxu0 %vm204_vm0, %v10194_v12  ;;  %7874 = vmatprep.subr.mxu1 %v6891_v61  ;;  %v6878_v42 = vunpack.c.l.bf16 %v12601_v26 }
 0x30f   :  { %v5325_v0 = vadd.f32 %v5324_v45, %v4269_v17  ;;  %v4270_v43 = vmax.f32 %v2364_v2, 0.0  ;;  %v2368_v44 = vadd.f32 %v2367_v49, %v12231_v32  ;;  %v2816_v54 = vpop.f32.mrf.mxu1  ;;  %9764 = vmatmul.mubr.msk.f32.gmra.mxu1 %vm204_vm0, %v10194_v12  ;;  %3173 = vmatprep.mubr.f32.mxu0 %v16372_v5  ;;  %v6751_v45 = vunpack.c.h.bf16 %v12584_v33 }
 0x310   :  { %v5399_v29 = vadd.f32 %v5398_v20, %v4271_v16  ;;  %v4272_v61 = vmax.f32 %v2813_v18, 0.0  ;;  %v2817_v50 = vadd.f32 %v2816_v54, %v12259_v53  ;;  %v2369_v21 = vpop.f32.mrf.mxu0  ;;  %3622 = vmatprep.mubr.f32.mxu1 %v16372_v5  ;;  %7804 = vmatpush1.msra.mxu0 %v6762_v31  ;;  %v6879_v14 = vunpack.c.h.bf16 %v12601_v26  ;;  %v12646_v54 = vld [vmem:[%s16363_s3 + $0x80] sm:$0xff] }
 0x311   :  { %v5362_v37 = vadd.f32 %v5361_v58, %v4270_v43  ;;  %v4285_v35 = vmax.f32 %v2368_v44, 0.0  ;;  %v2370_v20 = vadd.f32 %v2369_v21, %v12267_v41  ;;  %v2818_v23 = vpop.f32.mrf.mxu1  ;;  %7875 = vmatpush1.msra.mxu1 %v6890_v59  ;;  %7805 = vmatprep.subr.mxu0 %v6759_v11  ;;  %v10195_v58 = vld [vmem:[%s16360_s0 + $0x18] sm:$0xff]  ;;  %v12632_v59 = vld [vmem:[%s16363_s3 + $0x290] sm:$0xff]  ;;  %v6746_v49 = vunpack.c.l.bf16 %v12615_v38 }
 0x312   :  { %v5436_v31 = vadd.f32 %v5435_v60, %v4272_v61  ;;  %v4287_v17 = vmax.f32 %v2817_v50, 0.0  ;;  %v2819_v2 = vadd.f32 %v2818_v23, %v12275_v13  ;;  %v2373_v63 = vpop.f32.mrf.mxu0  ;;  %9701 = vmatmul.mubr.msk.f32.gmra.mxu0 %vm204_vm0, %v10195_v58  ;;  %7876 = vmatprep.subr.mxu1 %v6887_v34  ;;  %v6874_v46 = vunpack.c.l.bf16 %v12632_v59 }
 0x313   :  { %v5326_v11 = vadd.f32 %v5325_v0, %v4285_v35  ;;  %v4286_v60 = vmax.f32 %v2370_v20, 0.0  ;;  %v2374_v16 = vadd.f32 %v2373_v63, %v12231_v32  ;;  %v2822_v18 = vpop.f32.mrf.mxu1  ;;  %9765 = vmatmul.mubr.msk.f32.gmra.mxu1 %vm204_vm0, %v10195_v58  ;;  %3179 = vmatprep.mubr.f32.mxu0 %v16372_v5  ;;  %v6747_v0 = vunpack.c.h.bf16 %v12615_v38 }
 0x314   :  { %v5400_v12 = vadd.f32 %v5399_v29, %v4287_v17  ;;  %v4288_v34 = vmax.f32 %v2819_v2, 0.0  ;;  %v2823_v43 = vadd.f32 %v2822_v18, %v12259_v53  ;;  %v2375_v44 = vpop.f32.mrf.mxu0  ;;  %3628 = vmatprep.mubr.f32.mxu1 %v16372_v5  ;;  %7806 = vmatpush1.msra.mxu0 %v6758_v10  ;;  %v6875_v40 = vunpack.c.h.bf16 %v12632_v59  ;;  %v12677_v18 = vld [vmem:[%s16363_s3 + $0x70] sm:$0xff] }
 0x315   :  { %v5363_v61 = vadd.f32 %v5362_v37, %v4286_v60  ;;  %v4301_v50 = vmax.f32 %v2374_v16, 0.0  ;;  %v2376_v29 = vadd.f32 %v2375_v44, %v12267_v41  ;;  %v2824_v21 = vpop.f32.mrf.mxu1  ;;  %7877 = vmatpush1.msra.mxu1 %v6886_v62  ;;  %7807 = vmatprep.subr.mxu0 %v6755_v25  ;;  %v10196_v37 = vld [vmem:[%s16360_s0 + $0x20] sm:$0xff]  ;;  %v6742_v63 = vunpack.c.l.bf16 %v12646_v54 }
 0x316   :  { %v5437_v10 = vadd.f32 %v5436_v31, %v4288_v34  ;;  %v4303_v35 = vmax.f32 %v2823_v43, 0.0  ;;  %v2825_v20 = vadd.f32 %v2824_v21, %v12275_v13  ;;  %v2379_v23 = vpop.f32.mrf.mxu0  ;;  %9702 = vmatmul.mubr.msk.f32.gmra.mxu0 %vm204_vm0, %v10196_v37  ;;  %7878 = vmatprep.subr.mxu1 %v6883_v6  ;;  %v12663_v62 = vld [vmem:[%s16363_s3 + $0x280] sm:$0xff] }
 0x317   :  { %v5327_v25 = vadd.f32 %v5326_v11, %v4301_v50  ;;  %v4302_v31 = vmax.f32 %v2376_v29, 0.0  ;;  %v2380_v17 = vadd.f32 %v2379_v23, %v12231_v32  ;;  %v2828_v2 = vpop.f32.mrf.mxu1  ;;  %9766 = vmatmul.mubr.msk.f32.gmra.mxu1 %vm204_vm0, %v10196_v37  ;;  %3185 = vmatprep.mubr.f32.mxu0 %v16372_v5  ;;  %v6743_v11 = vunpack.c.h.bf16 %v12646_v54 }
 0x318   :  { %v5401_v58 = vadd.f32 %v5400_v12, %v4303_v35  ;;  %v4304_v6 = vmax.f32 %v2825_v20, 0.0  ;;  %v2829_v60 = vadd.f32 %v2828_v2, %v12259_v53  ;;  %v2381_v16 = vpop.f32.mrf.mxu0  ;;  %3634 = vmatprep.mubr.f32.mxu1 %v16372_v5  ;;  %7808 = vmatpush1.msra.mxu0 %v6754_v39  ;;  %v6870_v22 = vunpack.c.l.bf16 %v12663_v62  ;;  %v12708_v2 = vld [vmem:[%s16363_s3 + $0x60] sm:$0xff] }
 0x319   :  { %v5364_v34 = vadd.f32 %v5363_v61, %v4302_v31  ;;  %v4317_v43 = vmax.f32 %v2380_v17, 0.0  ;;  %v2382_v12 = vadd.f32 %v2381_v16, %v12267_v41  ;;  %v2830_v44 = vpop.f32.mrf.mxu1  ;;  %7879 = vmatpush1.msra.mxu1 %v6882_v15  ;;  %7809 = vmatprep.subr.mxu0 %v6751_v45  ;;  %v10197_v61 = vld [vmem:[%s16360_s0 + $0x28] sm:$0xff]  ;;  %v6871_v55 = vunpack.c.h.bf16 %v12663_v62  ;;  %v12694_v15 = vld [vmem:[%s16363_s3 + $0x270] sm:$0xff] }
 0x31a   :  { %v5438_v39 = vadd.f32 %v5437_v10, %v4304_v6  ;;  %v4319_v50 = vmax.f32 %v2829_v60, 0.0  ;;  %v2831_v29 = vadd.f32 %v2830_v44, %v12275_v13  ;;  %v2385_v21 = vpop.f32.mrf.mxu0  ;;  %9703 = vmatmul.mubr.msk.f32.gmra.mxu0 %vm204_vm0, %v10197_v61  ;;  %7880 = vmatprep.subr.mxu1 %v6879_v14  ;;  %v6738_v23 = vunpack.c.l.bf16 %v12677_v18 }
 0x31b   :  { %v5328_v45 = vadd.f32 %v5327_v25, %v4317_v43  ;;  %v4318_v10 = vmax.f32 %v2382_v12, 0.0  ;;  %v2386_v35 = vadd.f32 %v2385_v21, %v12231_v32  ;;  %v2834_v20 = vpop.f32.mrf.mxu1  ;;  %9767 = vmatmul.mubr.msk.f32.gmra.mxu1 %vm204_vm0, %v10197_v61  ;;  %3191 = vmatprep.mubr.f32.mxu0 %v16372_v5  ;;  %v6739_v25 = vunpack.c.h.bf16 %v12677_v18 }
 0x31c   :  { %v5402_v37 = vadd.f32 %v5401_v58, %v4319_v50  ;;  %v4320_v14 = vmax.f32 %v2831_v29, 0.0  ;;  %v2835_v31 = vadd.f32 %v2834_v20, %v12259_v53  ;;  %v2387_v17 = vpop.f32.mrf.mxu0  ;;  %3640 = vmatprep.mubr.f32.mxu1 %v16372_v5  ;;  %7810 = vmatpush1.msra.mxu0 %v6750_v56  ;;  %v6866_v33 = vunpack.c.l.bf16 %v12694_v15  ;;  %v12739_v20 = vld [vmem:[%s16363_s3 + $0x50] sm:$0xff] }
 0x31d   :  { %v5365_v6 = vadd.f32 %v5364_v34, %v4318_v10  ;;  %v4333_v60 = vmax.f32 %v2386_v35, 0.0  ;;  %v2388_v58 = vadd.f32 %v2387_v17, %v12267_v41  ;;  %v2836_v16 = vpop.f32.mrf.mxu1  ;;  %7881 = vmatpush1.msra.mxu1 %v6878_v42  ;;  %7811 = vmatprep.subr.mxu0 %v6747_v0  ;;  %v10198_v34 = vld [vmem:[%s16360_s0 + $0x30] sm:$0xff]  ;;  %v6867_v26 = vunpack.c.h.bf16 %v12694_v15  ;;  %v12725_v42 = vld [vmem:[%s16363_s3 + $0x260] sm:$0xff] }
 0x31e   :  { %v5439_v56 = vadd.f32 %v5438_v39, %v4320_v14  ;;  %v4335_v43 = vmax.f32 %v2835_v31, 0.0  ;;  %v2837_v12 = vadd.f32 %v2836_v16, %v12275_v13  ;;  %v2391_v44 = vpop.f32.mrf.mxu0  ;;  %9704 = vmatmul.mubr.msk.f32.gmra.mxu0 %vm204_vm0, %v10198_v34  ;;  %7882 = vmatprep.subr.mxu1 %v6875_v40  ;;  %v6734_v21 = vunpack.c.l.bf16 %v12708_v2 }
 0x31f   :  { %v5329_v0 = vadd.f32 %v5328_v45, %v4333_v60  ;;  %v4334_v39 = vmax.f32 %v2388_v58, 0.0  ;;  %v2392_v50 = vadd.f32 %v2391_v44, %v12231_v32  ;;  %v2840_v29 = vpop.f32.mrf.mxu1  ;;  %9768 = vmatmul.mubr.msk.f32.gmra.mxu1 %vm204_vm0, %v10198_v34  ;;  %3197 = vmatprep.mubr.f32.mxu0 %v16372_v5  ;;  %v6735_v45 = vunpack.c.h.bf16 %v12708_v2 }
 0x320   :  { %v5403_v61 = vadd.f32 %v5402_v37, %v4335_v43  ;;  %v4336_v40 = vmax.f32 %v2837_v12, 0.0  ;;  %v2841_v10 = vadd.f32 %v2840_v29, %v12259_v53  ;;  %v2393_v35 = vpop.f32.mrf.mxu0  ;;  %3646 = vmatprep.mubr.f32.mxu1 %v16372_v5  ;;  %7812 = vmatpush1.msra.mxu0 %v6746_v49  ;;  %v6862_v38 = vunpack.c.l.bf16 %v12725_v42  ;;  %v12770_v29 = vld [vmem:[%s16363_s3 + $0x40] sm:$0xff] }
 0x321   :  { %v5366_v14 = vadd.f32 %v5365_v6, %v4334_v39  ;;  %v4349_v31 = vmax.f32 %v2392_v50, 0.0  ;;  %v2394_v37 = vadd.f32 %v2393_v35, %v12267_v41  ;;  %v2842_v17 = vpop.f32.mrf.mxu1  ;;  %7883 = vmatpush1.msra.mxu1 %v6874_v46  ;;  %7813 = vmatprep.subr.mxu0 %v6743_v11  ;;  %v10199_v6 = vld [vmem:[%s16360_s0 + $0x38] sm:$0xff]  ;;  %v6863_v59 = vunpack.c.h.bf16 %v12725_v42  ;;  %v12756_v46 = vld [vmem:[%s16363_s3 + $0x250] sm:$0xff] }
 0x322   :  { %v5440_v49 = vadd.f32 %v5439_v56, %v4336_v40  ;;  %v4351_v60 = vmax.f32 %v2841_v10, 0.0  ;;  %v2843_v58 = vadd.f32 %v2842_v17, %v12275_v13  ;;  %v2397_v16 = vpop.f32.mrf.mxu0  ;;  %9705 = vmatmul.mubr.msk.f32.gmra.mxu0 %vm204_vm0, %v10199_v6  ;;  %7884 = vmatprep.subr.mxu1 %v6871_v55  ;;  %v6730_v44 = vunpack.c.l.bf16 %v12739_v20 }
 0x323   :  { %v5330_v11 = vadd.f32 %v5329_v0, %v4349_v31  ;;  %v4350_v56 = vmax.f32 %v2394_v37, 0.0  ;;  %v2398_v43 = vadd.f32 %v2397_v16, %v12231_v32  ;;  %v2846_v12 = vpop.f32.mrf.mxu1  ;;  %9769 = vmatmul.mubr.msk.f32.gmra.mxu1 %vm204_vm0, %v10199_v6  ;;  %3203 = vmatprep.mubr.f32.mxu0 %v16372_v5  ;;  %v6731_v0 = vunpack.c.h.bf16 %v12739_v20 }
 0x324   :  { %v5404_v34 = vadd.f32 %v5403_v61, %v4351_v60  ;;  %v4352_v55 = vmax.f32 %v2843_v58, 0.0  ;;  %v2847_v39 = vadd.f32 %v2846_v12, %v12259_v53  ;;  %v2399_v50 = vpop.f32.mrf.mxu0  ;;  %3652 = vmatprep.mubr.f32.mxu1 %v16372_v5  ;;  %7814 = vmatpush1.msra.mxu0 %v6742_v63  ;;  %v6858_v54 = vunpack.c.l.bf16 %v12756_v46  ;;  %v12801_v12 = vld [vmem:[%s16363_s3 + $0x30] sm:$0xff] }
 0x325   :  { %v5367_v40 = vadd.f32 %v5366_v14, %v4350_v56  ;;  %v4365_v10 = vmax.f32 %v2398_v43, 0.0  ;;  %v2400_v61 = vadd.f32 %v2399_v50, %v12267_v41  ;;  %v2848_v35 = vpop.f32.mrf.mxu1  ;;  %7885 = vmatpush1.msra.mxu1 %v6870_v22  ;;  %7815 = vmatprep.subr.mxu0 %v6739_v25  ;;  %v10200_v14 = vld [vmem:[%s16360_s0 + $0x40] sm:$0xff]  ;;  %v6859_v62 = vunpack.c.h.bf16 %v12756_v46 }
 0x326   :  { %v5441_v63 = vadd.f32 %v5440_v49, %v4352_v55  ;;  %v4367_v31 = vmax.f32 %v2847_v39, 0.0  ;;  %v2849_v37 = vadd.f32 %v2848_v35, %v12275_v13  ;;  %v2403_v17 = vpop.f32.mrf.mxu0  ;;  %9706 = vmatmul.mubr.msk.f32.gmra.mxu0 %vm204_vm0, %v10200_v14  ;;  %7886 = vmatprep.subr.mxu1 %v6867_v26  ;;  %v12787_v22 = vld [vmem:[%s16363_s3 + $0x240] sm:$0xff]  ;;  %v6726_v16 = vunpack.c.l.bf16 %v12770_v29 }
 0x327   :  { %v5331_v25 = vadd.f32 %v5330_v11, %v4365_v10  ;;  %v4366_v49 = vmax.f32 %v2400_v61, 0.0  ;;  %v2404_v60 = vadd.f32 %v2403_v17, %v12231_v32  ;;  %v2852_v58 = vpop.f32.mrf.mxu1  ;;  %9770 = vmatmul.mubr.msk.f32.gmra.mxu1 %vm204_vm0, %v10200_v14  ;;  %3209 = vmatprep.mubr.f32.mxu0 %v16372_v5  ;;  %v6727_v11 = vunpack.c.h.bf16 %v12770_v29 }
 0x328   :  { %v5405_v6 = vadd.f32 %v5404_v34, %v4367_v31  ;;  %v4368_v26 = vmax.f32 %v2849_v37, 0.0  ;;  %v2853_v56 = vadd.f32 %v2852_v58, %v12259_v53  ;;  %v2405_v43 = vpop.f32.mrf.mxu0  ;;  %3658 = vmatprep.mubr.f32.mxu1 %v16372_v5  ;;  %7816 = vmatpush1.msra.mxu0 %v6738_v23  ;;  %v6854_v18 = vunpack.c.l.bf16 %v12787_v22  ;;  %v12832_v58 = vld [vmem:[%s16363_s3 + $0x20] sm:$0xff] }
 0x329   :  { %v5368_v55 = vadd.f32 %v5367_v40, %v4366_v49  ;;  %v4381_v39 = vmax.f32 %v2404_v60, 0.0  ;;  %v2406_v34 = vadd.f32 %v2405_v43, %v12267_v41  ;;  %v2854_v50 = vpop.f32.mrf.mxu1  ;;  %7887 = vmatpush1.msra.mxu1 %v6866_v33  ;;  %7817 = vmatprep.subr.mxu0 %v6735_v45  ;;  %v10201_v40 = vld [vmem:[%s16360_s0 + $0x48] sm:$0xff]  ;;  %v6855_v15 = vunpack.c.h.bf16 %v12787_v22  ;;  %v12818_v33 = vld [vmem:[%s16363_s3 + $0x230] sm:$0xff] }
 0x32a   :  { %v5442_v23 = vadd.f32 %v5441_v63, %v4368_v26  ;;  %v4383_v10 = vmax.f32 %v2853_v56, 0.0  ;;  %v2855_v61 = vadd.f32 %v2854_v50, %v12275_v13  ;;  %v2409_v35 = vpop.f32.mrf.mxu0  ;;  %9707 = vmatmul.mubr.msk.f32.gmra.mxu0 %vm204_vm0, %v10201_v40  ;;  %7888 = vmatprep.subr.mxu1 %v6863_v59  ;;  %v6722_v17 = vunpack.c.l.bf16 %v12801_v12 }
 0x32b   :  { %v5332_v45 = vadd.f32 %v5331_v25, %v4381_v39  ;;  %v4382_v63 = vmax.f32 %v2406_v34, 0.0  ;;  %v2410_v31 = vadd.f32 %v2409_v35, %v12231_v32  ;;  %v2858_v37 = vpop.f32.mrf.mxu1  ;;  %9771 = vmatmul.mubr.msk.f32.gmra.mxu1 %vm204_vm0, %v10201_v40  ;;  %3215 = vmatprep.mubr.f32.mxu0 %v16372_v5  ;;  %v6723_v25 = vunpack.c.h.bf16 %v12801_v12 }
 0x32c   :  { %v5406_v14 = vadd.f32 %v5405_v6, %v4383_v10  ;;  %v4384_v59 = vmax.f32 %v2855_v61, 0.0  ;;  %v2859_v49 = vadd.f32 %v2858_v37, %v12259_v53  ;;  %v2411_v60 = vpop.f32.mrf.mxu0  ;;  %3664 = vmatprep.mubr.f32.mxu1 %v16372_v5  ;;  %7818 = vmatpush1.msra.mxu0 %v6734_v21  ;;  %v6850_v2 = vunpack.c.l.bf16 %v12818_v33  ;;  %v12863_v37 = vld [vmem:[%s16363_s3 + $0x10] sm:$0xff] }
 0x32d   :  { %v5369_v26 = vadd.f32 %v5368_v55, %v4382_v63  ;;  %v4397_v56 = vmax.f32 %v2410_v31, 0.0  ;;  %v2412_v6 = vadd.f32 %v2411_v60, %v12267_v41  ;;  %v2860_v43 = vpop.f32.mrf.mxu1  ;;  %7889 = vmatpush1.msra.mxu1 %v6862_v38  ;;  %7819 = vmatprep.subr.mxu0 %v6731_v0  ;;  %v10202_v55 = vld [vmem:[%s16360_s0 + $0x50] sm:$0xff]  ;;  %v6851_v42 = vunpack.c.h.bf16 %v12818_v33  ;;  %v12849_v38 = vld [vmem:[%s16363_s3 + $0x220] sm:$0xff] }
 0x32e   :  { %v5443_v21 = vadd.f32 %v5442_v23, %v4384_v59  ;;  %v4399_v39 = vmax.f32 %v2859_v49, 0.0  ;;  %v2861_v34 = vadd.f32 %v2860_v43, %v12275_v13  ;;  %v2415_v50 = vpop.f32.mrf.mxu0  ;;  %9708 = vmatmul.mubr.msk.f32.gmra.mxu0 %vm204_vm0, %v10202_v55  ;;  %7890 = vmatprep.subr.mxu1 %v6859_v62  ;;  %v6718_v35 = vunpack.c.l.bf16 %v12832_v58 }
 0x32f   :  { %v5333_v0 = vadd.f32 %v5332_v45, %v4397_v56  ;;  %v4398_v23 = vmax.f32 %v2412_v6, 0.0  ;;  %v2416_v10 = vadd.f32 %v2415_v50, %v12231_v32  ;;  %v2864_v61 = vpop.f32.mrf.mxu1  ;;  %9772 = vmatmul.mubr.msk.f32.gmra.mxu1 %vm204_vm0, %v10202_v55  ;;  %3221 = vmatprep.mubr.f32.mxu0 %v16372_v5  ;;  %v6719_v45 = vunpack.c.h.bf16 %v12832_v58 }
 0x330   :  { %v5407_v40 = vadd.f32 %v5406_v14, %v4399_v39  ;;  %v4400_v62 = vmax.f32 %v2861_v34, 0.0  ;;  %v2865_v63 = vadd.f32 %v2864_v61, %v12259_v53  ;;  %v2417_v31 = vpop.f32.mrf.mxu0  ;;  %3670 = vmatprep.mubr.f32.mxu1 %v16372_v5  ;;  %7820 = vmatpush1.msra.mxu0 %v6730_v44  ;;  %v6846_v20 = vunpack.c.l.bf16 %v12849_v38  ;;  %v12894_v61 = vld [vmem:[%s16363_s3] sm:$0xff] }
 0x331   :  { %v5370_v59 = vadd.f32 %v5369_v26, %v4398_v23  ;;  %v4413_v49 = vmax.f32 %v2416_v10, 0.0  ;;  %v2418_v14 = vadd.f32 %v2417_v31, %v12267_v41  ;;  %v2866_v60 = vpop.f32.mrf.mxu1  ;;  %7891 = vmatpush1.msra.mxu1 %v6858_v54  ;;  %7821 = vmatprep.subr.mxu0 %v6727_v11  ;;  %v10203_v26 = vld [vmem:[%s16360_s0 + $0x58] sm:$0xff]  ;;  %v6847_v46 = vunpack.c.h.bf16 %v12849_v38  ;;  %v12880_v54 = vld [vmem:[%s16363_s3 + $0x210] sm:$0xff] }
 0x332   :  { %v5444_v44 = vadd.f32 %v5443_v21, %v4400_v62  ;;  %v4415_v56 = vmax.f32 %v2865_v63, 0.0  ;;  %v2867_v6 = vadd.f32 %v2866_v60, %v12275_v13  ;;  %v2421_v43 = vpop.f32.mrf.mxu0  ;;  %9709 = vmatmul.mubr.msk.f32.gmra.mxu0 %vm204_vm0, %v10203_v26  ;;  %7892 = vmatprep.subr.mxu1 %v6855_v15  ;;  %v6714_v50 = vunpack.c.l.bf16 %v12863_v37 }
 0x333   :  { %v5334_v11 = vadd.f32 %v5333_v0, %v4413_v49  ;;  %v4414_v21 = vmax.f32 %v2418_v14, 0.0  ;;  %v2422_v39 = vadd.f32 %v2421_v43, %v12231_v32  ;;  %v2870_v34 = vpop.f32.mrf.mxu1  ;;  %9773 = vmatmul.mubr.msk.f32.gmra.mxu1 %vm204_vm0, %v10203_v26  ;;  %3227 = vmatprep.mubr.f32.mxu0 %v16372_v5  ;;  %v6715_v0 = vunpack.c.h.bf16 %v12863_v37 }
 0x334   :  { %v5408_v55 = vadd.f32 %v5407_v40, %v4415_v56  ;;  %v4416_v15 = vmax.f32 %v2867_v6, 0.0  ;;  %v2871_v23 = vadd.f32 %v2870_v34, %v12259_v53  ;;  %v2423_v10 = vpop.f32.mrf.mxu0  ;;  %3676 = vmatprep.mubr.f32.mxu1 %v16372_v5  ;;  %7822 = vmatpush1.msra.mxu0 %v6726_v16  ;;  %v6842_v29 = vunpack.c.l.bf16 %v12880_v54  ;;  %v12925_v34 = vld [vmem:[%s16363_s3 + $0x1f0] sm:$0xff] }
 0x335   :  { %v5371_v62 = vadd.f32 %v5370_v59, %v4414_v21  ;;  %v4429_v63 = vmax.f32 %v2422_v39, 0.0  ;;  %v2424_v40 = vadd.f32 %v2423_v10, %v12267_v41  ;;  %v2872_v31 = vpop.f32.mrf.mxu1  ;;  %7893 = vmatpush1.msra.mxu1 %v6854_v18  ;;  %7823 = vmatprep.subr.mxu0 %v6723_v25  ;;  %v10204_v59 = vld [vmem:[%s16360_s0 + $0x60] sm:$0xff]  ;;  %v6843_v22 = vunpack.c.h.bf16 %v12880_v54 }
 0x336   :  { %v5445_v16 = vadd.f32 %v5444_v44, %v4416_v15  ;;  %v4431_v49 = vmax.f32 %v2871_v23, 0.0  ;;  %v2873_v14 = vadd.f32 %v2872_v31, %v12275_v13  ;;  %v2427_v60 = vpop.f32.mrf.mxu0  ;;  %9710 = vmatmul.mubr.msk.f32.gmra.mxu0 %vm204_vm0, %v10204_v59  ;;  %7894 = vmatprep.subr.mxu1 %v6851_v42  ;;  %v12911_v18 = vld [vmem:[%s16363_s3 + $0x200] sm:$0xff]  ;;  %v6710_v43 = vunpack.c.l.bf16 %v12894_v61 }
 0x337   :  { %v5335_v25 = vadd.f32 %v5334_v11, %v4429_v63  ;;  %v4430_v44 = vmax.f32 %v2424_v40, 0.0  ;;  %v2428_v56 = vadd.f32 %v2427_v60, %v12231_v32  ;;  %v2876_v6 = vpop.f32.mrf.mxu1  ;;  %9774 = vmatmul.mubr.msk.f32.gmra.mxu1 %vm204_vm0, %v10204_v59  ;;  %3233 = vmatprep.mubr.f32.mxu0 %v16372_v5  ;;  %v6711_v11 = vunpack.c.h.bf16 %v12894_v61 }
 0x338   :  { %v5409_v26 = vadd.f32 %v5408_v55, %v4431_v49  ;;  %v4432_v42 = vmax.f32 %v2873_v14, 0.0  ;;  %v2877_v21 = vadd.f32 %v2876_v6, %v12259_v53  ;;  %v2429_v39 = vpop.f32.mrf.mxu0  ;;  %3682 = vmatprep.mubr.f32.mxu1 %v16372_v5  ;;  %7824 = vmatpush1.msra.mxu0 %v6722_v17  ;;  %v6838_v12 = vunpack.c.l.bf16 %v12911_v18  ;;  %v12956_v6 = vld [vmem:[%s16363_s3 + $0x1e0] sm:$0xff] }
 0x339   :  { %v5372_v15 = vadd.f32 %v5371_v62, %v4430_v44  ;;  %v4445_v23 = vmax.f32 %v2428_v56, 0.0  ;;  %v2430_v55 = vadd.f32 %v2429_v39, %v12267_v41  ;;  %v2878_v10 = vpop.f32.mrf.mxu1  ;;  %7895 = vmatpush1.msra.mxu1 %v6850_v2  ;;  %7825 = vmatprep.subr.mxu0 %v6719_v45  ;;  %v10205_v62 = vld [vmem:[%s16360_s0 + $0x68] sm:$0xff]  ;;  %v6839_v33 = vunpack.c.h.bf16 %v12911_v18  ;;  %v12942_v2 = vld [vmem:[%s16363_s3 + $0x3f0] sm:$0xff]  ;;  %v10208_v18 = vld [vmem:[%s16360_s0 + $0x80] sm:$0xff] }
 0x33a   :  { %v5446_v17 = vadd.f32 %v5445_v16, %v4432_v42  ;;  %v4447_v63 = vmax.f32 %v2877_v21, 0.0  ;;  %v2879_v40 = vadd.f32 %v2878_v10, %v12275_v13  ;;  %v2433_v31 = vpop.f32.mrf.mxu0  ;;  %9711 = vmatmul.mubr.msk.f32.gmra.mxu0 %vm204_vm0, %v10205_v62  ;;  %7896 = vmatprep.subr.mxu1 %v6847_v46  ;;  %v6834_v60 = vunpack.c.l.bf16 %v12925_v34 }
 0x33b   :  { %v5336_v45 = vadd.f32 %v5335_v25, %v4445_v23  ;;  %v4446_v16 = vmax.f32 %v2430_v55, 0.0  ;;  %v2434_v49 = vadd.f32 %v2433_v31, %v12231_v32  ;;  %v2882_v14 = vpop.f32.mrf.mxu1  ;;  %9775 = vmatmul.mubr.msk.f32.gmra.mxu1 %vm204_vm0, %v10205_v62  ;;  %3239 = vmatprep.mubr.f32.mxu0 %v16372_v5  ;;  %v6835_v25 = vunpack.c.h.bf16 %v12925_v34 }
 0x33c   :  { %v5410_v59 = vadd.f32 %v5409_v26, %v4447_v63  ;;  %v4448_v46 = vmax.f32 %v2879_v40, 0.0  ;;  %v2883_v44 = vadd.f32 %v2882_v14, %v12259_v53  ;;  %v2435_v56 = vpop.f32.mrf.mxu0  ;;  %3688 = vmatprep.mubr.f32.mxu1 %v16372_v5  ;;  %7826 = vmatpush1.msra.mxu0 %v6718_v35  ;;  %v6962_v58 = vunpack.c.l.bf16 %v12942_v2  ;;  %v12987_v14 = vld [vmem:[%s16363_s3 + $0x1d0] sm:$0xff] }
 0x33d   :  { %v5373_v42 = vadd.f32 %v5372_v15, %v4446_v16  ;;  %v4461_v21 = vmax.f32 %v2434_v49, 0.0  ;;  %v2436_v26 = vadd.f32 %v2435_v56, %v12267_v41  ;;  %v2884_v39 = vpop.f32.mrf.mxu1  ;;  %7897 = vmatpush1.msra.mxu1 %v6846_v20  ;;  %7827 = vmatprep.subr.mxu0 %v6715_v0  ;;  %v10206_v15 = vld [vmem:[%s16360_s0 + $0x70] sm:$0xff]  ;;  %v6963_v38 = vunpack.c.h.bf16 %v12942_v2  ;;  %v12973_v20 = vld [vmem:[%s16363_s3 + $0x3e0] sm:$0xff]  ;;  %v10209_v2 = vld [vmem:[%s16360_s0 + $0x88] sm:$0xff] }
 0x33e   :  { %v5447_v35 = vadd.f32 %v5446_v17, %v4448_v46  ;;  %v4463_v23 = vmax.f32 %v2883_v44, 0.0  ;;  %v2885_v55 = vadd.f32 %v2884_v39, %v12275_v13  ;;  %v2439_v10 = vpop.f32.mrf.mxu0  ;;  %9712 = vmatmul.mubr.msk.f32.gmra.mxu0 %vm204_vm0, %v10206_v15  ;;  %7898 = vmatprep.subr.mxu1 %v6843_v22  ;;  %v6830_v31 = vunpack.c.l.bf16 %v12956_v6 }
 0x33f   :  { %v5337_v0 = vadd.f32 %v5336_v45, %v4461_v21  ;;  %v4462_v17 = vmax.f32 %v2436_v26, 0.0  ;;  %v2440_v63 = vadd.f32 %v2439_v10, %v12231_v32  ;;  %v2888_v40 = vpop.f32.mrf.mxu1  ;;  %9776 = vmatmul.mubr.msk.f32.gmra.mxu1 %vm204_vm0, %v10206_v15  ;;  %3245 = vmatprep.mubr.f32.mxu0 %v16372_v5  ;;  %v6831_v45 = vunpack.c.h.bf16 %v12956_v6 }
 0x340   :  { %v5411_v62 = vadd.f32 %v5410_v59, %v4463_v23  ;;  %v4464_v22 = vmax.f32 %v2885_v55, 0.0  ;;  %v2889_v16 = vadd.f32 %v2888_v40, %v12259_v53  ;;  %v2441_v49 = vpop.f32.mrf.mxu0  ;;  %3694 = vmatprep.mubr.f32.mxu1 %v16372_v5  ;;  %7828 = vmatpush1.msra.mxu0 %v6714_v50  ;;  %v6958_v37 = vunpack.c.l.bf16 %v12973_v20  ;;  %v13018_v40 = vld [vmem:[%s16363_s3 + $0x1c0] sm:$0xff] }
 0x341   :  { %v5374_v46 = vadd.f32 %v5373_v42, %v4462_v17  ;;  %v4477_v44 = vmax.f32 %v2440_v63, 0.0  ;;  %v2442_v59 = vadd.f32 %v2441_v49, %v12267_v41  ;;  %v2890_v56 = vpop.f32.mrf.mxu1  ;;  %7899 = vmatpush1.msra.mxu1 %v6842_v29  ;;  %7829 = vmatprep.subr.mxu0 %v6711_v11  ;;  %v10207_v42 = vld [vmem:[%s16360_s0 + $0x78] sm:$0xff]  ;;  %v6959_v54 = vunpack.c.h.bf16 %v12973_v20  ;;  %v13004_v29 = vld [vmem:[%s16363_s3 + $0x3d0] sm:$0xff] }
 0x342   :  { %v5448_v50 = vadd.f32 %v5447_v35, %v4464_v22  ;;  %v4479_v21 = vmax.f32 %v2889_v16, 0.0  ;;  %v2891_v26 = vadd.f32 %v2890_v56, %v12275_v13  ;;  %v2445_v39 = vpop.f32.mrf.mxu0  ;;  %9713 = vmatmul.mubr.msk.f32.gmra.mxu0 %vm204_vm0, %v10207_v42  ;;  %7900 = vmatprep.subr.mxu1 %v6839_v33  ;;  %v6826_v10 = vunpack.c.l.bf16 %v12987_v14 }
 0x343   :  { %v5338_v11 = vadd.f32 %v5337_v0, %v4477_v44  ;;  %v4478_v35 = vmax.f32 %v2442_v59, 0.0  ;;  %v2446_v23 = vadd.f32 %v2445_v39, %v12231_v32  ;;  %v2894_v55 = vpop.f32.mrf.mxu1  ;;  %9777 = vmatmul.mubr.msk.f32.gmra.mxu1 %vm204_vm0, %v10207_v42  ;;  %3251 = vmatprep.mubr.f32.mxu0 %v16372_v5  ;;  %v6827_v0 = vunpack.c.h.bf16 %v12987_v14 }
 0x344   :  { %v5412_v15 = vadd.f32 %v5411_v62, %v4479_v21  ;;  %v4480_v33 = vmax.f32 %v2891_v26, 0.0  ;;  %v2895_v17 = vadd.f32 %v2894_v55, %v12259_v53  ;;  %v2447_v63 = vpop.f32.mrf.mxu0  ;;  %3700 = vmatprep.mubr.f32.mxu1 %v16372_v5  ;;  %7830 = vmatpush1.msra.mxu0 %v6710_v43  ;;  %v6954_v61 = vunpack.c.l.bf16 %v13004_v29  ;;  %v13029_v43 = vld [vmem:[%s16363_s3 + $0x3c0] sm:$0xff] }
 0x345   :  { %v5375_v22 = vadd.f32 %v5374_v46, %v4478_v35  ;;  %v4493_v16 = vmax.f32 %v2446_v23, 0.0  ;;  %v2448_v62 = vadd.f32 %v2447_v63, %v12267_v41  ;;  %v2896_v49 = vpop.f32.mrf.mxu1  ;;  %7901 = vmatpush1.msra.mxu1 %v6838_v12  ;;  %7831 = vmatprep.subr.mxu0 %v6835_v25  ;;  %v6955_v12 = vunpack.c.h.bf16 %v13004_v29  ;;  %v13040_v25 = vld [vmem:[%s16363_s3 + $0x1b0] sm:$0xff] }
 0x346   :  { %v5449_v44 = vadd.f32 %v5448_v50, %v4480_v33  ;;  %v4495_v59 = vmax.f32 %v2895_v17, 0.0  ;;  %v2897_v46 = vadd.f32 %v2896_v49, %v12275_v13  ;;  %v2451_v56 = vpop.f32.mrf.mxu0  ;;  %9714 = vmatmul.mubr.msk.f32.gmra.mxu0 %vm204_vm0, %v10208_v18  ;;  %7902 = vmatprep.subr.mxu1 %v6963_v38  ;;  %v6822_v39 = vunpack.c.l.bf16 %v13018_v40  ;;  %v13054_v33 = vld [vmem:[%s16363_s3 + $0x3b0] sm:$0xff] }
 0x347   :  { %v5339_v21 = vadd.f32 %v5338_v11, %v4493_v16  ;;  %v4494_v50 = vmax.f32 %v2448_v62, 0.0  ;;  %v2900_v26 = vpop.f32.mrf.mxu1  ;;  %9778 = vmatmul.mubr.msk.f32.gmra.mxu1 %vm204_vm0, %v10208_v18  ;;  %3257 = vmatprep.mubr.f32.mxu0 %v16372_v5  ;;  %v6823_v42 = vunpack.c.h.bf16 %v13018_v40  ;;  %v6950_v11 = vunpack.c.l.bf16 %v13029_v43 }
 0x348   :  { %v5413_v35 = vadd.f32 %v5412_v15, %v4495_v59  ;;  %v4496_v38 = vmax.f32 %v2897_v46, 0.0  ;;  %v2453_v23 = vpop.f32.mrf.mxu0  ;;  %3706 = vmatprep.mubr.f32.mxu1 %v16372_v5  ;;  %7832 = vmatpush2.msra.mxu0 %v6834_v60  ;;  %v6951_v55 = vunpack.c.h.bf16 %v13029_v43  ;;  %v2452_v63 = vadd.f32 %v2451_v56, %v12231_v32  ;;  %v13066_v60 = vld [vmem:[%s16363_s3 + $0x1a0] sm:$0xff] }
 0x349   :  { %v5376_v17 = vadd.f32 %v5375_v22, %v4494_v50  ;;  %v2901_v15 = vadd.f32 %v2900_v26, %v12259_v53  ;;  %v2902_v16 = vpop.f32.mrf.mxu1  ;;  %7903 = vmatpush2.msra.mxu1 %v6962_v58  ;;  %7833 = vmatprep.subr.mxu0 %v6831_v45  ;;  %v6818_v34 = vunpack.c.l.bf16 %v13040_v25  ;;  %v5340_v62 = vrot.slane %v5339_v21, 4 }
 0x34a   :  { %v13068_v22 = vadd.f32 %v5449_v44, %v4496_v38  ;;  %v2454_v49 = vadd.f32 %v2453_v23, %v12267_v41  ;;  %v2457_v59 = vpop.f32.mrf.mxu0  ;;  %9715 = vmatmul.mubr.msk.f32.gmra.mxu0 %vm204_vm0, %v10209_v2  ;;  %7904 = vmatprep.subr.mxu1 %v6959_v54  ;;  %v6819_v58 = vunpack.c.h.bf16 %v13040_v25  ;;  %v5414_v45 = vrot.slane %v5413_v35, 4  ;;  %v10213_v25 = vld [vmem:[%s16360_s0 + $0xa8] sm:$0xff] }
 0x34b   :  { %v2458_v46 = vadd.f32 %v2457_v59, %v12231_v32  ;;  %v2906_v56 = vpop.f32.mrf.mxu1  ;;  %9779 = vmatmul.mubr.msk.f32.gmra.mxu1 %vm204_vm0, %v10209_v2  ;;  %3263 = vmatprep.mubr.f32.mxu0 %v16372_v5  ;;  %v6946_v44 = vunpack.c.l.bf16 %v13054_v33  ;;  %v6947_v18 = vunpack.c.h.bf16 %v13054_v33  ;;  %v5377_v50 = vrot.slane %v5376_v17, 4  ;;  %v6248_v33 = vld [vmem:[%s16363_s3 + $0x190] sm:$0xff] }
 0x34c   :  { %v2903_v26 = vadd.f32 %v2902_v16, %v12275_v13  ;;  %v2907_v38 = vadd.f32 %v2906_v56, %v12259_v53  ;;  %v2459_v54 = vpop.f32.mrf.mxu0  ;;  %3712 = vmatprep.mubr.f32.mxu1 %v16372_v5  ;;  %7834 = vmatpush2.msra.mxu0 %v6830_v31  ;;  %v6814_v23 = vunpack.c.l.bf16 %v13066_v60  ;;  %v4509_v59 = vmax.f32 %v2452_v63, 0.0  ;;  %v10210_v63 = vld [vmem:[%s16360_s0 + $0x90] sm:$0xff] }
 0x34d   :  { %v4511_v2 = vmax.f32 %v2901_v15, 0.0  ;;  %v4525_v57 = vmax.f32 %v2458_v46, 0.0  ;;  %v2460_v19 = vadd.f32 %v2459_v54, %v12267_v41  ;;  %v2908_v24 = vpop.f32.mrf.mxu1  ;;  %7905 = vmatpush2.msra.mxu1 %v6958_v37  ;;  %7835 = vmatprep.subr.mxu0 %v6827_v0  ;;  %v13094_v16 = vadd.f32 %v5340_v62, %v5339_v21 }
 0x34e   :  { %v4510_v56 = vmax.f32 %v2454_v49, 0.0  ;;  %v4527_v47 = vmax.f32 %v2907_v38, 0.0  ;;  %v2909_v6 = vadd.f32 %v2908_v24, %v12275_v13  ;;  %v2463_v31 = vpop.f32.mrf.mxu0  ;;  %9716 = vmatmul.mubr.msk.f32.gmra.mxu0 %vm204_vm0, %v10210_v63  ;;  %7906 = vmatprep.subr.mxu1 %v6955_v12  ;;  %v13101_v15 = vadd.f32 %v5414_v45, %v5413_v35 }
 0x34f   :  { %v5451_v20 = vrot.slane %v13068_v22, 4  ;;  %v5901_v37 = vadd.f32 %v4525_v57, %v4509_v59  ;;  %v4526_v0 = vmax.f32 %v2460_v19, 0.0  ;;  %v2912_v21 = vpop.f32.mrf.mxu1  ;;  %9780 = vmatmul.mubr.msk.f32.gmra.mxu1 %vm204_vm0, %v10210_v63  ;;  %3269 = vmatprep.mubr.f32.mxu0 %v16372_v5  ;;  %v13106_v24 = vadd.f32 %v5377_v50, %v5376_v17 }
 0x350   :  { %v4512_v62 = vmax.f32 %v2903_v26, 0.0  ;;  %v5975_v49 = vadd.f32 %v4527_v47, %v4511_v2  ;;  %v4528_v46 = vmax.f32 %v2909_v6, 0.0  ;;  %v2465_v38 = vpop.f32.mrf.mxu0  ;;  %3718 = vmatprep.mubr.f32.mxu1 %v16372_v5  ;;  %7836 = vmatpush2.msra.mxu0 %v6826_v10  ;;  %v2464_v57 = vadd.f32 %v2463_v31, %v12231_v32  ;;  %v10211_v26 = vld [vmem:[%s16360_s0 + $0x98] sm:$0xff] }
 0x351   :  { %v5938_v12 = vadd.f32 %v4526_v0, %v4510_v56  ;;  %v2913_v19 = vadd.f32 %v2912_v21, %v12259_v53  ;;  %v2914_v35 = vpop.f32.mrf.mxu1  ;;  %7907 = vmatpush2.msra.mxu1 %v6954_v61  ;;  %7837 = vmatprep.subr.mxu0 %v6823_v42  ;;  %v6815_v47 = vunpack.c.h.bf16 %v13066_v60  ;;  %v5342_v17 = vrot.slane %v13094_v16, 2  ;;  %v10214_v60 = vld [vmem:[%s16360_s0 + $0xb0] sm:$0xff] }
 0x352   :  { %v6012_v45 = vadd.f32 %v4528_v46, %v4512_v62  ;;  %v2466_v14 = vadd.f32 %v2465_v38, %v12267_v41  ;;  %v2915_v10 = vadd.f32 %v2914_v35, %v12275_v13  ;;  %v2469_v50 = vpop.f32.mrf.mxu0  ;;  %9717 = vmatmul.mubr.msk.f32.gmra.mxu0 %vm204_vm0, %v10211_v26  ;;  %7908 = vmatprep.subr.mxu1 %v6951_v55  ;;  %v5416_v29 = vrot.slane %v13101_v15, 2 }
 0x353   :  { %v4541_v61 = vmax.f32 %v2464_v57, 0.0  ;;  %v4543_v42 = vmax.f32 %v2913_v19, 0.0  ;;  %v2470_v54 = vadd.f32 %v2469_v50, %v12231_v32  ;;  %v2918_v59 = vpop.f32.mrf.mxu1  ;;  %9781 = vmatmul.mubr.msk.f32.gmra.mxu1 %vm204_vm0, %v10211_v26  ;;  %3275 = vmatprep.mubr.f32.mxu0 %v16372_v5  ;;  %v13132_v2 = vadd.f32 %v5451_v20, %v13068_v22  ;;  %v6314_v22 = vld [vmem:[%s16363_s3 + $0x3a0] sm:$0xff] }
 0x354   :  { %v4542_v56 = vmax.f32 %v2466_v14, 0.0  ;;  %v4544_v6 = vmax.f32 %v2915_v10, 0.0  ;;  %v2919_v31 = vadd.f32 %v2918_v59, %v12259_v53  ;;  %v2471_v63 = vpop.f32.mrf.mxu0  ;;  %3724 = vmatprep.mubr.f32.mxu1 %v16372_v5  ;;  %7838 = vmatpush2.msra.mxu0 %v6822_v39  ;;  %v13154_v43 = vadd.f32 %v5342_v17, %v13094_v16 }
 0x355   :  { %v5902_v55 = vadd.f32 %v5901_v37, %v4541_v61  ;;  %v5976_v0 = vadd.f32 %v5975_v49, %v4543_v42  ;;  %v4557_v21 = vmax.f32 %v2470_v54, 0.0  ;;  %v2472_v62 = vadd.f32 %v2471_v63, %v12267_v41  ;;  %v2920_v46 = vpop.f32.mrf.mxu1  ;;  %7909 = vmatpush2.msra.mxu1 %v6950_v11  ;;  %7839 = vmatprep.subr.mxu0 %v6819_v58  ;;  %v10212_v49 = vld [vmem:[%s16360_s0 + $0xa0] sm:$0xff] }
 0x356   :  { %v5939_v20 = vadd.f32 %v5938_v12, %v4542_v56  ;;  %v6013_v38 = vadd.f32 %v6012_v45, %v4544_v6  ;;  %v4559_v40 = vmax.f32 %v2919_v31, 0.0  ;;  %v2921_v39 = vadd.f32 %v2920_v46, %v12275_v13  ;;  %v2475_v37 = vpop.f32.mrf.mxu0  ;;  %9718 = vmatmul.mubr.msk.f32.gmra.mxu0 %vm204_vm0, %v10212_v49  ;;  %7910 = vmatprep.subr.mxu1 %v6947_v18 }
 0x357   :  { %v5903_v11 = vadd.f32 %v5902_v55, %v4557_v21  ;;  %v4558_v58 = vmax.f32 %v2472_v62, 0.0  ;;  %v2476_v12 = vadd.f32 %v2475_v37, %v12231_v32  ;;  %v2924_v57 = vpop.f32.mrf.mxu1  ;;  %9782 = vmatmul.mubr.msk.f32.gmra.mxu1 %vm204_vm0, %v10212_v49  ;;  %3281 = vmatprep.mubr.f32.mxu0 %v16372_v5  ;;  %v6943_v18 = vunpack.c.h.bf16 %v6314_v22 }
 0x358   :  { %v5977_v19 = vadd.f32 %v5976_v0, %v4559_v40  ;;  %v4560_v35 = vmax.f32 %v2921_v39, 0.0  ;;  %v2925_v45 = vadd.f32 %v2924_v57, %v12259_v53  ;;  %v2477_v14 = vpop.f32.mrf.mxu0  ;;  %3730 = vmatprep.mubr.f32.mxu1 %v16372_v5  ;;  %7840 = vmatpush2.msra.mxu0 %v6818_v34  ;;  %v6942_v26 = vunpack.c.l.bf16 %v6314_v22 }
 0x359   :  { %v5940_v16 = vadd.f32 %v5939_v20, %v4558_v58  ;;  %v4573_v17 = vmax.f32 %v2476_v12, 0.0  ;;  %v2478_v10 = vadd.f32 %v2477_v14, %v12267_v41  ;;  %v2926_v50 = vpop.f32.mrf.mxu1  ;;  %7911 = vmatpush2.msra.mxu1 %v6946_v44  ;;  %7841 = vmatprep.subr.mxu0 %v6815_v47  ;;  %v5379_v61 = vrot.slane %v13106_v24, 2 }
 0x35a   :  { %v6014_v42 = vadd.f32 %v6013_v38, %v4560_v35  ;;  %v4575_v54 = vmax.f32 %v2925_v45, 0.0  ;;  %v2927_v59 = vadd.f32 %v2926_v50, %v12275_v13  ;;  %v2481_v56 = vpop.f32.mrf.mxu0  ;;  %9719 = vmatmul.mubr.msk.f32.gmra.mxu0 %vm204_vm0, %v10213_v25  ;;  %7912 = vmatprep.subr.mxu1 %v6943_v18  ;;  %v13176_v34 = vadd.f32 %v5416_v29, %v13101_v15  ;;  %v6312_v15 = vld [vmem:[%s16363_s3 + $0x390] sm:$0xff]  ;;  %v13201_v35 = vld [vmem:[%s16363_s3 + $0x180] sm:$0xff] }
 0x35b   :  { %v5904_v44 = vadd.f32 %v5903_v11, %v4573_v17  ;;  %v4574_v47 = vmax.f32 %v2478_v10, 0.0  ;;  %v2482_v6 = vadd.f32 %v2481_v56, %v12231_v32  ;;  %v2930_v31 = vpop.f32.mrf.mxu1  ;;  %9783 = vmatmul.mubr.msk.f32.gmra.mxu1 %vm204_vm0, %v10213_v25  ;;  %3287 = vmatprep.mubr.f32.mxu0 %v16372_v5  ;;  %v5453_v63 = vrot.slane %v13132_v2, 2 }
 0x35c   :  { %v5978_v55 = vadd.f32 %v5977_v19, %v4575_v54  ;;  %v4576_v0 = vmax.f32 %v2927_v59, 0.0  ;;  %v2931_v21 = vadd.f32 %v2930_v31, %v12259_v53  ;;  %v2483_v62 = vpop.f32.mrf.mxu0  ;;  %3736 = vmatprep.mubr.f32.mxu1 %v16372_v5  ;;  %7842 = vmatpush2.msra.mxu0 %v6814_v23  ;;  %v6810_v38 = vunpack.c.l.bf16 %v6248_v33  ;;  %v6310_v59 = vld [vmem:[%s16363_s3 + $0x380] sm:$0xff] }
 0x35d   :  { %v5941_v29 = vadd.f32 %v5940_v16, %v4574_v47  ;;  %v4589_v46 = vmax.f32 %v2482_v6, 0.0  ;;  %v2484_v22 = vadd.f32 %v2483_v62, %v12267_v41  ;;  %v2932_v20 = vpop.f32.mrf.mxu1  ;;  %7913 = vmatpush2.msra.mxu1 %v6942_v26  ;;  %v6811_v23 = vunpack.c.h.bf16 %v6248_v33  ;;  %v10215_v47 = vld [vmem:[%s16360_s0 + $0xb8] sm:$0xff] }
 0x35e   :  { %v6015_v40 = vadd.f32 %v6014_v42, %v4576_v0  ;;  %v4591_v39 = vmax.f32 %v2931_v21, 0.0  ;;  %v2933_v37 = vadd.f32 %v2932_v20, %v12275_v13  ;;  %v2487_v49 = vpop.f32.mrf.mxu0  ;;  %9720 = vmatmul.mubr.msk.f32.gmra.mxu0 %vm204_vm0, %v10214_v60  ;;  %v6938_v19 = vunpack.c.l.bf16 %v6312_v15 }
 0x35f   :  { %v5905_v11 = vadd.f32 %v5904_v44, %v4589_v46  ;;  %v4590_v58 = vmax.f32 %v2484_v22, 0.0  ;;  %v2488_v12 = vadd.f32 %v2487_v49, %v12231_v32  ;;  %v2936_v57 = vpop.f32.mrf.mxu1  ;;  %9784 = vmatmul.mubr.msk.f32.gmra.mxu1 %vm204_vm0, %v10214_v60  ;;  %3293 = vmatprep.mubr.f32.mxu0 %v16372_v5  ;;  %v6939_v17 = vunpack.c.h.bf16 %v6312_v15  ;;  %v13223_v15 = vld [vmem:[%s16363_s3 + $0x170] sm:$0xff] }
 0x360   :  { %v5979_v45 = vadd.f32 %v5978_v55, %v4591_v39  ;;  %v4592_v14 = vmax.f32 %v2933_v37, 0.0  ;;  %v2937_v18 = vadd.f32 %v2936_v57, %v12259_v53  ;;  %v2489_v16 = vpop.f32.mrf.mxu0  ;;  %3742 = vmatprep.mubr.f32.mxu1 %v16372_v5  ;;  %7843 = vmatprep.subr.mxu0 %v6811_v23  ;;  %v5344_v10 = vrot.slane %v13154_v43, 1  ;;  %v6308_v23 = vld [vmem:[%s16363_s3 + $0x370] sm:$0xff] }
 0x361   :  { %v5942_v50 = vadd.f32 %v5941_v29, %v4590_v58  ;;  %v4605_v26 = vmax.f32 %v2488_v12, 0.0  ;;  %v2490_v42 = vadd.f32 %v2489_v16, %v12267_v41  ;;  %v2938_v54 = vpop.f32.mrf.mxu1  ;;  %7844 = vmatpush2.msra.mxu0 %v6810_v38  ;;  %7914 = vmatprep.subr.mxu1 %v6939_v17  ;;  %v6807_v6 = vunpack.c.h.bf16 %v13201_v35 }
 0x362   :  { %v6016_v56 = vadd.f32 %v6015_v40, %v4592_v14  ;;  %v4607_v25 = vmax.f32 %v2937_v18, 0.0  ;;  %v2939_v33 = vadd.f32 %v2938_v54, %v12275_v13  ;;  %v2493_v44 = vpop.f32.mrf.mxu0  ;;  %9721 = vmatmul.mubr.msk.f32.gmra.mxu0 %vm204_vm0, %v10215_v47  ;;  %v6806_v62 = vunpack.c.l.bf16 %v13201_v35  ;;  %7915 = vmatpush2.msra.mxu1 %v6938_v19  ;;  %v10216_v19 = vld [vmem:[%s16360_s0 + $0xc0] sm:$0xff] }
 0x363   :  { %v5906_v31 = vadd.f32 %v5905_v11, %v4605_v26  ;;  %v4606_v55 = vmax.f32 %v2490_v42, 0.0  ;;  %v2494_v0 = vadd.f32 %v2493_v44, %v12231_v32  ;;  %v2942_v21 = vpop.f32.mrf.mxu1  ;;  %9785 = vmatmul.mubr.msk.f32.gmra.mxu1 %vm204_vm0, %v10215_v47  ;;  %3299 = vmatprep.mubr.f32.mxu0 %v16372_v5  ;;  %v6935_v38 = vunpack.c.h.bf16 %v6310_v59 }
 0x364   :  { %v5980_v29 = vadd.f32 %v5979_v45, %v4607_v25  ;;  %v4608_v46 = vmax.f32 %v2939_v33, 0.0  ;;  %v2943_v22 = vadd.f32 %v2942_v21, %v12259_v53  ;;  %v2495_v20 = vpop.f32.mrf.mxu0  ;;  %3748 = vmatprep.mubr.f32.mxu1 %v16372_v5  ;;  %7845 = vmatprep.subr.mxu0 %v6807_v6  ;;  %v6934_v60 = vunpack.c.l.bf16 %v6310_v59 }
 0x365   :  { %v5943_v40 = vadd.f32 %v5942_v50, %v4606_v55  ;;  %v4621_v39 = vmax.f32 %v2494_v0, 0.0  ;;  %v2496_v37 = vadd.f32 %v2495_v20, %v12267_v41  ;;  %v2944_v49 = vpop.f32.mrf.mxu1  ;;  %7916 = vmatprep.subr.mxu1 %v6935_v38  ;;  %v6803_v35 = vunpack.c.h.bf16 %v13223_v15  ;;  %v13244_v50 = vld [vmem:[%s16363_s3 + $0x160] sm:$0xff]  ;;  %7846 = vmatpush2.msra.mxu0 %v6806_v62  ;;  %v10217_v62 = vld [vmem:[%s16360_s0 + $0xc8] sm:$0xff] }
 0x366   :  { %v6017_v11 = vadd.f32 %v6016_v56, %v4608_v46  ;;  %v4623_v58 = vmax.f32 %v2943_v22, 0.0  ;;  %v2945_v12 = vadd.f32 %v2944_v49, %v12275_v13  ;;  %v2499_v57 = vpop.f32.mrf.mxu0  ;;  %9722 = vmatmul.mubr.msk.f32.gmra.mxu0 %vm204_vm0, %v10216_v19  ;;  %v6802_v17 = vunpack.c.l.bf16 %v13223_v15  ;;  %7917 = vmatpush2.msra.mxu1 %v6934_v60 }
 0x367   :  { %v5907_v45 = vadd.f32 %v5906_v31, %v4621_v39  ;;  %v4622_v14 = vmax.f32 %v2496_v37, 0.0  ;;  %v2500_v18 = vadd.f32 %v2499_v57, %v12231_v32  ;;  %v2948_v16 = vpop.f32.mrf.mxu1  ;;  %9786 = vmatmul.mubr.msk.f32.gmra.mxu1 %vm204_vm0, %v10216_v19  ;;  %3305 = vmatprep.mubr.f32.mxu0 %v16372_v5  ;;  %v6931_v56 = vunpack.c.h.bf16 %v6308_v23  ;;  %v6306_v31 = vld [vmem:[%s16363_s3 + $0x360] sm:$0xff] }
 0x368   :  { %v5981_v26 = vadd.f32 %v5980_v29, %v4623_v58  ;;  %v4624_v42 = vmax.f32 %v2945_v12, 0.0  ;;  %v2949_v54 = vadd.f32 %v2948_v16, %v12259_v53  ;;  %v2501_v59 = vpop.f32.mrf.mxu0  ;;  %3754 = vmatprep.mubr.f32.mxu1 %v16372_v5  ;;  %7847 = vmatprep.subr.mxu0 %v6803_v35  ;;  %v6930_v6 = vunpack.c.l.bf16 %v6308_v23 }
 0x369   :  { %v5944_v25 = vadd.f32 %v5943_v40, %v4622_v14  ;;  %v4637_v33 = vmax.f32 %v2500_v18, 0.0  ;;  %v2502_v44 = vadd.f32 %v2501_v59, %v12267_v41  ;;  %v2950_v47 = vpop.f32.mrf.mxu1  ;;  %7918 = vmatprep.subr.mxu1 %v6931_v56  ;;  %v6799_v29 = vunpack.c.h.bf16 %v13244_v50  ;;  %7848 = vmatpush2.msra.mxu0 %v6802_v17  ;;  %v10218_v17 = vld [vmem:[%s16360_s0 + $0xd0] sm:$0xff] }
 0x36a   :  { %v6018_v55 = vadd.f32 %v6017_v11, %v4624_v42  ;;  %v4639_v0 = vmax.f32 %v2949_v54, 0.0  ;;  %v2951_v21 = vadd.f32 %v2950_v47, %v12275_v13  ;;  %v2505_v15 = vpop.f32.mrf.mxu0  ;;  %9723 = vmatmul.mubr.msk.f32.gmra.mxu0 %vm204_vm0, %v10217_v62  ;;  %v6798_v40 = vunpack.c.l.bf16 %v13244_v50  ;;  %7919 = vmatpush2.msra.mxu1 %v6930_v6  ;;  %v6240_v50 = vld [vmem:[%s16363_s3 + $0x150] sm:$0xff] }
 0x36b   :  { %v5908_v46 = vadd.f32 %v5907_v45, %v4637_v33  ;;  %v4638_v22 = vmax.f32 %v2502_v44, 0.0  ;;  %v2506_v20 = vadd.f32 %v2505_v15, %v12231_v32  ;;  %v2954_v38 = vpop.f32.mrf.mxu1  ;;  %9787 = vmatmul.mubr.msk.f32.gmra.mxu1 %vm204_vm0, %v10217_v62  ;;  %3311 = vmatprep.mubr.f32.mxu0 %v16372_v5  ;;  %v6927_v23 = vunpack.c.h.bf16 %v6306_v31 }
 0x36c   :  { %v5982_v39 = vadd.f32 %v5981_v26, %v4639_v0  ;;  %v4640_v37 = vmax.f32 %v2951_v21, 0.0  ;;  %v2955_v49 = vadd.f32 %v2954_v38, %v12259_v53  ;;  %v2507_v60 = vpop.f32.mrf.mxu0  ;;  %3760 = vmatprep.mubr.f32.mxu1 %v16372_v5  ;;  %7849 = vmatprep.subr.mxu0 %v6799_v29  ;;  %v6926_v19 = vunpack.c.l.bf16 %v6306_v31  ;;  %v6304_v31 = vld [vmem:[%s16363_s3 + $0x350] sm:$0xff]  ;;  %v10219_v38 = vld [vmem:[%s16360_s0 + $0xd8] sm:$0xff] }
 0x36d   :  { %v5945_v11 = vadd.f32 %v5944_v25, %v4638_v22  ;;  %v4653_v58 = vmax.f32 %v2506_v20, 0.0  ;;  %v2508_v12 = vadd.f32 %v2507_v60, %v12267_v41  ;;  %v2956_v57 = vpop.f32.mrf.mxu1  ;;  %v5418_v35 = vrot.slane %v13176_v34, 1  ;;  %7920 = vmatprep.subr.mxu1 %v6927_v23  ;;  %7850 = vmatpush2.msra.mxu0 %v6798_v40 }
 0x36e   :  { %v6019_v45 = vadd.f32 %v6018_v55, %v4640_v37  ;;  %v4655_v14 = vmax.f32 %v2955_v49, 0.0  ;;  %v2957_v18 = vadd.f32 %v2956_v57, %v12275_v13  ;;  %v2511_v16 = vpop.f32.mrf.mxu0  ;;  %9724 = vmatmul.mubr.msk.f32.gmra.mxu0 %vm204_vm0, %v10218_v17  ;;  %v6794_v56 = vunpack.c.l.bf16 %v6240_v50  ;;  %7921 = vmatpush2.msra.mxu1 %v6926_v19 }
 0x36f   :  { %v5909_v26 = vadd.f32 %v5908_v46, %v4653_v58  ;;  %v4654_v42 = vmax.f32 %v2508_v12, 0.0  ;;  %v2512_v54 = vadd.f32 %v2511_v16, %v12231_v32  ;;  %v2960_v59 = vpop.f32.mrf.mxu1  ;;  %9788 = vmatmul.mubr.msk.f32.gmra.mxu1 %vm204_vm0, %v10218_v17  ;;  %3317 = vmatprep.mubr.f32.mxu0 %v16372_v5  ;;  %v6795_v6 = vunpack.c.h.bf16 %v6240_v50 }
 0x370   :  { %v5983_v25 = vadd.f32 %v5982_v39, %v4655_v14  ;;  %v4656_v33 = vmax.f32 %v2957_v18, 0.0  ;;  %v2961_v44 = vadd.f32 %v2960_v59, %v12259_v53  ;;  %v2513_v47 = vpop.f32.mrf.mxu0  ;;  %3766 = vmatprep.mubr.f32.mxu1 %v16372_v5  ;;  %v6922_v62 = vunpack.c.l.bf16 %v6304_v31  ;;  %v13305_v18 = vld [vmem:[%s16362_s2 + $0x8] sm:$0xff] }
 0x371   :  { %v5946_v55 = vadd.f32 %v5945_v11, %v4654_v42  ;;  %v4669_v0 = vmax.f32 %v2512_v54, 0.0  ;;  %v2514_v21 = vadd.f32 %v2513_v47, %v12267_v41  ;;  %v2962_v15 = vpop.f32.mrf.mxu1  ;;  %7851 = vmatprep.subr.mxu0 %v6795_v6  ;;  %v6923_v40 = vunpack.c.h.bf16 %v6304_v31  ;;  %v10221_v42 = vld [vmem:[%s16360_s0 + $0xe0] sm:$0xff] }
 0x372   :  { %v6020_v29 = vadd.f32 %v6019_v45, %v4656_v33  ;;  %v4671_v46 = vmax.f32 %v2961_v44, 0.0  ;;  %v2963_v22 = vadd.f32 %v2962_v15, %v12275_v13  ;;  %v2517_v20 = vpop.f32.mrf.mxu0  ;;  %9725 = vmatmul.mubr.msk.f32.gmra.mxu0 %vm204_vm0, %v10219_v38  ;;  %v13291_v39 = vadd.f32 %v5344_v10, %v13154_v43 }
 0x373   :  { %v5910_v37 = vadd.f32 %v5909_v26, %v4669_v0  ;;  %v4670_v49 = vmax.f32 %v2514_v21, 0.0  ;;  %v2518_v60 = vadd.f32 %v2517_v20, %v12231_v32  ;;  %v2966_v23 = vpop.f32.mrf.mxu1  ;;  %9789 = vmatmul.mubr.msk.f32.gmra.mxu1 %vm204_vm0, %v10219_v38  ;;  %3323 = vmatprep.mubr.f32.mxu0 %v16372_v5  ;;  %v13297_v11 = vadd.f32 %v5418_v35, %v13176_v34 }
 0x374   :  { %16436 = vst [vmem:[#allocation15_spill] sm:$0xff] %v13291_v39  ;;  %v5984_v58 = vadd.f32 %v5983_v25, %v4671_v46  ;;  %v4672_v12 = vmax.f32 %v2963_v22, 0.0  ;;  %v2967_v57 = vadd.f32 %v2966_v23, %v12259_v53  ;;  %v2519_v19 = vpop.f32.mrf.mxu0  ;;  %3772 = vmatprep.mubr.f32.mxu1 %v16372_v5  ;;  %7852 = vmatpush2.msra.mxu0 %v6794_v56  ;;  %v16438_v34 = vsub.s32 4, %v10673_v1  ;;  %v6238_v56 = vld [vmem:[%s16363_s3 + $0x140] sm:$0xff]  ;;  %v10222_v23 = vld [vmem:[%s16360_s0 + $0xe8] sm:$0xff] }
 0x375   :  { %16437 = vst [vmem:[#allocation16_spill] sm:$0xff] %v13297_v11  ;;  %v5947_v43 = vadd.f32 %v5946_v55, %v4670_v49  ;;  %v4685_v10 = vmax.f32 %v2518_v60, 0.0  ;;  %v2520_v45 = vadd.f32 %v2519_v19, %v12267_v41  ;;  %v2968_v14 = vpop.f32.mrf.mxu1  ;;  %7922 = vmatprep.subr.mxu1 %v6923_v40  ;;  %v16439_v54 = vsub.s32 6, %v10673_v1  ;;  %v10240_v11 = vld [vmem:[%s16360_s0 + $0x178] sm:$0xff] }
 0x376   :  { %v13310_v35 = vrot.slane %v13305_v18, %v16438_v34  ;;  %v6021_v16 = vadd.f32 %v6020_v29, %v4672_v12  ;;  %v4687_v17 = vmax.f32 %v2967_v57, 0.0  ;;  %v2969_v50 = vadd.f32 %v2968_v14, %v12275_v13  ;;  %v2523_v26 = vpop.f32.mrf.mxu0  ;;  %9726 = vmatmul.mubr.msk.f32.gmra.mxu0 %vm204_vm0, %v10221_v42  ;;  %7923 = vmatpush2.msra.mxu1 %v6922_v62  ;;  %v6302_v62 = vld [vmem:[%s16363_s3 + $0x340] sm:$0xff] }
 0x377   :  { %v13320_v59 = vrot.slane %v13305_v18, %v16439_v54  ;;  %v5911_v25 = vadd.f32 %v5910_v37, %v4685_v10  ;;  %v4686_v33 = vmax.f32 %v2520_v45, 0.0  ;;  %v2524_v44 = vadd.f32 %v2523_v26, %v12231_v32  ;;  %v2972_v47 = vpop.f32.mrf.mxu1  ;;  %9790 = vmatmul.mubr.msk.f32.gmra.mxu1 %vm204_vm0, %v10221_v42  ;;  %3329 = vmatprep.mubr.f32.mxu0 %v16372_v5 }
 0x378   :  { %v6790_v6 = vunpack.c.l.bf16 %v6238_v56  ;;  %v5985_v31 = vadd.f32 %v5984_v58, %v4687_v17  ;;  %v4688_v55 = vmax.f32 %v2969_v50, 0.0  ;;  %v2973_v0 = vadd.f32 %v2972_v47, %v12259_v53  ;;  %v2525_v21 = vpop.f32.mrf.mxu0  ;;  %3778 = vmatprep.mubr.f32.mxu1 %v16372_v5  ;;  %v6236_v17 = vld [vmem:[%s16363_s3 + $0x130] sm:$0xff] }
 0x379   :  { %v6791_v15 = vunpack.c.h.bf16 %v6238_v56  ;;  %v5948_v29 = vadd.f32 %v5947_v43, %v4686_v33  ;;  %v4701_v46 = vmax.f32 %v2524_v44, 0.0  ;;  %v2526_v22 = vadd.f32 %v2525_v21, %v12267_v41  ;;  %v2974_v20 = vpop.f32.mrf.mxu1  ;;  %v6300_v50 = vld [vmem:[%s16363_s3 + $0x330] sm:$0xff] }
 0x37a   :  { %v6918_v38 = vunpack.c.l.bf16 %v6302_v62  ;;  %v6022_v40 = vadd.f32 %v6021_v16, %v4688_v55  ;;  %v4703_v37 = vmax.f32 %v2973_v0, 0.0  ;;  %v2975_v49 = vadd.f32 %v2974_v20, %v12275_v13  ;;  %v2529_v60 = vpop.f32.mrf.mxu0  ;;  %9727 = vmatmul.mubr.msk.f32.gmra.mxu0 %vm204_vm0, %v10222_v23 }
 0x37b   :  { %7853 = vmatprep.subr.mxu0 %v6791_v15  ;;  %v6919_v58 = vunpack.c.h.bf16 %v6302_v62  ;;  %v5912_v12 = vadd.f32 %v5911_v25, %v4701_v46  ;;  %v4702_v57 = vmax.f32 %v2526_v22, 0.0  ;;  %v2530_v19 = vadd.f32 %v2529_v60, %v12231_v32  ;;  %v2978_v43 = vpop.f32.mrf.mxu1  ;;  %9791 = vmatmul.mubr.msk.f32.gmra.mxu1 %vm204_vm0, %v10222_v23  ;;  %v13372_v15 = vld [vmem:[%s16363_s3 + $0x120] sm:$0xff] }
 0x37c   :  { %3335 = vmatprep.mubr.f32.mxu0 %v16372_v5  ;;  %v13345_v10 = vadd.f32 %v5379_v61, %v13106_v24  ;;  %v5986_v45 = vadd.f32 %v5985_v31, %v4703_v37  ;;  %v4704_v14 = vmax.f32 %v2975_v49, 0.0  ;;  %v2979_v34 = vadd.f32 %v2978_v43, %v12259_v53  ;;  %v2531_v16 = vpop.f32.mrf.mxu0  ;;  %3784 = vmatprep.mubr.f32.mxu1 %v16372_v5  ;;  %v6298_v60 = vld [vmem:[%s16363_s3 + $0x320] sm:$0xff]  ;;  %v10224_v43 = vld [vmem:[%s16360_s0 + $0xf8] sm:$0xff] }
 0x37d   :  { %7854 = vmatpush2.msra.mxu0 %v6790_v6  ;;  %v13358_v24 = vadd.f32 %v5453_v63, %v13132_v2  ;;  %v5949_v61 = vadd.f32 %v5948_v29, %v4702_v57  ;;  %v4717_v26 = vmax.f32 %v2530_v19, 0.0  ;;  %v2532_v42 = vadd.f32 %v2531_v16, %v12267_v41  ;;  %v2980_v54 = vpop.f32.mrf.mxu1  ;;  %7924 = vmatprep.subr.mxu1 %v6919_v58  ;;  %v10223_v6 = vld [vmem:[%s16360_s0 + $0xf0] sm:$0xff] }
 0x37e   :  { %v6787_v56 = vunpack.c.h.bf16 %v6236_v17  ;;  %v6023_v25 = vadd.f32 %v6022_v40, %v4704_v14  ;;  %v4719_v33 = vmax.f32 %v2979_v34, 0.0  ;;  %v2981_v44 = vadd.f32 %v2980_v54, %v12275_v13  ;;  %v2535_v47 = vpop.f32.mrf.mxu0  ;;  %9728 = vmatmul.mubr.msk.f32.gmra.mxu0 %vm204_vm0, %v10223_v6  ;;  %7925 = vmatpush2.msra.mxu1 %v6918_v38 }
 0x37f   :  { %v6786_v2 = vunpack.c.l.bf16 %v6236_v17  ;;  %v5913_v63 = vadd.f32 %v5912_v12, %v4717_v26  ;;  %v4718_v31 = vmax.f32 %v2532_v42, 0.0  ;;  %v2536_v55 = vadd.f32 %v2535_v47, %v12231_v32  ;;  %v2984_v0 = vpop.f32.mrf.mxu1  ;;  %9792 = vmatmul.mubr.msk.f32.gmra.mxu1 %vm204_vm0, %v10223_v6  ;;  %3341 = vmatprep.mubr.f32.mxu0 %v16372_v5 }
 0x380   :  { %v6914_v21 = vunpack.c.l.bf16 %v6300_v50  ;;  %v5987_v62 = vadd.f32 %v5986_v45, %v4719_v33  ;;  %v4720_v29 = vmax.f32 %v2981_v44, 0.0  ;;  %v2985_v46 = vadd.f32 %v2984_v0, %v12259_v53  ;;  %v2537_v22 = vpop.f32.mrf.mxu0  ;;  %3790 = vmatprep.mubr.f32.mxu1 %v16372_v5  ;;  %7855 = vmatprep.subr.mxu0 %v6787_v56 }
 0x381   :  { %v6915_v20 = vunpack.c.h.bf16 %v6300_v50  ;;  %v5950_v38 = vadd.f32 %v5949_v61, %v4718_v31  ;;  %v4733_v40 = vmax.f32 %v2536_v55, 0.0  ;;  %v2538_v37 = vadd.f32 %v2537_v22, %v12267_v41  ;;  %v2986_v49 = vpop.f32.mrf.mxu1  ;;  %7856 = vmatpush2.msra.mxu0 %v6786_v2  ;;  %v13394_v61 = vld [vmem:[%s16363_s3 + $0x110] sm:$0xff] }
 0x382   :  { %v5381_v23 = vrot.slane %v13345_v10, 1  ;;  %v6024_v58 = vadd.f32 %v6023_v25, %v4720_v29  ;;  %v4735_v12 = vmax.f32 %v2985_v46, 0.0  ;;  %v2987_v57 = vadd.f32 %v2986_v49, %v12275_v13  ;;  %v2541_v19 = vpop.f32.mrf.mxu0  ;;  %9729 = vmatmul.mubr.msk.f32.gmra.mxu0 %vm204_vm0, %v10224_v43 }
 0x383   :  { %7926 = vmatprep.subr.mxu1 %v6915_v20  ;;  %v6783_v45 = vunpack.c.h.bf16 %v13372_v15  ;;  %v5914_v14 = vadd.f32 %v5913_v63, %v4733_v40  ;;  %v4734_v34 = vmax.f32 %v2538_v37, 0.0  ;;  %v2542_v16 = vadd.f32 %v2541_v19, %v12231_v32  ;;  %v2990_v17 = vpop.f32.mrf.mxu1  ;;  %9793 = vmatmul.mubr.msk.f32.gmra.mxu1 %vm204_vm0, %v10224_v43  ;;  %v6296_v63 = vld [vmem:[%s16363_s3 + $0x310] sm:$0xff]  ;;  %v13415_v40 = vld [vmem:[%s16363_s3 + $0x100] sm:$0xff] }
 0x384   :  { %3347 = vmatprep.mubr.f32.mxu0 %v16372_v5  ;;  %v6782_v50 = vunpack.c.l.bf16 %v13372_v15  ;;  %v5988_v26 = vadd.f32 %v5987_v62, %v4735_v12  ;;  %v4736_v42 = vmax.f32 %v2987_v57, 0.0  ;;  %v2991_v54 = vadd.f32 %v2990_v17, %v12259_v53  ;;  %v2543_v56 = vpop.f32.mrf.mxu0  ;;  %3796 = vmatprep.mubr.f32.mxu1 %v16372_v5 }
 0x385   :  { %7927 = vmatpush2.msra.mxu1 %v6914_v21  ;;  %v6911_v25 = vunpack.c.h.bf16 %v6298_v60  ;;  %v5951_v33 = vadd.f32 %v5950_v38, %v4734_v34  ;;  %v4749_v44 = vmax.f32 %v2542_v16, 0.0  ;;  %v2544_v47 = vadd.f32 %v2543_v56, %v12267_v41  ;;  %v2992_v6 = vpop.f32.mrf.mxu1  ;;  %7857 = vmatprep.subr.mxu0 %v6783_v45  ;;  %v10225_v21 = vld [vmem:[%s16360_s0 + $0x100] sm:$0xff] }
 0x386   :  { %v6910_v2 = vunpack.c.l.bf16 %v6298_v60  ;;  %v6025_v31 = vadd.f32 %v6024_v58, %v4736_v42  ;;  %v4751_v55 = vmax.f32 %v2991_v54, 0.0  ;;  %v2993_v0 = vadd.f32 %v2992_v6, %v12275_v13  ;;  %v2547_v15 = vpop.f32.mrf.mxu0  ;;  %9730 = vmatmul.mubr.msk.f32.gmra.mxu0 %vm204_vm0, %v10225_v21  ;;  %v6294_v34 = vld [vmem:[%s16363_s3 + $0x300] sm:$0xff] }
 0x387   :  { %7928 = vmatprep.subr.mxu1 %v6911_v25  ;;  %v6779_v62 = vunpack.c.h.bf16 %v13394_v61  ;;  %v5915_v29 = vadd.f32 %v5914_v14, %v4749_v44  ;;  %v4750_v46 = vmax.f32 %v2544_v47, 0.0  ;;  %v2548_v22 = vadd.f32 %v2547_v15, %v12231_v32  ;;  %v2996_v20 = vpop.f32.mrf.mxu1  ;;  %9794 = vmatmul.mubr.msk.f32.gmra.mxu1 %vm204_vm0, %v10225_v21  ;;  %v13436_v47 = vld [vmem:[%s16363_s3 + $0x4f0] sm:$0xff] }
 0x388   :  { %3353 = vmatprep.mubr.f32.mxu0 %v16372_v5  ;;  %v6778_v38 = vunpack.c.l.bf16 %v13394_v61  ;;  %v5989_v37 = vadd.f32 %v5988_v26, %v4751_v55  ;;  %v4752_v49 = vmax.f32 %v2993_v0, 0.0  ;;  %v2997_v60 = vadd.f32 %v2996_v20, %v12259_v53  ;;  %v2549_v58 = vpop.f32.mrf.mxu0  ;;  %3802 = vmatprep.mubr.f32.mxu1 %v16372_v5 }
 0x389   :  { %7858 = vmatpush2.msra.mxu0 %v6782_v50  ;;  %v6907_v12 = vunpack.c.h.bf16 %v6296_v63  ;;  %v5952_v57 = vadd.f32 %v5951_v33, %v4750_v46  ;;  %v4765_v19 = vmax.f32 %v2548_v22, 0.0  ;;  %v2550_v43 = vadd.f32 %v2549_v58, %v12267_v41  ;;  %v2998_v45 = vpop.f32.mrf.mxu1  ;;  %7929 = vmatpush2.msra.mxu1 %v6910_v2  ;;  %v10226_v50 = vld [vmem:[%s16360_s0 + $0x108] sm:$0xff]  ;;  %v13444_v46 = vld [vmem:[%s16363_s3 + $0x6f0] sm:$0xff] }
 0x38a   :  { %7859 = vmatprep.subr.mxu0 %v6779_v62  ;;  %v6906_v14 = vunpack.c.l.bf16 %v6296_v63  ;;  %v6026_v16 = vadd.f32 %v6025_v31, %v4752_v49  ;;  %v4767_v17 = vmax.f32 %v2997_v60, 0.0  ;;  %v2999_v61 = vadd.f32 %v2998_v45, %v12275_v13  ;;  %v2553_v26 = vpop.f32.mrf.mxu0  ;;  %9731 = vmatmul.mubr.msk.f32.gmra.mxu0 %vm204_vm0, %v10226_v50 }
 0x38b   :  { %7930 = vmatprep.subr.mxu1 %v6907_v12  ;;  %v6775_v42 = vunpack.c.h.bf16 %v13415_v40  ;;  %v5916_v54 = vadd.f32 %v5915_v29, %v4765_v19  ;;  %v4766_v56 = vmax.f32 %v2550_v43, 0.0  ;;  %v2554_v25 = vadd.f32 %v2553_v26, %v12231_v32  ;;  %v3002_v33 = vpop.f32.mrf.mxu1  ;;  %9795 = vmatmul.mubr.msk.f32.gmra.mxu1 %vm204_vm0, %v10226_v50 }
 0x38c   :  { %3359 = vmatprep.mubr.f32.mxu0 %v16372_v5  ;;  %v6774_v44 = vunpack.c.l.bf16 %v13415_v40  ;;  %v5990_v6 = vadd.f32 %v5989_v37, %v4767_v17  ;;  %v4768_v2 = vmax.f32 %v2999_v61, 0.0  ;;  %v3003_v63 = vadd.f32 %v3002_v33, %v12259_v53  ;;  %v2555_v31 = vpop.f32.mrf.mxu0  ;;  %3808 = vmatprep.mubr.f32.mxu1 %v16372_v5 }
 0x38d   :  { %7860 = vmatpush2.msra.mxu0 %v6778_v38  ;;  %v6903_v55 = vunpack.c.h.bf16 %v6294_v34  ;;  %v5953_v0 = vadd.f32 %v5952_v57, %v4766_v56  ;;  %v4781_v15 = vmax.f32 %v2554_v25, 0.0  ;;  %v2556_v21 = vadd.f32 %v2555_v31, %v12267_v41  ;;  %v3004_v62 = vpop.f32.mrf.mxu1  ;;  %7931 = vmatpush2.msra.mxu1 %v6906_v14  ;;  %v10227_v38 = vld [vmem:[%s16360_s0 + $0x110] sm:$0xff] }
 0x38e   :  { %7861 = vmatprep.subr.mxu0 %v6775_v42  ;;  %v6902_v29 = vunpack.c.l.bf16 %v6294_v34  ;;  %v6027_v22 = vadd.f32 %v6026_v16, %v4768_v2  ;;  %v4783_v20 = vmax.f32 %v3003_v63, 0.0  ;;  %v3005_v40 = vadd.f32 %v3004_v62, %v12275_v13  ;;  %v2559_v37 = vpop.f32.mrf.mxu0  ;;  %9732 = vmatmul.mubr.msk.f32.gmra.mxu0 %vm204_vm0, %v10227_v38 }
 0x38f   :  { %7932 = vmatprep.subr.mxu1 %v6903_v55  ;;  %v7027_v49 = vunpack.c.h.bf16 %v13436_v47  ;;  %v5917_v60 = vadd.f32 %v5916_v54, %v4781_v15  ;;  %v4782_v58 = vmax.f32 %v2556_v21, 0.0  ;;  %v2560_v12 = vadd.f32 %v2559_v37, %v12231_v32  ;;  %v3008_v57 = vpop.f32.mrf.mxu1  ;;  %9796 = vmatmul.mubr.msk.f32.gmra.mxu1 %vm204_vm0, %v10227_v38 }
 0x390   :  { %3365 = vmatprep.mubr.f32.mxu0 %v16372_v5  ;;  %v5455_v19 = vrot.slane %v13358_v24, 1  ;;  %v5991_v43 = vadd.f32 %v5990_v6, %v4783_v20  ;;  %v4784_v45 = vmax.f32 %v3005_v40, 0.0  ;;  %v3009_v14 = vadd.f32 %v3008_v57, %v12259_v53  ;;  %v2561_v34 = vpop.f32.mrf.mxu0  ;;  %3814 = vmatprep.mubr.f32.mxu1 %v16372_v5  ;;  %v13488_v20 = vld [vmem:[%s16363_s3 + $0x4e0] sm:$0xff] }
 0x391   :  { %7862 = vmatpush2.msra.mxu0 %v6774_v44  ;;  %v7155_v16 = vunpack.c.h.bf16 %v13444_v46  ;;  %v5954_v17 = vadd.f32 %v5953_v0, %v4782_v58  ;;  %v4797_v61 = vmax.f32 %v2560_v12, 0.0  ;;  %v2562_v26 = vadd.f32 %v2561_v34, %v12267_v41  ;;  %v3010_v50 = vpop.f32.mrf.mxu1  ;;  %7933 = vmatpush2.msra.mxu1 %v6902_v29  ;;  %v10228_v44 = vld [vmem:[%s16360_s0 + $0x118] sm:$0xff] }
 0x392   :  { %v16440_v42 = vsub.s32 5, %v10673_v1  ;;  %7941 = vmatprep.subr.mxu0 %v7027_v49  ;;  %v6028_v56 = vadd.f32 %v6027_v22, %v4784_v45  ;;  %v4799_v25 = vmax.f32 %v3009_v14, 0.0  ;;  %v3011_v33 = vadd.f32 %v3010_v50, %v12275_v13  ;;  %v2565_v6 = vpop.f32.mrf.mxu0  ;;  %9733 = vmatmul.mubr.msk.f32.gmra.mxu0 %vm204_vm0, %v10228_v44  ;;  %v10237_v49 = vld [vmem:[%s16360_s0 + $0x160] sm:$0xff] }
 0x393   :  { %v16441_v2 = vsub.s32 7, %v10673_v1  ;;  %8012 = vmatprep.subr.mxu1 %v7155_v16  ;;  %v5918_v31 = vadd.f32 %v5917_v60, %v4797_v61  ;;  %v4798_v55 = vmax.f32 %v2562_v26, 0.0  ;;  %v2566_v0 = vadd.f32 %v2565_v6, %v12231_v32  ;;  %v3014_v15 = vpop.f32.mrf.mxu1  ;;  %9797 = vmatmul.mubr.msk.f32.gmra.mxu1 %vm204_vm0, %v10228_v44 }
 0x394   :  { %v13463_v54 = vrot.slane %v13305_v18, %v16440_v42  ;;  %3371 = vmatprep.mubr.f32.mxu0 %v16372_v5  ;;  %v13481_v21 = vadd.f32 %v5381_v23, %v13345_v10  ;;  %v5992_v62 = vadd.f32 %v5991_v43, %v4799_v25  ;;  %v4800_v29 = vmax.f32 %v3011_v33, 0.0  ;;  %v2567_v22 = vpop.f32.mrf.mxu0  ;;  %3820 = vmatprep.mubr.f32.mxu1 %v16372_v5  ;;  %v10229_v43 = vld [vmem:[%s16360_s0 + $0x120] sm:$0xff]  ;;  %v13516_v25 = vld [vmem:[%s16363_s3 + $0x4d0] sm:$0xff] }
 0x395   :  { %v13473_v63 = vrot.slane %v13305_v18, %v16441_v2  ;;  %v3015_v18 = vadd.f32 %v3014_v15, %v12259_v53  ;;  %v13491_v40 = vadd.f32 %v5455_v19, %v13358_v24  ;;  %v5955_v37 = vadd.f32 %v5954_v17, %v4798_v55  ;;  %v3016_v23 = vpop.f32.mrf.mxu1  ;;  %v13504_v19 = vld [vmem:[%s16363_s3 + $0x6e0] sm:$0xff]  ;;  %v10235_v17 = vld [vmem:[%s16360_s0 + $0x150] sm:$0xff] }
 0x396   :  { %16442 = vst [vmem:[#allocation17_spill] sm:$0xff] %v13481_v21  ;;  %v4813_v38 = vmax.f32 %v2566_v0, 0.0  ;;  %v2568_v10 = vadd.f32 %v2567_v22, %v12267_v41  ;;  %v6029_v60 = vadd.f32 %v6028_v56, %v4800_v29  ;;  %v3017_v12 = vadd.f32 %v3016_v23, %v12275_v13  ;;  %v2571_v57 = vpop.f32.mrf.mxu0  ;;  %9734 = vmatmul.mubr.msk.f32.gmra.mxu0 %vm204_vm0, %v10229_v43  ;;  %v10230_v29 = vld [vmem:[%s16360_s0 + $0x128] sm:$0xff]  ;;  %v13529_v22 = vld [vmem:[%s16363_s3 + $0x6d0] sm:$0xff]  ;;  %v10236_v56 = vld [vmem:[%s16360_s0 + $0x158] sm:$0xff] }
 0x397   :  { %16443 = vst [vmem:[#allocation18_spill] sm:$0xff] %v13491_v40  ;;  %v4815_v58 = vmax.f32 %v3015_v18, 0.0  ;;  %v2572_v34 = vadd.f32 %v2571_v57, %v12231_v32  ;;  %v3020_v16 = vpop.f32.mrf.mxu1  ;;  %9798 = vmatmul.mubr.msk.f32.gmra.mxu1 %vm204_vm0, %v10229_v43  ;;  %3377 = vmatprep.mubr.f32.mxu0 %v16372_v5 }
 0x398   :  { %v5919_v45 = vadd.f32 %v5918_v31, %v4813_v38  ;;  %v4814_v14 = vmax.f32 %v2568_v10, 0.0  ;;  %v4816_v26 = vmax.f32 %v3017_v12, 0.0  ;;  %v3021_v50 = vadd.f32 %v3020_v16, %v12259_v53  ;;  %v2573_v42 = vpop.f32.mrf.mxu0  ;;  %3826 = vmatprep.mubr.f32.mxu1 %v16372_v5 }
 0x399   :  { %v5993_v61 = vadd.f32 %v5992_v62, %v4815_v58  ;;  %v4829_v6 = vmax.f32 %v2572_v34, 0.0  ;;  %v2574_v44 = vadd.f32 %v2573_v42, %v12267_v41  ;;  %v3022_v2 = vpop.f32.mrf.mxu1 }
 0x39a   :  { %v5956_v33 = vadd.f32 %v5955_v37, %v4814_v14  ;;  %v6030_v55 = vadd.f32 %v6029_v60, %v4816_v26  ;;  %v4831_v0 = vmax.f32 %v3021_v50, 0.0  ;;  %v3023_v15 = vadd.f32 %v3022_v2, %v12275_v13  ;;  %v2577_v62 = vpop.f32.mrf.mxu0  ;;  %9735 = vmatmul.mubr.msk.f32.gmra.mxu0 %vm204_vm0, %v10230_v29  ;;  %v10233_v60 = vld [vmem:[%s16360_s0 + $0x140] sm:$0xff]  ;;  %v10234_v14 = vld [vmem:[%s16360_s0 + $0x148] sm:$0xff] }
 0x39b   :  { %v5920_v37 = vadd.f32 %v5919_v45, %v4829_v6  ;;  %v4830_v38 = vmax.f32 %v2574_v44, 0.0  ;;  %v2578_v10 = vadd.f32 %v2577_v62, %v12231_v32  ;;  %v3026_v23 = vpop.f32.mrf.mxu1  ;;  %9799 = vmatmul.mubr.msk.f32.gmra.mxu1 %vm204_vm0, %v10230_v29  ;;  %3383 = vmatprep.mubr.f32.mxu0 %v16372_v5  ;;  %v13541_v45 = vld [vmem:[%s16363_s3 + $0x4c0] sm:$0xff] }
 0x39c   :  { %v5994_v58 = vadd.f32 %v5993_v61, %v4831_v0  ;;  %v4832_v12 = vmax.f32 %v3023_v15, 0.0  ;;  %v3027_v57 = vadd.f32 %v3026_v23, %v12259_v53  ;;  %v2579_v43 = vpop.f32.mrf.mxu0  ;;  %3832 = vmatprep.mubr.f32.mxu1 %v16372_v5  ;;  %v10231_v0 = vld [vmem:[%s16360_s0 + $0x130] sm:$0xff] }
 0x39d   :  { %v5957_v34 = vadd.f32 %v5956_v33, %v4830_v38  ;;  %v4845_v16 = vmax.f32 %v2578_v10, 0.0  ;;  %v2580_v26 = vadd.f32 %v2579_v43, %v12267_v41  ;;  %v3028_v50 = vpop.f32.mrf.mxu1  ;;  %v13554_v33 = vld [vmem:[%s16363_s3 + $0x6c0] sm:$0xff] }
 0x39e   :  { %v6031_v42 = vadd.f32 %v6030_v55, %v4832_v12  ;;  %v4847_v6 = vmax.f32 %v3027_v57, 0.0  ;;  %v3029_v44 = vadd.f32 %v3028_v50, %v12275_v13  ;;  %v2583_v2 = vpop.f32.mrf.mxu0  ;;  %9736 = vmatmul.mubr.msk.f32.gmra.mxu0 %vm204_vm0, %v10231_v0  ;;  %v10232_v50 = vld [vmem:[%s16360_s0 + $0x138] sm:$0xff] }
 0x39f   :  { %v5921_v62 = vadd.f32 %v5920_v37, %v4845_v16  ;;  %v4846_v29 = vmax.f32 %v2580_v26, 0.0  ;;  %v2584_v55 = vadd.f32 %v2583_v2, %v12231_v32  ;;  %v3032_v38 = vpop.f32.mrf.mxu1  ;;  %9800 = vmatmul.mubr.msk.f32.gmra.mxu1 %vm204_vm0, %v10231_v0  ;;  %3389 = vmatprep.mubr.f32.mxu0 %v16372_v5  ;;  %v13566_v37 = vld [vmem:[%s16363_s3 + $0x4b0] sm:$0xff] }
 0x3a0   :  { %v5995_v23 = vadd.f32 %v5994_v58, %v4847_v6  ;;  %v4848_v12 = vmax.f32 %v3029_v44, 0.0  ;;  %v3033_v57 = vadd.f32 %v3032_v38, %v12259_v53  ;;  %v2585_v43 = vpop.f32.mrf.mxu0  ;;  %3838 = vmatprep.mubr.f32.mxu1 %v16372_v5 }
 0x3a1   :  { %v5958_v16 = vadd.f32 %v5957_v34, %v4846_v29  ;;  %v4861_v26 = vmax.f32 %v2584_v55, 0.0  ;;  %v2586_v2 = vadd.f32 %v2585_v43, %v12267_v41  ;;  %v3034_v0 = vpop.f32.mrf.mxu1  ;;  %v13579_v34 = vld [vmem:[%s16363_s3 + $0x6b0] sm:$0xff] }
 0x3a2   :  { %v6032_v6 = vadd.f32 %v6031_v42, %v4848_v12  ;;  %v4863_v44 = vmax.f32 %v3033_v57, 0.0  ;;  %v3035_v38 = vadd.f32 %v3034_v0, %v12275_v13  ;;  %v2589_v10 = vpop.f32.mrf.mxu0  ;;  %9737 = vmatmul.mubr.msk.f32.gmra.mxu0 %vm204_vm0, %v10232_v50 }
 0x3a3   :  { %v5922_v29 = vadd.f32 %v5921_v62, %v4861_v26  ;;  %v4862_v55 = vmax.f32 %v2586_v2, 0.0  ;;  %v2590_v42 = vadd.f32 %v2589_v10, %v12231_v32  ;;  %v3038_v12 = vpop.f32.mrf.mxu1  ;;  %9801 = vmatmul.mubr.msk.f32.gmra.mxu1 %vm204_vm0, %v10232_v50  ;;  %3395 = vmatprep.mubr.f32.mxu0 %v16372_v5  ;;  %v13591_v62 = vld [vmem:[%s16363_s3 + $0x4a0] sm:$0xff] }
 0x3a4   :  { %v5996_v43 = vadd.f32 %v5995_v23, %v4863_v44  ;;  %v4864_v0 = vmax.f32 %v3035_v38, 0.0  ;;  %v3039_v58 = vadd.f32 %v3038_v12, %v12259_v53  ;;  %v2591_v61 = vpop.f32.mrf.mxu0  ;;  %3844 = vmatprep.mubr.f32.mxu1 %v16372_v5 }
 0x3a5   :  { %v5959_v10 = vadd.f32 %v5958_v16, %v4862_v55  ;;  %v4877_v50 = vmax.f32 %v2590_v42, 0.0  ;;  %v2592_v26 = vadd.f32 %v2591_v61, %v12267_v41  ;;  %v3040_v2 = vpop.f32.mrf.mxu1  ;;  %v13604_v61 = vld [vmem:[%s16363_s3 + $0x6a0] sm:$0xff] }
 0x3a6   :  { %v6033_v44 = vadd.f32 %v6032_v6, %v4864_v0  ;;  %v4879_v38 = vmax.f32 %v3039_v58, 0.0  ;;  %v3041_v12 = vadd.f32 %v3040_v2, %v12275_v13  ;;  %v2595_v57 = vpop.f32.mrf.mxu0  ;;  %9738 = vmatmul.mubr.msk.f32.gmra.mxu0 %vm204_vm0, %v10233_v60 }
 0x3a7   :  { %v5923_v16 = vadd.f32 %v5922_v29, %v4877_v50  ;;  %v4878_v55 = vmax.f32 %v2592_v26, 0.0  ;;  %v2596_v58 = vadd.f32 %v2595_v57, %v12231_v32  ;;  %v3044_v6 = vpop.f32.mrf.mxu1  ;;  %9802 = vmatmul.mubr.msk.f32.gmra.mxu1 %vm204_vm0, %v10233_v60  ;;  %3401 = vmatprep.mubr.f32.mxu0 %v16372_v5  ;;  %v13616_v29 = vld [vmem:[%s16363_s3 + $0x490] sm:$0xff] }
 0x3a8   :  { %v5997_v0 = vadd.f32 %v5996_v43, %v4879_v38  ;;  %v4880_v2 = vmax.f32 %v3041_v12, 0.0  ;;  %v3045_v23 = vadd.f32 %v3044_v6, %v12259_v53  ;;  %v2597_v15 = vpop.f32.mrf.mxu0  ;;  %3850 = vmatprep.mubr.f32.mxu1 %v16372_v5 }
 0x3a9   :  { %v5960_v57 = vadd.f32 %v5959_v10, %v4878_v55  ;;  %v4893_v60 = vmax.f32 %v2596_v58, 0.0  ;;  %v2598_v50 = vadd.f32 %v2597_v15, %v12267_v41  ;;  %v3046_v26 = vpop.f32.mrf.mxu1  ;;  %v13629_v15 = vld [vmem:[%s16363_s3 + $0x690] sm:$0xff] }
 0x3aa   :  { %v6034_v38 = vadd.f32 %v6033_v44, %v4880_v2  ;;  %v4895_v12 = vmax.f32 %v3045_v23, 0.0  ;;  %v3047_v6 = vadd.f32 %v3046_v26, %v12275_v13  ;;  %v2601_v42 = vpop.f32.mrf.mxu0  ;;  %9739 = vmatmul.mubr.msk.f32.gmra.mxu0 %vm204_vm0, %v10234_v14 }
 0x3ab   :  { %v5924_v10 = vadd.f32 %v5923_v16, %v4893_v60  ;;  %v4894_v55 = vmax.f32 %v2598_v50, 0.0  ;;  %v2602_v23 = vadd.f32 %v2601_v42, %v12231_v32  ;;  %v3050_v44 = vpop.f32.mrf.mxu1  ;;  %9803 = vmatmul.mubr.msk.f32.gmra.mxu1 %vm204_vm0, %v10234_v14  ;;  %3407 = vmatprep.mubr.f32.mxu0 %v16372_v5  ;;  %v13641_v16 = vld [vmem:[%s16363_s3 + $0x480] sm:$0xff] }
 0x3ac   :  { %v5998_v2 = vadd.f32 %v5997_v0, %v4895_v12  ;;  %v4896_v26 = vmax.f32 %v3047_v6, 0.0  ;;  %v3051_v43 = vadd.f32 %v3050_v44, %v12259_v53  ;;  %v2603_v31 = vpop.f32.mrf.mxu0  ;;  %3856 = vmatprep.mubr.f32.mxu1 %v16372_v5 }
 0x3ad   :  { %v5961_v42 = vadd.f32 %v5960_v57, %v4894_v55  ;;  %v4909_v14 = vmax.f32 %v2602_v23, 0.0  ;;  %v2604_v60 = vadd.f32 %v2603_v31, %v12267_v41  ;;  %v3052_v50 = vpop.f32.mrf.mxu1  ;;  %v13654_v31 = vld [vmem:[%s16363_s3 + $0x680] sm:$0xff] }
 0x3ae   :  { %v6035_v12 = vadd.f32 %v6034_v38, %v4896_v26  ;;  %v4911_v6 = vmax.f32 %v3051_v43, 0.0  ;;  %v3053_v44 = vadd.f32 %v3052_v50, %v12275_v13  ;;  %v2607_v58 = vpop.f32.mrf.mxu0  ;;  %9740 = vmatmul.mubr.msk.f32.gmra.mxu0 %vm204_vm0, %v10235_v17 }
 0x3af   :  { %v5925_v57 = vadd.f32 %v5924_v10, %v4909_v14  ;;  %v4910_v55 = vmax.f32 %v2604_v60, 0.0  ;;  %v2608_v43 = vadd.f32 %v2607_v58, %v12231_v32  ;;  %v3056_v38 = vpop.f32.mrf.mxu1  ;;  %9804 = vmatmul.mubr.msk.f32.gmra.mxu1 %vm204_vm0, %v10235_v17  ;;  %3413 = vmatprep.mubr.f32.mxu0 %v16372_v5  ;;  %v13666_v10 = vld [vmem:[%s16363_s3 + $0x470] sm:$0xff] }
 0x3b0   :  { %v5999_v26 = vadd.f32 %v5998_v2, %v4911_v6  ;;  %v4912_v50 = vmax.f32 %v3053_v44, 0.0  ;;  %v3057_v0 = vadd.f32 %v3056_v38, %v12259_v53  ;;  %v2609_v18 = vpop.f32.mrf.mxu0  ;;  %3862 = vmatprep.mubr.f32.mxu1 %v16372_v5 }
 0x3b1   :  { %v5962_v58 = vadd.f32 %v5961_v42, %v4910_v55  ;;  %v4925_v17 = vmax.f32 %v2608_v43, 0.0  ;;  %v2610_v14 = vadd.f32 %v2609_v18, %v12267_v41  ;;  %v3058_v60 = vpop.f32.mrf.mxu1  ;;  %v13679_v18 = vld [vmem:[%s16363_s3 + $0x670] sm:$0xff] }
 0x3b2   :  { %v6036_v6 = vadd.f32 %v6035_v12, %v4912_v50  ;;  %v4927_v44 = vmax.f32 %v3057_v0, 0.0  ;;  %v3059_v38 = vadd.f32 %v3058_v60, %v12275_v13  ;;  %v2613_v23 = vpop.f32.mrf.mxu0  ;;  %9741 = vmatmul.mubr.msk.f32.gmra.mxu0 %vm204_vm0, %v10236_v56 }
 0x3b3   :  { %v5926_v42 = vadd.f32 %v5925_v57, %v4925_v17  ;;  %v4926_v55 = vmax.f32 %v2610_v14, 0.0  ;;  %v2614_v0 = vadd.f32 %v2613_v23, %v12231_v32  ;;  %v3062_v12 = vpop.f32.mrf.mxu1  ;;  %9805 = vmatmul.mubr.msk.f32.gmra.mxu1 %vm204_vm0, %v10236_v56  ;;  %3419 = vmatprep.mubr.f32.mxu0 %v16372_v5  ;;  %v13691_v57 = vld [vmem:[%s16363_s3 + $0x460] sm:$0xff] }
 0x3b4   :  { %v6000_v50 = vadd.f32 %v5999_v26, %v4927_v44  ;;  %v4928_v60 = vmax.f32 %v3059_v38, 0.0  ;;  %v3063_v2 = vadd.f32 %v3062_v12, %v12259_v53  ;;  %v2615_v24 = vpop.f32.mrf.mxu0  ;;  %3868 = vmatprep.mubr.f32.mxu1 %v16372_v5 }
 0x3b5   :  { %v5963_v23 = vadd.f32 %v5962_v58, %v4926_v55  ;;  %v4941_v56 = vmax.f32 %v2614_v0, 0.0  ;;  %v2616_v17 = vadd.f32 %v2615_v24, %v12267_v41  ;;  %v3064_v14 = vpop.f32.mrf.mxu1  ;;  %v13704_v24 = vld [vmem:[%s16363_s3 + $0x660] sm:$0xff]  ;;  %v16444_v0 = vmov 0.0  }
 0x3b6   :  { %v6037_v44 = vadd.f32 %v6036_v6, %v4928_v60  ;;  %v4943_v38 = vmax.f32 %v3063_v2, 0.0  ;;  %v3065_v12 = vadd.f32 %v3064_v14, %v12275_v13  ;;  %v2619_v43 = vpop.f32.mrf.mxu0  ;;  %9742 = vmatmul.mubr.msk.f32.gmra.mxu0 %vm204_vm0, %v10237_v49 }
 0x3b7   :  { %v5927_v58 = vadd.f32 %v5926_v42, %v4941_v56  ;;  %v4942_v55 = vmax.f32 %v2616_v17, 0.0  ;;  %v2620_v2 = vadd.f32 %v2619_v43, %v12231_v32  ;;  %v3068_v6 = vpop.f32.mrf.mxu1  ;;  %9806 = vmatmul.mubr.msk.f32.gmra.mxu1 %vm204_vm0, %v10237_v49  ;;  %3425 = vmatprep.mubr.f32.mxu0 %v16444_v0  ;;  %v13716_v42 = vld [vmem:[%s16363_s3 + $0x450] sm:$0xff] }
 0x3b8   :  { %v6001_v14 = vadd.f32 %v6000_v50, %v4943_v38  ;;  %v4944_v26 = vmax.f32 %v3065_v12, 0.0  ;;  %v3069_v5 = vadd.f32 %v3068_v6, %v12259_v53  ;;  %v2621_v1 = vpop.f32.mrf.mxu0  ;;  %3874 = vmatprep.mubr.f32.mxu1 %v16444_v0 }
 0x3b9   :  { %v5964_v43 = vadd.f32 %v5963_v23, %v4942_v55  ;;  %v4957_v49 = vmax.f32 %v2620_v2, 0.0  ;;  %v2622_v56 = vadd.f32 %v2621_v1, %v12267_v41  ;;  %v3070_v17 = vpop.f32.mrf.mxu1  ;;  %v13729_v1 = vld [vmem:[%s16363_s3 + $0x650] sm:$0xff] }
 0x3ba   :  { %v6038_v38 = vadd.f32 %v6037_v44, %v4944_v26  ;;  %v4959_v12 = vmax.f32 %v3069_v5, 0.0  ;;  %v3071_v6 = vadd.f32 %v3070_v17, %v12275_v13  ;;  %v2625_v60 = vpop.f32.mrf.mxu0  ;;  %9743 = vmatmul.mubr.msk.f32.gmra.mxu0 %vm204_vm0, %v10238_v8 }
 0x3bb   :  { %v5928_v23 = vadd.f32 %v5927_v58, %v4957_v49  ;;  %v4958_v55 = vmax.f32 %v2622_v56, 0.0  ;;  %v2626_v5 = vadd.f32 %v2625_v60, %v12231_v32  ;;  %v3074_v26 = vpop.f32.mrf.mxu1  ;;  %9807 = vmatmul.mubr.msk.f32.gmra.mxu1 %vm204_vm0, %v10238_v8  ;;  %3431 = vmatprep.mubr.f32.mxu0 %v16444_v0  ;;  %v13741_v58 = vld [vmem:[%s16363_s3 + $0x440] sm:$0xff] }
 0x3bc   :  { %v6002_v2 = vadd.f32 %v6001_v14, %v4959_v12  ;;  %v4960_v17 = vmax.f32 %v3071_v6, 0.0  ;;  %v3075_v50 = vadd.f32 %v3074_v26, %v12259_v53  ;;  %v2627_v4 = vpop.f32.mrf.mxu0  ;;  %3880 = vmatprep.mubr.f32.mxu1 %v16444_v0 }
 0x3bd   :  { %v5965_v60 = vadd.f32 %v5964_v43, %v4958_v55  ;;  %v4973_v8 = vmax.f32 %v2626_v5, 0.0  ;;  %v2628_v49 = vadd.f32 %v2627_v4, %v12267_v41  ;;  %v3076_v56 = vpop.f32.mrf.mxu1  ;;  %v13754_v4 = vld [vmem:[%s16363_s3 + $0x640] sm:$0xff] }
 0x3be   :  { %v6039_v12 = vadd.f32 %v6038_v38, %v4960_v17  ;;  %v4975_v6 = vmax.f32 %v3075_v50, 0.0  ;;  %v3077_v26 = vadd.f32 %v3076_v56, %v12275_v13  ;;  %v2631_v44 = vpop.f32.mrf.mxu0  ;;  %9744 = vmatmul.mubr.msk.f32.gmra.mxu0 %vm204_vm0, %v10239_v7  ;;  %16445 = vst [vmem:[#allocation19_spill] sm:$0xff] %v13754_v4 }
 0x3bf   :  { %v5929_v43 = vadd.f32 %v5928_v23, %v4973_v8  ;;  %v4974_v55 = vmax.f32 %v2628_v49, 0.0  ;;  %v2632_v50 = vadd.f32 %v2631_v44, %v12231_v32  ;;  %v3080_v38 = vpop.f32.mrf.mxu1  ;;  %9808 = vmatmul.mubr.msk.f32.gmra.mxu1 %vm204_vm0, %v10239_v7  ;;  %3437 = vmatprep.mubr.f32.mxu0 %v16444_v0  ;;  %v13766_v23 = vld [vmem:[%s16363_s3 + $0x430] sm:$0xff] }
 0x3c0   :  { %v6003_v17 = vadd.f32 %v6002_v2, %v4975_v6  ;;  %v4976_v56 = vmax.f32 %v3077_v26, 0.0  ;;  %v3081_v14 = vadd.f32 %v3080_v38, %v12259_v53  ;;  %v2633_v3 = vpop.f32.mrf.mxu0  ;;  %3886 = vmatprep.mubr.f32.mxu1 %v16444_v0  ;;  %16446 = vst [vmem:[#allocation20_spill] sm:$0xff] %v13766_v23 }
 0x3c1   :  { %v5966_v44 = vadd.f32 %v5965_v60, %v4974_v55  ;;  %v4989_v7 = vmax.f32 %v2632_v50, 0.0  ;;  %v2634_v8 = vadd.f32 %v2633_v3, %v12267_v41  ;;  %v3082_v49 = vpop.f32.mrf.mxu1  ;;  %v13779_v3 = vld [vmem:[%s16363_s3 + $0x630] sm:$0xff]  ;;  %v10242_v50 = vld [vmem:[%s16360_s0 + $0x188] sm:$0xff] }
 0x3c2   :  { %v6040_v6 = vadd.f32 %v6039_v12, %v4976_v56  ;;  %v4991_v26 = vmax.f32 %v3081_v14, 0.0  ;;  %v3083_v38 = vadd.f32 %v3082_v49, %v12275_v13  ;;  %v2637_v5 = vpop.f32.mrf.mxu0  ;;  %9745 = vmatmul.mubr.msk.f32.gmra.mxu0 %vm204_vm0, %v10240_v11  ;;  %16447 = vst [vmem:[#allocation21_spill] sm:$0xff] %v13779_v3 }
 0x3c3   :  { %v5930_v60 = vadd.f32 %v5929_v43, %v4989_v7  ;;  %v4990_v55 = vmax.f32 %v2634_v8, 0.0  ;;  %v2638_v14 = vadd.f32 %v2637_v5, %v12231_v32  ;;  %v3086_v12 = vpop.f32.mrf.mxu1  ;;  %9809 = vmatmul.mubr.msk.f32.gmra.mxu1 %vm204_vm0, %v10240_v11  ;;  %3443 = vmatprep.mubr.f32.mxu0 %v16444_v0  ;;  %v13791_v32 = vld [vmem:[%s16363_s3 + $0x420] sm:$0xff] }
 0x3c4   :  { %v6004_v56 = vadd.f32 %v6003_v17, %v4991_v26  ;;  %v4992_v49 = vmax.f32 %v3083_v38, 0.0  ;;  %v3087_v2 = vadd.f32 %v3086_v12, %v12259_v53  ;;  %v2639_v39 = vpop.f32.mrf.mxu0  ;;  %3892 = vmatprep.mubr.f32.mxu1 %v16444_v0  ;;  %16448 = vst [vmem:[#allocation22_spill] sm:$0xff] %v13791_v32  ;;  %v13798_v53 = vld [vmem:[%s16363_s3 + $0x620] sm:$0xff] }
 0x3c5   :  { %v5967_v43 = vadd.f32 %v5966_v44, %v4990_v55  ;;  %v5005_v11 = vmax.f32 %v2638_v14, 0.0  ;;  %v2640_v5 = vadd.f32 %v2639_v39, %v12267_v41  ;;  %v3088_v7 = vpop.f32.mrf.mxu1  ;;  %16449 = vst [vmem:[#allocation23_spill] sm:$0xff] %v13798_v53  ;;  %v10241_v44 = vld [vmem:[%s16360_s0 + $0x180] sm:$0xff]  ;;  %v13809_v39 = vld [vmem:[%s16363_s3 + $0x410] sm:$0xff] }
 0x3c6   :  { %v6041_v8 = vadd.f32 %v6040_v6, %v4992_v49  ;;  %v5007_v26 = vmax.f32 %v3087_v2, 0.0  ;;  %v3089_v38 = vadd.f32 %v3088_v7, %v12275_v13  ;;  %v3157_v12 = vpop.f32.mrf.mxu0  ;;  %9746 = vmatmul.mubr.msk.f32.gmra.mxu0 %vm204_vm0, %v10241_v44  ;;  %16450 = vst [vmem:[#allocation24_spill] sm:$0xff] %v13809_v39 }
 0x3c7   :  { %v5931_v55 = vadd.f32 %v5930_v60, %v5005_v11  ;;  %v5006_v14 = vmax.f32 %v2640_v5, 0.0  ;;  %v3606_v6 = vpop.f32.mrf.mxu1  ;;  %9810 = vmatmul.mubr.msk.f32.gmra.mxu1 %vm204_vm0, %v10241_v44  ;;  %3449 = vmatprep.mubr.f32.mxu0 %v16444_v0  ;;  %v13821_v60 = vld [vmem:[%s16363_s3 + $0x610] sm:$0xff]  ;;  %v3158_v44 = vadd.f32 %v3157_v12, %v13310_v35 }
 0x3c8   :  { %v6005_v49 = vadd.f32 %v6004_v56, %v5007_v26  ;;  %v5008_v7 = vmax.f32 %v3089_v38, 0.0  ;;  %v3159_v17 = vpop.f32.mrf.mxu0  ;;  %3898 = vmatprep.mubr.f32.mxu1 %v16444_v0  ;;  %16451 = vst [vmem:[#allocation25_spill] sm:$0xff] %v13821_v60  ;;  %v3607_v2 = vadd.f32 %v3606_v6, %v13320_v59 }
 0x3c9   :  { %v5932_v11 = vrot.slane %v5931_v55, 4  ;;  %v5968_v5 = vadd.f32 %v5967_v43, %v5006_v14  ;;  %v3608_v13 = vpop.f32.mrf.mxu1  ;;  %v3160_v43 = vadd.f32 %v3159_v17, %v13463_v54 }
 0x3ca   :  { %v6006_v26 = vrot.slane %v6005_v49, 4  ;;  %v6042_v38 = vadd.f32 %v6041_v8, %v5008_v7  ;;  %v3163_v27 = vpop.f32.mrf.mxu0  ;;  %9747 = vmatmul.mubr.msk.f32.gmra.mxu0 %vm204_vm0, %v10242_v50  ;;  %v3609_v7 = vadd.f32 %v3608_v13, %v13473_v63  ;;  %v4003_v39 = vmax.f32 %v3607_v2, 0.0  ;;  %v10243_v13 = vld [vmem:[%s16360_s0 + $0x190] sm:$0xff] }
 0x3cb   :  { %v5933_v9 = vadd.f32 %v5932_v11, %v5931_v55  ;;  %v3164_v12 = vadd.f32 %v3163_v27, %v13310_v35  ;;  %v3612_v14 = vpop.f32.mrf.mxu1  ;;  %9811 = vmatmul.mubr.msk.f32.gmra.mxu1 %vm204_vm0, %v10242_v50  ;;  %3455 = vmatprep.mubr.f32.mxu0 %v16444_v0  ;;  %v5969_v17 = vrot.slane %v5968_v5, 4  ;;  %v4001_v11 = vmax.f32 %v3158_v44, 0.0 }
 0x3cc   :  { %v6007_v6 = vadd.f32 %v6006_v26, %v6005_v49  ;;  %v3613_v56 = vadd.f32 %v3612_v14, %v13320_v59  ;;  %v3165_v40 = vpop.f32.mrf.mxu0  ;;  %3904 = vmatprep.mubr.f32.mxu1 %v16444_v0  ;;  %v6043_v21 = vrot.slane %v6042_v38, 4  ;;  %v4002_v8 = vmax.f32 %v3160_v43, 0.0 }
 0x3cd   :  { %v4017_v27 = vmax.f32 %v3164_v12, 0.0  ;;  %v3166_v41 = vadd.f32 %v3165_v40, %v13463_v54  ;;  %v3614_v50 = vpop.f32.mrf.mxu1  ;;  %v5934_v14 = vrot.slane %v5933_v9, 2  ;;  %v4004_v2 = vmax.f32 %v3609_v7, 0.0 }
 0x3ce   :  { %v4019_v53 = vmax.f32 %v3613_v56, 0.0  ;;  %v3615_v49 = vadd.f32 %v3614_v50, %v13473_v63  ;;  %v3169_v26 = vpop.f32.mrf.mxu0  ;;  %9748 = vmatmul.mubr.msk.f32.gmra.mxu0 %vm204_vm0, %v10243_v13  ;;  %v6008_v40 = vrot.slane %v6007_v6, 2  ;;  %v13849_v32 = vadd.f32 %v5969_v17, %v5968_v5 }
 0x3cf   :  { %v5457_v55 = vadd.f32 %v4017_v27, %v4001_v11  ;;  %v4018_v44 = vmax.f32 %v3166_v41, 0.0  ;;  %v3618_v12 = vpop.f32.mrf.mxu1  ;;  %9812 = vmatmul.mubr.msk.f32.gmra.mxu1 %vm204_vm0, %v10243_v13  ;;  %3461 = vmatprep.mubr.f32.mxu0 %v16444_v0  ;;  %v3170_v23 = vadd.f32 %v3169_v26, %v13310_v35  ;;  %v13853_v11 = vadd.f32 %v6043_v21, %v6042_v38 }
 0x3d0   :  { %v5531_v56 = vadd.f32 %v4019_v53, %v4003_v39  ;;  %v4020_v50 = vmax.f32 %v3615_v49, 0.0  ;;  %v3171_v60 = vpop.f32.mrf.mxu0  ;;  %3910 = vmatprep.mubr.f32.mxu1 %v16444_v0  ;;  %v3619_v43 = vadd.f32 %v3618_v12, %v13320_v59  ;;  %v10244_v39 = vld [vmem:[%s16360_s0 + $0x198] sm:$0xff]  ;;  %v5935_v5 = vadd.f32 %v5934_v14, %v5933_v9 }
 0x3d1   :  { %v5494_v3 = vadd.f32 %v4018_v44, %v4002_v8  ;;  %v3620_v41 = vpop.f32.mrf.mxu1  ;;  %v3172_v13 = vadd.f32 %v3171_v60, %v13463_v54  ;;  %v4033_v8 = vmax.f32 %v3170_v23, 0.0  ;;  %v6009_v21 = vadd.f32 %v6008_v40, %v6007_v6  ;;  %v10245_v6 = vld [vmem:[%s16360_s0 + $0x1a0] sm:$0xff] }
 0x3d2   :  { %v5568_v27 = vadd.f32 %v4020_v50, %v4004_v2  ;;  %v3621_v7 = vadd.f32 %v3620_v41, %v13473_v63  ;;  %v3175_v53 = vpop.f32.mrf.mxu0  ;;  %9749 = vmatmul.mubr.msk.f32.gmra.mxu0 %vm204_vm0, %v10244_v39  ;;  %v4035_v17 = vmax.f32 %v3619_v43, 0.0  ;;  %v5936_v40 = vrot.slane %v5935_v5, 1 }
 0x3d3   :  { %v3176_v49 = vadd.f32 %v3175_v53, %v13310_v35  ;;  %v3624_v26 = vpop.f32.mrf.mxu1  ;;  %9813 = vmatmul.mubr.msk.f32.gmra.mxu1 %vm204_vm0, %v10244_v39  ;;  %3467 = vmatprep.mubr.f32.mxu0 %v16444_v0  ;;  %v4034_v60 = vmax.f32 %v3172_v13, 0.0  ;;  %v5458_v2 = vadd.f32 %v5457_v55, %v4033_v8 }
 0x3d4   :  { %v4036_v38 = vmax.f32 %v3621_v7, 0.0  ;;  %v3625_v44 = vadd.f32 %v3624_v26, %v13320_v59  ;;  %v3177_v12 = vpop.f32.mrf.mxu0  ;;  %3916 = vmatprep.mubr.f32.mxu1 %v16444_v0  ;;  %v5532_v50 = vadd.f32 %v5531_v56, %v4035_v17 }
 0x3d5   :  { %v4049_v9 = vmax.f32 %v3176_v49, 0.0  ;;  %v3178_v23 = vadd.f32 %v3177_v12, %v13463_v54  ;;  %v3626_v14 = vpop.f32.mrf.mxu1  ;;  %v5495_v43 = vadd.f32 %v5494_v3, %v4034_v60  ;;  %v6010_v3 = vrot.slane %v6009_v21, 1  ;;  %v10249_v12 = vld [vmem:[%s16360_s0 + $0x1c0] sm:$0xff] }
 0x3d6   :  { %v5569_v41 = vadd.f32 %v5568_v27, %v4036_v38  ;;  %v4051_v53 = vmax.f32 %v3625_v44, 0.0  ;;  %v3627_v39 = vadd.f32 %v3626_v14, %v13473_v63  ;;  %v3181_v4 = vpop.f32.mrf.mxu0  ;;  %9750 = vmatmul.mubr.msk.f32.gmra.mxu0 %vm204_vm0, %v10245_v6  ;;  %v10246_v14 = vld [vmem:[%s16360_s0 + $0x1a8] sm:$0xff] }
 0x3d7   :  { %v5459_v13 = vadd.f32 %v5458_v2, %v4049_v9  ;;  %v4050_v55 = vmax.f32 %v3178_v23, 0.0  ;;  %v3182_v56 = vadd.f32 %v3181_v4, %v13310_v35  ;;  %v3630_v7 = vpop.f32.mrf.mxu1  ;;  %9814 = vmatmul.mubr.msk.f32.gmra.mxu1 %vm204_vm0, %v10245_v6  ;;  %3473 = vmatprep.mubr.f32.mxu0 %v16444_v0 }
 0x3d8   :  { %v5533_v27 = vadd.f32 %v5532_v50, %v4051_v53  ;;  %v4052_v8 = vmax.f32 %v3627_v39, 0.0  ;;  %v3631_v17 = vadd.f32 %v3630_v7, %v13320_v59  ;;  %v3183_v49 = vpop.f32.mrf.mxu0  ;;  %3922 = vmatprep.mubr.f32.mxu1 %v16444_v0  ;;  %v13890_v53 = vadd.f32 %v5936_v40, %v5935_v5  ;;  %v13902_v5 = vld [vmem:[%s16363_s3 + $0x600] sm:$0xff] }
 0x3d9   :  { %v5496_v60 = vadd.f32 %v5495_v43, %v4050_v55  ;;  %v4065_v38 = vmax.f32 %v3182_v56, 0.0  ;;  %v3184_v44 = vadd.f32 %v3183_v49, %v13463_v54  ;;  %v3632_v4 = vpop.f32.mrf.mxu1  ;;  %v13888_v43 = vld [vmem:[%s16363_s3 + $0x400] sm:$0xff]  ;;  %v13895_v56 = vadd.f32 %v6010_v3, %v6009_v21  ;;  %v10248_v21 = vld [vmem:[%s16360_s0 + $0x1b8] sm:$0xff] }
 0x3da   :  { %v5570_v2 = vadd.f32 %v5569_v41, %v4052_v8  ;;  %v4067_v9 = vmax.f32 %v3631_v17, 0.0  ;;  %v3633_v23 = vadd.f32 %v3632_v4, %v13473_v63  ;;  %v3187_v50 = vpop.f32.mrf.mxu0  ;;  %9751 = vmatmul.mubr.msk.f32.gmra.mxu0 %vm204_vm0, %v10246_v14  ;;  %16452 = vst [vmem:[#allocation26_spill] sm:$0xff] %v13890_v53 }
 0x3db   :  { %v5460_v39 = vadd.f32 %v5459_v13, %v4065_v38  ;;  %v4066_v6 = vmax.f32 %v3184_v44, 0.0  ;;  %v3188_v41 = vadd.f32 %v3187_v50, %v13310_v35  ;;  %v3636_v55 = vpop.f32.mrf.mxu1  ;;  %9815 = vmatmul.mubr.msk.f32.gmra.mxu1 %vm204_vm0, %v10246_v14  ;;  %3479 = vmatprep.mubr.f32.mxu0 %v16444_v0  ;;  %16453 = vst [vmem:[#allocation27_spill] sm:$0xff] %v13895_v56  ;;  %v10250_v56 = vld [vmem:[%s16360_s0 + $0x1c8] sm:$0xff] }
 0x3dc   :  { %v5534_v7 = vadd.f32 %v5533_v27, %v4067_v9  ;;  %v4068_v8 = vmax.f32 %v3633_v23, 0.0  ;;  %v3637_v17 = vadd.f32 %v3636_v55, %v13320_v59  ;;  %v3189_v49 = vpop.f32.mrf.mxu0  ;;  %3928 = vmatprep.mubr.f32.mxu1 %v16444_v0  ;;  %v10247_v23 = vld [vmem:[%s16360_s0 + $0x1b0] sm:$0xff] }
 0x3dd   :  { %v5497_v40 = vadd.f32 %v5496_v60, %v4066_v6  ;;  %v4081_v13 = vmax.f32 %v3188_v41, 0.0  ;;  %v3190_v38 = vadd.f32 %v3189_v49, %v13463_v54  ;;  %v3638_v44 = vpop.f32.mrf.mxu1  ;;  %v13915_v60 = vld [vmem:[%s16363_s3 + $0x5f0] sm:$0xff] }
 0x3de   :  { %v5571_v3 = vadd.f32 %v5570_v2, %v4068_v8  ;;  %v4083_v27 = vmax.f32 %v3637_v17, 0.0  ;;  %v3639_v4 = vadd.f32 %v3638_v44, %v13473_v63  ;;  %v3193_v9 = vpop.f32.mrf.mxu0  ;;  %9752 = vmatmul.mubr.msk.f32.gmra.mxu0 %vm204_vm0, %v10247_v23 }
 0x3df   :  { %v5461_v14 = vadd.f32 %v5460_v39, %v4081_v13  ;;  %v4082_v6 = vmax.f32 %v3190_v38, 0.0  ;;  %v3194_v2 = vadd.f32 %v3193_v9, %v13310_v35  ;;  %v3642_v41 = vpop.f32.mrf.mxu1  ;;  %9816 = vmatmul.mubr.msk.f32.gmra.mxu1 %vm204_vm0, %v10247_v23  ;;  %3485 = vmatprep.mubr.f32.mxu0 %v16444_v0  ;;  %v13927_v39 = vld [vmem:[%s16363_s3 + $0x7f0] sm:$0xff] }
 0x3e0   :  { %v5535_v8 = vadd.f32 %v5534_v7, %v4083_v27  ;;  %v4084_v17 = vmax.f32 %v3639_v4, 0.0  ;;  %v3643_v49 = vadd.f32 %v3642_v41, %v13320_v59  ;;  %v3195_v44 = vpop.f32.mrf.mxu0  ;;  %3934 = vmatprep.mubr.f32.mxu1 %v16444_v0 }
 0x3e1   :  { %v5498_v13 = vadd.f32 %v5497_v40, %v4082_v6  ;;  %v4097_v38 = vmax.f32 %v3194_v2, 0.0  ;;  %v3196_v9 = vadd.f32 %v3195_v44, %v13463_v54  ;;  %v3644_v23 = vpop.f32.mrf.mxu1  ;;  %v13940_v40 = vld [vmem:[%s16363_s3 + $0x5e0] sm:$0xff] }
 0x3e2   :  { %v5572_v27 = vadd.f32 %v5571_v3, %v4084_v17  ;;  %v4099_v4 = vmax.f32 %v3643_v49, 0.0  ;;  %v3645_v41 = vadd.f32 %v3644_v23, %v13473_v63  ;;  %v3199_v55 = vpop.f32.mrf.mxu0  ;;  %9753 = vmatmul.mubr.msk.f32.gmra.mxu0 %vm204_vm0, %v10248_v21  ;;  %16454 = vst [vmem:[#allocation28_spill] sm:$0xff] %v13940_v40 }
 0x3e3   :  { %v5462_v6 = vadd.f32 %v5461_v14, %v4097_v38  ;;  %v4098_v2 = vmax.f32 %v3196_v9, 0.0  ;;  %v3200_v3 = vadd.f32 %v3199_v55, %v13310_v35  ;;  %v3648_v17 = vpop.f32.mrf.mxu1  ;;  %9817 = vmatmul.mubr.msk.f32.gmra.mxu1 %vm204_vm0, %v10248_v21  ;;  %3491 = vmatprep.mubr.f32.mxu0 %v16444_v0  ;;  %v13952_v14 = vld [vmem:[%s16363_s3 + $0x7e0] sm:$0xff] }
 0x3e4   :  { %v5536_v44 = vadd.f32 %v5535_v8, %v4099_v4  ;;  %v4100_v23 = vmax.f32 %v3645_v41, 0.0  ;;  %v3649_v7 = vadd.f32 %v3648_v17, %v13320_v59  ;;  %v3201_v50 = vpop.f32.mrf.mxu0  ;;  %3940 = vmatprep.mubr.f32.mxu1 %v16444_v0  ;;  %16455 = vst [vmem:[#allocation29_spill] sm:$0xff] %v13952_v14 }
 0x3e5   :  { %v5499_v55 = vadd.f32 %v5498_v13, %v4098_v2  ;;  %v4113_v21 = vmax.f32 %v3200_v3, 0.0  ;;  %v3202_v38 = vadd.f32 %v3201_v50, %v13463_v54  ;;  %v3650_v9 = vpop.f32.mrf.mxu1  ;;  %v13965_v50 = vld [vmem:[%s16363_s3 + $0x5d0] sm:$0xff] }
 0x3e6   :  { %v5573_v4 = vadd.f32 %v5572_v27, %v4100_v23  ;;  %v4115_v41 = vmax.f32 %v3649_v7, 0.0  ;;  %v3651_v17 = vadd.f32 %v3650_v9, %v13473_v63  ;;  %v3205_v49 = vpop.f32.mrf.mxu0  ;;  %9754 = vmatmul.mubr.msk.f32.gmra.mxu0 %vm204_vm0, %v10249_v12  ;;  %16456 = vst [vmem:[#allocation30_spill] sm:$0xff] %v13965_v50 }
 0x3e7   :  { %v5463_v13 = vadd.f32 %v5462_v6, %v4113_v21  ;;  %v4114_v2 = vmax.f32 %v3202_v38, 0.0  ;;  %v3206_v7 = vadd.f32 %v3205_v49, %v13310_v35  ;;  %v3654_v27 = vpop.f32.mrf.mxu1  ;;  %9818 = vmatmul.mubr.msk.f32.gmra.mxu1 %vm204_vm0, %v10249_v12  ;;  %3497 = vmatprep.mubr.f32.mxu0 %v16444_v0  ;;  %v13977_v6 = vld [vmem:[%s16363_s3 + $0x7d0] sm:$0xff] }
 0x3e8   :  { %v5537_v23 = vadd.f32 %v5536_v44, %v4115_v41  ;;  %v4116_v9 = vmax.f32 %v3651_v17, 0.0  ;;  %v3655_v8 = vadd.f32 %v3654_v27, %v13320_v59  ;;  %v3207_v26 = vpop.f32.mrf.mxu0  ;;  %3946 = vmatprep.mubr.f32.mxu1 %v16444_v0  ;;  %16457 = vst [vmem:[#allocation31_spill] sm:$0xff] %v13977_v6 }
 0x3e9   :  { %v5500_v49 = vadd.f32 %v5499_v55, %v4114_v2  ;;  %v4129_v12 = vmax.f32 %v3206_v7, 0.0  ;;  %v3208_v21 = vadd.f32 %v3207_v26, %v13463_v54  ;;  %v3656_v38 = vpop.f32.mrf.mxu1  ;;  %v13990_v26 = vld [vmem:[%s16363_s3 + $0x5c0] sm:$0xff] }
 0x3ea   :  { %v5574_v41 = vadd.f32 %v5573_v4, %v4116_v9  ;;  %v4131_v17 = vmax.f32 %v3655_v8, 0.0  ;;  %v3657_v27 = vadd.f32 %v3656_v38, %v13473_v63  ;;  %v3211_v3 = vpop.f32.mrf.mxu0  ;;  %9755 = vmatmul.mubr.msk.f32.gmra.mxu0 %vm204_vm0, %v10250_v56  ;;  %16458 = vst [vmem:[#allocation32_spill] sm:$0xff] %v13990_v26 }
 0x3eb   :  { %v5464_v55 = vadd.f32 %v5463_v13, %v4129_v12  ;;  %v4130_v2 = vmax.f32 %v3208_v21, 0.0  ;;  %v3212_v8 = vadd.f32 %v3211_v3, %v13310_v35  ;;  %v3660_v4 = vpop.f32.mrf.mxu1  ;;  %9819 = vmatmul.mubr.msk.f32.gmra.mxu1 %vm204_vm0, %v10250_v56  ;;  %3503 = vmatprep.mubr.f32.mxu0 %v16444_v0  ;;  %v14002_v13 = vld [vmem:[%s16363_s3 + $0x7c0] sm:$0xff] }
 0x3ec   :  { %v5538_v9 = vadd.f32 %v5537_v23, %v4131_v17  ;;  %v4132_v38 = vmax.f32 %v3657_v27, 0.0  ;;  %v3661_v44 = vadd.f32 %v3660_v4, %v13320_v59  ;;  %v3213_v53 = vpop.f32.mrf.mxu0  ;;  %3952 = vmatprep.mubr.f32.mxu1 %v16444_v0  ;;  %16459 = vst [vmem:[#allocation33_spill] sm:$0xff] %v14002_v13  ;;  %v14009_v17 = vld [vmem:[%s16363_s3 + $0x5b0] sm:$0xff] }
 0x3ed   :  { %v5501_v3 = vadd.f32 %v5500_v49, %v4130_v2  ;;  %v4145_v56 = vmax.f32 %v3212_v8, 0.0  ;;  %v3214_v12 = vadd.f32 %v3213_v53, %v13463_v54  ;;  %v3662_v21 = vpop.f32.mrf.mxu1  ;;  %16460 = vst [vmem:[#allocation34_spill] sm:$0xff] %v14009_v17  ;;  %v10251_v49 = vld [vmem:[%s16360_s0 + $0x1d0] sm:$0xff] }
 0x3ee   :  { %v5575_v27 = vadd.f32 %v5574_v41, %v4132_v38  ;;  %v4147_v4 = vmax.f32 %v3661_v44, 0.0  ;;  %v3663_v7 = vadd.f32 %v3662_v21, %v13473_v63  ;;  %v3217_v50 = vpop.f32.mrf.mxu0  ;;  %9756 = vmatmul.mubr.msk.f32.gmra.mxu0 %vm204_vm0, %v10251_v49  ;;  %v14020_v2 = vld [vmem:[%s16363_s3 + $0x7b0] sm:$0xff] }
 0x3ef   :  { %16461 = vst [vmem:[#allocation35_spill] sm:$0xff] %v14020_v2  ;;  %v5465_v8 = vadd.f32 %v5464_v55, %v4145_v56  ;;  %v3218_v41 = vadd.f32 %v3217_v50, %v13310_v35  ;;  %v3666_v44 = vpop.f32.mrf.mxu1  ;;  %9820 = vmatmul.mubr.msk.f32.gmra.mxu1 %vm204_vm0, %v10251_v49  ;;  %3509 = vmatprep.mubr.f32.mxu0 %v16444_v0  ;;  %v4146_v6 = vmax.f32 %v3214_v12, 0.0  ;;  %v14033_v50 = vld [vmem:[%s16363_s3 + $0x5a0] sm:$0xff]  ;;  %v10252_v55 = vld [vmem:[%s16360_s0 + $0x1d8] sm:$0xff] }
 0x3f0   :  { %v5539_v23 = vadd.f32 %v5538_v9, %v4147_v4  ;;  %v3667_v53 = vadd.f32 %v3666_v44, %v13320_v59  ;;  %v3219_v26 = vpop.f32.mrf.mxu0  ;;  %3958 = vmatprep.mubr.f32.mxu1 %v16444_v0  ;;  %16462 = vst [vmem:[#allocation36_spill] sm:$0xff] %v14033_v50  ;;  %v4148_v12 = vmax.f32 %v3663_v7, 0.0 }
 0x3f1   :  { %v4161_v56 = vmax.f32 %v3218_v41, 0.0  ;;  %v3220_v49 = vadd.f32 %v3219_v26, %v13463_v54  ;;  %v3668_v38 = vpop.f32.mrf.mxu1  ;;  %v14047_v26 = vld [vmem:[%s16363_s3 + $0x7a0] sm:$0xff]  ;;  %v5502_v17 = vadd.f32 %v5501_v3, %v4146_v6 }
 0x3f2   :  { %v4163_v4 = vmax.f32 %v3667_v53, 0.0  ;;  %v3669_v44 = vadd.f32 %v3668_v38, %v13473_v63  ;;  %v3223_v13 = vpop.f32.mrf.mxu0  ;;  %9757 = vmatmul.mubr.msk.f32.gmra.mxu0 %vm204_vm0, %v10252_v55  ;;  %16463 = vst [vmem:[#allocation37_spill] sm:$0xff] %v14047_v26  ;;  %v5576_v6 = vadd.f32 %v5575_v27, %v4148_v12 }
 0x3f3   :  { %v5466_v21 = vadd.f32 %v5465_v8, %v4161_v56  ;;  %v3224_v7 = vadd.f32 %v3223_v13, %v13310_v35  ;;  %v3672_v53 = vpop.f32.mrf.mxu1  ;;  %9821 = vmatmul.mubr.msk.f32.gmra.mxu1 %vm204_vm0, %v10252_v55  ;;  %3515 = vmatprep.mubr.f32.mxu0 %v16444_v0  ;;  %v4162_v41 = vmax.f32 %v3220_v49, 0.0  ;;  %v14059_v13 = vld [vmem:[%s16363_s3 + $0x590] sm:$0xff] }
 0x3f4   :  { %v5540_v14 = vadd.f32 %v5539_v23, %v4163_v4  ;;  %v3673_v2 = vadd.f32 %v3672_v53, %v13320_v59  ;;  %v3225_v40 = vpop.f32.mrf.mxu0  ;;  %3964 = vmatprep.mubr.f32.mxu1 %v16444_v0  ;;  %16464 = vst [vmem:[#allocation38_spill] sm:$0xff] %v14059_v13  ;;  %v4164_v8 = vmax.f32 %v3669_v44, 0.0  ;;  %v10253_v4 = vld [vmem:[%s16360_s0 + $0x1e0] sm:$0xff] }
 0x3f5   :  { %v4177_v55 = vmax.f32 %v3224_v7, 0.0  ;;  %v3226_v56 = vadd.f32 %v3225_v40, %v13463_v54  ;;  %v3674_v38 = vpop.f32.mrf.mxu1  ;;  %v14072_v40 = vld [vmem:[%s16363_s3 + $0x790] sm:$0xff] }
 0x3f6   :  { %v4179_v3 = vmax.f32 %v3673_v2, 0.0  ;;  %v3675_v23 = vadd.f32 %v3674_v38, %v13473_v63  ;;  %v3229_v49 = vpop.f32.mrf.mxu0  ;;  %9758 = vmatmul.mubr.msk.f32.gmra.mxu0 %vm204_vm0, %v10253_v4  ;;  %16465 = vst [vmem:[#allocation39_spill] sm:$0xff] %v14072_v40  ;;  %v5503_v38 = vadd.f32 %v5502_v17, %v4162_v41 }
 0x3f7   :  { %v5467_v44 = vadd.f32 %v5466_v21, %v4177_v55  ;;  %v3230_v27 = vadd.f32 %v3229_v49, %v13310_v35  ;;  %v3678_v2 = vpop.f32.mrf.mxu1  ;;  %9822 = vmatmul.mubr.msk.f32.gmra.mxu1 %vm204_vm0, %v10253_v4  ;;  %3521 = vmatprep.mubr.f32.mxu0 %v16444_v0  ;;  %v4178_v53 = vmax.f32 %v3226_v56, 0.0  ;;  %v14084_v21 = vld [vmem:[%s16363_s3 + $0x580] sm:$0xff]  ;;  %v5577_v55 = vadd.f32 %v5576_v6, %v4164_v8 }
 0x3f8   :  { %v5541_v9 = vadd.f32 %v5540_v14, %v4179_v3  ;;  %v3679_v26 = vadd.f32 %v3678_v2, %v13320_v59  ;;  %v3231_v50 = vpop.f32.mrf.mxu0  ;;  %3970 = vmatprep.mubr.f32.mxu1 %v16444_v0  ;;  %16466 = vst [vmem:[#allocation40_spill] sm:$0xff] %v14084_v21  ;;  %v4180_v17 = vmax.f32 %v3675_v23, 0.0  ;;  %v10254_v3 = vld [vmem:[%s16360_s0 + $0x1e8] sm:$0xff] }
 0x3f9   :  { %v4193_v49 = vmax.f32 %v3230_v27, 0.0  ;;  %v3232_v4 = vadd.f32 %v3231_v50, %v13463_v54  ;;  %v3680_v12 = vpop.f32.mrf.mxu1  ;;  %v14097_v50 = vld [vmem:[%s16363_s3 + $0x780] sm:$0xff] }
 0x3fa   :  { %v4195_v14 = vmax.f32 %v3679_v26, 0.0  ;;  %v3681_v41 = vadd.f32 %v3680_v12, %v13473_v63  ;;  %v3235_v56 = vpop.f32.mrf.mxu0  ;;  %9759 = vmatmul.mubr.msk.f32.gmra.mxu0 %vm204_vm0, %v10254_v3  ;;  %16467 = vst [vmem:[#allocation41_spill] sm:$0xff] %v14097_v50  ;;  %v5504_v12 = vadd.f32 %v5503_v38, %v4178_v53  ;;  %v5578_v53 = vadd.f32 %v5577_v55, %v4180_v17 }
 0x3fb   :  { %v5468_v8 = vadd.f32 %v5467_v44, %v4193_v49  ;;  %v3236_v6 = vadd.f32 %v3235_v56, %v13310_v35  ;;  %v3684_v26 = vpop.f32.mrf.mxu1  ;;  %9823 = vmatmul.mubr.msk.f32.gmra.mxu1 %vm204_vm0, %v10254_v3  ;;  %3527 = vmatprep.mubr.f32.mxu0 %v16444_v0  ;;  %v4194_v2 = vmax.f32 %v3232_v4, 0.0  ;;  %v14109_v44 = vld [vmem:[%s16363_s3 + $0x570] sm:$0xff] }
 0x3fc   :  { %v5542_v7 = vadd.f32 %v5541_v9, %v4195_v14  ;;  %v3685_v40 = vadd.f32 %v3684_v26, %v13320_v59  ;;  %v3237_v13 = vpop.f32.mrf.mxu0  ;;  %3976 = vmatprep.mubr.f32.mxu1 %v16444_v0  ;;  %v4196_v49 = vmax.f32 %v3681_v41, 0.0  ;;  %v10255_v14 = vld [vmem:[%s16360_s0 + $0x1f0] sm:$0xff] }
 0x3fd   :  { %v4209_v56 = vmax.f32 %v3236_v6, 0.0  ;;  %v3238_v3 = vadd.f32 %v3237_v13, %v13463_v54  ;;  %v3686_v23 = vpop.f32.mrf.mxu1  ;;  %v14122_v13 = vld [vmem:[%s16363_s3 + $0x770] sm:$0xff] }
 0x3fe   :  { %v4211_v9 = vmax.f32 %v3685_v40, 0.0  ;;  %v3687_v38 = vadd.f32 %v3686_v23, %v13473_v63  ;;  %v3241_v4 = vpop.f32.mrf.mxu0  ;;  %9760 = vmatmul.mubr.msk.f32.gmra.mxu0 %vm204_vm0, %v10255_v14  ;;  %16468 = vst [vmem:[#allocation42_spill] sm:$0xff] %v14122_v13  ;;  %v5505_v23 = vadd.f32 %v5504_v12, %v4194_v2 }
 0x3ff   :  { %v5469_v41 = vadd.f32 %v5468_v8, %v4209_v56  ;;  %v3242_v55 = vadd.f32 %v3241_v4, %v13310_v35  ;;  %v3690_v40 = vpop.f32.mrf.mxu1  ;;  %9824 = vmatmul.mubr.msk.f32.gmra.mxu1 %vm204_vm0, %v10255_v14  ;;  %3533 = vmatprep.mubr.f32.mxu0 %v16444_v0  ;;  %v4210_v26 = vmax.f32 %v3238_v3, 0.0  ;;  %v14134_v8 = vld [vmem:[%s16363_s3 + $0x560] sm:$0xff]  ;;  %v5579_v56 = vadd.f32 %v5578_v53, %v4196_v49 }
 0x400   :  { %v5543_v27 = vadd.f32 %v5542_v7, %v4211_v9  ;;  %v3691_v50 = vadd.f32 %v3690_v40, %v13320_v59  ;;  %v3243_v21 = vpop.f32.mrf.mxu0  ;;  %3982 = vmatprep.mubr.f32.mxu1 %v16444_v0  ;;  %v4212_v2 = vmax.f32 %v3687_v38, 0.0  ;;  %v10256_v0 = vld [vmem:[%s16360_s0 + $0x1f8] sm:$0xff] }
 0x401   :  { %v4225_v4 = vmax.f32 %v3242_v55, 0.0  ;;  %v3244_v14 = vadd.f32 %v3243_v21, %v13463_v54  ;;  %v3692_v17 = vpop.f32.mrf.mxu1  ;;  %v14147_v21 = vld [vmem:[%s16363_s3 + $0x760] sm:$0xff]  ;;  %v5506_v40 = vadd.f32 %v5505_v23, %v4210_v26  ;;  %v16469_v55 = vunpack.c.l.bf16 %v13436_v47 }
 0x402   :  { %v4227_v7 = vmax.f32 %v3691_v50, 0.0  ;;  %v3693_v12 = vadd.f32 %v3692_v17, %v13473_v63  ;;  %v3247_v3 = vpop.f32.mrf.mxu0  ;;  %9761 = vmatmul.mubr.msk.f32.gmra.mxu0 %vm204_vm0, %v10256_v0  ;;  %v5580_v26 = vadd.f32 %v5579_v56, %v4212_v2  ;;  %v14186_v47 = vld [vmem:[%s16363_s3 + $0x540] sm:$0xff] }
 0x403   :  { %v5470_v49 = vadd.f32 %v5469_v41, %v4225_v4  ;;  %v3248_v53 = vadd.f32 %v3247_v3, %v13310_v35  ;;  %v3696_v50 = vpop.f32.mrf.mxu1  ;;  %9825 = vmatmul.mubr.msk.f32.gmra.mxu1 %vm204_vm0, %v10256_v0  ;;  %7863 = vmatprep.mubr.f32.mxu0 %v11566_v28  ;;  %v4226_v6 = vmax.f32 %v3244_v14, 0.0  ;;  %v14159_v41 = vld [vmem:[%s16363_s3 + $0x550] sm:$0xff] }
 0x404   :  { %v5544_v17 = vadd.f32 %v5543_v27, %v4227_v7  ;;  %v3697_v9 = vadd.f32 %v3696_v50, %v13320_v59  ;;  %7934 = vmatprep.mubr.f32.mxu1 %v11570_v30  ;;  %v3249_v13 = vpop.f32.mrf.mxu0  ;;  %v4228_v4 = vmax.f32 %v3693_v12, 0.0  ;;  %v14166_v27 = vld [vmem:[%s16363_s3 + $0x750] sm:$0xff]  ;;  %v7183_v12 = vunpack.c.h.bf16 %v14147_v21 }
 0x405   :  { %v4241_v3 = vmax.f32 %v3248_v53, 0.0  ;;  %v3250_v0 = vadd.f32 %v3249_v13, %v13463_v54  ;;  %v3698_v38 = vpop.f32.mrf.mxu1  ;;  %v5507_v2 = vadd.f32 %v5506_v40, %v4226_v6  ;;  %v16472_v40 = vunpack.c.h.bf16 %v13504_v19 }
 0x406   :  { %v4243_v23 = vmax.f32 %v3697_v9, 0.0  ;;  %v3699_v14 = vadd.f32 %v3698_v38, %v13473_v63  ;;  %v3253_v7 = vpop.f32.mrf.mxu0  ;;  %7864 = vmatmul.mubr.f32.vlgmr.msra.gmra.mxu0 %v11580_v52  ;;  %v16470_v52 = vunpack.c.l.bf16 %v13444_v46 }
 0x407   :  { %v5471_v53 = vadd.f32 %v5470_v49, %v4241_v3  ;;  %v3254_v13 = vadd.f32 %v3253_v7, %v13310_v35  ;;  %v3702_v50 = vpop.f32.mrf.mxu1  ;;  %7935 = vmatmul.mubr.f32.vlgmr.msra.gmra.mxu1 %v11585_v48  ;;  %7942 = vmatpush1.msra.mxu0 %v16469_v55  ;;  %v16471_v49 = vunpack.c.h.bf16 %v13488_v20  ;;  %v5581_v55 = vadd.f32 %v5580_v26, %v4228_v4  ;;  %v14200_v26 = vld [vmem:[%s16363_s3 + $0x740] sm:$0xff] }
 0x408   :  { %v5545_v9 = vadd.f32 %v5544_v17, %v4243_v23  ;;  %v3703_v38 = vadd.f32 %v3702_v50, %v13320_v59  ;;  %8013 = vmatpush1.msra.mxu1 %v16470_v52  ;;  %v3255_v3 = vpop.f32.mrf.mxu0  ;;  %v4242_v30 = vmax.f32 %v3250_v0, 0.0  ;;  %8005 = vmatprep.mubr.f32.mxu0 %v12427_v36  ;;  %v4244_v17 = vmax.f32 %v3699_v14, 0.0 }
 0x409   :  { %7943 = vmatprep.subr.mxu0 %v16471_v49  ;;  %v4257_v6 = vmax.f32 %v3254_v13, 0.0  ;;  %8014 = vmatprep.subr.mxu1 %v16472_v40  ;;  %v3256_v52 = vadd.f32 %v3255_v3, %v13463_v54  ;;  %v3704_v46 = vpop.f32.mrf.mxu1  ;;  %v16473_v49 = vunpack.c.l.bf16 %v13488_v20  ;;  %v16474_v14 = vunpack.c.l.bf16 %v13504_v19 }
 0x40a   :  { %v4259_v23 = vmax.f32 %v3703_v38, 0.0  ;;  %8076 = vmatprep.mubr.f32.mxu1 %v12433_v51  ;;  %v3705_v50 = vadd.f32 %v3704_v46, %v13473_v63  ;;  %v3259_v4 = vpop.f32.mrf.mxu0  ;;  %v16475_v38 = vunpack.c.h.bf16 %v13516_v25  ;;  %v16476_v0 = vunpack.c.h.bf16 %v13529_v22 }
 0x40b   :  { %7944 = vmatpush1.msra.mxu0 %v16473_v49  ;;  %v5472_v13 = vadd.f32 %v5471_v53, %v4257_v6  ;;  %v4258_v3 = vmax.f32 %v3256_v52, 0.0  ;;  %8015 = vmatpush1.msra.mxu1 %v16474_v14  ;;  %v3260_v40 = vadd.f32 %v3259_v4, %v13310_v35  ;;  %v3708_v20 = vpop.f32.mrf.mxu1  ;;  %v16477_v53 = vunpack.c.l.bf16 %v13516_v25 }
 0x40c   :  { %7945 = vmatprep.subr.mxu0 %v16475_v38  ;;  %v5546_v49 = vadd.f32 %v5545_v9, %v4259_v23  ;;  %v4260_v7 = vmax.f32 %v3705_v50, 0.0  ;;  %8016 = vmatprep.subr.mxu1 %v16476_v0  ;;  %v3709_v56 = vadd.f32 %v3708_v20, %v13320_v59  ;;  %v3261_v19 = vpop.f32.mrf.mxu0  ;;  %v7047_v6 = vunpack.c.h.bf16 %v14186_v47 }
 0x40d   :  { %7946 = vmatpush1.msra.mxu0 %v16477_v53  ;;  %v5508_v52 = vadd.f32 %v5507_v2, %v4242_v30  ;;  %v4273_v14 = vmax.f32 %v3260_v40, 0.0  ;;  %v16478_v4 = vunpack.c.l.bf16 %v13529_v22  ;;  %v16479_v38 = vunpack.c.h.bf16 %v13541_v45  ;;  %v3710_v23 = vpop.f32.mrf.mxu1  ;;  %v14229_v40 = vld [vmem:[%s16363_s3 + $0x530] sm:$0xff] }
 0x40e   :  { %v3262_v9 = vadd.f32 %v3261_v19, %v13463_v54  ;;  %v5582_v0 = vadd.f32 %v5581_v55, %v4244_v17  ;;  %v4275_v20 = vmax.f32 %v3709_v56, 0.0  ;;  %v16480_v25 = vunpack.c.h.bf16 %v13554_v33  ;;  %v3265_v22 = vpop.f32.mrf.mxu0 }
 0x40f   :  { %8017 = vmatpush1.msra.mxu1 %v16478_v4  ;;  %7947 = vmatprep.subr.mxu0 %v16479_v38  ;;  %v3711_v53 = vadd.f32 %v3710_v23, %v13473_v63  ;;  %v16481_v30 = vunpack.c.l.bf16 %v13541_v45  ;;  %v7175_v2 = vunpack.c.h.bf16 %v14200_v26  ;;  %v5509_v19 = vadd.f32 %v5508_v52, %v4258_v3  ;;  %v3714_v38 = vpop.f32.mrf.mxu1 }
 0x410   :  { %8018 = vmatprep.subr.mxu1 %v16480_v25  ;;  %v5473_v4 = vadd.f32 %v5472_v13, %v4273_v14  ;;  %v4274_v55 = vmax.f32 %v3262_v9, 0.0  ;;  %v16482_v56 = vunpack.c.l.bf16 %v13554_v33  ;;  %v16483_v17 = vunpack.c.h.bf16 %v13566_v37  ;;  %v3267_v3 = vpop.f32.mrf.mxu0  ;;  %v14244_v33 = vld [vmem:[%s16363_s3 + $0x730] sm:$0xff] }
 0x411   :  { %7948 = vmatpush1.msra.mxu0 %v16481_v30  ;;  %v3266_v45 = vadd.f32 %v3265_v22, %v13310_v35  ;;  %v5583_v23 = vadd.f32 %v5582_v0, %v4260_v7  ;;  %v5547_v25 = vadd.f32 %v5546_v49, %v4275_v20  ;;  %v4276_v30 = vmax.f32 %v3711_v53, 0.0 }
 0x412   :  { %8019 = vmatpush1.msra.mxu1 %v16482_v56  ;;  %7949 = vmatprep.subr.mxu0 %v16483_v17  ;;  %v16484_v50 = vunpack.c.h.bf16 %v13579_v34  ;;  %v3715_v46 = vadd.f32 %v3714_v38, %v13320_v59  ;;  %v16485_v13 = vunpack.c.l.bf16 %v13566_v37  ;;  %v5510_v52 = vadd.f32 %v5509_v19, %v4274_v55  ;;  %v14261_v56 = vld [vmem:[%s16363_s3 + $0x520] sm:$0xff] }
 0x413   :  { %v4289_v14 = vmax.f32 %v3266_v45, 0.0  ;;  %v16486_v7 = vunpack.c.l.bf16 %v13579_v34  ;;  %v16487_v49 = vunpack.c.h.bf16 %v13591_v62  ;;  %v3268_v9 = vadd.f32 %v3267_v3, %v13463_v54  ;;  %v3271_v34 = vpop.f32.mrf.mxu0 }
 0x414   :  { %8020 = vmatprep.subr.mxu1 %v16484_v50  ;;  %7950 = vmatpush1.msra.mxu0 %v16485_v13  ;;  %v3716_v50 = vpop.f32.mrf.mxu1  ;;  %v7042_v37 = vunpack.c.l.bf16 %v14229_v40  ;;  %v5584_v0 = vadd.f32 %v5583_v23, %v4276_v30  ;;  %v4291_v20 = vmax.f32 %v3715_v46, 0.0  ;;  %v16488_v53 = vunpack.c.h.bf16 %v13604_v61 }
 0x415   :  { %8021 = vmatpush1.msra.mxu1 %v16486_v7  ;;  %7951 = vmatprep.subr.mxu0 %v16487_v49  ;;  %v3717_v22 = vadd.f32 %v3716_v50, %v13473_v63  ;;  %v16489_v19 = vunpack.c.l.bf16 %v13591_v62  ;;  %v7043_v55 = vunpack.c.h.bf16 %v14229_v40  ;;  %v5474_v17 = vadd.f32 %v5473_v4, %v4289_v14 }
 0x416   :  { %8022 = vmatprep.subr.mxu1 %v16488_v53  ;;  %v4290_v45 = vmax.f32 %v3268_v9, 0.0  ;;  %v16490_v46 = vunpack.c.l.bf16 %v13604_v61  ;;  %v16491_v38 = vunpack.c.h.bf16 %v13616_v29  ;;  %v3272_v23 = vadd.f32 %v3271_v34, %v13310_v35  ;;  %v3720_v62 = vpop.f32.mrf.mxu1  ;;  %v3273_v61 = vpop.f32.mrf.mxu0  ;;  %v14278_v9 = vld [vmem:[%s16363_s3 + $0x720] sm:$0xff] }
 0x417   :  { %7952 = vmatpush1.msra.mxu0 %v16489_v19  ;;  %v7170_v30 = vunpack.c.l.bf16 %v14244_v33  ;;  %v5548_v13 = vadd.f32 %v5547_v25, %v4291_v20  ;;  %v4292_v3 = vmax.f32 %v3717_v22, 0.0  ;;  %v16492_v7 = vunpack.c.h.bf16 %v13629_v15 }
 0x418   :  { %8023 = vmatpush1.msra.mxu1 %v16490_v46  ;;  %7953 = vmatprep.subr.mxu0 %v16491_v38  ;;  %v3721_v49 = vadd.f32 %v3720_v62, %v13320_v59  ;;  %v16493_v4 = vunpack.c.l.bf16 %v13616_v29  ;;  %v7171_v14 = vunpack.c.h.bf16 %v14244_v33  ;;  %v5511_v50 = vadd.f32 %v5510_v52, %v4290_v45  ;;  %v3722_v29 = vpop.f32.mrf.mxu1 }
 0x419   :  { %8024 = vmatprep.subr.mxu1 %v16492_v7  ;;  %v4305_v53 = vmax.f32 %v3272_v23, 0.0  ;;  %v16494_v25 = vunpack.c.l.bf16 %v13629_v15  ;;  %v16495_v20 = vunpack.c.h.bf16 %v13641_v16  ;;  %v3274_v22 = vadd.f32 %v3273_v61, %v13463_v54  ;;  %v3277_v15 = vpop.f32.mrf.mxu0  ;;  %v14295_v23 = vld [vmem:[%s16363_s3 + $0x510] sm:$0xff] }
 0x41a   :  { %7954 = vmatpush1.msra.mxu0 %v16493_v4  ;;  %v5585_v34 = vadd.f32 %v5584_v0, %v4292_v3  ;;  %v4307_v46 = vmax.f32 %v3721_v49, 0.0  ;;  %v16496_v38 = vunpack.c.h.bf16 %v13654_v31  ;;  %v3723_v62 = vadd.f32 %v3722_v29, %v13473_v63 }
 0x41b   :  { %8025 = vmatpush1.msra.mxu1 %v16494_v25  ;;  %7955 = vmatprep.subr.mxu0 %v16495_v20  ;;  %v16497_v52 = vunpack.c.l.bf16 %v13641_v16  ;;  %v7039_v45 = vunpack.c.h.bf16 %v14261_v56  ;;  %v5475_v7 = vadd.f32 %v5474_v17, %v4305_v53  ;;  %v4306_v4 = vmax.f32 %v3274_v22, 0.0  ;;  %v3726_v16 = vpop.f32.mrf.mxu1  ;;  %v14312_v22 = vld [vmem:[%s16363_s3 + $0x710] sm:$0xff] }
 0x41c   :  { %8026 = vmatprep.subr.mxu1 %v16496_v38  ;;  %v16498_v0 = vunpack.c.l.bf16 %v13654_v31  ;;  %v16499_v3 = vunpack.c.h.bf16 %v13666_v10  ;;  %v3278_v49 = vadd.f32 %v3277_v15, %v13310_v35  ;;  %v5549_v25 = vadd.f32 %v5548_v13, %v4307_v46  ;;  %v3279_v31 = vpop.f32.mrf.mxu0 }
 0x41d   :  { %7956 = vmatpush1.msra.mxu0 %v16497_v52  ;;  %v4308_v20 = vmax.f32 %v3723_v62, 0.0  ;;  %v16500_v29 = vunpack.c.h.bf16 %v13679_v18  ;;  %v3727_v38 = vadd.f32 %v3726_v16, %v13320_v59  ;;  %v16501_v17 = vunpack.c.l.bf16 %v13666_v10  ;;  %v3728_v10 = vpop.f32.mrf.mxu1 }
 0x41e   :  { %8027 = vmatpush1.msra.mxu1 %v16498_v0  ;;  %7957 = vmatprep.subr.mxu0 %v16499_v3  ;;  %v5512_v52 = vadd.f32 %v5511_v50, %v4306_v4  ;;  %v4321_v15 = vmax.f32 %v3278_v49, 0.0  ;;  %v16502_v13 = vunpack.c.l.bf16 %v13679_v18  ;;  %v16503_v46 = vunpack.c.h.bf16 %v13691_v57  ;;  %v3283_v18 = vpop.f32.mrf.mxu0  ;;  %v14329_v49 = vld [vmem:[%s16363_s3 + $0x500] sm:$0xff] }
 0x41f   :  { %8028 = vmatprep.subr.mxu1 %v16500_v29  ;;  %7958 = vmatpush1.msra.mxu0 %v16501_v17  ;;  %v3280_v62 = vadd.f32 %v3279_v31, %v13463_v54  ;;  %v5586_v3 = vadd.f32 %v5585_v34, %v4308_v20  ;;  %v4323_v16 = vmax.f32 %v3727_v38, 0.0  ;;  %v16504_v29 = vunpack.c.h.bf16 %v13704_v24 }
 0x420   :  { %8029 = vmatpush1.msra.mxu1 %v16502_v13  ;;  %7959 = vmatprep.subr.mxu0 %v16503_v46  ;;  %v3729_v17 = vadd.f32 %v3728_v10, %v13473_v63  ;;  %v16505_v50 = vunpack.c.l.bf16 %v13691_v57  ;;  %v5476_v31 = vadd.f32 %v5475_v7, %v4321_v15  ;;  %v16506_v34 = vunpack.c.l.bf16 %v13704_v24  ;;  %v3732_v57 = vpop.f32.mrf.mxu1  ;;  %v3285_v24 = vpop.f32.mrf.mxu0 }
 0x421   :  { %8030 = vmatprep.subr.mxu1 %v16504_v29  ;;  %v4322_v13 = vmax.f32 %v3280_v62, 0.0  ;;  %v16507_v20 = vunpack.c.h.bf16 %v13716_v42  ;;  %v3284_v38 = vadd.f32 %v3283_v18, %v13310_v35  ;;  %v5550_v10 = vadd.f32 %v5549_v25, %v4323_v16 }
 0x422   :  { %7960 = vmatpush1.msra.mxu0 %v16505_v50  ;;  %8031 = vmatpush1.msra.mxu1 %v16506_v34  ;;  %v4324_v29 = vmax.f32 %v3729_v17, 0.0  ;;  %v16508_v50 = vunpack.c.h.bf16 %v13729_v1  ;;  %v3733_v0 = vadd.f32 %v3732_v57, %v13320_v59  ;;  %v16509_v7 = vunpack.c.l.bf16 %v13716_v42  ;;  %v3734_v16 = vpop.f32.mrf.mxu1  ;;  %v16512_v42 = vld [vmem:[#allocation19_spill] sm:$0xff] }
 0x423   :  { %7961 = vmatprep.subr.mxu0 %v16507_v20  ;;  %v5513_v62 = vadd.f32 %v5512_v52, %v4322_v13  ;;  %v4337_v34 = vmax.f32 %v3284_v38, 0.0  ;;  %v16510_v18 = vunpack.c.l.bf16 %v13729_v1  ;;  %v16511_v20 = vunpack.c.h.bf16 %v13741_v58  ;;  %v3289_v1 = vpop.f32.mrf.mxu0 }
 0x424   :  { %8032 = vmatprep.subr.mxu1 %v16508_v50  ;;  %7962 = vmatpush1.msra.mxu0 %v16509_v7  ;;  %v3286_v25 = vadd.f32 %v3285_v24, %v13463_v54  ;;  %v5587_v57 = vadd.f32 %v5586_v3, %v4324_v29  ;;  %v4339_v50 = vmax.f32 %v3733_v0, 0.0  ;;  %v16513_v7 = vunpack.c.h.bf16 %v16512_v42  ;;  %v3738_v3 = vpop.f32.mrf.mxu1 }
 0x425   :  { %8033 = vmatpush1.msra.mxu1 %v16510_v18  ;;  %7963 = vmatprep.subr.mxu0 %v16511_v20  ;;  %v3735_v46 = vadd.f32 %v3734_v16, %v13473_v63  ;;  %v16514_v52 = vunpack.c.l.bf16 %v13741_v58  ;;  %v5477_v38 = vadd.f32 %v5476_v31, %v4337_v34  ;;  %v16515_v24 = vunpack.c.l.bf16 %v16512_v42  ;;  %v16516_v20 = vld [vmem:[#allocation20_spill] sm:$0xff] }
 0x426   :  { %8034 = vmatprep.subr.mxu1 %v16513_v7  ;;  %v4338_v18 = vmax.f32 %v3286_v25, 0.0  ;;  %v16517_v17 = vunpack.c.h.bf16 %v16516_v20  ;;  %v3290_v0 = vadd.f32 %v3289_v1, %v13310_v35  ;;  %v16518_v29 = vrot.slane %v13849_v32, 2  ;;  %v3291_v25 = vpop.f32.mrf.mxu0 }
 0x427   :  { %7964 = vmatpush1.msra.mxu0 %v16514_v52  ;;  %8035 = vmatpush1.msra.mxu1 %v16515_v24  ;;  %v5551_v58 = vadd.f32 %v5550_v10, %v4339_v50  ;;  %v4340_v7 = vmax.f32 %v3735_v46, 0.0  ;;  %v16519_v52 = vld [vmem:[#allocation21_spill] sm:$0xff]  ;;  %v3739_v31 = vadd.f32 %v3738_v3, %v13320_v59  ;;  %v16521_v34 = vunpack.c.l.bf16 %v16516_v20 }
 0x428   :  { %7965 = vmatprep.subr.mxu0 %v16517_v17  ;;  %v5972_v16 = vadd.f32 %v16518_v29, %v13849_v32  ;;  %v16520_v15 = vunpack.c.h.bf16 %v16519_v52  ;;  %v16522_v17 = vrot.slane %v13853_v11, 2  ;;  %v5514_v1 = vadd.f32 %v5513_v62, %v4338_v18  ;;  %v16524_v32 = vld [vmem:[#allocation22_spill] sm:$0xff]  ;;  %v16526_v29 = vld [vmem:[#allocation23_spill] sm:$0xff]  ;;  %v3295_v62 = vpop.f32.mrf.mxu0 }
 0x429   :  { %7966 = vmatpush1.msra.mxu0 %v16521_v34  ;;  %v4353_v24 = vmax.f32 %v3290_v0, 0.0  ;;  %v16523_v13 = vunpack.c.l.bf16 %v16519_v52  ;;  %v16525_v46 = vunpack.c.h.bf16 %v16524_v32  ;;  %v3292_v10 = vadd.f32 %v3291_v25, %v13463_v54  ;;  %v16530_v25 = vld [vmem:[#allocation24_spill] sm:$0xff] }
 0x42a   :  { %8036 = vmatprep.subr.mxu1 %v16520_v15  ;;  %v6046_v42 = vadd.f32 %v16522_v17, %v13853_v11  ;;  %v3740_v15 = vpop.f32.mrf.mxu1  ;;  %v5973_v50 = vrot.slane %v5972_v16, 1  ;;  %v5588_v3 = vadd.f32 %v5587_v57, %v4340_v7  ;;  %v4355_v20 = vmax.f32 %v3739_v31, 0.0 }
 0x42b   :  { %8037 = vmatpush1.msra.mxu1 %v16523_v13  ;;  %7967 = vmatprep.subr.mxu0 %v16525_v46  ;;  %v16527_v34 = vunpack.c.h.bf16 %v16526_v29  ;;  %v3741_v4 = vadd.f32 %v3740_v15, %v13473_v63  ;;  %v16528_v11 = vunpack.c.l.bf16 %v16524_v32  ;;  %v5478_v13 = vadd.f32 %v5477_v38, %v4353_v24  ;;  %v16532_v15 = vld [vmem:[#allocation25_spill] sm:$0xff]  ;;  %v3297_v24 = vpop.f32.mrf.mxu0 }
 0x42c   :  { %v6047_v18 = vrot.slane %v6046_v42, 1  ;;  %v4354_v0 = vmax.f32 %v3292_v10, 0.0  ;;  %v16529_v52 = vunpack.c.l.bf16 %v16526_v29  ;;  %v16531_v17 = vunpack.c.h.bf16 %v16530_v25  ;;  %v3744_v7 = vpop.f32.mrf.mxu1  ;;  %v14394_v10 = vld [vmem:[%s16363_s3 + $0x700] sm:$0xff] }
 0x42d   :  { %8038 = vmatprep.subr.mxu1 %v16527_v34  ;;  %7968 = vmatpush1.msra.mxu0 %v16528_v11  ;;  %v3296_v57 = vadd.f32 %v3295_v62, %v13310_v35  ;;  %v5974_v31 = vadd.f32 %v5973_v50, %v5972_v16  ;;  %v5552_v46 = vadd.f32 %v5551_v58, %v4355_v20  ;;  %v4356_v34 = vmax.f32 %v3741_v4, 0.0  ;;  %v16537_v50 = vld [vmem:[#allocation17_spill] sm:$0xff] }
 0x42e   :  { %8039 = vmatpush1.msra.mxu1 %v16529_v52  ;;  %7969 = vmatprep.subr.mxu0 %v16531_v17  ;;  %v16533_v61 = vunpack.c.h.bf16 %v16532_v15  ;;  %v3745_v32 = vadd.f32 %v3744_v7, %v13320_v59  ;;  %v16534_v38 = vunpack.c.l.bf16 %v16530_v25  ;;  %v6048_v29 = vadd.f32 %v6047_v18, %v6046_v42  ;;  %v3746_v58 = vpop.f32.mrf.mxu1  ;;  %v3301_v18 = vpop.f32.mrf.mxu0 }
 0x42f   :  { %v5515_v11 = vadd.f32 %v5514_v1, %v4354_v0  ;;  %v4369_v62 = vmax.f32 %v3296_v57, 0.0  ;;  %v16535_v16 = vunpack.c.l.bf16 %v16532_v15  ;;  %v16536_v4 = vunpack.c.h.bf16 %v13888_v43  ;;  %v14413_v0 = vld [vmem:[%s16363_s3 + $0x8f0] sm:$0xff]  ;;  %v16540_v57 = vld [vmem:[#allocation18_spill] sm:$0xff] }
 0x430   :  { %8040 = vmatprep.subr.mxu1 %v16533_v61  ;;  %7970 = vmatpush1.msra.mxu0 %v16534_v38  ;;  %v3298_v61 = vadd.f32 %v3297_v24, %v13463_v54  ;;  %v14403_v20 = vsel %vm7766_vm1, %v5974_v31, %v16537_v50  ;;  %v5589_v52 = vadd.f32 %v5588_v3, %v4356_v34  ;;  %v4371_v25 = vmax.f32 %v3745_v32, 0.0  ;;  %v3750_v32 = vpop.f32.mrf.mxu1 }
 0x431   :  { %8041 = vmatpush1.msra.mxu1 %v16535_v16  ;;  %7971 = vmatprep.subr.mxu0 %v16536_v4  ;;  %v16538_v17 = vunpack.c.h.bf16 %v13902_v5  ;;  %v3747_v42 = vadd.f32 %v3746_v58, %v13473_v63  ;;  %v16539_v1 = vunpack.c.l.bf16 %v13888_v43  ;;  %v14417_v7 = vsel %vm7766_vm1, %v6048_v29, %v16540_v57 }
 0x432   :  { %v5479_v3 = vadd.f32 %v5478_v13, %v4369_v62  ;;  %v4370_v31 = vmax.f32 %v3298_v61, 0.0  ;;  %v16541_v34 = vunpack.c.l.bf16 %v13902_v5  ;;  %v16542_v15 = vunpack.c.h.bf16 %v13915_v60  ;;  %v3303_v5 = vpop.f32.mrf.mxu0  ;;  %v14434_v61 = vld [vmem:[%s16363_s3 + $0xaf0] sm:$0xff] }
 0x433   :  { %8042 = vmatprep.subr.mxu1 %v16538_v17  ;;  %7972 = vmatpush1.msra.mxu0 %v16539_v1  ;;  %v3302_v43 = vadd.f32 %v3301_v18, %v13310_v35  ;;  %v5553_v24 = vadd.f32 %v5552_v46, %v4371_v25  ;;  %v4372_v16 = vmax.f32 %v3747_v42, 0.0  ;;  %v16543_v4 = vunpack.c.h.bf16 %v13927_v39  ;;  %v16546_v25 = vld [vmem:[#allocation28_spill] sm:$0xff] }
 0x434   :  { %8043 = vmatpush1.msra.mxu1 %v16541_v34  ;;  %7973 = vmatprep.subr.mxu0 %v16542_v15  ;;  %v3751_v29 = vadd.f32 %v3750_v32, %v13320_v59  ;;  %v16544_v13 = vunpack.c.l.bf16 %v13915_v60  ;;  %v5516_v58 = vadd.f32 %v5515_v11, %v4370_v31  ;;  %v16545_v46 = vunpack.c.l.bf16 %v13927_v39  ;;  %v3752_v60 = vpop.f32.mrf.mxu1  ;;  %v16548_v34 = vld [vmem:[#allocation29_spill] sm:$0xff]  ;;  %v3307_v39 = vpop.f32.mrf.mxu0 }
 0x435   :  { %8044 = vmatprep.subr.mxu1 %v16543_v4  ;;  %v4385_v50 = vmax.f32 %v3302_v43, 0.0  ;;  %v16547_v17 = vunpack.c.h.bf16 %v16546_v25  ;;  %v3304_v42 = vadd.f32 %v3303_v5, %v13463_v54  ;;  %v5590_v18 = vadd.f32 %v5589_v52, %v4372_v16  ;;  %v14451_v43 = vld [vmem:[%s16363_s3 + $0x8e0] sm:$0xff] }
 0x436   :  { %7974 = vmatpush2.msra.mxu0 %v16544_v13  ;;  %8045 = vmatpush2.msra.mxu1 %v16545_v46  ;;  %v4387_v57 = vmax.f32 %v3751_v29, 0.0  ;;  %v16549_v15 = vunpack.c.h.bf16 %v16548_v34  ;;  %v3753_v32 = vadd.f32 %v3752_v60, %v13473_v63  ;;  %v16550_v11 = vunpack.c.l.bf16 %v16546_v25  ;;  %v16552_v16 = vld [vmem:[#allocation30_spill] sm:$0xff]  ;;  %v3756_v46 = vpop.f32.mrf.mxu1  ;;  %v16560_v25 = vld [vmem:[#allocation33_spill] sm:$0xff] }
 0x437   :  { %7975 = vmatprep.subr.mxu0 %v16547_v17  ;;  %v5480_v4 = vadd.f32 %v5479_v3, %v4385_v50  ;;  %v4386_v13 = vmax.f32 %v3304_v42, 0.0  ;;  %v16551_v52 = vunpack.c.l.bf16 %v16548_v34  ;;  %v16553_v29 = vunpack.c.h.bf16 %v16552_v16  ;;  %v3309_v50 = vpop.f32.mrf.mxu0  ;;  %v14468_v34 = vld [vmem:[%s16363_s3 + $0xae0] sm:$0xff] }
 0x438   :  { %8046 = vmatprep.subr.mxu1 %v16549_v15  ;;  %7976 = vmatpush2.msra.mxu0 %v16550_v11  ;;  %v3308_v5 = vadd.f32 %v3307_v39, %v13310_v35  ;;  %v5554_v17 = vadd.f32 %v5553_v24, %v4387_v57  ;;  %v4388_v60 = vmax.f32 %v3753_v32, 0.0  ;;  %v16554_v15 = vld [vmem:[#allocation31_spill] sm:$0xff]  ;;  %v3757_v1 = vadd.f32 %v3756_v46, %v13320_v59  ;;  %v16558_v57 = vld [vmem:[#allocation32_spill] sm:$0xff] }
 0x439   :  { %8047 = vmatpush2.msra.mxu1 %v16551_v52  ;;  %7977 = vmatprep.subr.mxu0 %v16553_v29  ;;  %v16555_v11 = vunpack.c.h.bf16 %v16554_v15  ;;  %v16556_v3 = vunpack.c.l.bf16 %v16552_v16  ;;  %v5517_v39 = vadd.f32 %v5516_v58, %v4386_v13  ;;  %v16557_v24 = vunpack.c.l.bf16 %v16554_v15  ;;  %v3758_v16 = vpop.f32.mrf.mxu1  ;;  %v3313_v13 = vpop.f32.mrf.mxu0  ;;  %v14485_v15 = vld [vmem:[%s16363_s3 + $0x8d0] sm:$0xff] }
 0x43a   :  { %v4401_v52 = vmax.f32 %v3308_v5, 0.0  ;;  %v16559_v32 = vunpack.c.h.bf16 %v16558_v57  ;;  %v3310_v29 = vadd.f32 %v3309_v50, %v13463_v54  ;;  %v16561_v42 = vunpack.c.h.bf16 %v16560_v25  ;;  %v16566_v46 = vld [vmem:[#allocation35_spill] sm:$0xff] }
 0x43b   :  { %8048 = vmatprep.subr.mxu1 %v16555_v11  ;;  %7978 = vmatpush2.msra.mxu0 %v16556_v3  ;;  %v5591_v11 = vadd.f32 %v5590_v18, %v4388_v60  ;;  %v4403_v3 = vmax.f32 %v3757_v1, 0.0  ;;  %v3759_v31 = vadd.f32 %v3758_v16, %v13473_v63  ;;  %v16562_v58 = vunpack.c.l.bf16 %v16558_v57  ;;  %v16564_v18 = vld [vmem:[#allocation34_spill] sm:$0xff]  ;;  %v3762_v57 = vpop.f32.mrf.mxu1 }
 0x43c   :  { %8049 = vmatpush2.msra.mxu1 %v16557_v24  ;;  %7979 = vmatprep.subr.mxu0 %v16559_v32  ;;  %v5481_v50 = vadd.f32 %v5480_v4, %v4401_v52  ;;  %v4402_v24 = vmax.f32 %v3310_v29, 0.0  ;;  %v16563_v1 = vunpack.c.l.bf16 %v16560_v25  ;;  %v16565_v60 = vunpack.c.h.bf16 %v16564_v18  ;;  %v3315_v25 = vpop.f32.mrf.mxu0  ;;  %v14502_v29 = vld [vmem:[%s16363_s3 + $0xad0] sm:$0xff]  ;;  %v16572_v32 = vld [vmem:[#allocation37_spill] sm:$0xff] }
 0x43d   :  { %8050 = vmatprep.subr.mxu1 %v16561_v42  ;;  %7980 = vmatpush2.msra.mxu0 %v16562_v58  ;;  %v3314_v42 = vadd.f32 %v3313_v13, %v13310_v35  ;;  %v5555_v16 = vadd.f32 %v5554_v17, %v4403_v3  ;;  %v4404_v58 = vmax.f32 %v3759_v31, 0.0  ;;  %v16567_v5 = vunpack.c.h.bf16 %v16566_v46  ;;  %v16570_v17 = vld [vmem:[#allocation36_spill] sm:$0xff] }
 0x43e   :  { %8051 = vmatpush2.msra.mxu1 %v16563_v1  ;;  %7981 = vmatprep.subr.mxu0 %v16565_v60  ;;  %v3763_v38 = vadd.f32 %v3762_v57, %v13320_v59  ;;  %v16568_v4 = vunpack.c.l.bf16 %v16564_v18  ;;  %v5518_v13 = vadd.f32 %v5517_v39, %v4402_v24  ;;  %v16569_v31 = vunpack.c.l.bf16 %v16566_v46  ;;  %v3764_v18 = vpop.f32.mrf.mxu1  ;;  %v3319_v46 = vpop.f32.mrf.mxu0  ;;  %v16578_v60 = vld [vmem:[#allocation39_spill] sm:$0xff] }
 0x43f   :  { %8052 = vmatprep.subr.mxu1 %v16567_v5  ;;  %v4417_v1 = vmax.f32 %v3314_v42, 0.0  ;;  %v16571_v3 = vunpack.c.h.bf16 %v16570_v17  ;;  %v3316_v5 = vadd.f32 %v3315_v25, %v13463_v54  ;;  %v5592_v57 = vadd.f32 %v5591_v11, %v4404_v58  ;;  %v14519_v42 = vld [vmem:[%s16363_s3 + $0x8c0] sm:$0xff] }
 0x440   :  { %7982 = vmatpush2.msra.mxu0 %v16568_v4  ;;  %8053 = vmatpush2.msra.mxu1 %v16569_v31  ;;  %v4419_v4 = vmax.f32 %v3763_v38, 0.0  ;;  %v16573_v52 = vunpack.c.h.bf16 %v16572_v32  ;;  %v3765_v62 = vadd.f32 %v3764_v18, %v13473_v63  ;;  %v16574_v39 = vunpack.c.l.bf16 %v16570_v17  ;;  %v16576_v11 = vld [vmem:[#allocation38_spill] sm:$0xff]  ;;  %v3768_v17 = vpop.f32.mrf.mxu1 }
 0x441   :  { %7983 = vmatprep.subr.mxu0 %v16571_v3  ;;  %v5482_v25 = vadd.f32 %v5481_v50, %v4417_v1  ;;  %v4418_v31 = vmax.f32 %v3316_v5, 0.0  ;;  %v16575_v38 = vunpack.c.l.bf16 %v16572_v32  ;;  %v16577_v58 = vunpack.c.h.bf16 %v16576_v11  ;;  %v3321_v32 = vpop.f32.mrf.mxu0  ;;  %v14536_v5 = vld [vmem:[%s16363_s3 + $0xac0] sm:$0xff] }
 0x442   :  { %8054 = vmatprep.subr.mxu1 %v16573_v52  ;;  %7984 = vmatpush2.msra.mxu0 %v16574_v39  ;;  %v3320_v52 = vadd.f32 %v3319_v46, %v13310_v35  ;;  %v5556_v18 = vadd.f32 %v5555_v16, %v4419_v4  ;;  %v4420_v39 = vmax.f32 %v3765_v62, 0.0  ;;  %v16579_v24 = vunpack.c.h.bf16 %v16578_v60  ;;  %v16582_v16 = vld [vmem:[#allocation40_spill] sm:$0xff]  ;;  %v16584_v3 = vld [vmem:[#allocation41_spill] sm:$0xff] }
 0x443   :  { %8055 = vmatpush2.msra.mxu1 %v16575_v38  ;;  %7985 = vmatprep.subr.mxu0 %v16577_v58  ;;  %v3769_v19 = vadd.f32 %v3768_v17, %v13320_v59  ;;  %v16580_v50 = vunpack.c.l.bf16 %v16576_v11  ;;  %v5519_v46 = vadd.f32 %v5518_v13, %v4418_v31  ;;  %v16581_v62 = vunpack.c.l.bf16 %v16578_v60  ;;  %v3770_v11 = vpop.f32.mrf.mxu1  ;;  %v3325_v60 = vpop.f32.mrf.mxu0 }
 0x444   :  { %8056 = vmatprep.subr.mxu1 %v16579_v24  ;;  %v4433_v38 = vmax.f32 %v3320_v52, 0.0  ;;  %v16583_v4 = vunpack.c.h.bf16 %v16582_v16  ;;  %v3322_v24 = vadd.f32 %v3321_v32, %v13463_v54  ;;  %v5593_v17 = vadd.f32 %v5592_v57, %v4420_v39  ;;  %v14553_v52 = vld [vmem:[%s16363_s3 + $0x8b0] sm:$0xff] }
 0x445   :  { %7986 = vmatpush2.msra.mxu0 %v16580_v50  ;;  %8057 = vmatpush2.msra.mxu1 %v16581_v62  ;;  %v4435_v50 = vmax.f32 %v3769_v19, 0.0  ;;  %v16585_v1 = vunpack.c.h.bf16 %v16584_v3  ;;  %v3771_v53 = vadd.f32 %v3770_v11, %v13473_v63  ;;  %v16586_v13 = vunpack.c.l.bf16 %v16582_v16 }
 0x446   :  { %7987 = vmatprep.subr.mxu0 %v16583_v4  ;;  %v5483_v32 = vadd.f32 %v5482_v25, %v4433_v38  ;;  %v4434_v62 = vmax.f32 %v3322_v24, 0.0  ;;  %v16587_v19 = vunpack.c.l.bf16 %v16584_v3  ;;  %v16588_v57 = vunpack.c.h.bf16 %v14109_v44  ;;  %v3327_v3 = vpop.f32.mrf.mxu0  ;;  %v14570_v24 = vld [vmem:[%s16363_s3 + $0xab0] sm:$0xff] }
 0x447   :  { %8058 = vmatprep.subr.mxu1 %v16585_v1  ;;  %7988 = vmatpush2.msra.mxu0 %v16586_v13  ;;  %v3326_v39 = vadd.f32 %v3325_v60, %v13310_v35  ;;  %v3774_v1 = vpop.f32.mrf.mxu1  ;;  %v7398_v16 = vunpack.c.l.bf16 %v14536_v5  ;;  %v5557_v4 = vadd.f32 %v5556_v18, %v4435_v50  ;;  %v4436_v11 = vmax.f32 %v3771_v53, 0.0  ;;  %v16589_v13 = vld [vmem:[#allocation42_spill] sm:$0xff] }
 0x448   :  { %8059 = vmatpush2.msra.mxu1 %v16587_v19  ;;  %7989 = vmatprep.subr.mxu0 %v16588_v57  ;;  %v16590_v58 = vunpack.c.h.bf16 %v16589_v13  ;;  %v3775_v31 = vadd.f32 %v3774_v1, %v13320_v59  ;;  %v16591_v25 = vunpack.c.l.bf16 %v14109_v44  ;;  %v7399_v38 = vunpack.c.h.bf16 %v14536_v5 }
 0x449   :  { %v5520_v60 = vadd.f32 %v5519_v46, %v4434_v62  ;;  %v4449_v19 = vmax.f32 %v3326_v39, 0.0  ;;  %v16592_v53 = vunpack.c.l.bf16 %v16589_v13  ;;  %v16593_v18 = vunpack.c.h.bf16 %v14134_v8  ;;  %v3776_v44 = vpop.f32.mrf.mxu1  ;;  %v3331_v62 = vpop.f32.mrf.mxu0  ;;  %v14587_v13 = vld [vmem:[%s16363_s3 + $0x8a0] sm:$0xff] }
 0x44a   :  { %8060 = vmatprep.subr.mxu1 %v16590_v58  ;;  %7990 = vmatpush2.msra.mxu0 %v16591_v25  ;;  %v3328_v58 = vadd.f32 %v3327_v3, %v13463_v54  ;;  %v5594_v57 = vadd.f32 %v5593_v17, %v4436_v11  ;;  %v4451_v1 = vmax.f32 %v3775_v31, 0.0  ;;  %v3777_v25 = vadd.f32 %v3776_v44, %v13473_v63 }
 0x44b   :  { %8061 = vmatpush2.msra.mxu1 %v16592_v53  ;;  %7991 = vmatprep.subr.mxu0 %v16593_v18  ;;  %v16594_v46 = vunpack.c.l.bf16 %v14134_v8  ;;  %v7267_v39 = vunpack.c.h.bf16 %v14553_v52  ;;  %v5484_v3 = vadd.f32 %v5483_v32, %v4449_v19  ;;  %v16595_v17 = vunpack.c.l.bf16 %v14147_v21  ;;  %v3780_v8 = vpop.f32.mrf.mxu1  ;;  %v3333_v21 = vpop.f32.mrf.mxu0 }
 0x44c   :  { %8062 = vmatprep.subr.mxu1 %v7183_v12  ;;  %v4450_v53 = vmax.f32 %v3328_v58, 0.0  ;;  %v16596_v12 = vunpack.c.h.bf16 %v14159_v41  ;;  %v3332_v31 = vadd.f32 %v3331_v62, %v13310_v35  ;;  %v7394_v11 = vunpack.c.l.bf16 %v14570_v24  ;;  %v14604_v58 = vld [vmem:[%s16363_s3 + $0xaa0] sm:$0xff] }
 0x44d   :  { %7992 = vmatpush2.msra.mxu0 %v16594_v46  ;;  %8063 = vmatpush2.msra.mxu1 %v16595_v17  ;;  %v5558_v18 = vadd.f32 %v5557_v4, %v4451_v1  ;;  %v4452_v44 = vmax.f32 %v3777_v25, 0.0  ;;  %v16597_v46 = vunpack.c.h.bf16 %v14166_v27  ;;  %v3781_v50 = vadd.f32 %v3780_v8, %v13320_v59 }
 0x44e   :  { %7993 = vmatprep.subr.mxu0 %v16596_v12  ;;  %v16598_v32 = vunpack.c.l.bf16 %v14159_v41  ;;  %v7395_v19 = vunpack.c.h.bf16 %v14570_v24  ;;  %v5521_v62 = vadd.f32 %v5520_v60, %v4450_v53  ;;  %v4465_v17 = vmax.f32 %v3332_v31, 0.0  ;;  %v3782_v41 = vpop.f32.mrf.mxu1 }
 0x44f   :  { %8064 = vmatprep.subr.mxu1 %v16597_v46  ;;  %v16599_v4 = vunpack.c.l.bf16 %v14166_v27  ;;  %v3334_v1 = vadd.f32 %v3333_v21, %v13463_v54  ;;  %v7262_v25 = vunpack.c.l.bf16 %v14587_v13  ;;  %v5595_v12 = vadd.f32 %v5594_v57, %v4452_v44  ;;  %v3337_v27 = vpop.f32.mrf.mxu0 }
 0x450   :  { %7994 = vmatpush2.msra.mxu0 %v16598_v32  ;;  %v4467_v8 = vmax.f32 %v3781_v50, 0.0  ;;  %v3783_v46 = vadd.f32 %v3782_v41, %v13473_v63  ;;  %v16600_v60 = vunpack.c.l.bf16 %v14186_v47  ;;  %v7263_v53 = vunpack.c.h.bf16 %v14587_v13  ;;  %v3786_v47 = vpop.f32.mrf.mxu1 }
 0x451   :  { %8065 = vmatpush2.msra.mxu1 %v16599_v4  ;;  %7995 = vmatprep.subr.mxu0 %v7047_v6  ;;  %v14621_v6 = vld [vmem:[%s16363_s3 + $0x890] sm:$0xff]  ;;  %v5485_v31 = vadd.f32 %v5484_v3, %v4465_v17  ;;  %v4466_v32 = vmax.f32 %v3334_v1, 0.0  ;;  %v16601_v50 = vunpack.c.l.bf16 %v14200_v26  ;;  %v7390_v57 = vunpack.c.l.bf16 %v14604_v58  ;;  %v3339_v26 = vpop.f32.mrf.mxu0 }
 0x452   :  { %8066 = vmatprep.subr.mxu1 %v7175_v2  ;;  %7996 = vmatpush2.msra.mxu0 %v16600_v60  ;;  %v3338_v2 = vadd.f32 %v3337_v27, %v13310_v35  ;;  %v5559_v44 = vadd.f32 %v5558_v18, %v4467_v8  ;;  %v4468_v21 = vmax.f32 %v3783_v46, 0.0  ;;  %v3787_v4 = vadd.f32 %v3786_v47, %v13320_v59  ;;  %v3788_v40 = vpop.f32.mrf.mxu1 }
 0x453   :  { %8067 = vmatpush2.msra.mxu1 %v16601_v50  ;;  %7997 = vmatprep.subr.mxu0 %v7043_v55  ;;  %v7391_v3 = vunpack.c.h.bf16 %v14604_v58  ;;  %v14638_v55 = vld [vmem:[%s16363_s3 + $0xa90] sm:$0xff]  ;;  %v5522_v17 = vadd.f32 %v5521_v62, %v4466_v32  ;;  %v16602_v8 = vunpack.c.h.bf16 %v14278_v9  ;;  %v3789_v46 = vadd.f32 %v3788_v40, %v13473_v63  ;;  %v3343_v33 = vpop.f32.mrf.mxu0  ;;  %v6530_v58 = vld [vmem:[%s16363_s3 + $0xa60] sm:$0xff] }
 0x454   :  { %8068 = vmatprep.subr.mxu1 %v7171_v14  ;;  %7998 = vmatpush2.msra.mxu0 %v7042_v37  ;;  %v4481_v1 = vmax.f32 %v3338_v2, 0.0  ;;  %v3340_v14 = vadd.f32 %v3339_v26, %v13463_v54  ;;  %v7258_v37 = vunpack.c.l.bf16 %v14621_v6  ;;  %v5596_v18 = vadd.f32 %v5595_v12, %v4468_v21 }
 0x455   :  { %8069 = vmatpush2.msra.mxu1 %v7170_v30  ;;  %7999 = vmatprep.subr.mxu0 %v7039_v45  ;;  %v4483_v41 = vmax.f32 %v3787_v4, 0.0  ;;  %v16603_v62 = vunpack.c.l.bf16 %v14261_v56  ;;  %v7259_v30 = vunpack.c.h.bf16 %v14621_v6  ;;  %v14655_v45 = vld [vmem:[%s16363_s3 + $0x880] sm:$0xff]  ;;  %v16604_v12 = vunpack.c.l.bf16 %v14278_v9  ;;  %v3792_v56 = vpop.f32.mrf.mxu1  ;;  %v3345_v9 = vpop.f32.mrf.mxu0 }
 0x456   :  { %8070 = vmatprep.subr.mxu1 %v16602_v8  ;;  %v5486_v60 = vadd.f32 %v5485_v31, %v4481_v1  ;;  %v4482_v27 = vmax.f32 %v3340_v14, 0.0  ;;  %v16605_v32 = vunpack.c.h.bf16 %v14295_v23  ;;  %v3344_v50 = vadd.f32 %v3343_v33, %v13310_v35  ;;  %v14672_v14 = vld [vmem:[%s16363_s3 + $0xa80] sm:$0xff] }
 0x457   :  { %8000 = vmatpush2.msra.mxu0 %v16603_v62  ;;  %8071 = vmatpush2.msra.mxu1 %v16604_v12  ;;  %v5560_v47 = vadd.f32 %v5559_v44, %v4483_v41  ;;  %v4484_v21 = vmax.f32 %v3789_v46, 0.0  ;;  %v16606_v4 = vunpack.c.h.bf16 %v14312_v22  ;;  %v3793_v26 = vadd.f32 %v3792_v56, %v13320_v59 }
 0x458   :  { %8001 = vmatprep.subr.mxu0 %v16605_v32  ;;  %v16607_v31 = vunpack.c.l.bf16 %v14295_v23  ;;  %v7387_v1 = vunpack.c.h.bf16 %v14638_v55  ;;  %v5523_v40 = vadd.f32 %v5522_v17, %v4482_v27  ;;  %v4497_v8 = vmax.f32 %v3344_v50, 0.0  ;;  %v3794_v23 = vpop.f32.mrf.mxu1  ;;  %v14689_v50 = vld [vmem:[%s16363_s3 + $0x870] sm:$0xff] }
 0x459   :  { %8072 = vmatprep.subr.mxu1 %v16606_v4  ;;  %v16608_v44 = vunpack.c.l.bf16 %v14312_v22  ;;  %v16609_v41 = vunpack.c.h.bf16 %v14329_v49  ;;  %v3346_v46 = vadd.f32 %v3345_v9, %v13463_v54  ;;  %v5597_v33 = vadd.f32 %v5596_v18, %v4484_v21  ;;  %v3349_v22 = vpop.f32.mrf.mxu0  ;;  %v16613_v21 = vld [vmem:[#allocation13_spill] sm:$0xff] }
 0x45a   :  { %8002 = vmatpush2.msra.mxu0 %v16607_v31  ;;  %v4499_v12 = vmax.f32 %v3793_v26, 0.0  ;;  %v16610_v32 = vunpack.c.h.bf16 %v14394_v10  ;;  %v3795_v56 = vadd.f32 %v3794_v23, %v13473_v63  ;;  %v16611_v17 = vunpack.c.l.bf16 %v14329_v49  ;;  %v3798_v9 = vpop.f32.mrf.mxu1  ;;  %v16614_v23 = vld [vmem:[#allocation14_spill] sm:$0xff] }
 0x45b   :  { %8073 = vmatpush2.msra.mxu1 %v16608_v44  ;;  %8003 = vmatprep.subr.mxu0 %v16609_v41  ;;  %v5487_v4 = vadd.f32 %v5486_v60, %v4497_v8  ;;  %v4498_v31 = vmax.f32 %v3346_v46, 0.0  ;;  %v16612_v18 = vunpack.c.l.bf16 %v14394_v10  ;;  %v3350_v26 = vadd.f32 %v3349_v22, %v13310_v35  ;;  %v3351_v8 = vpop.f32.mrf.mxu0 }
 0x45c   :  { %8074 = vmatprep.subr.mxu1 %v16610_v32  ;;  %8004 = vmatpush2.msra.mxu0 %v16611_v17  ;;  %v5561_v44 = vadd.f32 %v5560_v47, %v4499_v12  ;;  %v4500_v41 = vmax.f32 %v3795_v56, 0.0  ;;  %v16615_v32 = vunpack.c.h.bf16 %v14413_v0  ;;  %v3799_v60 = vadd.f32 %v3798_v9, %v13320_v59  ;;  %v3800_v47 = vpop.f32.mrf.mxu1 }
 0x45d   :  { %8075 = vmatpush2.msra.mxu1 %v16612_v18  ;;  %8006 = vmatmul.mubr.f32.vlgmr.msra.gmra.mxu0 %v16613_v21  ;;  %v5488_v46 = vrot.slane %v5487_v4, 4  ;;  %v5524_v17 = vadd.f32 %v5523_v40, %v4498_v31  ;;  %v16616_v18 = vunpack.c.h.bf16 %v14434_v61  ;;  %v16617_v22 = vunpack.c.l.bf16 %v14413_v0  ;;  %v3355_v31 = vpop.f32.mrf.mxu0 }
 0x45e   :  { %8077 = vmatmul.mubr.f32.vlgmr.msra.gmra.mxu1 %v16614_v23  ;;  %8083 = vmatprep.subr.mxu0 %v16615_v32  ;;  %v5562_v49 = vrot.slane %v5561_v44, 4  ;;  %v5598_v32 = vadd.f32 %v5597_v33, %v4500_v41  ;;  %v4513_v62 = vmax.f32 %v3350_v26, 0.0  ;;  %v16618_v9 = vunpack.c.l.bf16 %v14434_v61  ;;  %v3804_v33 = vpop.f32.mrf.mxu1 }
 0x45f   :  { %8154 = vmatprep.subr.mxu1 %v16616_v18  ;;  %8084 = vmatpush1.msra.mxu0 %v16617_v22  ;;  %v3352_v40 = vadd.f32 %v3351_v8, %v13463_v54  ;;  %v5489_v18 = vadd.f32 %v5488_v46, %v5487_v4  ;;  %v5525_v10 = vrot.slane %v5524_v17, 4  ;;  %v4515_v0 = vmax.f32 %v3799_v60, 0.0  ;;  %v3357_v60 = vpop.f32.mrf.mxu0  ;;  %v14724_v46 = vld [vmem:[%s16363_s3 + $0xa70] sm:$0xff] }
 0x460   :  { %8147 = vmatprep.mubr.f32.mxu0 %v14403_v20  ;;  %8155 = vmatpush1.msra.mxu1 %v16618_v9  ;;  %v16619_v22 = vunpack.c.h.bf16 %v14451_v43  ;;  %v3356_v12 = vadd.f32 %v3355_v31, %v13310_v35  ;;  %v5563_v26 = vadd.f32 %v5562_v49, %v5561_v44  ;;  %v5599_v41 = vrot.slane %v5598_v32, 4 }
 0x461   :  { %8218 = vmatprep.mubr.f32.mxu1 %v14417_v7  ;;  %v16620_v56 = vunpack.c.h.bf16 %v14468_v34  ;;  %v3801_v61 = vadd.f32 %v3800_v47, %v13473_v63  ;;  %v16621_v8 = vunpack.c.l.bf16 %v14451_v43  ;;  %v3805_v4 = vadd.f32 %v3804_v33, %v13320_v59 }
 0x462   :  { %8085 = vmatprep.subr.mxu0 %v16619_v22  ;;  %v5490_v9 = vrot.slane %v5489_v18, 2  ;;  %v14726_v31 = vadd.f32 %v5525_v10, %v5524_v17  ;;  %v16622_v49 = vunpack.c.l.bf16 %v14468_v34  ;;  %v16623_v44 = vunpack.c.h.bf16 %v14485_v15  ;;  %v14736_v22 = vld [vmem:[%s16363_s3 + $0x860] sm:$0xff] }
 0x463   :  { %8156 = vmatprep.subr.mxu1 %v16620_v56  ;;  %8086 = vmatpush1.msra.mxu0 %v16621_v8  ;;  %v4529_v47 = vmax.f32 %v3356_v12, 0.0  ;;  %v3358_v43 = vadd.f32 %v3357_v60, %v13463_v54  ;;  %v3806_v56 = vpop.f32.mrf.mxu1  ;;  %v5564_v33 = vrot.slane %v5563_v26, 2  ;;  %v14738_v8 = vadd.f32 %v5599_v41, %v5598_v32 }
 0x464   :  { %8157 = vmatpush1.msra.mxu1 %v16622_v49  ;;  %8087 = vmatprep.subr.mxu0 %v16623_v44  ;;  %v16624_v10 = vunpack.c.h.bf16 %v14502_v29  ;;  %v4531_v34 = vmax.f32 %v3805_v4, 0.0  ;;  %v16625_v17 = vunpack.c.l.bf16 %v14485_v15  ;;  %v3807_v12 = vadd.f32 %v3806_v56, %v13473_v63  ;;  %v3361_v49 = vpop.f32.mrf.mxu0 }
 0x465   :  { %v6049_v60 = vadd.f32 %v4529_v47, %v4513_v62  ;;  %v16626_v44 = vunpack.c.l.bf16 %v14502_v29  ;;  %v16627_v27 = vunpack.c.h.bf16 %v14519_v42  ;;  %v4530_v2 = vmax.f32 %v3358_v43, 0.0  ;;  %v3810_v32 = vpop.f32.mrf.mxu1 }
 0x466   :  { %8158 = vmatprep.subr.mxu1 %v16624_v10  ;;  %8088 = vmatpush1.msra.mxu0 %v16625_v17  ;;  %v7378_v41 = vunpack.c.l.bf16 %v14724_v46  ;;  %v7379_v10 = vunpack.c.h.bf16 %v14724_v46  ;;  %v6123_v4 = vadd.f32 %v4531_v34, %v4515_v0  ;;  %v4532_v15 = vmax.f32 %v3807_v12, 0.0  ;;  %v3363_v62 = vpop.f32.mrf.mxu0 }
 0x467   :  { %8159 = vmatpush1.msra.mxu1 %v16626_v44  ;;  %8089 = vmatprep.subr.mxu0 %v16627_v27  ;;  %v16628_v56 = vunpack.c.l.bf16 %v14519_v42  ;;  %v7246_v29 = vunpack.c.l.bf16 %v14736_v22  ;;  %v7247_v47 = vunpack.c.h.bf16 %v14736_v22  ;;  %v14757_v27 = vadd.f32 %v5490_v9, %v5489_v18  ;;  %v3812_v0 = vpop.f32.mrf.mxu1  ;;  %v6524_v22 = vld [vmem:[%s16363_s3 + $0xa30] sm:$0xff] }
 0x468   :  { %8160 = vmatprep.subr.mxu1 %v7399_v38  ;;  %v4514_v43 = vmax.f32 %v3352_v40, 0.0  ;;  %v4516_v17 = vmax.f32 %v3801_v61, 0.0  ;;  %v3362_v38 = vadd.f32 %v3361_v49, %v13310_v35  ;;  %v14764_v42 = vadd.f32 %v5564_v33, %v5563_v26 }
 0x469   :  { %8090 = vmatpush1.msra.mxu0 %v16628_v56  ;;  %8161 = vmatpush1.msra.mxu1 %v7398_v16  ;;  %v5527_v34 = vrot.slane %v14726_v31, 2  ;;  %v5601_v12 = vrot.slane %v14738_v8, 2  ;;  %v3811_v40 = vadd.f32 %v3810_v32, %v13320_v59  ;;  %v16629_v5 = vunpack.c.l.bf16 %v14553_v52  ;;  %v3367_v16 = vpop.f32.mrf.mxu0  ;;  %v3816_v9 = vpop.f32.mrf.mxu1 }
 0x46a   :  { %8091 = vmatprep.subr.mxu0 %v7267_v39  ;;  %8162 = vmatprep.subr.mxu1 %v7395_v19  ;;  %v6086_v18 = vadd.f32 %v4530_v2, %v4514_v43  ;;  %v4545_v39 = vmax.f32 %v3362_v38, 0.0  ;;  %v3364_v26 = vadd.f32 %v3363_v62, %v13463_v54  ;;  %v3813_v61 = vadd.f32 %v3812_v0, %v13473_v63 }
 0x46b   :  { %8092 = vmatpush1.msra.mxu0 %v16629_v5  ;;  %8163 = vmatpush1.msra.mxu1 %v7394_v11  ;;  %v6160_v19 = vadd.f32 %v4532_v15, %v4516_v17  ;;  %v4547_v33 = vmax.f32 %v3811_v40, 0.0  ;;  %v3368_v52 = vadd.f32 %v3367_v16, %v13310_v35  ;;  %v3817_v24 = vadd.f32 %v3816_v9, %v13320_v59  ;;  %v3369_v11 = vpop.f32.mrf.mxu0  ;;  %v6464_v5 = vld [vmem:[%s16363_s3 + $0x850] sm:$0xff] }
 0x46c   :  { %8093 = vmatprep.subr.mxu0 %v7263_v53  ;;  %8164 = vmatprep.subr.mxu1 %v7391_v3  ;;  %v6050_v2 = vadd.f32 %v6049_v60, %v4545_v39  ;;  %v4546_v53 = vmax.f32 %v3364_v26, 0.0  ;;  %v4548_v49 = vmax.f32 %v3813_v61, 0.0  ;;  %v3370_v44 = vadd.f32 %v3369_v11, %v13463_v54  ;;  %v3818_v3 = vpop.f32.mrf.mxu1  ;;  %v6528_v16 = vld [vmem:[%s16363_s3 + $0xa50] sm:$0xff] }
 0x46d   :  { %8094 = vmatpush1.msra.mxu0 %v7262_v25  ;;  %8165 = vmatpush1.msra.mxu1 %v7390_v57  ;;  %v6124_v32 = vadd.f32 %v6123_v4, %v4547_v33  ;;  %v4561_v13 = vmax.f32 %v3368_v52, 0.0  ;;  %v4563_v25 = vmax.f32 %v3817_v24, 0.0  ;;  %v3819_v60 = vadd.f32 %v3818_v3, %v13473_v63  ;;  %v3373_v15 = vpop.f32.mrf.mxu0 }
 0x46e   :  { %8095 = vmatprep.subr.mxu0 %v7259_v30  ;;  %8166 = vmatprep.subr.mxu1 %v7387_v1  ;;  %v6087_v57 = vadd.f32 %v6086_v18, %v4546_v53  ;;  %v6161_v30 = vadd.f32 %v6160_v19, %v4548_v49  ;;  %v16630_v56 = vunpack.c.l.bf16 %v14638_v55  ;;  %v16631_v4 = vunpack.c.h.bf16 %v14655_v45  ;;  %v3822_v6 = vpop.f32.mrf.mxu1  ;;  %v6462_v53 = vld [vmem:[%s16363_s3 + $0x840] sm:$0xff] }
 0x46f   :  { %8096 = vmatpush1.msra.mxu0 %v7258_v37  ;;  %v4562_v1 = vmax.f32 %v3370_v44, 0.0  ;;  %v3374_v62 = vadd.f32 %v3373_v15, %v13310_v35  ;;  %v6051_v37 = vadd.f32 %v6050_v2, %v4561_v13  ;;  %v6125_v43 = vadd.f32 %v6124_v32, %v4563_v25  ;;  %v3375_v55 = vpop.f32.mrf.mxu0  ;;  %v6526_v32 = vld [vmem:[%s16363_s3 + $0xa40] sm:$0xff] }
 0x470   :  { %8167 = vmatpush1.msra.mxu1 %v16630_v56  ;;  %8097 = vmatprep.subr.mxu0 %v16631_v4  ;;  %v16632_v17 = vunpack.c.h.bf16 %v14672_v14  ;;  %v4564_v38 = vmax.f32 %v3819_v60, 0.0  ;;  %v16633_v0 = vunpack.c.l.bf16 %v14655_v45  ;;  %v3823_v40 = vadd.f32 %v3822_v6, %v13320_v59  ;;  %v3824_v19 = vpop.f32.mrf.mxu1  ;;  %v6460_v56 = vld [vmem:[%s16363_s3 + $0x830] sm:$0xff] }
 0x471   :  { %v6088_v18 = vadd.f32 %v6087_v57, %v4562_v1  ;;  %v16634_v39 = vunpack.c.l.bf16 %v14672_v14  ;;  %v16635_v26 = vunpack.c.h.bf16 %v14689_v50  ;;  %v4577_v45 = vmax.f32 %v3374_v62, 0.0  ;;  %v3379_v2 = vpop.f32.mrf.mxu0 }
 0x472   :  { %8168 = vmatprep.subr.mxu1 %v16632_v17  ;;  %8098 = vmatpush1.msra.mxu0 %v16633_v0  ;;  %v7374_v61 = vunpack.c.l.bf16 %v6530_v58  ;;  %v7375_v9 = vunpack.c.h.bf16 %v6530_v58  ;;  %v6162_v33 = vadd.f32 %v6161_v30, %v4564_v38  ;;  %v4579_v52 = vmax.f32 %v3823_v40, 0.0  ;;  %v3828_v3 = vpop.f32.mrf.mxu1  ;;  %v6458_v40 = vld [vmem:[%s16363_s3 + $0x820] sm:$0xff] }
 0x473   :  { %8169 = vmatpush1.msra.mxu1 %v16634_v39  ;;  %8099 = vmatprep.subr.mxu0 %v16635_v26  ;;  %v16636_v24 = vunpack.c.l.bf16 %v14689_v50  ;;  %v3376_v11 = vadd.f32 %v3375_v55, %v13463_v54  ;;  %v3825_v14 = vadd.f32 %v3824_v19, %v13473_v63  ;;  %v6052_v49 = vadd.f32 %v6051_v37, %v4577_v45  ;;  %v6522_v39 = vld [vmem:[%s16363_s3 + $0xa20] sm:$0xff] }
 0x474   :  { %8170 = vmatprep.subr.mxu1 %v7379_v10  ;;  %v7242_v10 = vunpack.c.l.bf16 %v6464_v5  ;;  %v7243_v44 = vunpack.c.h.bf16 %v6464_v5  ;;  %v7370_v50 = vunpack.c.l.bf16 %v6528_v16  ;;  %v6126_v13 = vadd.f32 %v6125_v43, %v4579_v52  ;;  %v3830_v30 = vpop.f32.mrf.mxu1 }
 0x475   :  { %8100 = vmatpush1.msra.mxu0 %v16636_v24  ;;  %8171 = vmatpush1.msra.mxu1 %v7378_v41  ;;  %v4578_v25 = vmax.f32 %v3376_v11, 0.0  ;;  %v4580_v60 = vmax.f32 %v3825_v14, 0.0  ;;  %v7371_v46 = vunpack.c.h.bf16 %v6528_v16  ;;  %v3381_v41 = vpop.f32.mrf.mxu0  ;;  %v3829_v15 = vadd.f32 %v3828_v3, %v13320_v59 }
 0x476   :  { %8101 = vmatprep.subr.mxu0 %v7247_v47  ;;  %8172 = vmatprep.subr.mxu1 %v7375_v9  ;;  %v3380_v47 = vadd.f32 %v3379_v2, %v13310_v35  ;;  %v7238_v58 = vunpack.c.l.bf16 %v6462_v53  ;;  %v7239_v57 = vunpack.c.h.bf16 %v6462_v53  ;;  %v7366_v1 = vunpack.c.l.bf16 %v6526_v32  ;;  %v3834_v0 = vpop.f32.mrf.mxu1  ;;  %v6456_v2 = vld [vmem:[%s16363_s3 + $0x810] sm:$0xff] }
 0x477   :  { %8102 = vmatpush1.msra.mxu0 %v7246_v29  ;;  %8173 = vmatpush1.msra.mxu1 %v7374_v61  ;;  %v6089_v29 = vadd.f32 %v6088_v18, %v4578_v25  ;;  %v6163_v4 = vadd.f32 %v6162_v33, %v4580_v60  ;;  %v7367_v62 = vunpack.c.h.bf16 %v6526_v32  ;;  %v3385_v6 = vpop.f32.mrf.mxu0  ;;  %v4595_v43 = vmax.f32 %v3829_v15, 0.0  ;;  %v6520_v53 = vld [vmem:[%s16363_s3 + $0xa10] sm:$0xff] }
 0x478   :  { %8103 = vmatprep.subr.mxu0 %v7243_v44  ;;  %8174 = vmatprep.subr.mxu1 %v7371_v46  ;;  %v4593_v37 = vmax.f32 %v3380_v47, 0.0  ;;  %v3382_v17 = vadd.f32 %v3381_v41, %v13463_v54  ;;  %v3831_v38 = vadd.f32 %v3830_v30, %v13473_v63  ;;  %v7234_v55 = vunpack.c.l.bf16 %v6460_v56  ;;  %v3836_v33 = vpop.f32.mrf.mxu1  ;;  %v6454_v41 = vld [vmem:[%s16363_s3 + $0x800] sm:$0xff] }
 0x479   :  { %8104 = vmatpush1.msra.mxu0 %v7242_v10  ;;  %8175 = vmatpush1.msra.mxu1 %v7370_v50  ;;  %v7235_v5 = vunpack.c.h.bf16 %v6460_v56  ;;  %v7362_v16 = vunpack.c.l.bf16 %v6524_v22  ;;  %v7363_v18 = vunpack.c.h.bf16 %v6524_v22  ;;  %v3387_v26 = vpop.f32.mrf.mxu0  ;;  %v6127_v61 = vadd.f32 %v6126_v13, %v4595_v43  ;;  %v6518_v56 = vld [vmem:[%s16363_s3 + $0xa00] sm:$0xff] }
 0x47a   :  { %8105 = vmatprep.subr.mxu0 %v7239_v57  ;;  %8176 = vmatprep.subr.mxu1 %v7367_v62  ;;  %v6053_v45 = vadd.f32 %v6052_v49, %v4593_v37  ;;  %v4594_v9 = vmax.f32 %v3382_v17, 0.0  ;;  %v4596_v19 = vmax.f32 %v3831_v38, 0.0  ;;  %v3386_v52 = vadd.f32 %v3385_v6, %v13310_v35  ;;  %v3840_v32 = vpop.f32.mrf.mxu1 }
 0x47b   :  { %8106 = vmatpush1.msra.mxu0 %v7238_v58  ;;  %8177 = vmatpush1.msra.mxu1 %v7366_v1  ;;  %v3835_v24 = vadd.f32 %v3834_v0, %v13320_v59  ;;  %v7230_v11 = vunpack.c.l.bf16 %v6458_v40  ;;  %v7231_v14 = vunpack.c.h.bf16 %v6458_v40  ;;  %v3391_v49 = vpop.f32.mrf.mxu0  ;;  %v7358_v50 = vunpack.c.l.bf16 %v6522_v39  ;;  %v6516_v0 = vld [vmem:[%s16363_s3 + $0x9f0] sm:$0xff] }
 0x47c   :  { %8107 = vmatprep.subr.mxu0 %v7235_v5  ;;  %8178 = vmatprep.subr.mxu1 %v7363_v18  ;;  %v6090_v10 = vadd.f32 %v6089_v29, %v4594_v9  ;;  %v6164_v44 = vadd.f32 %v6163_v4, %v4596_v19  ;;  %v7359_v3 = vunpack.c.h.bf16 %v6522_v39  ;;  %v4609_v13 = vmax.f32 %v3386_v52, 0.0  ;;  %v3842_v22 = vpop.f32.mrf.mxu1  ;;  %v6580_v40 = vld [vmem:[%s16363_s3 + $0xbf0] sm:$0xff] }
 0x47d   :  { %8108 = vmatpush1.msra.mxu0 %v7234_v55  ;;  %8179 = vmatpush1.msra.mxu1 %v7362_v16  ;;  %v4611_v25 = vmax.f32 %v3835_v24, 0.0  ;;  %v3388_v60 = vadd.f32 %v3387_v26, %v13463_v54  ;;  %v3837_v46 = vadd.f32 %v3836_v33, %v13473_v63  ;;  %v3393_v47 = vpop.f32.mrf.mxu0  ;;  %v7226_v15 = vunpack.c.l.bf16 %v6456_v2  ;;  %v6514_v33 = vld [vmem:[%s16363_s3 + $0x9e0] sm:$0xff] }
 0x47e   :  { %8109 = vmatprep.subr.mxu0 %v7231_v14  ;;  %8180 = vmatprep.subr.mxu1 %v7359_v3  ;;  %v7227_v58 = vunpack.c.h.bf16 %v6456_v2  ;;  %v7354_v57 = vunpack.c.l.bf16 %v6520_v53  ;;  %v7355_v30 = vunpack.c.h.bf16 %v6520_v53  ;;  %v6054_v29 = vadd.f32 %v6053_v45, %v4609_v13  ;;  %v3846_v55 = vpop.f32.mrf.mxu1  ;;  %v6578_v53 = vld [vmem:[%s16363_s3 + $0xbe0] sm:$0xff] }
 0x47f   :  { %8110 = vmatpush1.msra.mxu0 %v7230_v11  ;;  %v6128_v4 = vadd.f32 %v6127_v61, %v4611_v25  ;;  %v4610_v1 = vmax.f32 %v3388_v60, 0.0  ;;  %v4612_v62 = vmax.f32 %v3837_v46, 0.0  ;;  %8181 = vmatpush1.msra.mxu1 %v7358_v50  ;;  %v3397_v6 = vpop.f32.mrf.mxu0  ;;  %v3392_v37 = vadd.f32 %v3391_v49, %v13310_v35 }
 0x480   :  { %8111 = vmatprep.subr.mxu0 %v7227_v58  ;;  %8182 = vmatprep.subr.mxu1 %v7355_v30  ;;  %v3841_v43 = vadd.f32 %v3840_v32, %v13320_v59  ;;  %v7222_v17 = vunpack.c.l.bf16 %v6454_v41  ;;  %v7223_v38 = vunpack.c.h.bf16 %v6454_v41  ;;  %v7350_v18 = vunpack.c.l.bf16 %v6518_v56  ;;  %v3848_v52 = vpop.f32.mrf.mxu1  ;;  %v6512_v41 = vld [vmem:[%s16363_s3 + $0x9d0] sm:$0xff] }
 0x481   :  { %v6091_v5 = vadd.f32 %v6090_v10, %v4610_v1  ;;  %v6165_v16 = vadd.f32 %v6164_v44, %v4612_v62  ;;  %8112 = vmatpush1.msra.mxu0 %v7226_v15  ;;  %8183 = vmatpush1.msra.mxu1 %v7354_v57  ;;  %v7351_v39 = vunpack.c.h.bf16 %v6518_v56  ;;  %v3399_v26 = vpop.f32.mrf.mxu0  ;;  %v4625_v45 = vmax.f32 %v3392_v37, 0.0 }
 0x482   :  { %v4627_v61 = vmax.f32 %v3841_v43, 0.0  ;;  %8113 = vmatprep.subr.mxu0 %v7223_v38  ;;  %v3394_v9 = vadd.f32 %v3393_v47, %v13463_v54  ;;  %v3843_v19 = vadd.f32 %v3842_v22, %v13473_v63  ;;  %v7346_v24 = vunpack.c.l.bf16 %v6516_v0  ;;  %v3852_v32 = vpop.f32.mrf.mxu1  ;;  %v6576_v47 = vld [vmem:[%s16363_s3 + $0xbd0] sm:$0xff] }
 0x483   :  { %8184 = vmatprep.subr.mxu1 %v7351_v39  ;;  %8114 = vmatpush1.msra.mxu0 %v7222_v17  ;;  %v7347_v11 = vunpack.c.h.bf16 %v6516_v0  ;;  %v7474_v14 = vunpack.c.l.bf16 %v6580_v40  ;;  %v7475_v2 = vunpack.c.h.bf16 %v6580_v40  ;;  %v3403_v49 = vpop.f32.mrf.mxu0  ;;  %v6055_v10 = vadd.f32 %v6054_v29, %v4625_v45  ;;  %v6574_v40 = vld [vmem:[%s16363_s3 + $0xbc0] sm:$0xff] }
 0x484   :  { %v6129_v44 = vadd.f32 %v6128_v4, %v4627_v61  ;;  %v4626_v50 = vmax.f32 %v3394_v9, 0.0  ;;  %v4628_v3 = vmax.f32 %v3843_v19, 0.0  ;;  %8185 = vmatpush1.msra.mxu1 %v7350_v18  ;;  %v3398_v13 = vadd.f32 %v3397_v6, %v13310_v35  ;;  %v3854_v22 = vpop.f32.mrf.mxu1  ;;  %v6510_v6 = vld [vmem:[%s16363_s3 + $0x9c0] sm:$0xff] }
 0x485   :  { %8115 = vmatprep.subr.mxu0 %v7347_v11  ;;  %8186 = vmatprep.subr.mxu1 %v7475_v2  ;;  %v3847_v25 = vadd.f32 %v3846_v55, %v13320_v59  ;;  %v7342_v60 = vunpack.c.l.bf16 %v6514_v33  ;;  %v7343_v46 = vunpack.c.h.bf16 %v6514_v33  ;;  %v3405_v15 = vpop.f32.mrf.mxu0  ;;  %v7470_v30 = vunpack.c.l.bf16 %v6578_v53  ;;  %v6508_v33 = vld [vmem:[%s16363_s3 + $0x9b0] sm:$0xff] }
 0x486   :  { %v6092_v58 = vadd.f32 %v6091_v5, %v4626_v50  ;;  %v6166_v57 = vadd.f32 %v6165_v16, %v4628_v3  ;;  %8116 = vmatpush2.msra.mxu0 %v7346_v24  ;;  %8187 = vmatpush2.msra.mxu1 %v7474_v14  ;;  %v7471_v56 = vunpack.c.h.bf16 %v6578_v53  ;;  %v4641_v29 = vmax.f32 %v3398_v13, 0.0  ;;  %v3858_v55 = vpop.f32.mrf.mxu1 }
 0x487   :  { %v4643_v4 = vmax.f32 %v3847_v25, 0.0  ;;  %8117 = vmatprep.subr.mxu0 %v7343_v46  ;;  %v3400_v1 = vadd.f32 %v3399_v26, %v13463_v54  ;;  %v3849_v62 = vadd.f32 %v3848_v52, %v13473_v63  ;;  %v3409_v37 = vpop.f32.mrf.mxu0  ;;  %v7338_v43 = vunpack.c.l.bf16 %v6512_v41  ;;  %v6572_v52 = vld [vmem:[%s16363_s3 + $0xbb0] sm:$0xff] }
 0x488   :  { %8188 = vmatprep.subr.mxu1 %v7471_v56  ;;  %8118 = vmatpush2.msra.mxu0 %v7342_v60  ;;  %v7339_v17 = vunpack.c.h.bf16 %v6512_v41  ;;  %v7466_v38 = vunpack.c.l.bf16 %v6576_v47  ;;  %v7467_v0 = vunpack.c.h.bf16 %v6576_v47  ;;  %v6056_v5 = vadd.f32 %v6055_v10, %v4641_v29  ;;  %v3860_v24 = vpop.f32.mrf.mxu1  ;;  %v6570_v47 = vld [vmem:[%s16363_s3 + $0xba0] sm:$0xff] }
 0x489   :  { %v6130_v16 = vadd.f32 %v6129_v44, %v4643_v4  ;;  %v4642_v18 = vmax.f32 %v3400_v1, 0.0  ;;  %v4644_v39 = vmax.f32 %v3849_v62, 0.0  ;;  %8189 = vmatpush2.msra.mxu1 %v7470_v30  ;;  %v3411_v26 = vpop.f32.mrf.mxu0  ;;  %v3404_v45 = vadd.f32 %v3403_v49, %v13310_v35 }
 0x48a   :  { %8119 = vmatprep.subr.mxu0 %v7339_v17  ;;  %8190 = vmatprep.subr.mxu1 %v7467_v0  ;;  %v3853_v61 = vadd.f32 %v3852_v32, %v13320_v59  ;;  %v7334_v9 = vunpack.c.l.bf16 %v6510_v6  ;;  %v7335_v19 = vunpack.c.h.bf16 %v6510_v6  ;;  %v7462_v2 = vunpack.c.l.bf16 %v6574_v40  ;;  %v6506_v32 = vld [vmem:[%s16363_s3 + $0x9a0] sm:$0xff]  ;;  %v3864_v13 = vpop.f32.mrf.mxu1  ;;  %v6504_v6 = vld [vmem:[%s16363_s3 + $0x990] sm:$0xff] }
 0x48b   :  { %v6093_v11 = vadd.f32 %v6092_v58, %v4642_v18  ;;  %v6167_v14 = vadd.f32 %v6166_v57, %v4644_v39  ;;  %8120 = vmatpush2.msra.mxu0 %v7338_v43  ;;  %8191 = vmatpush2.msra.mxu1 %v7466_v38  ;;  %v7463_v53 = vunpack.c.h.bf16 %v6574_v40  ;;  %v3415_v49 = vpop.f32.mrf.mxu0  ;;  %v4657_v10 = vmax.f32 %v3404_v45, 0.0  ;;  %v6568_v43 = vld [vmem:[%s16363_s3 + $0xb90] sm:$0xff]  ;;  %v6502_v45 = vld [vmem:[%s16363_s3 + $0x980] sm:$0xff] }
 0x48c   :  { %v4659_v44 = vmax.f32 %v3853_v61, 0.0  ;;  %8121 = vmatprep.subr.mxu0 %v7335_v19  ;;  %v3406_v50 = vadd.f32 %v3405_v15, %v13463_v54  ;;  %v3855_v3 = vadd.f32 %v3854_v22, %v13473_v63  ;;  %v7330_v25 = vunpack.c.l.bf16 %v6508_v33  ;;  %v3866_v22 = vpop.f32.mrf.mxu1 }
 0x48d   :  { %8192 = vmatprep.subr.mxu1 %v7463_v53  ;;  %8122 = vmatpush2.msra.mxu0 %v7334_v9  ;;  %v7331_v60 = vunpack.c.h.bf16 %v6508_v33  ;;  %v7458_v46 = vunpack.c.l.bf16 %v6572_v52  ;;  %v7459_v41 = vunpack.c.h.bf16 %v6572_v52  ;;  %v14916_v58 = vpop.f32.mrf.mxu0  ;;  %v6057_v15 = vadd.f32 %v6056_v5, %v4657_v10 }
 0x48e   :  { %v6131_v57 = vadd.f32 %v6130_v16, %v4659_v44  ;;  %v4658_v30 = vmax.f32 %v3406_v50, 0.0  ;;  %v4660_v56 = vmax.f32 %v3855_v3, 0.0  ;;  %8193 = vmatpush2.msra.mxu1 %v7462_v2  ;;  %v3410_v29 = vadd.f32 %v3409_v37, %v13310_v35  ;;  %v3870_v5 = vpop.f32.mrf.mxu1 }
 0x48f   :  { %8123 = vmatprep.subr.mxu0 %v7331_v60  ;;  %8194 = vmatprep.subr.mxu1 %v7459_v41  ;;  %v3859_v4 = vadd.f32 %v3858_v55, %v13320_v59  ;;  %v7326_v1 = vunpack.c.l.bf16 %v6506_v32  ;;  %v7327_v62 = vunpack.c.h.bf16 %v6506_v32  ;;  %v14926_v17 = vpop.f32.mrf.mxu0  ;;  %v7454_v40 = vunpack.c.l.bf16 %v6570_v47  ;;  %v6564_v60 = vld [vmem:[%s16363_s3 + $0xb70] sm:$0xff] }
 0x490   :  { %v6094_v38 = vadd.f32 %v6093_v11, %v4658_v30  ;;  %v6168_v0 = vadd.f32 %v6167_v14, %v4660_v56  ;;  %8124 = vmatpush2.msra.mxu0 %v7330_v25  ;;  %8195 = vmatpush2.msra.mxu1 %v7458_v46  ;;  %v7455_v37 = vunpack.c.h.bf16 %v6570_v47  ;;  %v4673_v55 = vmax.f32 %v3410_v29, 0.0  ;;  %v6566_v11 = vld [vmem:[%s16363_s3 + $0xb80] sm:$0xff]  ;;  %v14938_v14 = vpop.f32.mrf.mxu1  ;;  %v6500_v25 = vld [vmem:[%s16363_s3 + $0x970] sm:$0xff] }
 0x491   :  { %v4675_v16 = vmax.f32 %v3859_v4, 0.0  ;;  %8125 = vmatprep.subr.mxu0 %v7327_v62  ;;  %v3412_v18 = vadd.f32 %v3411_v26, %v13463_v54  ;;  %v3861_v39 = vadd.f32 %v3860_v24, %v13473_v63  ;;  %v14933_v61 = vpop.f32.mrf.mxu0  ;;  %v7322_v9 = vunpack.c.l.bf16 %v6504_v6  ;;  %v6498_v4 = vld [vmem:[%s16363_s3 + $0x960] sm:$0xff] }
 0x492   :  { %8196 = vmatprep.subr.mxu1 %v7455_v37  ;;  %8126 = vmatpush2.msra.mxu0 %v7326_v1  ;;  %v7323_v19 = vunpack.c.h.bf16 %v6504_v6  ;;  %v7450_v33 = vunpack.c.l.bf16 %v6568_v43  ;;  %v7451_v52 = vunpack.c.h.bf16 %v6568_v43  ;;  %v6058_v26 = vadd.f32 %v6057_v15, %v4673_v55  ;;  %v14950_v46 = vpop.f32.mrf.mxu1 }
 0x493   :  { %v6132_v24 = vadd.f32 %v6131_v57, %v4675_v16  ;;  %v4674_v2 = vmax.f32 %v3412_v18, 0.0  ;;  %v4676_v53 = vmax.f32 %v3861_v39, 0.0  ;;  %8197 = vmatpush2.msra.mxu1 %v7454_v40  ;;  %v14940_v10 = vpop.f32.mrf.mxu0  ;;  %v3416_v44 = vadd.f32 %v3415_v49, %v13310_v35 }
 0x494   :  { %8127 = vmatprep.subr.mxu0 %v7323_v19  ;;  %8198 = vmatprep.subr.mxu1 %v7451_v52  ;;  %v3865_v50 = vadd.f32 %v3864_v13, %v13320_v59  ;;  %v7318_v3 = vunpack.c.l.bf16 %v6502_v45  ;;  %v7319_v32 = vunpack.c.h.bf16 %v6502_v45  ;;  %v7446_v15 = vunpack.c.l.bf16 %v6566_v11  ;;  %v14960_v1 = vpop.f32.mrf.mxu1  ;;  %v6496_v19 = vld [vmem:[%s16363_s3 + $0x950] sm:$0xff] }
 0x495   :  { %v6095_v41 = vadd.f32 %v6094_v38, %v4674_v2  ;;  %v6169_v47 = vadd.f32 %v6168_v0, %v4676_v53  ;;  %8128 = vmatpush2.msra.mxu0 %v7322_v9  ;;  %8199 = vmatpush2.msra.mxu1 %v7450_v33  ;;  %v7447_v49 = vunpack.c.h.bf16 %v6566_v11  ;;  %v14952_v57 = vpop.f32.mrf.mxu0  ;;  %v4689_v13 = vmax.f32 %v3416_v44, 0.0  ;;  %v6562_v0 = vld [vmem:[%s16363_s3 + $0xb60] sm:$0xff]  ;;  %v6560_v33 = vld [vmem:[%s16363_s3 + $0xb50] sm:$0xff] }
 0x496   :  { %v4691_v30 = vmax.f32 %v3865_v50, 0.0  ;;  %8129 = vmatprep.subr.mxu0 %v7319_v32  ;;  %v3418_v56 = vadd.f32 %v14916_v58, %v13463_v54  ;;  %v3867_v29 = vadd.f32 %v3866_v22, %v13473_v63  ;;  %v7314_v62 = vunpack.c.l.bf16 %v6500_v25  ;;  %v14967_v16 = vpop.f32.mrf.mxu1 }
 0x497   :  { %8200 = vmatprep.subr.mxu1 %v7447_v49  ;;  %8130 = vmatpush2.msra.mxu0 %v7318_v3  ;;  %v7315_v6 = vunpack.c.h.bf16 %v6500_v25  ;;  %v7442_v43 = vunpack.c.l.bf16 %v6564_v60  ;;  %v7443_v38 = vunpack.c.h.bf16 %v6564_v60  ;;  %v14965_v40 = vpop.f32.mrf.mxu0  ;;  %v6059_v58 = vadd.f32 %v6058_v26, %v4689_v13  ;;  %v6494_v3 = vld [vmem:[%s16363_s3 + $0x940] sm:$0xff] }
 0x498   :  { %v6133_v22 = vadd.f32 %v6132_v24, %v4691_v30  ;;  %v4690_v37 = vmax.f32 %v3418_v56, 0.0  ;;  %v4692_v55 = vmax.f32 %v3867_v29, 0.0  ;;  %8201 = vmatpush2.msra.mxu1 %v7446_v15  ;;  %v3422_v18 = vadd.f32 %v14926_v17, %v13310_v35  ;;  %v14980_v2 = vpop.f32.mrf.mxu1  ;;  %v6558_v15 = vld [vmem:[%s16363_s3 + $0xb40] sm:$0xff] }
 0x499   :  { %8131 = vmatprep.subr.mxu0 %v7315_v6  ;;  %8202 = vmatprep.subr.mxu1 %v7443_v38  ;;  %v3871_v39 = vadd.f32 %v3870_v5, %v13320_v59  ;;  %v7310_v45 = vunpack.c.l.bf16 %v6498_v4  ;;  %v7311_v9 = vunpack.c.h.bf16 %v6498_v4  ;;  %v14978_v52 = vpop.f32.mrf.mxu0  ;;  %v7438_v24 = vunpack.c.l.bf16 %v6562_v0  ;;  %v6556_v38 = vld [vmem:[%s16363_s3 + $0xb30] sm:$0xff] }
 0x49a   :  { %v6096_v11 = vadd.f32 %v6095_v41, %v4690_v37  ;;  %v6170_v26 = vadd.f32 %v6169_v47, %v4692_v55  ;;  %8132 = vmatpush2.msra.mxu0 %v7314_v62  ;;  %8203 = vmatpush2.msra.mxu1 %v7442_v43  ;;  %v7439_v17 = vunpack.c.h.bf16 %v6562_v0  ;;  %v4705_v5 = vmax.f32 %v3422_v18, 0.0  ;;  %v6492_v43 = vld [vmem:[%s16363_s3 + $0x930] sm:$0xff] }
 0x49b   :  { %v4707_v53 = vmax.f32 %v3871_v39, 0.0  ;;  %8133 = vmatprep.subr.mxu0 %v7311_v9  ;;  %v3424_v44 = vadd.f32 %v14933_v61, %v13463_v54  ;;  %v3873_v50 = vadd.f32 %v14938_v14, %v13473_v63  ;;  %v14989_v32 = vpop.f32.mrf.mxu0  ;;  %v7306_v25 = vunpack.c.l.bf16 %v6496_v19  ;;  %v14994_v61 = vpop.f32.mrf.mxu1  ;;  %v6490_v9 = vld [vmem:[%s16363_s3 + $0x920] sm:$0xff] }
 0x49c   :  { %8204 = vmatprep.subr.mxu1 %v7439_v17  ;;  %8134 = vmatpush2.msra.mxu0 %v7310_v45  ;;  %v7307_v60 = vunpack.c.h.bf16 %v6496_v19  ;;  %v7434_v41 = vunpack.c.l.bf16 %v6560_v33  ;;  %v7435_v47 = vunpack.c.h.bf16 %v6560_v33  ;;  %v6060_v49 = vadd.f32 %v6059_v58, %v4705_v5  ;;  %v6554_v17 = vld [vmem:[%s16363_s3 + $0xb20] sm:$0xff] }
 0x49d   :  { %v6134_v14 = vadd.f32 %v6133_v22, %v4707_v53  ;;  %v4706_v13 = vmax.f32 %v3424_v44, 0.0  ;;  %v4708_v30 = vmax.f32 %v3873_v50, 0.0  ;;  %8205 = vmatpush2.msra.mxu1 %v7438_v24  ;;  %v14996_v56 = vpop.f32.mrf.mxu0  ;;  %v3428_v29 = vadd.f32 %v14940_v10, %v13310_v35  ;;  %v15008_v0 = vpop.f32.mrf.mxu1 }
 0x49e   :  { %8135 = vmatprep.subr.mxu0 %v7307_v60  ;;  %8206 = vmatprep.subr.mxu1 %v7435_v47  ;;  %v3877_v4 = vadd.f32 %v14950_v46, %v13320_v59  ;;  %v7302_v62 = vunpack.c.l.bf16 %v6494_v3  ;;  %v7303_v6 = vunpack.c.h.bf16 %v6494_v3  ;;  %v7430_v10 = vunpack.c.l.bf16 %v6558_v15  ;;  %v6488_v47 = vld [vmem:[%s16363_s3 + $0x910] sm:$0xff] }
 0x49f   :  { %v6097_v58 = vadd.f32 %v6096_v11, %v4706_v13  ;;  %v6171_v22 = vadd.f32 %v6170_v26, %v4708_v30  ;;  %8136 = vmatpush2.msra.mxu0 %v7306_v25  ;;  %8207 = vmatpush2.msra.mxu1 %v7434_v41  ;;  %v7431_v37 = vunpack.c.h.bf16 %v6558_v15  ;;  %v15010_v55 = vpop.f32.mrf.mxu0  ;;  %v4721_v46 = vmax.f32 %v3428_v29, 0.0  ;;  %v15019_v19 = vpop.f32.mrf.mxu1  ;;  %v6552_v15 = vld [vmem:[%s16363_s3 + $0xb10] sm:$0xff] }
 0x4a0   :  { %v4723_v18 = vmax.f32 %v3877_v4, 0.0  ;;  %8137 = vmatprep.subr.mxu0 %v7303_v6  ;;  %v3430_v39 = vadd.f32 %v14952_v57, %v13463_v54  ;;  %v3879_v45 = vadd.f32 %v14960_v1, %v13473_v63  ;;  %v7298_v33 = vunpack.c.l.bf16 %v6492_v43 }
 0x4a1   :  { %8208 = vmatprep.subr.mxu1 %v7431_v37  ;;  %8138 = vmatpush2.msra.mxu0 %v7302_v62  ;;  %v7299_v11 = vunpack.c.h.bf16 %v6492_v43  ;;  %v7426_v26 = vunpack.c.l.bf16 %v6556_v38  ;;  %v7427_v24 = vunpack.c.h.bf16 %v6556_v38  ;;  %v15024_v57 = vpop.f32.mrf.mxu0  ;;  %v6061_v5 = vadd.f32 %v6060_v49, %v4721_v46  ;;  %v15026_v50 = vpop.f32.mrf.mxu1  ;;  %v6486_v43 = vld [vmem:[%s16363_s3 + $0x900] sm:$0xff] }
 0x4a2   :  { %v6135_v1 = vadd.f32 %v6134_v14, %v4723_v18  ;;  %v4722_v53 = vmax.f32 %v3430_v39, 0.0  ;;  %v4724_v44 = vmax.f32 %v3879_v45, 0.0  ;;  %8209 = vmatpush2.msra.mxu1 %v7430_v10  ;;  %v3434_v3 = vadd.f32 %v14965_v40, %v13310_v35  ;;  %v6550_v46 = vld [vmem:[%s16363_s3 + $0xb00] sm:$0xff] }
 0x4a3   :  { %8139 = vmatprep.subr.mxu0 %v7299_v11  ;;  %8210 = vmatprep.subr.mxu1 %v7427_v24  ;;  %v3883_v25 = vadd.f32 %v14967_v16, %v13320_v59  ;;  %v7294_v60 = vunpack.c.l.bf16 %v6490_v9  ;;  %v7295_v41 = vunpack.c.h.bf16 %v6490_v9  ;;  %v15038_v49 = vpop.f32.mrf.mxu0  ;;  %v7422_v40 = vunpack.c.l.bf16 %v6554_v17  ;;  %v15040_v29 = vpop.f32.mrf.mxu1 }
 0x4a4   :  { %v6098_v14 = vadd.f32 %v6097_v58, %v4722_v53  ;;  %v6172_v13 = vadd.f32 %v6171_v22, %v4724_v44  ;;  %8140 = vmatpush2.msra.mxu0 %v7298_v33  ;;  %8211 = vmatpush2.msra.mxu1 %v7426_v26  ;;  %v7423_v30 = vunpack.c.h.bf16 %v6554_v17  ;;  %v4737_v16 = vmax.f32 %v3434_v3, 0.0 }
 0x4a5   :  { %v4739_v4 = vmax.f32 %v3883_v25, 0.0  ;;  %8141 = vmatprep.subr.mxu0 %v7295_v41  ;;  %v3436_v62 = vadd.f32 %v14978_v52, %v13463_v54  ;;  %v3885_v6 = vadd.f32 %v14980_v2, %v13473_v63  ;;  %v15049_v38 = vpop.f32.mrf.mxu0  ;;  %v7290_v58 = vunpack.c.l.bf16 %v6488_v47  ;;  %v3902_v52 = vpop.f32.mrf.mxu1  ;;  %v15061_v25 = vld [vmem:[%s16363_s3 + $0xcf0] sm:$0xff] }
 0x4a6   :  { %8212 = vmatprep.subr.mxu1 %v7423_v30  ;;  %8142 = vmatpush2.msra.mxu0 %v7294_v60  ;;  %v7291_v22 = vunpack.c.h.bf16 %v6488_v47  ;;  %v7418_v10 = vunpack.c.l.bf16 %v6552_v15  ;;  %v7419_v37 = vunpack.c.h.bf16 %v6552_v15  ;;  %v6062_v18 = vadd.f32 %v6061_v5, %v4737_v16  ;;  %v16639_v30 = vld [vmem:[#allocation16_spill] sm:$0xff]  ;;  %v16640_v16 = vld [vmem:[#allocation27_spill] sm:$0xff] }
 0x4a7   :  { %v6136_v39 = vadd.f32 %v6135_v1, %v4739_v4  ;;  %v4738_v2 = vmax.f32 %v3436_v62, 0.0  ;;  %v4740_v45 = vmax.f32 %v3885_v6, 0.0  ;;  %8213 = vmatpush2.msra.mxu1 %v7422_v40  ;;  %v3457_v9 = vpop.f32.mrf.mxu0  ;;  %v3440_v33 = vadd.f32 %v14989_v32, %v13310_v35  ;;  %v3906_v17 = vpop.f32.mrf.mxu1 }
 0x4a8   :  { %8143 = vmatprep.subr.mxu0 %v7291_v22  ;;  %8214 = vmatprep.subr.mxu1 %v7419_v37  ;;  %v3889_v11 = vadd.f32 %v14994_v61, %v13320_v59  ;;  %v7286_v26 = vunpack.c.l.bf16 %v6486_v43  ;;  %v7287_v24 = vunpack.c.h.bf16 %v6486_v43  ;;  %v7414_v5 = vunpack.c.l.bf16 %v6550_v46 }
 0x4a9   :  { %v6099_v53 = vadd.f32 %v6098_v14, %v4738_v2  ;;  %v6173_v44 = vadd.f32 %v6172_v13, %v4740_v45  ;;  %8144 = vmatpush2.msra.mxu0 %v7290_v58  ;;  %8215 = vmatpush2.msra.mxu1 %v7418_v10  ;;  %v7415_v1 = vunpack.c.h.bf16 %v6550_v46  ;;  %v3459_v3 = vpop.f32.mrf.mxu0  ;;  %v4753_v60 = vmax.f32 %v3440_v33, 0.0  ;;  %v3908_v47 = vpop.f32.mrf.mxu1  ;;  %v16637_v14 = vld [vmem:[#allocation15_spill] sm:$0xff]  ;;  %v16638_v13 = vld [vmem:[#allocation26_spill] sm:$0xff] }
 0x4aa   :  { %v4755_v32 = vmax.f32 %v3889_v11, 0.0  ;;  %8145 = vmatprep.subr.mxu0 %v7287_v24  ;;  %v3442_v61 = vadd.f32 %v14996_v56, %v13463_v54  ;;  %v3891_v41 = vadd.f32 %v15008_v0, %v13473_v63  ;;  %v5492_v15 = vrot.slane %v14757_v27, 1 }
 0x4ab   :  { %8216 = vmatprep.subr.mxu1 %v7415_v1  ;;  %8146 = vmatpush2.msra.mxu0 %v7286_v26  ;;  %v15071_v40 = vsel %vm7766_vm1, %v16638_v13, %v16637_v14  ;;  %v15076_v4 = vsel %vm7766_vm1, %v16640_v16, %v16639_v30  ;;  %v3446_v56 = vadd.f32 %v15010_v55, %v13310_v35  ;;  %v3463_v62 = vpop.f32.mrf.mxu0  ;;  %v3912_v58 = vpop.f32.mrf.mxu1  ;;  %v7538_v22 = vunpack.c.l.bf16 %v15061_v25 }
 0x4ac   :  { %v6063_v0 = vadd.f32 %v6062_v18, %v4753_v60  ;;  %v4754_v6 = vmax.f32 %v3442_v61, 0.0  ;;  %v4756_v43 = vmax.f32 %v3891_v41, 0.0  ;;  %8217 = vmatpush2.msra.mxu1 %v7414_v5  ;;  %8148 = vmatmul.mubr.f32.vlgmr.msra.gmra.mxu0 %v15071_v40  ;;  %v3895_v37 = vadd.f32 %v15019_v19, %v13320_v59 }
 0x4ad   :  { %8219 = vmatmul.mubr.f32.vlgmr.msra.gmra.mxu1 %v15076_v4  ;;  %v4769_v10 = vmax.f32 %v3446_v56, 0.0  ;;  %v3448_v46 = vadd.f32 %v15024_v57, %v13463_v54  ;;  %v3897_v55 = vadd.f32 %v15026_v50, %v13473_v63  ;;  %v3465_v18 = vpop.f32.mrf.mxu0  ;;  %v6137_v2 = vadd.f32 %v6136_v39, %v4755_v32  ;;  %v3914_v26 = vpop.f32.mrf.mxu1 }
 0x4ae   :  { %v6100_v45 = vadd.f32 %v6099_v53, %v4754_v6  ;;  %v3452_v33 = vadd.f32 %v15038_v49, %v13310_v35  ;;  %v3901_v11 = vadd.f32 %v15040_v29, %v13320_v59  ;;  %v6174_v24 = vadd.f32 %v6173_v44, %v4756_v43 }
 0x4af   :  { %v4771_v5 = vmax.f32 %v3895_v37, 0.0  ;;  %v4770_v1 = vmax.f32 %v3448_v46, 0.0  ;;  %v4772_v19 = vmax.f32 %v3897_v55, 0.0  ;;  %v3469_v60 = vpop.f32.mrf.mxu0  ;;  %v3454_v50 = vadd.f32 %v15049_v38, %v13463_v54  ;;  %v3918_v53 = vpop.f32.mrf.mxu1 }
 0x4b0   :  { %v4785_v61 = vmax.f32 %v3452_v33, 0.0  ;;  %v4787_v57 = vmax.f32 %v3901_v11, 0.0  ;;  %v3903_v39 = vadd.f32 %v3902_v52, %v13473_v63  ;;  %v6064_v32 = vadd.f32 %v6063_v0, %v4769_v10 }
 0x4b1   :  { %v6138_v41 = vadd.f32 %v6137_v2, %v4771_v5  ;;  %v6101_v49 = vadd.f32 %v6100_v45, %v4770_v1  ;;  %v3458_v14 = vadd.f32 %v3457_v9, %v13310_v35  ;;  %v3471_v29 = vpop.f32.mrf.mxu0  ;;  %v6175_v13 = vadd.f32 %v6174_v24, %v4772_v19  ;;  %v3920_v56 = vpop.f32.mrf.mxu1 }
 0x4b2   :  { %v4786_v44 = vmax.f32 %v3454_v50, 0.0  ;;  %v4788_v30 = vmax.f32 %v3903_v39, 0.0  ;;  %v3907_v16 = vadd.f32 %v3906_v17, %v13320_v59  ;;  %v6065_v6 = vadd.f32 %v6064_v32, %v4785_v61 }
 0x4b3   :  { %v4801_v43 = vmax.f32 %v3458_v14, 0.0  ;;  %v3460_v37 = vadd.f32 %v3459_v3, %v13463_v54  ;;  %v3909_v38 = vadd.f32 %v3908_v47, %v13473_v63  ;;  %v3475_v52 = vpop.f32.mrf.mxu0  ;;  %v6139_v46 = vadd.f32 %v6138_v41, %v4787_v57  ;;  %v3924_v9 = vpop.f32.mrf.mxu1 }
 0x4b4   :  { %v6102_v0 = vadd.f32 %v6101_v49, %v4786_v44  ;;  %v4803_v10 = vmax.f32 %v3907_v16, 0.0  ;;  %v3464_v55 = vadd.f32 %v3463_v62, %v13310_v35  ;;  %v6176_v2 = vadd.f32 %v6175_v13, %v4788_v30  ;;  %v6676_v49 = vld [vmem:[%s16363_s3 + $0xef0] sm:$0xff] }
 0x4b5   :  { %v4802_v45 = vmax.f32 %v3460_v37, 0.0  ;;  %v4804_v33 = vmax.f32 %v3909_v38, 0.0  ;;  %v3913_v11 = vadd.f32 %v3912_v58, %v13320_v59  ;;  %v3477_v17 = vpop.f32.mrf.mxu0  ;;  %v6066_v24 = vadd.f32 %v6065_v6, %v4801_v43  ;;  %v3926_v47 = vpop.f32.mrf.mxu1 }
 0x4b6   :  { %v4817_v5 = vmax.f32 %v3464_v55, 0.0  ;;  %v3466_v1 = vadd.f32 %v3465_v18, %v13463_v54  ;;  %v3915_v3 = vadd.f32 %v3914_v26, %v13473_v63  ;;  %v6140_v19 = vadd.f32 %v6139_v46, %v4803_v10 }
 0x4b7   :  { %v6103_v61 = vadd.f32 %v6102_v0, %v4802_v45  ;;  %v4819_v57 = vmax.f32 %v3913_v11, 0.0  ;;  %v3470_v50 = vadd.f32 %v3469_v60, %v13310_v35  ;;  %v15105_v62 = vpop.f32.mrf.mxu0  ;;  %v6177_v39 = vadd.f32 %v6176_v2, %v4804_v33  ;;  %v3930_v18 = vpop.f32.mrf.mxu1  ;;  %v6608_v11 = vld [vmem:[%s16363_s3 + $0xcd0] sm:$0xff] }
 0x4b8   :  { %v4818_v32 = vmax.f32 %v3466_v1, 0.0  ;;  %v4820_v41 = vmax.f32 %v3915_v3, 0.0  ;;  %v3919_v58 = vadd.f32 %v3918_v53, %v13320_v59  ;;  %v6067_v14 = vadd.f32 %v6066_v24, %v4817_v5  ;;  %v6610_v53 = vld [vmem:[%s16363_s3 + $0xce0] sm:$0xff] }
 0x4b9   :  { %v4833_v26 = vmax.f32 %v3470_v50, 0.0  ;;  %v3472_v13 = vadd.f32 %v3471_v29, %v13463_v54  ;;  %v3921_v44 = vadd.f32 %v3920_v56, %v13473_v63  ;;  %v15113_v30 = vpop.f32.mrf.mxu0  ;;  %v6141_v60 = vadd.f32 %v6140_v19, %v4819_v57  ;;  %v15119_v37 = vpop.f32.mrf.mxu1  ;;  %v6674_v29 = vld [vmem:[%s16363_s3 + $0xee0] sm:$0xff] }
 0x4ba   :  { %v6104_v16 = vadd.f32 %v6103_v61, %v4818_v32  ;;  %v4835_v6 = vmax.f32 %v3919_v58, 0.0  ;;  %v7539_v43 = vunpack.c.h.bf16 %v15061_v25  ;;  %v6178_v38 = vadd.f32 %v6177_v39, %v4820_v41  ;;  %v6672_v61 = vld [vmem:[%s16363_s3 + $0xed0] sm:$0xff] }
 0x4bb   :  { %v6068_v46 = vadd.f32 %v6067_v14, %v4833_v26  ;;  %v4834_v0 = vmax.f32 %v3472_v13, 0.0  ;;  %v7666_v10 = vunpack.c.l.bf16 %v6676_v49  ;;  %v15124_v56 = vpop.f32.mrf.mxu0  ;;  %v4836_v55 = vmax.f32 %v3921_v44, 0.0  ;;  %v15131_v24 = vpop.f32.mrf.mxu1  ;;  %v6670_v14 = vld [vmem:[%s16363_s3 + $0xec0] sm:$0xff] }
 0x4bc   :  { %8225 = vmatprep.subr.mxu0 %v7539_v43  ;;  %v7667_v2 = vunpack.c.h.bf16 %v6676_v49  ;;  %v3476_v45 = vadd.f32 %v3475_v52, %v13310_v35  ;;  %v3925_v33 = vadd.f32 %v3924_v9, %v13320_v59  ;;  %v6142_v5 = vadd.f32 %v6141_v60, %v4835_v6  ;;  %v6606_v49 = vld [vmem:[%s16363_s3 + $0xcc0] sm:$0xff] }
 0x4bd   :  { %v6105_v1 = vadd.f32 %v6104_v16, %v4834_v0  ;;  %8226 = vmatpush1.msra.mxu0 %v7538_v22  ;;  %v7534_v3 = vunpack.c.l.bf16 %v6610_v53  ;;  %v7535_v19 = vunpack.c.h.bf16 %v6610_v53  ;;  %v15138_v52 = vpop.f32.mrf.mxu0  ;;  %v7662_v50 = vunpack.c.l.bf16 %v6674_v29  ;;  %v15140_v32 = vpop.f32.mrf.mxu1 }
 0x4be   :  { %8296 = vmatprep.subr.mxu1 %v7667_v2  ;;  %v4849_v9 = vmax.f32 %v3476_v45, 0.0  ;;  %v4851_v57 = vmax.f32 %v3925_v33, 0.0  ;;  %v7663_v39 = vunpack.c.h.bf16 %v6674_v29  ;;  %v3478_v25 = vadd.f32 %v3477_v17, %v13463_v54  ;;  %v6668_v2 = vld [vmem:[%s16363_s3 + $0xeb0] sm:$0xff] }
 0x4bf   :  { %8297 = vmatpush1.msra.mxu1 %v7666_v10  ;;  %8227 = vmatprep.subr.mxu0 %v7535_v19  ;;  %v3927_v22 = vadd.f32 %v3926_v47, %v13473_v63  ;;  %v7530_v41 = vunpack.c.l.bf16 %v6608_v11  ;;  %v7531_v58 = vunpack.c.h.bf16 %v6608_v11  ;;  %v15150_v26 = vpop.f32.mrf.mxu0  ;;  %v6179_v13 = vadd.f32 %v6178_v38, %v4836_v55  ;;  %v15152_v16 = vpop.f32.mrf.mxu1  ;;  %v6604_v38 = vld [vmem:[%s16363_s3 + $0xcb0] sm:$0xff] }
 0x4c0   :  { %v6069_v44 = vadd.f32 %v6068_v46, %v4849_v9  ;;  %8298 = vmatprep.subr.mxu1 %v7663_v39  ;;  %8228 = vmatpush1.msra.mxu0 %v7534_v3  ;;  %v7658_v60 = vunpack.c.l.bf16 %v6672_v61  ;;  %v7659_v17 = vunpack.c.h.bf16 %v6672_v61  ;;  %v4850_v47 = vmax.f32 %v3478_v25, 0.0 }
 0x4c1   :  { %8299 = vmatpush1.msra.mxu1 %v7662_v50  ;;  %v4852_v6 = vmax.f32 %v3927_v22, 0.0  ;;  %8229 = vmatprep.subr.mxu0 %v7531_v58  ;;  %v3482_v43 = vadd.f32 %v15105_v62, %v13310_v35  ;;  %v3931_v53 = vadd.f32 %v3930_v18, %v13320_v59  ;;  %v15160_v46 = vpop.f32.mrf.mxu0  ;;  %v7526_v0 = vunpack.c.l.bf16 %v6606_v49  ;;  %v15165_v45 = vpop.f32.mrf.mxu1 }
 0x4c2   :  { %8300 = vmatprep.subr.mxu1 %v7659_v17  ;;  %8230 = vmatpush1.msra.mxu0 %v7530_v41  ;;  %v7527_v10 = vunpack.c.h.bf16 %v6606_v49  ;;  %v7654_v29 = vunpack.c.l.bf16 %v6670_v14  ;;  %v7655_v55 = vunpack.c.h.bf16 %v6670_v14  ;;  %v6143_v62 = vadd.f32 %v6142_v5, %v4851_v57  ;;  %v6602_v5 = vld [vmem:[%s16363_s3 + $0xca0] sm:$0xff] }
 0x4c3   :  { %v6106_v18 = vadd.f32 %v6105_v1, %v4850_v47  ;;  %8301 = vmatpush1.msra.mxu1 %v7658_v60  ;;  %v4865_v33 = vmax.f32 %v3482_v43, 0.0  ;;  %v4867_v11 = vmax.f32 %v3931_v53, 0.0  ;;  %v15167_v3 = vpop.f32.mrf.mxu0  ;;  %v3484_v19 = vadd.f32 %v15113_v30, %v13463_v54  ;;  %v6666_v1 = vld [vmem:[%s16363_s3 + $0xea0] sm:$0xff]  ;;  %v15179_v57 = vpop.f32.mrf.mxu1  ;;  %v6664_v43 = vld [vmem:[%s16363_s3 + $0xe90] sm:$0xff] }
 0x4c4   :  { %8231 = vmatprep.subr.mxu0 %v7527_v10  ;;  %8302 = vmatprep.subr.mxu1 %v7655_v55  ;;  %v3933_v61 = vadd.f32 %v15119_v37, %v13473_v63  ;;  %v7522_v9 = vunpack.c.l.bf16 %v6604_v38  ;;  %v7523_v50 = vunpack.c.h.bf16 %v6604_v38  ;;  %v6180_v39 = vadd.f32 %v6179_v13, %v4852_v6  ;;  %v6600_v13 = vld [vmem:[%s16363_s3 + $0xc90] sm:$0xff] }
 0x4c5   :  { %v6070_v25 = vadd.f32 %v6069_v44, %v4865_v33  ;;  %8232 = vmatpush1.msra.mxu0 %v7526_v0  ;;  %8303 = vmatpush1.msra.mxu1 %v7654_v29  ;;  %v7650_v30 = vunpack.c.l.bf16 %v6668_v2  ;;  %v7651_v22 = vunpack.c.h.bf16 %v6668_v2  ;;  %v15181_v41 = vpop.f32.mrf.mxu0  ;;  %v4866_v37 = vmax.f32 %v3484_v19, 0.0  ;;  %v15190_v44 = vpop.f32.mrf.mxu1 }
 0x4c6   :  { %v4868_v58 = vmax.f32 %v3933_v61, 0.0  ;;  %8233 = vmatprep.subr.mxu0 %v7523_v50  ;;  %v3488_v49 = vadd.f32 %v15124_v56, %v13310_v35  ;;  %v3937_v14 = vadd.f32 %v15131_v24, %v13320_v59  ;;  %v7518_v60 = vunpack.c.l.bf16 %v6602_v5 }
 0x4c7   :  { %8304 = vmatprep.subr.mxu1 %v7651_v22  ;;  %8234 = vmatpush1.msra.mxu0 %v7522_v9  ;;  %v7519_v17 = vunpack.c.h.bf16 %v6602_v5  ;;  %v7646_v47 = vunpack.c.l.bf16 %v6666_v1  ;;  %v7647_v6 = vunpack.c.h.bf16 %v6666_v1  ;;  %v15195_v56 = vpop.f32.mrf.mxu0  ;;  %v6144_v53 = vadd.f32 %v6143_v62, %v4867_v11  ;;  %v15197_v10 = vpop.f32.mrf.mxu1  ;;  %v6598_v62 = vld [vmem:[%s16363_s3 + $0xc80] sm:$0xff] }
 0x4c8   :  { %v6107_v24 = vadd.f32 %v6106_v18, %v4866_v37  ;;  %8305 = vmatpush1.msra.mxu1 %v7650_v30  ;;  %v4881_v38 = vmax.f32 %v3488_v49, 0.0  ;;  %v4883_v0 = vmax.f32 %v3937_v14, 0.0  ;;  %v3490_v29 = vadd.f32 %v15138_v52, %v13463_v54  ;;  %v6662_v18 = vld [vmem:[%s16363_s3 + $0xe80] sm:$0xff]  ;;  %v6660_v14 = vld [vmem:[%s16363_s3 + $0xe70] sm:$0xff] }
 0x4c9   :  { %8235 = vmatprep.subr.mxu0 %v7519_v17  ;;  %8306 = vmatprep.subr.mxu1 %v7647_v6  ;;  %v3939_v55 = vadd.f32 %v15140_v32, %v13473_v63  ;;  %v7514_v2 = vunpack.c.l.bf16 %v6600_v13  ;;  %v7515_v33 = vunpack.c.h.bf16 %v6600_v13  ;;  %v15209_v11 = vpop.f32.mrf.mxu0  ;;  %v6181_v19 = vadd.f32 %v6180_v39, %v4868_v58  ;;  %v15211_v50 = vpop.f32.mrf.mxu1  ;;  %v6596_v39 = vld [vmem:[%s16363_s3 + $0xc70] sm:$0xff] }
 0x4ca   :  { %v6071_v61 = vadd.f32 %v6070_v25, %v4881_v38  ;;  %8236 = vmatpush1.msra.mxu0 %v7518_v60  ;;  %8307 = vmatpush1.msra.mxu1 %v7646_v47  ;;  %v7642_v52 = vunpack.c.l.bf16 %v6664_v43  ;;  %v7643_v9 = vunpack.c.h.bf16 %v6664_v43  ;;  %v4882_v32 = vmax.f32 %v3490_v29, 0.0  ;;  %v6594_v29 = vld [vmem:[%s16363_s3 + $0xc60] sm:$0xff] }
 0x4cb   :  { %v4884_v5 = vmax.f32 %v3939_v55, 0.0  ;;  %8237 = vmatprep.subr.mxu0 %v7515_v33  ;;  %v3494_v1 = vadd.f32 %v15150_v26, %v13310_v35  ;;  %v3943_v30 = vadd.f32 %v15152_v16, %v13320_v59  ;;  %v15220_v25 = vpop.f32.mrf.mxu0  ;;  %v7510_v22 = vunpack.c.l.bf16 %v6598_v62  ;;  %v15225_v26 = vpop.f32.mrf.mxu1 }
 0x4cc   :  { %8308 = vmatprep.subr.mxu1 %v7643_v9  ;;  %8238 = vmatpush1.msra.mxu0 %v7514_v2  ;;  %v7511_v37 = vunpack.c.h.bf16 %v6598_v62  ;;  %v7638_v58 = vunpack.c.l.bf16 %v6662_v18  ;;  %v7639_v49 = vunpack.c.h.bf16 %v6662_v18  ;;  %v6145_v13 = vadd.f32 %v6144_v53, %v4883_v0  ;;  %v6658_v53 = vld [vmem:[%s16363_s3 + $0xe60] sm:$0xff]  ;;  %v6592_v9 = vld [vmem:[%s16363_s3 + $0xc50] sm:$0xff] }
 0x4cd   :  { %v6108_v16 = vadd.f32 %v6107_v24, %v4882_v32  ;;  %8309 = vmatpush1.msra.mxu1 %v7642_v52  ;;  %v4897_v60 = vmax.f32 %v3494_v1, 0.0  ;;  %v4899_v17 = vmax.f32 %v3943_v30, 0.0  ;;  %v3496_v47 = vadd.f32 %v15160_v46, %v13463_v54  ;;  %v15237_v24 = vpop.f32.mrf.mxu0  ;;  %v15239_v0 = vpop.f32.mrf.mxu1  ;;  %v6656_v1 = vld [vmem:[%s16363_s3 + $0xe50] sm:$0xff] }
 0x4ce   :  { %8239 = vmatprep.subr.mxu0 %v7511_v37  ;;  %8310 = vmatprep.subr.mxu1 %v7639_v49  ;;  %v3945_v6 = vadd.f32 %v15165_v45, %v13473_v63  ;;  %v7506_v43 = vunpack.c.l.bf16 %v6596_v39  ;;  %v7507_v38 = vunpack.c.h.bf16 %v6596_v39  ;;  %v6182_v55 = vadd.f32 %v6181_v19, %v4884_v5 }
 0x4cf   :  { %v6072_v2 = vadd.f32 %v6071_v61, %v4897_v60  ;;  %8240 = vmatpush1.msra.mxu0 %v7510_v22  ;;  %8311 = vmatpush1.msra.mxu1 %v7638_v58  ;;  %v7634_v46 = vunpack.c.l.bf16 %v6660_v14  ;;  %v7635_v45 = vunpack.c.h.bf16 %v6660_v14  ;;  %v4898_v33 = vmax.f32 %v3496_v47, 0.0  ;;  %v15253_v37 = vpop.f32.mrf.mxu1 }
 0x4d0   :  { %v4900_v62 = vmax.f32 %v3945_v6, 0.0  ;;  %8241 = vmatprep.subr.mxu0 %v7507_v38  ;;  %v3500_v18 = vadd.f32 %v15167_v3, %v13310_v35  ;;  %v3949_v52 = vadd.f32 %v15179_v57, %v13320_v59  ;;  %v7502_v19 = vunpack.c.l.bf16 %v6594_v29  ;;  %v15251_v57 = vpop.f32.mrf.mxu0 }
 0x4d1   :  { %8312 = vmatprep.subr.mxu1 %v7635_v45  ;;  %8242 = vmatpush1.msra.mxu0 %v7506_v43  ;;  %v7503_v61 = vunpack.c.h.bf16 %v6594_v29  ;;  %v7630_v32 = vunpack.c.l.bf16 %v6658_v53  ;;  %v7631_v5 = vunpack.c.h.bf16 %v6658_v53  ;;  %v6146_v30 = vadd.f32 %v6145_v13, %v4899_v17  ;;  %v6590_v13 = vld [vmem:[%s16363_s3 + $0xc40] sm:$0xff]  ;;  %v6588_v53 = vld [vmem:[%s16363_s3 + $0xc30] sm:$0xff] }
 0x4d2   :  { %v6109_v39 = vadd.f32 %v6108_v16, %v4898_v33  ;;  %8313 = vmatpush1.msra.mxu1 %v7634_v46  ;;  %v4913_v3 = vmax.f32 %v3500_v18, 0.0  ;;  %v4915_v22 = vmax.f32 %v3949_v52, 0.0  ;;  %v3502_v58 = vadd.f32 %v15181_v41, %v13463_v54  ;;  %v6654_v16 = vld [vmem:[%s16363_s3 + $0xe40] sm:$0xff]  ;;  %v6652_v33 = vld [vmem:[%s16363_s3 + $0xe30] sm:$0xff] }
 0x4d3   :  { %8243 = vmatprep.subr.mxu0 %v7503_v61  ;;  %8314 = vmatprep.subr.mxu1 %v7631_v5  ;;  %v3951_v49 = vadd.f32 %v15190_v44, %v13473_v63  ;;  %v7498_v14 = vunpack.c.l.bf16 %v6592_v9  ;;  %v7499_v60 = vunpack.c.h.bf16 %v6592_v9  ;;  %v6183_v17 = vadd.f32 %v6182_v55, %v4900_v62  ;;  %v15275_v62 = vpop.f32.mrf.mxu0 }
 0x4d4   :  { %v6073_v47 = vadd.f32 %v6072_v2, %v4913_v3  ;;  %8244 = vmatpush1.msra.mxu0 %v7502_v19  ;;  %8315 = vmatpush1.msra.mxu1 %v7630_v32  ;;  %v7626_v6 = vunpack.c.l.bf16 %v6656_v1  ;;  %v7627_v43 = vunpack.c.h.bf16 %v6656_v1  ;;  %v4914_v41 = vmax.f32 %v3502_v58, 0.0  ;;  %v6586_v1 = vld [vmem:[%s16363_s3 + $0xc20] sm:$0xff] }
 0x4d5   :  { %v4916_v38 = vmax.f32 %v3951_v49, 0.0  ;;  %8245 = vmatprep.subr.mxu0 %v7499_v60  ;;  %v3506_v44 = vadd.f32 %v15195_v56, %v13310_v35  ;;  %v3955_v29 = vadd.f32 %v15197_v10, %v13320_v59  ;;  %v7494_v55 = vunpack.c.l.bf16 %v6590_v13  ;;  %v15277_v56 = vpop.f32.mrf.mxu1  ;;  %v6584_v60 = vld [vmem:[%s16363_s3 + $0xc10] sm:$0xff] }
 0x4d6   :  { %8316 = vmatprep.subr.mxu1 %v7627_v43  ;;  %8246 = vmatpush1.msra.mxu0 %v7498_v14  ;;  %v7495_v2 = vunpack.c.h.bf16 %v6590_v13  ;;  %v7622_v46 = vunpack.c.l.bf16 %v6654_v16  ;;  %v7623_v45 = vunpack.c.h.bf16 %v6654_v16  ;;  %v6147_v18 = vadd.f32 %v6146_v30, %v4915_v22  ;;  %v6650_v30 = vld [vmem:[%s16363_s3 + $0xe20] sm:$0xff]  ;;  %v15296_v13 = vpop.f32.mrf.mxu0 }
 0x4d7   :  { %v6110_v10 = vadd.f32 %v6109_v39, %v4914_v41  ;;  %8317 = vmatpush1.msra.mxu1 %v7626_v6  ;;  %v4929_v52 = vmax.f32 %v3506_v44, 0.0  ;;  %v4931_v9 = vmax.f32 %v3955_v29, 0.0  ;;  %v3508_v19 = vadd.f32 %v15209_v11, %v13463_v54  ;;  %v15298_v16 = vpop.f32.mrf.mxu1 }
 0x4d8   :  { %8247 = vmatprep.subr.mxu0 %v7495_v2  ;;  %8318 = vmatprep.subr.mxu1 %v7623_v45  ;;  %v3957_v61 = vadd.f32 %v15211_v50, %v13473_v63  ;;  %v7490_v32 = vunpack.c.l.bf16 %v6588_v53  ;;  %v7491_v5 = vunpack.c.h.bf16 %v6588_v53  ;;  %v6184_v39 = vadd.f32 %v6183_v17, %v4916_v38  ;;  %v6646_v45 = vld [vmem:[%s16363_s3 + $0xe00] sm:$0xff] }
 0x4d9   :  { %v6074_v3 = vadd.f32 %v6073_v47, %v4929_v52  ;;  %8248 = vmatpush1.msra.mxu0 %v7494_v55  ;;  %8319 = vmatpush1.msra.mxu1 %v7622_v46  ;;  %v7618_v22 = vunpack.c.l.bf16 %v6652_v33  ;;  %v7619_v58 = vunpack.c.h.bf16 %v6652_v33  ;;  %v4930_v11 = vmax.f32 %v3508_v19, 0.0  ;;  %v6582_v46 = vld [vmem:[%s16363_s3 + $0xc00] sm:$0xff] }
 0x4da   :  { %v4932_v49 = vmax.f32 %v3957_v61, 0.0  ;;  %8249 = vmatprep.subr.mxu0 %v7491_v5  ;;  %v3512_v50 = vadd.f32 %v15220_v25, %v13310_v35  ;;  %v3961_v14 = vadd.f32 %v15225_v26, %v13320_v59  ;;  %v7486_v17 = vunpack.c.l.bf16 %v6586_v1  ;;  %v6648_v25 = vld [vmem:[%s16363_s3 + $0xe10] sm:$0xff] }
 0x4db   :  { %8320 = vmatprep.subr.mxu1 %v7619_v58  ;;  %8250 = vmatpush1.msra.mxu0 %v7490_v32  ;;  %v7487_v47 = vunpack.c.h.bf16 %v6586_v1  ;;  %v7614_v6 = vunpack.c.l.bf16 %v6650_v30  ;;  %v7615_v43 = vunpack.c.h.bf16 %v6650_v30  ;;  %v6148_v41 = vadd.f32 %v6147_v18, %v4931_v9  ;;  %v3974_v9 = vpop.f32.mrf.mxu1  ;;  %v6644_v5 = vld [vmem:[%s16363_s3 + $0xdf0] sm:$0xff] }
 0x4dc   :  { %v6111_v26 = vadd.f32 %v6110_v10, %v4930_v11  ;;  %8321 = vmatpush1.msra.mxu1 %v7618_v22  ;;  %v4945_v38 = vmax.f32 %v3512_v50, 0.0  ;;  %v4947_v44 = vmax.f32 %v3961_v14, 0.0  ;;  %v3514_v29 = vadd.f32 %v15237_v24, %v13463_v54  ;;  %v3525_v24 = vpop.f32.mrf.mxu0  ;;  %v6708_v22 = vld [vmem:[%s16363_s3 + $0xff0] sm:$0xff] }
 0x4dd   :  { %8251 = vmatprep.subr.mxu0 %v7487_v47  ;;  %8322 = vmatprep.subr.mxu1 %v7615_v43  ;;  %v3963_v53 = vadd.f32 %v15239_v0, %v13473_v63  ;;  %v7482_v55 = vunpack.c.l.bf16 %v6584_v60  ;;  %v7483_v2 = vunpack.c.h.bf16 %v6584_v60  ;;  %v6185_v33 = vadd.f32 %v6184_v39, %v4932_v49  ;;  %v6706_v47 = vld [vmem:[%s16363_s3 + $0xfe0] sm:$0xff]  ;;  %v3978_v43 = vpop.f32.mrf.mxu1 }
 0x4de   :  { %v6075_v18 = vadd.f32 %v6074_v3, %v4945_v38  ;;  %8252 = vmatpush1.msra.mxu0 %v7486_v17  ;;  %8323 = vmatpush1.msra.mxu1 %v7614_v6  ;;  %v7610_v10 = vunpack.c.l.bf16 %v6648_v25  ;;  %v7611_v52 = vunpack.c.h.bf16 %v6648_v25  ;;  %v4946_v19 = vmax.f32 %v3514_v29, 0.0  ;;  %v6642_v17 = vld [vmem:[%s16363_s3 + $0xde0] sm:$0xff]  ;;  %v3529_v6 = vpop.f32.mrf.mxu0 }
 0x4df   :  { %v4948_v0 = vmax.f32 %v3963_v53, 0.0  ;;  %8253 = vmatprep.subr.mxu0 %v7483_v2  ;;  %v3518_v61 = vadd.f32 %v15251_v57, %v13310_v35  ;;  %v3967_v32 = vadd.f32 %v15253_v37, %v13320_v59  ;;  %v7478_v1 = vunpack.c.l.bf16 %v6582_v46  ;;  %v6640_v53 = vld [vmem:[%s16363_s3 + $0xdd0] sm:$0xff] }
 0x4e0   :  { %8324 = vmatprep.subr.mxu1 %v7611_v52  ;;  %8254 = vmatpush1.msra.mxu0 %v7482_v55  ;;  %v7479_v30 = vunpack.c.h.bf16 %v6582_v46  ;;  %v7606_v39 = vunpack.c.l.bf16 %v6646_v45  ;;  %v7607_v3 = vunpack.c.h.bf16 %v6646_v45  ;;  %v6149_v58 = vadd.f32 %v6148_v41, %v4947_v44 }
 0x4e1   :  { %v6112_v11 = vadd.f32 %v6111_v26, %v4946_v19  ;;  %8325 = vmatpush1.msra.mxu1 %v7610_v10  ;;  %v4961_v57 = vmax.f32 %v3518_v61, 0.0  ;;  %v4963_v49 = vmax.f32 %v3967_v32, 0.0  ;;  %v3520_v37 = vadd.f32 %v15275_v62, %v13463_v54  ;;  %v3980_v19 = vpop.f32.mrf.mxu1 }
 0x4e2   :  { %8255 = vmatprep.subr.mxu0 %v7479_v30  ;;  %8326 = vmatprep.subr.mxu1 %v7607_v3  ;;  %v3969_v50 = vadd.f32 %v15277_v56, %v13473_v63  ;;  %v7602_v14 = vunpack.c.l.bf16 %v6644_v5  ;;  %v7603_v60 = vunpack.c.h.bf16 %v6644_v5  ;;  %v6186_v25 = vadd.f32 %v6185_v33, %v4948_v0  ;;  %v6704_v33 = vld [vmem:[%s16363_s3 + $0xfd0] sm:$0xff]  ;;  %v6702_v30 = vld [vmem:[%s16363_s3 + $0xfc0] sm:$0xff] }
 0x4e3   :  { %v6076_v41 = vadd.f32 %v6075_v18, %v4961_v57  ;;  %8256 = vmatpush1.msra.mxu0 %v7478_v1  ;;  %8327 = vmatpush1.msra.mxu1 %v7606_v39  ;;  %v7730_v62 = vunpack.c.l.bf16 %v6708_v22  ;;  %v7731_v26 = vunpack.c.h.bf16 %v6708_v22  ;;  %v4962_v38 = vmax.f32 %v3520_v37, 0.0  ;;  %v6638_v1 = vld [vmem:[%s16363_s3 + $0xdc0] sm:$0xff] }
 0x4e4   :  { %v4964_v56 = vmax.f32 %v3969_v50, 0.0  ;;  %8257 = vmatprep.subr.mxu0 %v7603_v60  ;;  %v3524_v44 = vadd.f32 %v15296_v13, %v13310_v35  ;;  %v3973_v29 = vadd.f32 %v15298_v16, %v13320_v59  ;;  %v7598_v55 = vunpack.c.l.bf16 %v6642_v17  ;;  %v3531_v16 = vpop.f32.mrf.mxu0 }
 0x4e5   :  { %8328 = vmatprep.subr.mxu1 %v7731_v26  ;;  %8258 = vmatpush2.msra.mxu0 %v7602_v14  ;;  %v7599_v2 = vunpack.c.h.bf16 %v6642_v17  ;;  %v7726_v46 = vunpack.c.l.bf16 %v6706_v47  ;;  %v7727_v45 = vunpack.c.h.bf16 %v6706_v47  ;;  %v6150_v18 = vadd.f32 %v6149_v58, %v4963_v49  ;;  %v6636_v49 = vld [vmem:[%s16363_s3 + $0xdb0] sm:$0xff] }
 0x4e6   :  { %v6113_v10 = vadd.f32 %v6112_v11, %v4962_v38  ;;  %8329 = vmatpush2.msra.mxu1 %v7730_v62  ;;  %v4977_v13 = vmax.f32 %v3524_v44, 0.0  ;;  %v4979_v52 = vmax.f32 %v3973_v29, 0.0  ;;  %v3526_v0 = vadd.f32 %v3525_v24, %v13463_v54  ;;  %v6700_v17 = vld [vmem:[%s16363_s3 + $0xfb0] sm:$0xff]  ;;  %v3535_v47 = vpop.f32.mrf.mxu0  ;;  %v6634_v29 = vld [vmem:[%s16363_s3 + $0xda0] sm:$0xff] }
 0x4e7   :  { %8259 = vmatprep.subr.mxu0 %v7599_v2  ;;  %8330 = vmatprep.subr.mxu1 %v7727_v45  ;;  %v3975_v61 = vadd.f32 %v3974_v9, %v13473_v63  ;;  %v7594_v32 = vunpack.c.l.bf16 %v6640_v53  ;;  %v7595_v5 = vunpack.c.h.bf16 %v6640_v53  ;;  %v6187_v39 = vadd.f32 %v6186_v25, %v4964_v56  ;;  %v3984_v25 = vpop.f32.mrf.mxu1  ;;  %v6698_v53 = vld [vmem:[%s16363_s3 + $0xfa0] sm:$0xff] }
 0x4e8   :  { %v6077_v3 = vadd.f32 %v6076_v41, %v4977_v13  ;;  %8260 = vmatpush2.msra.mxu0 %v7598_v55  ;;  %8331 = vmatpush2.msra.mxu1 %v7726_v46  ;;  %v7722_v22 = vunpack.c.l.bf16 %v6704_v33  ;;  %v7723_v58 = vunpack.c.h.bf16 %v6704_v33  ;;  %v4978_v11 = vmax.f32 %v3526_v0, 0.0 }
 0x4e9   :  { %v4980_v24 = vmax.f32 %v3975_v61, 0.0  ;;  %8261 = vmatprep.subr.mxu0 %v7595_v5  ;;  %v3530_v9 = vadd.f32 %v3529_v6, %v13310_v35  ;;  %v3979_v57 = vadd.f32 %v3978_v43, %v13320_v59  ;;  %v7590_v37 = vunpack.c.l.bf16 %v6638_v1 }
 0x4ea   :  { %8332 = vmatprep.subr.mxu1 %v7723_v58  ;;  %8262 = vmatpush2.msra.mxu0 %v7594_v32  ;;  %v7591_v50 = vunpack.c.h.bf16 %v6638_v1  ;;  %v7718_v14 = vunpack.c.l.bf16 %v6702_v30  ;;  %v7719_v60 = vunpack.c.h.bf16 %v6702_v30  ;;  %v6151_v41 = vadd.f32 %v6150_v18, %v4979_v52  ;;  %v3537_v52 = vpop.f32.mrf.mxu0  ;;  %v6696_v1 = vld [vmem:[%s16363_s3 + $0xf90] sm:$0xff] }
 0x4eb   :  { %v6114_v6 = vadd.f32 %v6113_v10, %v4978_v11  ;;  %8333 = vmatpush2.msra.mxu1 %v7722_v22  ;;  %v4993_v43 = vmax.f32 %v3530_v9, 0.0  ;;  %v4995_v62 = vmax.f32 %v3979_v57, 0.0  ;;  %v3532_v26 = vadd.f32 %v3531_v16, %v13463_v54  ;;  %v3986_v16 = vpop.f32.mrf.mxu1  ;;  %v6694_v9 = vld [vmem:[%s16363_s3 + $0xf80] sm:$0xff] }
 0x4ec   :  { %8263 = vmatprep.subr.mxu0 %v7591_v50  ;;  %8334 = vmatprep.subr.mxu1 %v7719_v60  ;;  %v3981_v38 = vadd.f32 %v3980_v19, %v13473_v63  ;;  %v7586_v56 = vunpack.c.l.bf16 %v6636_v49  ;;  %v7587_v44 = vunpack.c.h.bf16 %v6636_v49  ;;  %v6188_v55 = vadd.f32 %v6187_v39, %v4980_v24  ;;  %v6632_v19 = vld [vmem:[%s16363_s3 + $0xd90] sm:$0xff] }
 0x4ed   :  { %v6078_v2 = vadd.f32 %v6077_v3, %v4993_v43  ;;  %8264 = vmatpush2.msra.mxu0 %v7590_v37  ;;  %8335 = vmatpush2.msra.mxu1 %v7718_v14  ;;  %v7714_v46 = vunpack.c.l.bf16 %v6700_v17  ;;  %v7715_v45 = vunpack.c.h.bf16 %v6700_v17  ;;  %v4994_v33 = vmax.f32 %v3532_v26, 0.0  ;;  %v6630_v3 = vld [vmem:[%s16363_s3 + $0xd80] sm:$0xff]  ;;  %v6692_v43 = vld [vmem:[%s16363_s3 + $0xf70] sm:$0xff] }
 0x4ee   :  { %v4996_v18 = vmax.f32 %v3981_v38, 0.0  ;;  %8265 = vmatprep.subr.mxu0 %v7587_v44  ;;  %v3536_v10 = vadd.f32 %v3535_v47, %v13310_v35  ;;  %v3985_v13 = vadd.f32 %v3984_v25, %v13320_v59  ;;  %v7582_v0 = vunpack.c.l.bf16 %v6634_v29  ;;  %v6626_v44 = vld [vmem:[%s16363_s3 + $0xd60] sm:$0xff] }
 0x4ef   :  { %8336 = vmatprep.subr.mxu1 %v7715_v45  ;;  %8266 = vmatpush2.msra.mxu0 %v7586_v56  ;;  %v7583_v61 = vunpack.c.h.bf16 %v6634_v29  ;;  %v7710_v32 = vunpack.c.l.bf16 %v6698_v53  ;;  %v7711_v5 = vunpack.c.h.bf16 %v6698_v53  ;;  %v6152_v30 = vadd.f32 %v6151_v41, %v4995_v62 }
 0x4f0   :  { %v6115_v35 = vadd.f32 %v6114_v6, %v4994_v33  ;;  %8337 = vmatpush2.msra.mxu1 %v7714_v46  ;;  %v5009_v59 = vmax.f32 %v3536_v10, 0.0  ;;  %v5011_v39 = vmax.f32 %v3985_v13, 0.0  ;;  %v3538_v22 = vadd.f32 %v3537_v52, %v13463_v54  ;;  %v6628_v54 = vld [vmem:[%s16363_s3 + $0xd70] sm:$0xff]  ;;  %v6690_v46 = vld [vmem:[%s16363_s3 + $0xf60] sm:$0xff] }
 0x4f1   :  { %8267 = vmatprep.subr.mxu0 %v7583_v61  ;;  %8338 = vmatprep.subr.mxu1 %v7711_v5  ;;  %v3987_v58 = vadd.f32 %v3986_v16, %v13473_v63  ;;  %v7578_v11 = vunpack.c.l.bf16 %v6632_v19  ;;  %v7579_v24 = vunpack.c.h.bf16 %v6632_v19  ;;  %v7706_v37 = vunpack.c.l.bf16 %v6696_v1  ;;  %v6688_v19 = vld [vmem:[%s16363_s3 + $0xf50] sm:$0xff] }
 0x4f2   :  { %v6079_v57 = vadd.f32 %v6078_v2, %v5009_v59  ;;  %v6153_v49 = vadd.f32 %v6152_v30, %v5011_v39  ;;  %8268 = vmatpush2.msra.mxu0 %v7582_v0  ;;  %8339 = vmatpush2.msra.mxu1 %v7710_v32  ;;  %v7707_v50 = vunpack.c.h.bf16 %v6696_v1  ;;  %v6189_v14 = vadd.f32 %v6188_v55, %v4996_v18  ;;  %v6624_v18 = vld [vmem:[%s16363_s3 + $0xd50] sm:$0xff]  ;;  %v6622_v1 = vld [vmem:[%s16363_s3 + $0xd40] sm:$0xff] }
 0x4f3   :  { %v5010_v60 = vmax.f32 %v3538_v22, 0.0  ;;  %v5012_v17 = vmax.f32 %v3987_v58, 0.0  ;;  %8269 = vmatprep.subr.mxu0 %v7579_v24  ;;  %v7574_v47 = vunpack.c.l.bf16 %v6630_v3  ;;  %v7575_v41 = vunpack.c.h.bf16 %v6630_v3  ;;  %v6686_v3 = vld [vmem:[%s16363_s3 + $0xf40] sm:$0xff] }
 0x4f4   :  { %v6080_v63 = vrot.slane %v6079_v57, 4  ;;  %v6154_v25 = vrot.slane %v6153_v49, 4  ;;  %8340 = vmatprep.subr.mxu1 %v7707_v50  ;;  %8270 = vmatpush2.msra.mxu0 %v7578_v11  ;;  %v7702_v6 = vunpack.c.l.bf16 %v6694_v9  ;;  %v15392_v62 = vadd.f32 %v5527_v34, %v14726_v31 }
 0x4f5   :  { %v6116_v26 = vadd.f32 %v6115_v35, %v5010_v60  ;;  %v6190_v38 = vadd.f32 %v6189_v14, %v5012_v17  ;;  %8341 = vmatpush2.msra.mxu1 %v7706_v37  ;;  %v7703_v56 = vunpack.c.h.bf16 %v6694_v9  ;;  %8271 = vmatprep.subr.mxu0 %v7575_v41  ;;  %v7570_v55 = vunpack.c.l.bf16 %v6628_v54  ;;  %v6620_v9 = vld [vmem:[%s16363_s3 + $0xd30] sm:$0xff]  ;;  %v6618_v60 = vld [vmem:[%s16363_s3 + $0xd20] sm:$0xff] }
 0x4f6   :  { %v6081_v29 = vadd.f32 %v6080_v63, %v6079_v57  ;;  %v6155_v53 = vadd.f32 %v6154_v25, %v6153_v49  ;;  %v7571_v2 = vunpack.c.h.bf16 %v6628_v54  ;;  %8272 = vmatpush2.msra.mxu0 %v7574_v47  ;;  %v7698_v34 = vunpack.c.l.bf16 %v6692_v43  ;;  %v6684_v14 = vld [vmem:[%s16363_s3 + $0xf30] sm:$0xff] }
 0x4f7   :  { %v6117_v45 = vrot.slane %v6116_v26, 4  ;;  %v6191_v31 = vrot.slane %v6190_v38, 4  ;;  %8342 = vmatprep.subr.mxu1 %v7703_v56  ;;  %v7699_v33 = vunpack.c.h.bf16 %v6692_v43  ;;  %v7566_v52 = vunpack.c.l.bf16 %v6626_v44 }
 0x4f8   :  { %v6082_v10 = vrot.slane %v6081_v29, 2  ;;  %v6156_v13 = vrot.slane %v6155_v53, 2  ;;  %8343 = vmatpush2.msra.mxu1 %v7702_v6  ;;  %8273 = vmatprep.subr.mxu0 %v7571_v2  ;;  %v7567_v16 = vunpack.c.h.bf16 %v6626_v44  ;;  %v7694_v32 = vunpack.c.l.bf16 %v6690_v46 }
 0x4f9   :  { %v6118_v0 = vadd.f32 %v6117_v45, %v6116_v26  ;;  %v6192_v61 = vadd.f32 %v6191_v31, %v6190_v38  ;;  %8344 = vmatprep.subr.mxu1 %v7699_v33  ;;  %8274 = vmatpush2.msra.mxu0 %v7570_v55  ;;  %v7695_v5 = vunpack.c.h.bf16 %v6690_v46  ;;  %v7562_v59 = vunpack.c.l.bf16 %v6624_v18  ;;  %v6680_v26 = vld [vmem:[%s16363_s3 + $0xf10] sm:$0xff]  ;;  %v6678_v31 = vld [vmem:[%s16363_s3 + $0xf00] sm:$0xff] }
 0x4fa   :  { %v6083_v30 = vadd.f32 %v6082_v10, %v6081_v29  ;;  %v6157_v35 = vadd.f32 %v6156_v13, %v6155_v53  ;;  %8345 = vmatpush2.msra.mxu1 %v7698_v34  ;;  %8275 = vmatprep.subr.mxu0 %v7567_v16  ;;  %v7563_v39 = vunpack.c.h.bf16 %v6624_v18  ;;  %v7690_v11 = vunpack.c.l.bf16 %v6688_v19  ;;  %v6614_v53 = vld [vmem:[%s16363_s3 + $0xd00] sm:$0xff]  ;;  %v6229_v16 = vld [vmem:[%s16363_s3 + $0xf8] sm:$0xff] }
 0x4fb   :  { %v6119_v22 = vrot.slane %v6118_v0, 2  ;;  %v6193_v58 = vrot.slane %v6192_v61, 2  ;;  %8346 = vmatprep.subr.mxu1 %v7695_v5  ;;  %8276 = vmatpush2.msra.mxu0 %v7566_v52  ;;  %v7691_v24 = vunpack.c.h.bf16 %v6688_v19  ;;  %v5566_v57 = vrot.slane %v14764_v42, 1  ;;  %v6293_v5 = vld [vmem:[%s16363_s3 + $0x2f8] sm:$0xff] }
 0x4fc   :  { %v15419_v49 = vadd.f32 %v5601_v12, %v14738_v8  ;;  %8347 = vmatpush2.msra.mxu1 %v7694_v32  ;;  %8277 = vmatprep.subr.mxu0 %v7563_v39  ;;  %v7558_v37 = vunpack.c.l.bf16 %v6622_v1  ;;  %v7559_v50 = vunpack.c.h.bf16 %v6622_v1  ;;  %v6084_v17 = vrot.slane %v6083_v30, 1  ;;  %v6682_v8 = vld [vmem:[%s16363_s3 + $0xf20] sm:$0xff]  ;;  %v6616_v12 = vld [vmem:[%s16363_s3 + $0xd10] sm:$0xff] }
 0x4fd   :  { %v6158_v47 = vrot.slane %v6157_v35, 1  ;;  %8348 = vmatprep.subr.mxu1 %v7691_v24  ;;  %8278 = vmatpush2.msra.mxu0 %v7562_v59  ;;  %v7686_v54 = vunpack.c.l.bf16 %v6686_v3  ;;  %v7687_v63 = vunpack.c.h.bf16 %v6686_v3  ;;  %v6120_v25 = vadd.f32 %v6119_v22, %v6118_v0 }
 0x4fe   :  { %v6194_v41 = vadd.f32 %v6193_v58, %v6192_v61  ;;  %8349 = vmatpush2.msra.mxu1 %v7690_v11  ;;  %8279 = vmatprep.subr.mxu0 %v7559_v50  ;;  %v7554_v6 = vunpack.c.l.bf16 %v6620_v9  ;;  %v7555_v43 = vunpack.c.h.bf16 %v6620_v9  ;;  %v7682_v38 = vunpack.c.l.bf16 %v6684_v14  ;;  %v6227_v11 = vld [vmem:[%s16363_s3 + $0xe8] sm:$0xff] }
 0x4ff   :  { %8350 = vmatprep.subr.mxu1 %v7687_v63  ;;  %8280 = vmatpush2.msra.mxu0 %v7558_v37  ;;  %v7683_v56 = vunpack.c.h.bf16 %v6684_v14  ;;  %v7550_v44 = vunpack.c.l.bf16 %v6618_v60  ;;  %v7551_v29 = vunpack.c.h.bf16 %v6618_v60  ;;  %v5493_v55 = vadd.f32 %v5492_v15, %v14757_v27  ;;  %v6291_v9 = vld [vmem:[%s16363_s3 + $0x2e8] sm:$0xff]  ;;  %v6225_v14 = vld [vmem:[%s16363_s3 + $0xd8] sm:$0xff] }
 0x500   :  { %8351 = vmatpush2.msra.mxu1 %v7686_v54  ;;  %8281 = vmatprep.subr.mxu0 %v7555_v43  ;;  %v7678_v2 = vunpack.c.l.bf16 %v6682_v8  ;;  %v7679_v46 = vunpack.c.h.bf16 %v6682_v8  ;;  %v7547_v45 = vunpack.c.h.bf16 %v6616_v12  ;;  %v6085_v34 = vadd.f32 %v6084_v17, %v6083_v30  ;;  %v6289_v17 = vld [vmem:[%s16363_s3 + $0x2d8] sm:$0xff]  ;;  %v6223_v54 = vld [vmem:[%s16363_s3 + $0xc8] sm:$0xff] }
 0x501   :  { %v6159_v33 = vadd.f32 %v6158_v47, %v6157_v35  ;;  %8352 = vmatprep.subr.mxu1 %v7683_v56  ;;  %8282 = vmatpush2.msra.mxu0 %v7554_v6  ;;  %v7546_v18 = vunpack.c.l.bf16 %v6616_v12  ;;  %v7675_v10 = vunpack.c.h.bf16 %v6680_v26  ;;  %v7674_v13 = vunpack.c.l.bf16 %v6680_v26  ;;  %v6287_v12 = vld [vmem:[%s16363_s3 + $0x2c8] sm:$0xff]  ;;  %v6221_v6 = vld [vmem:[%s16363_s3 + $0xb8] sm:$0xff] }
 0x502   :  { %8353 = vmatpush2.msra.mxu1 %v7682_v38  ;;  %8283 = vmatprep.subr.mxu0 %v7551_v29  ;;  %v7543_v52 = vunpack.c.h.bf16 %v6614_v53  ;;  %v5529_v27 = vrot.slane %v15392_v62, 1  ;;  %v6121_v15 = vrot.slane %v6120_v25, 1  ;;  %v7542_v19 = vunpack.c.l.bf16 %v6614_v53  ;;  %v6285_v38 = vld [vmem:[%s16363_s3 + $0x2b8] sm:$0xff]  ;;  %v16641_v56 = vld [vmem:[#allocation11_spill] sm:$0xff] }
 0x503   :  { %8354 = vmatprep.subr.mxu1 %v7679_v46  ;;  %8284 = vmatpush2.msra.mxu0 %v7550_v44  ;;  %v7671_v0 = vunpack.c.h.bf16 %v6678_v31  ;;  %v5603_v61 = vrot.slane %v15419_v49, 1  ;;  %v6195_v32 = vrot.slane %v6194_v41, 1  ;;  %v5567_v1 = vadd.f32 %v5566_v57, %v14764_v42  ;;  %v6219_v53 = vld [vmem:[%s16363_s3 + $0xa8] sm:$0xff] }
 0x504   :  { %8355 = vmatpush2.msra.mxu1 %v7678_v2  ;;  %8285 = vmatprep.subr.mxu0 %v7547_v45  ;;  %v7670_v30 = vunpack.c.l.bf16 %v6678_v31  ;;  %v5530_v35 = vadd.f32 %v5529_v27, %v15392_v62  ;;  %v6122_v59 = vadd.f32 %v6121_v15, %v6120_v25  ;;  %v6773_v22 = vunpack.c.h.bf16 %v6229_v16  ;;  %v6283_v2 = vld [vmem:[%s16363_s3 + $0x2a8] sm:$0xff]  ;;  %v6217_v31 = vld [vmem:[%s16363_s3 + $0x98] sm:$0xff] }
 0x505   :  { %8356 = vmatprep.subr.mxu1 %v7675_v10  ;;  %8286 = vmatpush2.msra.mxu0 %v7546_v18  ;;  %v5604_v39 = vadd.f32 %v5603_v61, %v15419_v49  ;;  %v6196_v3 = vadd.f32 %v6195_v32, %v6194_v41  ;;  %v15457_v58 = vsel %vm7766_vm1, %v6085_v34, %v5493_v55  ;;  %v6901_v62 = vunpack.c.h.bf16 %v6293_v5  ;;  %v6281_v18 = vld [vmem:[%s16363_s3 + $0x298] sm:$0xff] }
 0x506   :  { %8357 = vmatpush2.msra.mxu1 %v7674_v13  ;;  %8287 = vmatprep.subr.mxu0 %v7543_v52  ;;  %v15463_v42 = vsel %vm7766_vm1, %v6122_v59, %v5530_v35  ;;  %v15466_v24 = vsel %vm7766_vm1, %v6159_v33, %v5567_v1  ;;  %v6772_v49 = vunpack.c.l.bf16 %v6229_v16  ;;  %v6900_v37 = vunpack.c.l.bf16 %v6293_v5  ;;  %v6215_v52 = vld [vmem:[%s16363_s3 + $0x88] sm:$0xff]  ;;  %v6213_v61 = vld [vmem:[%s16363_s3 + $0x78] sm:$0xff] }
 0x507   :  { %8358 = vmatprep.subr.mxu1 %v7671_v0  ;;  %8288 = vmatpush2.msra.mxu0 %v7542_v19  ;;  %v15472_v57 = vsel %vm7766_vm1, %v6196_v3, %v5604_v39  ;;  %v6769_v50 = vunpack.c.h.bf16 %v6227_v11  ;;  %v6897_v60 = vunpack.c.h.bf16 %v6291_v9  ;;  %v6768_v47 = vunpack.c.l.bf16 %v6227_v11  ;;  %v6279_v16 = vld [vmem:[%s16363_s3 + $0x288] sm:$0xff]  ;;  %v6277_v1 = vld [vmem:[%s16363_s3 + $0x278] sm:$0xff] }
 0x508   :  { %8359 = vmatpush2.msra.mxu1 %v7670_v30  ;;  %8289 = vmatprep.mubr.f32.mxu0 %v15463_v42  ;;  %v6896_v63 = vunpack.c.l.bf16 %v6291_v9  ;;  %v6765_v8 = vunpack.c.h.bf16 %v6225_v14  ;;  %v6764_v25 = vunpack.c.l.bf16 %v6225_v14  ;;  %v6893_v41 = vunpack.c.h.bf16 %v6289_v17  ;;  %v6211_v59 = vld [vmem:[%s16363_s3 + $0x68] sm:$0xff]  ;;  %v6209_v9 = vld [vmem:[%s16363_s3 + $0x58] sm:$0xff] }
 0x509   :  { %8360 = vmatprep.mubr.f32.mxu1 %v15472_v57  ;;  %8367 = vmatprep.subr.mxu0 %v6773_v22  ;;  %v6892_v43 = vunpack.c.l.bf16 %v6289_v17  ;;  %v6761_v26 = vunpack.c.h.bf16 %v6223_v54  ;;  %v6760_v44 = vunpack.c.l.bf16 %v6223_v54  ;;  %v6889_v29 = vunpack.c.h.bf16 %v6287_v12  ;;  %v6275_v22 = vld [vmem:[%s16363_s3 + $0x268] sm:$0xff] }
 0x50a   :  { %8438 = vmatprep.subr.mxu1 %v6901_v62  ;;  %8290 = vmatmul.mubr.f32.vlgmr.msra.gmra.mxu0 %v15457_v58  ;;  %v6888_v55 = vunpack.c.l.bf16 %v6287_v12  ;;  %v6756_v46 = vunpack.c.l.bf16 %v6221_v6  ;;  %v6885_v45 = vunpack.c.h.bf16 %v6285_v38  ;;  %v6884_v34 = vunpack.c.l.bf16 %v6285_v38  ;;  %v6207_v17 = vld [vmem:[%s16363_s3 + $0x48] sm:$0xff] }
 0x50b   :  { %8361 = vmatmul.mubr.f32.vlgmr.msra.gmra.mxu1 %v15466_v24  ;;  %8368 = vmatpush1.msra.mxu0 %v6772_v49  ;;  %v6753_v33 = vunpack.c.h.bf16 %v6219_v53  ;;  %v6752_v10 = vunpack.c.l.bf16 %v6219_v53  ;;  %v6881_v13 = vunpack.c.h.bf16 %v6283_v2  ;;  %v6880_v27 = vunpack.c.l.bf16 %v6283_v2  ;;  %v6267_v53 = vld [vmem:[%s16363_s3 + $0x228] sm:$0xff]  ;;  %v6201_v2 = vld [vmem:[%s16363_s3 + $0x18] sm:$0xff] }
 0x50c   :  { %8439 = vmatpush1.msra.mxu1 %v6900_v37  ;;  %8369 = vmatprep.subr.mxu0 %v6769_v50  ;;  %v6749_v15 = vunpack.c.h.bf16 %v6217_v31  ;;  %v6748_v19 = vunpack.c.l.bf16 %v6217_v31  ;;  %v6877_v0 = vunpack.c.h.bf16 %v6281_v18  ;;  %v6876_v32 = vunpack.c.l.bf16 %v6281_v18  ;;  %v6273_v50 = vld [vmem:[%s16363_s3 + $0x258] sm:$0xff]  ;;  %v6199_v18 = vld [vmem:[%s16363_s3 + $0x8] sm:$0xff] }
 0x50d   :  { %8431 = vmatprep.mubr.f32.mxu0 %v11566_v28  ;;  %8440 = vmatprep.subr.mxu1 %v6897_v60  ;;  %v6757_v28 = vunpack.c.h.bf16 %v6221_v6  ;;  %v6745_v5 = vunpack.c.h.bf16 %v6215_v52  ;;  %v6744_v30 = vunpack.c.l.bf16 %v6215_v52  ;;  %v6873_v35 = vunpack.c.h.bf16 %v6279_v16  ;;  %v6265_v31 = vld [vmem:[%s16363_s3 + $0x218] sm:$0xff]  ;;  %v6263_v52 = vld [vmem:[%s16363_s3 + $0x208] sm:$0xff] }
 0x50e   :  { %8502 = vmatprep.mubr.f32.mxu1 %v16641_v56  ;;  %8370 = vmatpush1.msra.mxu0 %v6768_v47  ;;  %v6872_v39 = vunpack.c.l.bf16 %v6279_v16  ;;  %v6741_v3 = vunpack.c.h.bf16 %v6213_v61  ;;  %v6740_v11 = vunpack.c.l.bf16 %v6213_v61  ;;  %v6869_v62 = vunpack.c.h.bf16 %v6277_v1  ;;  %v6203_v56 = vld [vmem:[%s16363_s3 + $0x28] sm:$0xff]  ;;  %v6261_v16 = vld [vmem:[%s16363_s3 + $0x1f8] sm:$0xff] }
 0x50f   :  { %8441 = vmatpush1.msra.mxu1 %v6896_v63  ;;  %8371 = vmatprep.subr.mxu0 %v6765_v8  ;;  %v6868_v49 = vunpack.c.l.bf16 %v6277_v1  ;;  %v6737_v37 = vunpack.c.h.bf16 %v6211_v59  ;;  %v6736_v14 = vunpack.c.l.bf16 %v6211_v59  ;;  %v6865_v60 = vunpack.c.h.bf16 %v6275_v22  ;;  %v6271_v63 = vld [vmem:[%s16363_s3 + $0x248] sm:$0xff]  ;;  %v6325_v61 = vld [vmem:[%s16363_s3 + $0x3f8] sm:$0xff] }
 0x510   :  { %8442 = vmatprep.subr.mxu1 %v6893_v41  ;;  %8372 = vmatpush1.msra.mxu0 %v6764_v25  ;;  %v6864_v47 = vunpack.c.l.bf16 %v6275_v22  ;;  %v6733_v54 = vunpack.c.h.bf16 %v6209_v9  ;;  %v6732_v8 = vunpack.c.l.bf16 %v6209_v9  ;;  %v6861_v12 = vunpack.c.h.bf16 %v6273_v50  ;;  %v6205_v25 = vld [vmem:[%s16363_s3 + $0x38] sm:$0xff]  ;;  %v6259_v1 = vld [vmem:[%s16363_s3 + $0x1e8] sm:$0xff] }
 0x511   :  { %8443 = vmatpush1.msra.mxu1 %v6892_v43  ;;  %8373 = vmatprep.subr.mxu0 %v6761_v26  ;;  %v6860_v41 = vunpack.c.l.bf16 %v6273_v50  ;;  %v6729_v6 = vunpack.c.h.bf16 %v6207_v17  ;;  %v6269_v43 = vld [vmem:[%s16363_s3 + $0x238] sm:$0xff]  ;;  %v6728_v26 = vunpack.c.l.bf16 %v6207_v17  ;;  %v6857_v38 = vunpack.c.h.bf16 %v6271_v63  ;;  %v6323_v59 = vld [vmem:[%s16363_s3 + $0x3e8] sm:$0xff] }
 0x512   :  { %8444 = vmatprep.subr.mxu1 %v6889_v29  ;;  %8374 = vmatpush1.msra.mxu0 %v6760_v44  ;;  %v6856_v44 = vunpack.c.l.bf16 %v6271_v63  ;;  %v6725_v29 = vunpack.c.h.bf16 %v6205_v25  ;;  %v6257_v22 = vld [vmem:[%s16363_s3 + $0x1d8] sm:$0xff]  ;;  %v6255_v50 = vld [vmem:[%s16363_s3 + $0x1c8] sm:$0xff] }
 0x513   :  { %8445 = vmatpush1.msra.mxu1 %v6888_v55  ;;  %8375 = vmatprep.subr.mxu0 %v6757_v28  ;;  %v6724_v55 = vunpack.c.l.bf16 %v6205_v25  ;;  %v6853_v28 = vunpack.c.h.bf16 %v6269_v43  ;;  %v6321_v9 = vld [vmem:[%s16363_s3 + $0x3d8] sm:$0xff]  ;;  %v6319_v17 = vld [vmem:[%s16363_s3 + $0x3c8] sm:$0xff] }
 0x514   :  { %8446 = vmatprep.subr.mxu1 %v6885_v45  ;;  %8376 = vmatpush1.msra.mxu0 %v6756_v46  ;;  %v6852_v46 = vunpack.c.l.bf16 %v6269_v43  ;;  %v6721_v45 = vunpack.c.h.bf16 %v6203_v56  ;;  %v6253_v63 = vld [vmem:[%s16363_s3 + $0x1b8] sm:$0xff]  ;;  %v6251_v43 = vld [vmem:[%s16363_s3 + $0x1a8] sm:$0xff] }
 0x515   :  { %8447 = vmatpush1.msra.mxu1 %v6884_v34  ;;  %8377 = vmatprep.subr.mxu0 %v6753_v33  ;;  %v6720_v34 = vunpack.c.l.bf16 %v6203_v56  ;;  %v6849_v33 = vunpack.c.h.bf16 %v6267_v53  ;;  %v6317_v25 = vld [vmem:[%s16363_s3 + $0x3b8] sm:$0xff]  ;;  %v6315_v56 = vld [vmem:[%s16363_s3 + $0x3a8] sm:$0xff] }
 0x516   :  { %8448 = vmatprep.subr.mxu1 %v6881_v13  ;;  %8378 = vmatpush1.msra.mxu0 %v6752_v10  ;;  %v6848_v10 = vunpack.c.l.bf16 %v6267_v53  ;;  %v6717_v13 = vunpack.c.h.bf16 %v6201_v2  ;;  %v6249_v53 = vld [vmem:[%s16363_s3 + $0x198] sm:$0xff] }
 0x517   :  { %8449 = vmatpush1.msra.mxu1 %v6880_v27  ;;  %8379 = vmatprep.subr.mxu0 %v6749_v15  ;;  %v6716_v27 = vunpack.c.l.bf16 %v6201_v2  ;;  %v6845_v15 = vunpack.c.h.bf16 %v6265_v31  ;;  %v6313_v2 = vld [vmem:[%s16363_s3 + $0x398] sm:$0xff] }
 0x518   :  { %8450 = vmatprep.subr.mxu1 %v6877_v0  ;;  %8380 = vmatpush1.msra.mxu0 %v6748_v19  ;;  %v6844_v19 = vunpack.c.l.bf16 %v6265_v31  ;;  %v6713_v0 = vunpack.c.h.bf16 %v6199_v18  ;;  %v6247_v31 = vld [vmem:[%s16363_s3 + $0x188] sm:$0xff] }
 0x519   :  { %8451 = vmatpush1.msra.mxu1 %v6876_v32  ;;  %8381 = vmatprep.subr.mxu0 %v6745_v5  ;;  %v6712_v32 = vunpack.c.l.bf16 %v6199_v18  ;;  %v6841_v5 = vunpack.c.h.bf16 %v6263_v52  ;;  %v6311_v18 = vld [vmem:[%s16363_s3 + $0x388] sm:$0xff] }
 0x51a   :  { %8452 = vmatprep.subr.mxu1 %v6873_v35  ;;  %8382 = vmatpush1.msra.mxu0 %v6744_v30  ;;  %v6840_v30 = vunpack.c.l.bf16 %v6263_v52  ;;  %v6837_v35 = vunpack.c.h.bf16 %v6261_v16  ;;  %v6245_v52 = vld [vmem:[%s16363_s3 + $0x178] sm:$0xff] }
 0x51b   :  { %8453 = vmatpush1.msra.mxu1 %v6872_v39  ;;  %8383 = vmatprep.subr.mxu0 %v6741_v3  ;;  %v6836_v39 = vunpack.c.l.bf16 %v6261_v16  ;;  %v6965_v3 = vunpack.c.h.bf16 %v6325_v61  ;;  %v6309_v16 = vld [vmem:[%s16363_s3 + $0x378] sm:$0xff] }
 0x51c   :  { %8454 = vmatprep.subr.mxu1 %v6869_v62  ;;  %8384 = vmatpush1.msra.mxu0 %v6740_v11  ;;  %v6964_v11 = vunpack.c.l.bf16 %v6325_v61  ;;  %v6833_v62 = vunpack.c.h.bf16 %v6259_v1  ;;  %v6243_v61 = vld [vmem:[%s16363_s3 + $0x168] sm:$0xff] }
 0x51d   :  { %8455 = vmatpush1.msra.mxu1 %v6868_v49  ;;  %8385 = vmatprep.subr.mxu0 %v6737_v37  ;;  %v6832_v49 = vunpack.c.l.bf16 %v6259_v1  ;;  %v6961_v37 = vunpack.c.h.bf16 %v6323_v59  ;;  %v6307_v1 = vld [vmem:[%s16363_s3 + $0x368] sm:$0xff] }
 0x51e   :  { %8456 = vmatprep.subr.mxu1 %v6865_v60  ;;  %8386 = vmatpush1.msra.mxu0 %v6736_v14  ;;  %v6960_v14 = vunpack.c.l.bf16 %v6323_v59  ;;  %v6829_v60 = vunpack.c.h.bf16 %v6257_v22  ;;  %v6241_v59 = vld [vmem:[%s16363_s3 + $0x158] sm:$0xff] }
 0x51f   :  { %8457 = vmatpush1.msra.mxu1 %v6864_v47  ;;  %8387 = vmatprep.subr.mxu0 %v6733_v54  ;;  %v6828_v47 = vunpack.c.l.bf16 %v6257_v22  ;;  %v6957_v54 = vunpack.c.h.bf16 %v6321_v9  ;;  %v6305_v22 = vld [vmem:[%s16363_s3 + $0x358] sm:$0xff] }
 0x520   :  { %8458 = vmatprep.subr.mxu1 %v6861_v12  ;;  %8388 = vmatpush1.msra.mxu0 %v6732_v8  ;;  %v6956_v8 = vunpack.c.l.bf16 %v6321_v9  ;;  %v6825_v12 = vunpack.c.h.bf16 %v6255_v50  ;;  %v6239_v9 = vld [vmem:[%s16363_s3 + $0x148] sm:$0xff] }
 0x521   :  { %8459 = vmatpush1.msra.mxu1 %v6860_v41  ;;  %8389 = vmatprep.subr.mxu0 %v6729_v6  ;;  %v6824_v41 = vunpack.c.l.bf16 %v6255_v50  ;;  %v6953_v6 = vunpack.c.h.bf16 %v6319_v17  ;;  %v6303_v50 = vld [vmem:[%s16363_s3 + $0x348] sm:$0xff] }
 0x522   :  { %8460 = vmatprep.subr.mxu1 %v6857_v38  ;;  %8390 = vmatpush1.msra.mxu0 %v6728_v26  ;;  %v6952_v26 = vunpack.c.l.bf16 %v6319_v17  ;;  %v6821_v38 = vunpack.c.h.bf16 %v6253_v63  ;;  %v6237_v17 = vld [vmem:[%s16363_s3 + $0x138] sm:$0xff] }
 0x523   :  { %8461 = vmatpush1.msra.mxu1 %v6856_v44  ;;  %8391 = vmatprep.subr.mxu0 %v6725_v29  ;;  %v6820_v44 = vunpack.c.l.bf16 %v6253_v63  ;;  %v6949_v29 = vunpack.c.h.bf16 %v6317_v25  ;;  %v6301_v63 = vld [vmem:[%s16363_s3 + $0x338] sm:$0xff] }
 0x524   :  { %8462 = vmatprep.subr.mxu1 %v6853_v28  ;;  %8392 = vmatpush1.msra.mxu0 %v6724_v55  ;;  %v6948_v55 = vunpack.c.l.bf16 %v6317_v25  ;;  %v6817_v28 = vunpack.c.h.bf16 %v6251_v43  ;;  %v6235_v25 = vld [vmem:[%s16363_s3 + $0x128] sm:$0xff] }
 0x525   :  { %8463 = vmatpush1.msra.mxu1 %v6852_v46  ;;  %8393 = vmatprep.subr.mxu0 %v6721_v45  ;;  %v6816_v46 = vunpack.c.l.bf16 %v6251_v43  ;;  %v6945_v45 = vunpack.c.h.bf16 %v6315_v56  ;;  %v6299_v43 = vld [vmem:[%s16363_s3 + $0x328] sm:$0xff] }
 0x526   :  { %8464 = vmatprep.subr.mxu1 %v6849_v33  ;;  %8394 = vmatpush1.msra.mxu0 %v6720_v34  ;;  %v6944_v34 = vunpack.c.l.bf16 %v6315_v56  ;;  %v6813_v33 = vunpack.c.h.bf16 %v6249_v53  ;;  %v6233_v56 = vld [vmem:[%s16363_s3 + $0x118] sm:$0xff] }
 0x527   :  { %8465 = vmatpush1.msra.mxu1 %v6848_v10  ;;  %8395 = vmatprep.subr.mxu0 %v6717_v13  ;;  %v6812_v10 = vunpack.c.l.bf16 %v6249_v53  ;;  %v6941_v13 = vunpack.c.h.bf16 %v6313_v2  ;;  %v6297_v53 = vld [vmem:[%s16363_s3 + $0x318] sm:$0xff] }
 0x528   :  { %8466 = vmatprep.subr.mxu1 %v6845_v15  ;;  %8396 = vmatpush1.msra.mxu0 %v6716_v27  ;;  %v6940_v27 = vunpack.c.l.bf16 %v6313_v2  ;;  %v6809_v15 = vunpack.c.h.bf16 %v6247_v31  ;;  %v6231_v2 = vld [vmem:[%s16363_s3 + $0x108] sm:$0xff] }
 0x529   :  { %8467 = vmatpush1.msra.mxu1 %v6844_v19  ;;  %8397 = vmatprep.subr.mxu0 %v6713_v0  ;;  %v6808_v19 = vunpack.c.l.bf16 %v6247_v31  ;;  %v6937_v0 = vunpack.c.h.bf16 %v6311_v18  ;;  %v6295_v31 = vld [vmem:[%s16363_s3 + $0x308] sm:$0xff] }
 0x52a   :  { %8468 = vmatprep.subr.mxu1 %v6841_v5  ;;  %8398 = vmatpush1.msra.mxu0 %v6712_v32  ;;  %v6936_v32 = vunpack.c.l.bf16 %v6311_v18  ;;  %v6805_v5 = vunpack.c.h.bf16 %v6245_v52  ;;  %v6908_v18 = vunpack.c.l.bf16 %v6297_v53 }
 0x52b   :  { %8469 = vmatpush1.msra.mxu1 %v6840_v30  ;;  %8399 = vmatprep.subr.mxu0 %v6837_v35  ;;  %v6804_v30 = vunpack.c.l.bf16 %v6245_v52  ;;  %v6933_v35 = vunpack.c.h.bf16 %v6309_v16  ;;  %v6776_v52 = vunpack.c.l.bf16 %v6231_v2 }
 0x52c   :  { %8470 = vmatprep.subr.mxu1 %v6965_v3  ;;  %8400 = vmatpush2.msra.mxu0 %v6836_v39  ;;  %v6932_v39 = vunpack.c.l.bf16 %v6309_v16  ;;  %v6801_v3 = vunpack.c.h.bf16 %v6243_v61  ;;  %v6904_v16 = vunpack.c.l.bf16 %v6295_v31 }
 0x52d   :  { %8471 = vmatpush2.msra.mxu1 %v6964_v11  ;;  %8401 = vmatprep.subr.mxu0 %v6833_v62  ;;  %v6800_v11 = vunpack.c.l.bf16 %v6243_v61  ;;  %v6929_v62 = vunpack.c.h.bf16 %v6307_v1 }
 0x52e   :  { %8472 = vmatprep.subr.mxu1 %v6961_v37  ;;  %8402 = vmatpush2.msra.mxu0 %v6832_v49  ;;  %v6928_v49 = vunpack.c.l.bf16 %v6307_v1  ;;  %v6797_v37 = vunpack.c.h.bf16 %v6241_v59 }
 0x52f   :  { %8473 = vmatpush2.msra.mxu1 %v6960_v14  ;;  %8403 = vmatprep.subr.mxu0 %v6829_v60  ;;  %v6796_v14 = vunpack.c.l.bf16 %v6241_v59  ;;  %v6925_v60 = vunpack.c.h.bf16 %v6305_v22 }
 0x530   :  { %8474 = vmatprep.subr.mxu1 %v6957_v54  ;;  %8404 = vmatpush2.msra.mxu0 %v6828_v47  ;;  %v6924_v47 = vunpack.c.l.bf16 %v6305_v22  ;;  %v6793_v54 = vunpack.c.h.bf16 %v6239_v9 }
 0x531   :  { %8475 = vmatpush2.msra.mxu1 %v6956_v8  ;;  %8405 = vmatprep.subr.mxu0 %v6825_v12  ;;  %v6792_v8 = vunpack.c.l.bf16 %v6239_v9  ;;  %v6921_v12 = vunpack.c.h.bf16 %v6303_v50 }
 0x532   :  { %8476 = vmatprep.subr.mxu1 %v6953_v6  ;;  %8406 = vmatpush2.msra.mxu0 %v6824_v41  ;;  %v6920_v41 = vunpack.c.l.bf16 %v6303_v50  ;;  %v6789_v6 = vunpack.c.h.bf16 %v6237_v17  ;;  %v6349_v50 = vld [vmem:[%s16363_s3 + $0x4b8] sm:$0xff] }
 0x533   :  { %8477 = vmatpush2.msra.mxu1 %v6952_v26  ;;  %8407 = vmatprep.subr.mxu0 %v6821_v38  ;;  %v6788_v26 = vunpack.c.l.bf16 %v6237_v17  ;;  %v6917_v38 = vunpack.c.h.bf16 %v6301_v63  ;;  %v6413_v17 = vld [vmem:[%s16363_s3 + $0x6b8] sm:$0xff] }
 0x534   :  { %8478 = vmatprep.subr.mxu1 %v6949_v29  ;;  %8408 = vmatpush2.msra.mxu0 %v6820_v44  ;;  %v6916_v44 = vunpack.c.l.bf16 %v6301_v63  ;;  %v6785_v29 = vunpack.c.h.bf16 %v6235_v25 }
 0x535   :  { %8479 = vmatpush2.msra.mxu1 %v6948_v55  ;;  %8409 = vmatprep.subr.mxu0 %v6817_v28  ;;  %v6784_v55 = vunpack.c.l.bf16 %v6235_v25  ;;  %v6913_v28 = vunpack.c.h.bf16 %v6299_v43  ;;  %v7141_v25 = vunpack.c.h.bf16 %v6413_v17 }
 0x536   :  { %8480 = vmatprep.subr.mxu1 %v6945_v45  ;;  %8410 = vmatpush2.msra.mxu0 %v6816_v46  ;;  %v6912_v46 = vunpack.c.l.bf16 %v6299_v43  ;;  %v6781_v45 = vunpack.c.h.bf16 %v6233_v56 }
 0x537   :  { %8481 = vmatpush2.msra.mxu1 %v6944_v34  ;;  %8411 = vmatprep.subr.mxu0 %v6813_v33  ;;  %v6780_v34 = vunpack.c.l.bf16 %v6233_v56  ;;  %v6909_v33 = vunpack.c.h.bf16 %v6297_v53 }
 0x538   :  { %8482 = vmatprep.subr.mxu1 %v6941_v13  ;;  %8412 = vmatpush2.msra.mxu0 %v6812_v10  ;;  %v6777_v10 = vunpack.c.h.bf16 %v6231_v2  ;;  %v6357_v13 = vld [vmem:[%s16363_s3 + $0x4f8] sm:$0xff] }
 0x539   :  { %8483 = vmatpush2.msra.mxu1 %v6940_v27  ;;  %8413 = vmatprep.subr.mxu0 %v6809_v15  ;;  %v6905_v27 = vunpack.c.h.bf16 %v6295_v31  ;;  %v6421_v15 = vld [vmem:[%s16363_s3 + $0x6f8] sm:$0xff]  ;;  %v7028_v61 = vunpack.c.l.bf16 %v6357_v13 }
 0x53a   :  { %8484 = vmatprep.subr.mxu1 %v6937_v0  ;;  %8414 = vmatpush2.msra.mxu0 %v6808_v19  ;;  %v7029_v19 = vunpack.c.h.bf16 %v6357_v13  ;;  %v6355_v0 = vld [vmem:[%s16363_s3 + $0x4e8] sm:$0xff]  ;;  %v7156_v1 = vunpack.c.l.bf16 %v6421_v15 }
 0x53b   :  { %8485 = vmatpush2.msra.mxu1 %v6936_v32  ;;  %8415 = vmatprep.subr.mxu0 %v6805_v5  ;;  %v7157_v32 = vunpack.c.h.bf16 %v6421_v15  ;;  %v6419_v5 = vld [vmem:[%s16363_s3 + $0x6e8] sm:$0xff]  ;;  %v7025_v59 = vunpack.c.h.bf16 %v6355_v0 }
 0x53c   :  { %8486 = vmatprep.subr.mxu1 %v6933_v35  ;;  %8416 = vmatpush2.msra.mxu0 %v6804_v30  ;;  %v6353_v30 = vld [vmem:[%s16363_s3 + $0x4d8] sm:$0xff]  ;;  %v7153_v22 = vunpack.c.h.bf16 %v6419_v5 }
 0x53d   :  { %8487 = vmatpush2.msra.mxu1 %v6932_v39  ;;  %8417 = vmatprep.subr.mxu0 %v6801_v3  ;;  %v16642_v35 = vld [vmem:[#allocation12_spill] sm:$0xff]  ;;  %v7024_v3 = vunpack.c.l.bf16 %v6355_v0  ;;  %v7021_v9 = vunpack.c.h.bf16 %v6353_v30 }
 0x53e   :  { %8488 = vmatprep.subr.mxu1 %v6929_v62  ;;  %8418 = vmatpush2.msra.mxu0 %v6800_v11  ;;  %v6417_v39 = vld [vmem:[%s16363_s3 + $0x6d8] sm:$0xff]  ;;  %v6351_v11 = vld [vmem:[%s16363_s3 + $0x4c8] sm:$0xff]  ;;  %v7152_v62 = vunpack.c.l.bf16 %v6419_v5 }
 0x53f   :  { %8489 = vmatpush2.msra.mxu1 %v6928_v49  ;;  %8419 = vmatprep.subr.mxu0 %v6797_v37  ;;  %v6415_v49 = vld [vmem:[%s16363_s3 + $0x6c8] sm:$0xff]  ;;  %v7020_v37 = vunpack.c.l.bf16 %v6353_v30 }
 0x540   :  { %8490 = vmatprep.subr.mxu1 %v6925_v60  ;;  %8420 = vmatpush2.msra.mxu0 %v6796_v14  ;;  %v7148_v14 = vunpack.c.l.bf16 %v6417_v39  ;;  %v7017_v60 = vunpack.c.h.bf16 %v6351_v11  ;;  %v7144_v63 = vunpack.c.l.bf16 %v6415_v49  ;;  %v6335_v30 = vld [vmem:[%s16363_s3 + $0x448] sm:$0xff] }
 0x541   :  { %8491 = vmatpush2.msra.mxu1 %v6924_v47  ;;  %8421 = vmatprep.subr.mxu0 %v6793_v54  ;;  %v7016_v47 = vunpack.c.l.bf16 %v6351_v11  ;;  %v6347_v54 = vld [vmem:[%s16363_s3 + $0x4a8] sm:$0xff]  ;;  %v6333_v11 = vld [vmem:[%s16363_s3 + $0x438] sm:$0xff] }
 0x542   :  { %8492 = vmatprep.subr.mxu1 %v6921_v12  ;;  %8422 = vmatpush2.msra.mxu0 %v6792_v8  ;;  %v7013_v8 = vunpack.c.h.bf16 %v6349_v50  ;;  %v7012_v12 = vunpack.c.l.bf16 %v6349_v50  ;;  %v7009_v43 = vunpack.c.h.bf16 %v6347_v54  ;;  %v6331_v50 = vld [vmem:[%s16363_s3 + $0x428] sm:$0xff] }
 0x543   :  { %8493 = vmatpush2.msra.mxu1 %v6920_v41  ;;  %8423 = vmatprep.subr.mxu0 %v6789_v6  ;;  %v6345_v41 = vld [vmem:[%s16363_s3 + $0x498] sm:$0xff]  ;;  %v7140_v6 = vunpack.c.l.bf16 %v6413_v17  ;;  %v6395_v17 = vld [vmem:[%s16363_s3 + $0x628] sm:$0xff] }
 0x544   :  { %8494 = vmatprep.subr.mxu1 %v6917_v38  ;;  %8424 = vmatpush2.msra.mxu0 %v6788_v26  ;;  %v6409_v26 = vld [vmem:[%s16363_s3 + $0x698] sm:$0xff]  ;;  %v7008_v38 = vunpack.c.l.bf16 %v6347_v54  ;;  %v7005_v53 = vunpack.c.h.bf16 %v6345_v41 }
 0x545   :  { %8495 = vmatpush2.msra.mxu1 %v6916_v44  ;;  %8425 = vmatprep.subr.mxu0 %v6785_v29  ;;  %v6343_v44 = vld [vmem:[%s16363_s3 + $0x488] sm:$0xff]  ;;  %v7133_v2 = vunpack.c.h.bf16 %v6409_v26  ;;  %v6329_v54 = vld [vmem:[%s16363_s3 + $0x418] sm:$0xff] }
 0x546   :  { %8496 = vmatprep.subr.mxu1 %v6913_v28  ;;  %8426 = vmatpush2.msra.mxu0 %v6784_v55  ;;  %v6407_v55 = vld [vmem:[%s16363_s3 + $0x688] sm:$0xff]  ;;  %v7004_v28 = vunpack.c.l.bf16 %v6345_v41  ;;  %v7001_v31 = vunpack.c.h.bf16 %v6343_v44 }
 0x547   :  { %8497 = vmatpush2.msra.mxu1 %v6912_v46  ;;  %8427 = vmatprep.subr.mxu0 %v6781_v45  ;;  %v6341_v46 = vld [vmem:[%s16363_s3 + $0x478] sm:$0xff]  ;;  %v7132_v45 = vunpack.c.l.bf16 %v6409_v26  ;;  %v7128_v13 = vunpack.c.l.bf16 %v6407_v55  ;;  %v6327_v41 = vld [vmem:[%s16363_s3 + $0x408] sm:$0xff] }
 0x548   :  { %8498 = vmatprep.subr.mxu1 %v6909_v33  ;;  %8428 = vmatpush2.msra.mxu0 %v6780_v34  ;;  %v6405_v34 = vld [vmem:[%s16363_s3 + $0x678] sm:$0xff]  ;;  %v7000_v33 = vunpack.c.l.bf16 %v6343_v44  ;;  %v6996_v15 = vunpack.c.l.bf16 %v6341_v46  ;;  %v6391_v26 = vld [vmem:[%s16363_s3 + $0x608] sm:$0xff] }
 0x549   :  { %8499 = vmatpush2.msra.mxu1 %v6908_v18  ;;  %8429 = vmatprep.subr.mxu0 %v6777_v10  ;;  %v7129_v18 = vunpack.c.h.bf16 %v6407_v55  ;;  %v6339_v10 = vld [vmem:[%s16363_s3 + $0x468] sm:$0xff]  ;;  %v7124_v0 = vunpack.c.l.bf16 %v6405_v34  ;;  %v6389_v44 = vld [vmem:[%s16363_s3 + $0x5f8] sm:$0xff] }
 0x54a   :  { %8500 = vmatprep.subr.mxu1 %v6905_v27  ;;  %8430 = vmatpush2.msra.mxu0 %v6776_v52  ;;  %v6997_v52 = vunpack.c.h.bf16 %v6341_v46  ;;  %v6403_v27 = vld [vmem:[%s16363_s3 + $0x668] sm:$0xff]  ;;  %v6992_v5 = vunpack.c.l.bf16 %v6339_v10  ;;  %v6453_v55 = vld [vmem:[%s16363_s3 + $0x7f8] sm:$0xff] }
 0x54b   :  { %8501 = vmatpush2.msra.mxu1 %v6904_v16  ;;  %8432 = vmatmul.mubr.f32.vlgmr.msra.gmra.mxu0 %v16642_v35  ;;  %v7125_v16 = vunpack.c.h.bf16 %v6405_v34  ;;  %v7120_v35 = vunpack.c.l.bf16 %v6403_v27  ;;  %v6387_v46 = vld [vmem:[%s16363_s3 + $0x5e8] sm:$0xff] }
 0x54c   :  { %8503 = vmatmul.mubr.f32.vlgmr.msra.gmra.mxu1 %v11585_v48  ;;  %8509 = vmatprep.subr.mxu0 %v7029_v19  ;;  %v7149_v48 = vunpack.c.h.bf16 %v6417_v39  ;;  %v6337_v19 = vld [vmem:[%s16363_s3 + $0x458] sm:$0xff]  ;;  %v6399_v39 = vld [vmem:[%s16363_s3 + $0x648] sm:$0xff] }
 0x54d   :  { %8580 = vmatprep.subr.mxu1 %v7157_v32  ;;  %8510 = vmatpush1.msra.mxu0 %v7028_v61  ;;  %v6993_v61 = vunpack.c.h.bf16 %v6339_v10  ;;  %v6401_v32 = vld [vmem:[%s16363_s3 + $0x658] sm:$0xff]  ;;  %v6451_v34 = vld [vmem:[%s16363_s3 + $0x7e8] sm:$0xff] }
 0x54e   :  { %8573 = vmatprep.mubr.f32.mxu0 %v12427_v36  ;;  %8581 = vmatpush1.msra.mxu1 %v7156_v1  ;;  %v7145_v36 = vunpack.c.h.bf16 %v6415_v49  ;;  %v7121_v1 = vunpack.c.h.bf16 %v6403_v27  ;;  %v6397_v49 = vld [vmem:[%s16363_s3 + $0x638] sm:$0xff] }
 0x54f   :  { %8644 = vmatprep.mubr.f32.mxu1 %v12433_v51  ;;  %8511 = vmatprep.subr.mxu0 %v7025_v59  ;;  %v6411_v51 = vld [vmem:[%s16363_s3 + $0x6a8] sm:$0xff]  ;;  %v6989_v59 = vunpack.c.h.bf16 %v6337_v19  ;;  %v6385_v10 = vld [vmem:[%s16363_s3 + $0x5d8] sm:$0xff] }
 0x550   :  { %8582 = vmatprep.subr.mxu1 %v7153_v22  ;;  %8512 = vmatpush1.msra.mxu0 %v7024_v3  ;;  %v7137_v56 = vunpack.c.h.bf16 %v6411_v51  ;;  %v7136_v29 = vunpack.c.l.bf16 %v6411_v51  ;;  %v6988_v3 = vunpack.c.l.bf16 %v6337_v19  ;;  %v7117_v22 = vunpack.c.h.bf16 %v6401_v32  ;;  %v6393_v51 = vld [vmem:[%s16363_s3 + $0x618] sm:$0xff]  ;;  %v6383_v19 = vld [vmem:[%s16363_s3 + $0x5c8] sm:$0xff] }
 0x551   :  { %8583 = vmatpush1.msra.mxu1 %v7152_v62  ;;  %8513 = vmatprep.subr.mxu0 %v7021_v9  ;;  %v7116_v62 = vunpack.c.l.bf16 %v6401_v32  ;;  %v6985_v9 = vunpack.c.h.bf16 %v6335_v30  ;;  %v6449_v27 = vld [vmem:[%s16363_s3 + $0x7d8] sm:$0xff]  ;;  %v6447_v32 = vld [vmem:[%s16363_s3 + $0x7c8] sm:$0xff] }
 0x552   :  { %8584 = vmatprep.subr.mxu1 %v7149_v48  ;;  %8514 = vmatpush1.msra.mxu0 %v7020_v37  ;;  %v6984_v37 = vunpack.c.l.bf16 %v6335_v30  ;;  %v7113_v48 = vunpack.c.h.bf16 %v6399_v39  ;;  %v6381_v30 = vld [vmem:[%s16363_s3 + $0x5b8] sm:$0xff] }
 0x553   :  { %8585 = vmatpush1.msra.mxu1 %v7148_v14  ;;  %8515 = vmatprep.subr.mxu0 %v7017_v60  ;;  %v7112_v14 = vunpack.c.l.bf16 %v6399_v39  ;;  %v6981_v60 = vunpack.c.h.bf16 %v6333_v11  ;;  %v6445_v39 = vld [vmem:[%s16363_s3 + $0x7b8] sm:$0xff] }
 0x554   :  { %8586 = vmatprep.subr.mxu1 %v7145_v36  ;;  %8516 = vmatpush1.msra.mxu0 %v7016_v47  ;;  %v6980_v47 = vunpack.c.l.bf16 %v6333_v11  ;;  %v7109_v36 = vunpack.c.h.bf16 %v6397_v49  ;;  %v6379_v11 = vld [vmem:[%s16363_s3 + $0x5a8] sm:$0xff] }
 0x555   :  { %8587 = vmatpush1.msra.mxu1 %v7144_v63  ;;  %8517 = vmatprep.subr.mxu0 %v7013_v8  ;;  %v7108_v63 = vunpack.c.l.bf16 %v6397_v49  ;;  %v6977_v8 = vunpack.c.h.bf16 %v6331_v50  ;;  %v6443_v49 = vld [vmem:[%s16363_s3 + $0x7a8] sm:$0xff] }
 0x556   :  { %8588 = vmatprep.subr.mxu1 %v7141_v25  ;;  %8518 = vmatpush1.msra.mxu0 %v7012_v12  ;;  %v6976_v12 = vunpack.c.l.bf16 %v6331_v50  ;;  %v7105_v25 = vunpack.c.h.bf16 %v6395_v17  ;;  %v6377_v50 = vld [vmem:[%s16363_s3 + $0x598] sm:$0xff] }
 0x557   :  { %8589 = vmatpush1.msra.mxu1 %v7140_v6  ;;  %8519 = vmatprep.subr.mxu0 %v7009_v43  ;;  %v7104_v6 = vunpack.c.l.bf16 %v6395_v17  ;;  %v6973_v43 = vunpack.c.h.bf16 %v6329_v54  ;;  %v6441_v17 = vld [vmem:[%s16363_s3 + $0x798] sm:$0xff] }
 0x558   :  { %8590 = vmatprep.subr.mxu1 %v7137_v56  ;;  %8520 = vmatpush1.msra.mxu0 %v7008_v38  ;;  %v6972_v38 = vunpack.c.l.bf16 %v6329_v54  ;;  %v7101_v56 = vunpack.c.h.bf16 %v6393_v51  ;;  %v6375_v54 = vld [vmem:[%s16363_s3 + $0x588] sm:$0xff] }
 0x559   :  { %8591 = vmatpush1.msra.mxu1 %v7136_v29  ;;  %8521 = vmatprep.subr.mxu0 %v7005_v53  ;;  %v7100_v29 = vunpack.c.l.bf16 %v6393_v51  ;;  %v6969_v53 = vunpack.c.h.bf16 %v6327_v41  ;;  %v6439_v51 = vld [vmem:[%s16363_s3 + $0x788] sm:$0xff] }
 0x55a   :  { %8592 = vmatprep.subr.mxu1 %v7133_v2  ;;  %8522 = vmatpush1.msra.mxu0 %v7004_v28  ;;  %v6968_v28 = vunpack.c.l.bf16 %v6327_v41  ;;  %v7097_v2 = vunpack.c.h.bf16 %v6391_v26  ;;  %v6373_v41 = vld [vmem:[%s16363_s3 + $0x578] sm:$0xff] }
 0x55b   :  { %8593 = vmatpush1.msra.mxu1 %v7132_v45  ;;  %8523 = vmatprep.subr.mxu0 %v7001_v31  ;;  %v7096_v45 = vunpack.c.l.bf16 %v6391_v26  ;;  %v7093_v31 = vunpack.c.h.bf16 %v6389_v44  ;;  %v6437_v26 = vld [vmem:[%s16363_s3 + $0x778] sm:$0xff] }
 0x55c   :  { %8594 = vmatprep.subr.mxu1 %v7129_v18  ;;  %8524 = vmatpush1.msra.mxu0 %v7000_v33  ;;  %v7092_v33 = vunpack.c.l.bf16 %v6389_v44  ;;  %v7221_v18 = vunpack.c.h.bf16 %v6453_v55  ;;  %v6371_v44 = vld [vmem:[%s16363_s3 + $0x568] sm:$0xff] }
 0x55d   :  { %8595 = vmatpush1.msra.mxu1 %v7128_v13  ;;  %8525 = vmatprep.subr.mxu0 %v6997_v52  ;;  %v7220_v13 = vunpack.c.l.bf16 %v6453_v55  ;;  %v7089_v52 = vunpack.c.h.bf16 %v6387_v46  ;;  %v6435_v55 = vld [vmem:[%s16363_s3 + $0x768] sm:$0xff] }
 0x55e   :  { %8596 = vmatprep.subr.mxu1 %v7125_v16  ;;  %8526 = vmatpush1.msra.mxu0 %v6996_v15  ;;  %v7088_v15 = vunpack.c.l.bf16 %v6387_v46  ;;  %v7217_v16 = vunpack.c.h.bf16 %v6451_v34  ;;  %v6369_v46 = vld [vmem:[%s16363_s3 + $0x558] sm:$0xff] }
 0x55f   :  { %8597 = vmatpush1.msra.mxu1 %v7124_v0  ;;  %8527 = vmatprep.subr.mxu0 %v6993_v61  ;;  %v7216_v0 = vunpack.c.l.bf16 %v6451_v34  ;;  %v7085_v61 = vunpack.c.h.bf16 %v6385_v10  ;;  %v6433_v34 = vld [vmem:[%s16363_s3 + $0x758] sm:$0xff] }
 0x560   :  { %8598 = vmatprep.subr.mxu1 %v7121_v1  ;;  %8528 = vmatpush1.msra.mxu0 %v6992_v5  ;;  %v7084_v5 = vunpack.c.l.bf16 %v6385_v10  ;;  %v7213_v1 = vunpack.c.h.bf16 %v6449_v27  ;;  %v6367_v10 = vld [vmem:[%s16363_s3 + $0x548] sm:$0xff] }
 0x561   :  { %8599 = vmatpush1.msra.mxu1 %v7120_v35  ;;  %8529 = vmatprep.subr.mxu0 %v6989_v59  ;;  %v7212_v35 = vunpack.c.l.bf16 %v6449_v27  ;;  %v7081_v59 = vunpack.c.h.bf16 %v6383_v19  ;;  %v6431_v27 = vld [vmem:[%s16363_s3 + $0x748] sm:$0xff] }
 0x562   :  { %8600 = vmatprep.subr.mxu1 %v7117_v22  ;;  %8530 = vmatpush1.msra.mxu0 %v6988_v3  ;;  %v7080_v3 = vunpack.c.l.bf16 %v6383_v19  ;;  %v7209_v22 = vunpack.c.h.bf16 %v6447_v32  ;;  %v6365_v19 = vld [vmem:[%s16363_s3 + $0x538] sm:$0xff] }
 0x563   :  { %8601 = vmatpush1.msra.mxu1 %v7116_v62  ;;  %8531 = vmatprep.subr.mxu0 %v6985_v9  ;;  %v7208_v62 = vunpack.c.l.bf16 %v6447_v32  ;;  %v7077_v9 = vunpack.c.h.bf16 %v6381_v30  ;;  %v6429_v32 = vld [vmem:[%s16363_s3 + $0x738] sm:$0xff] }
 0x564   :  { %8602 = vmatprep.subr.mxu1 %v7113_v48  ;;  %8532 = vmatpush1.msra.mxu0 %v6984_v37  ;;  %v7076_v37 = vunpack.c.l.bf16 %v6381_v30  ;;  %v7205_v48 = vunpack.c.h.bf16 %v6445_v39  ;;  %v6363_v30 = vld [vmem:[%s16363_s3 + $0x528] sm:$0xff] }
 0x565   :  { %8603 = vmatpush1.msra.mxu1 %v7112_v14  ;;  %8533 = vmatprep.subr.mxu0 %v6981_v60  ;;  %v7204_v14 = vunpack.c.l.bf16 %v6445_v39  ;;  %v7073_v60 = vunpack.c.h.bf16 %v6379_v11  ;;  %v6427_v39 = vld [vmem:[%s16363_s3 + $0x728] sm:$0xff] }
 0x566   :  { %8604 = vmatprep.subr.mxu1 %v7109_v36  ;;  %8534 = vmatpush1.msra.mxu0 %v6980_v47  ;;  %v7072_v47 = vunpack.c.l.bf16 %v6379_v11  ;;  %v7201_v36 = vunpack.c.h.bf16 %v6443_v49  ;;  %v6361_v11 = vld [vmem:[%s16363_s3 + $0x518] sm:$0xff] }
 0x567   :  { %8605 = vmatpush1.msra.mxu1 %v7108_v63  ;;  %8535 = vmatprep.subr.mxu0 %v6977_v8  ;;  %v7200_v63 = vunpack.c.l.bf16 %v6443_v49  ;;  %v7069_v8 = vunpack.c.h.bf16 %v6377_v50  ;;  %v6425_v49 = vld [vmem:[%s16363_s3 + $0x718] sm:$0xff] }
 0x568   :  { %8606 = vmatprep.subr.mxu1 %v7105_v25  ;;  %8536 = vmatpush1.msra.mxu0 %v6976_v12  ;;  %v7068_v12 = vunpack.c.l.bf16 %v6377_v50  ;;  %v7197_v25 = vunpack.c.h.bf16 %v6441_v17  ;;  %v6359_v50 = vld [vmem:[%s16363_s3 + $0x508] sm:$0xff] }
 0x569   :  { %8607 = vmatpush1.msra.mxu1 %v7104_v6  ;;  %8537 = vmatprep.subr.mxu0 %v6973_v43  ;;  %v7196_v6 = vunpack.c.l.bf16 %v6441_v17  ;;  %v7065_v43 = vunpack.c.h.bf16 %v6375_v54  ;;  %v6423_v17 = vld [vmem:[%s16363_s3 + $0x708] sm:$0xff] }
 0x56a   :  { %8608 = vmatprep.subr.mxu1 %v7101_v56  ;;  %8538 = vmatpush1.msra.mxu0 %v6972_v38  ;;  %v7064_v38 = vunpack.c.l.bf16 %v6375_v54  ;;  %v7193_v56 = vunpack.c.h.bf16 %v6439_v51  ;;  %v7164_v54 = vunpack.c.l.bf16 %v6425_v49 }
 0x56b   :  { %8609 = vmatpush1.msra.mxu1 %v7100_v29  ;;  %8539 = vmatprep.subr.mxu0 %v6969_v53  ;;  %v7192_v29 = vunpack.c.l.bf16 %v6439_v51  ;;  %v7061_v53 = vunpack.c.h.bf16 %v6373_v41  ;;  %v7032_v51 = vunpack.c.l.bf16 %v6359_v50 }
 0x56c   :  { %8610 = vmatprep.subr.mxu1 %v7097_v2  ;;  %8540 = vmatpush1.msra.mxu0 %v6968_v28  ;;  %v7060_v28 = vunpack.c.l.bf16 %v6373_v41  ;;  %v7189_v2 = vunpack.c.h.bf16 %v6437_v26  ;;  %v7160_v41 = vunpack.c.l.bf16 %v6423_v17 }
 0x56d   :  { %8611 = vmatpush1.msra.mxu1 %v7096_v45  ;;  %8541 = vmatprep.subr.mxu0 %v7093_v31  ;;  %v7188_v45 = vunpack.c.l.bf16 %v6437_v26  ;;  %v7057_v31 = vunpack.c.h.bf16 %v6371_v44 }
 0x56e   :  { %8612 = vmatprep.subr.mxu1 %v7221_v18  ;;  %8542 = vmatpush2.msra.mxu0 %v7092_v33  ;;  %v7056_v33 = vunpack.c.l.bf16 %v6371_v44  ;;  %v7185_v18 = vunpack.c.h.bf16 %v6435_v55 }
 0x56f   :  { %8613 = vmatpush2.msra.mxu1 %v7220_v13  ;;  %8543 = vmatprep.subr.mxu0 %v7089_v52  ;;  %v7184_v13 = vunpack.c.l.bf16 %v6435_v55  ;;  %v7053_v52 = vunpack.c.h.bf16 %v6369_v46  ;;  %v6545_v55 = vld [vmem:[%s16363_s3 + $0xad8] sm:$0xff] }
 0x570   :  { %8614 = vmatprep.subr.mxu1 %v7217_v16  ;;  %8544 = vmatpush2.msra.mxu0 %v7088_v15  ;;  %v7052_v15 = vunpack.c.l.bf16 %v6369_v46  ;;  %v7181_v16 = vunpack.c.h.bf16 %v6433_v34  ;;  %v6479_v46 = vld [vmem:[%s16363_s3 + $0x8c8] sm:$0xff] }
 0x571   :  { %8615 = vmatpush2.msra.mxu1 %v7216_v0  ;;  %8545 = vmatprep.subr.mxu0 %v7085_v61  ;;  %v7180_v0 = vunpack.c.l.bf16 %v6433_v34  ;;  %v7049_v61 = vunpack.c.h.bf16 %v6367_v10 }
 0x572   :  { %8616 = vmatprep.subr.mxu1 %v7213_v1  ;;  %8546 = vmatpush2.msra.mxu0 %v7084_v5  ;;  %v7048_v5 = vunpack.c.l.bf16 %v6367_v10  ;;  %v7177_v1 = vunpack.c.h.bf16 %v6431_v27  ;;  %v7273_v10 = vunpack.c.h.bf16 %v6479_v46 }
 0x573   :  { %8617 = vmatpush2.msra.mxu1 %v7212_v35  ;;  %8547 = vmatprep.subr.mxu0 %v7081_v59  ;;  %v7176_v35 = vunpack.c.l.bf16 %v6431_v27  ;;  %v7045_v59 = vunpack.c.h.bf16 %v6365_v19  ;;  %v6475_v27 = vld [vmem:[%s16363_s3 + $0x8a8] sm:$0xff] }
 0x574   :  { %8618 = vmatprep.subr.mxu1 %v7209_v22  ;;  %8548 = vmatpush2.msra.mxu0 %v7080_v3  ;;  %v7044_v3 = vunpack.c.l.bf16 %v6365_v19  ;;  %v7173_v22 = vunpack.c.h.bf16 %v6429_v32 }
 0x575   :  { %8619 = vmatpush2.msra.mxu1 %v7208_v62  ;;  %8549 = vmatprep.subr.mxu0 %v7077_v9  ;;  %v7172_v62 = vunpack.c.l.bf16 %v6429_v32  ;;  %v7041_v9 = vunpack.c.h.bf16 %v6363_v30 }
 0x576   :  { %8620 = vmatprep.subr.mxu1 %v7205_v48  ;;  %8550 = vmatpush2.msra.mxu0 %v7076_v37  ;;  %v7040_v37 = vunpack.c.l.bf16 %v6363_v30  ;;  %v7169_v48 = vunpack.c.h.bf16 %v6427_v39  ;;  %v7264_v30 = vunpack.c.l.bf16 %v6475_v27 }
 0x577   :  { %8621 = vmatpush2.msra.mxu1 %v7204_v14  ;;  %8551 = vmatprep.subr.mxu0 %v7073_v60  ;;  %v7168_v14 = vunpack.c.l.bf16 %v6427_v39  ;;  %v7037_v60 = vunpack.c.h.bf16 %v6361_v11 }
 0x578   :  { %8622 = vmatprep.subr.mxu1 %v7201_v36  ;;  %8552 = vmatpush2.msra.mxu0 %v7072_v47  ;;  %v7036_v47 = vunpack.c.l.bf16 %v6361_v11  ;;  %v7165_v36 = vunpack.c.h.bf16 %v6425_v49 }
 0x579   :  { %8623 = vmatpush2.msra.mxu1 %v7200_v63  ;;  %8553 = vmatprep.subr.mxu0 %v7069_v8  ;;  %v7033_v63 = vunpack.c.h.bf16 %v6359_v50  ;;  %v6485_v8 = vld [vmem:[%s16363_s3 + $0x8f8] sm:$0xff] }
 0x57a   :  { %8624 = vmatprep.subr.mxu1 %v7197_v25  ;;  %8554 = vmatpush2.msra.mxu0 %v7068_v12  ;;  %v7161_v12 = vunpack.c.h.bf16 %v6423_v17  ;;  %v6549_v25 = vld [vmem:[%s16363_s3 + $0xaf8] sm:$0xff]  ;;  %v7284_v26 = vunpack.c.l.bf16 %v6485_v8 }
 0x57b   :  { %8625 = vmatpush2.msra.mxu1 %v7196_v6  ;;  %8555 = vmatprep.subr.mxu0 %v7065_v43  ;;  %v7285_v6 = vunpack.c.h.bf16 %v6485_v8  ;;  %v6483_v43 = vld [vmem:[%s16363_s3 + $0x8e8] sm:$0xff]  ;;  %v7412_v44 = vunpack.c.l.bf16 %v6549_v25  ;;  %v6465_v8 = vld [vmem:[%s16363_s3 + $0x858] sm:$0xff] }
 0x57c   :  { %8626 = vmatprep.subr.mxu1 %v7193_v56  ;;  %8556 = vmatpush2.msra.mxu0 %v7064_v38  ;;  %v7413_v38 = vunpack.c.h.bf16 %v6549_v25  ;;  %v6547_v56 = vld [vmem:[%s16363_s3 + $0xae8] sm:$0xff]  ;;  %v6529_v25 = vld [vmem:[%s16363_s3 + $0xa58] sm:$0xff] }
 0x57d   :  { %8627 = vmatpush2.msra.mxu1 %v7192_v29  ;;  %8557 = vmatprep.subr.mxu0 %v7061_v53  ;;  %v6481_v29 = vld [vmem:[%s16363_s3 + $0x8d8] sm:$0xff]  ;;  %v7281_v53 = vunpack.c.h.bf16 %v6483_v43 }
 0x57e   :  { %8628 = vmatprep.subr.mxu1 %v7189_v2  ;;  %8558 = vmatpush2.msra.mxu0 %v7060_v28  ;;  %v7280_v28 = vunpack.c.l.bf16 %v6483_v43  ;;  %v7409_v2 = vunpack.c.h.bf16 %v6547_v56  ;;  %v7276_v34 = vunpack.c.l.bf16 %v6481_v29  ;;  %v6463_v43 = vld [vmem:[%s16363_s3 + $0x848] sm:$0xff] }
 0x57f   :  { %8629 = vmatpush2.msra.mxu1 %v7188_v45  ;;  %8559 = vmatprep.subr.mxu0 %v7057_v31  ;;  %v7408_v45 = vunpack.c.l.bf16 %v6547_v56  ;;  %v7277_v31 = vunpack.c.h.bf16 %v6481_v29  ;;  %v6527_v56 = vld [vmem:[%s16363_s3 + $0xa48] sm:$0xff]  ;;  %v7373_v29 = vunpack.c.h.bf16 %v6529_v25 }
 0x580   :  { %8630 = vmatprep.subr.mxu1 %v7185_v18  ;;  %8560 = vmatpush2.msra.mxu0 %v7056_v33  ;;  %v6477_v33 = vld [vmem:[%s16363_s3 + $0x8b8] sm:$0xff]  ;;  %v7404_v18 = vunpack.c.l.bf16 %v6545_v55 }
 0x581   :  { %8631 = vmatpush2.msra.mxu1 %v7184_v13  ;;  %8561 = vmatprep.subr.mxu0 %v7053_v52  ;;  %v6541_v13 = vld [vmem:[%s16363_s3 + $0xab8] sm:$0xff]  ;;  %v7272_v52 = vunpack.c.l.bf16 %v6479_v46  ;;  %v7268_v19 = vunpack.c.l.bf16 %v6477_v33  ;;  %v7240_v46 = vunpack.c.l.bf16 %v6463_v43 }
 0x582   :  { %8632 = vmatprep.subr.mxu1 %v7181_v16  ;;  %8562 = vmatpush2.msra.mxu0 %v7052_v15  ;;  %v7269_v16 = vunpack.c.h.bf16 %v6477_v33  ;;  %v7396_v32 = vunpack.c.l.bf16 %v6541_v13 }
 0x583   :  { %8633 = vmatpush2.msra.mxu1 %v7180_v0  ;;  %8563 = vmatprep.subr.mxu0 %v7049_v61  ;;  %v7397_v0 = vunpack.c.h.bf16 %v6541_v13  ;;  %v6473_v61 = vld [vmem:[%s16363_s3 + $0x898] sm:$0xff] }
 0x584   :  { %8634 = vmatprep.subr.mxu1 %v7177_v1  ;;  %8564 = vmatpush2.msra.mxu0 %v7048_v5  ;;  %v7265_v5 = vunpack.c.h.bf16 %v6475_v27  ;;  %v6537_v1 = vld [vmem:[%s16363_s3 + $0xa98] sm:$0xff]  ;;  %v7260_v11 = vunpack.c.l.bf16 %v6473_v61 }
 0x585   :  { %8635 = vmatpush2.msra.mxu1 %v7176_v35  ;;  %8565 = vmatprep.subr.mxu0 %v7045_v59  ;;  %v6471_v59 = vld [vmem:[%s16363_s3 + $0x888] sm:$0xff]  ;;  %v7388_v49 = vunpack.c.l.bf16 %v6537_v1 }
 0x586   :  { %8636 = vmatprep.subr.mxu1 %v7173_v22  ;;  %8566 = vmatpush2.msra.mxu0 %v7044_v3  ;;  %v7261_v3 = vunpack.c.h.bf16 %v6473_v61  ;;  %v6535_v22 = vld [vmem:[%s16363_s3 + $0xa88] sm:$0xff]  ;;  %v7256_v50 = vunpack.c.l.bf16 %v6471_v59 }
 0x587   :  { %8637 = vmatpush2.msra.mxu1 %v7172_v62  ;;  %8567 = vmatprep.subr.mxu0 %v7041_v9  ;;  %v7389_v62 = vunpack.c.h.bf16 %v6537_v1  ;;  %v6469_v9 = vld [vmem:[%s16363_s3 + $0x878] sm:$0xff]  ;;  %v7384_v17 = vunpack.c.l.bf16 %v6535_v22 }
 0x588   :  { %8638 = vmatprep.subr.mxu1 %v7169_v48  ;;  %8568 = vmatpush2.msra.mxu0 %v7040_v37  ;;  %v7257_v37 = vunpack.c.h.bf16 %v6471_v59  ;;  %v6533_v48 = vld [vmem:[%s16363_s3 + $0xa78] sm:$0xff] }
 0x589   :  { %8639 = vmatpush2.msra.mxu1 %v7168_v14  ;;  %8569 = vmatprep.subr.mxu0 %v7037_v60  ;;  %v7385_v14 = vunpack.c.h.bf16 %v6535_v22  ;;  %v6467_v60 = vld [vmem:[%s16363_s3 + $0x868] sm:$0xff] }
 0x58a   :  { %8640 = vmatprep.subr.mxu1 %v7165_v36  ;;  %8570 = vmatpush2.msra.mxu0 %v7036_v47  ;;  %v7253_v47 = vunpack.c.h.bf16 %v6469_v9  ;;  %v6531_v36 = vld [vmem:[%s16363_s3 + $0xa68] sm:$0xff] }
 0x58b   :  { %8641 = vmatpush2.msra.mxu1 %v7164_v54  ;;  %8571 = vmatprep.subr.mxu0 %v7033_v63  ;;  %v7252_v54 = vunpack.c.l.bf16 %v6469_v9  ;;  %v7381_v63 = vunpack.c.h.bf16 %v6533_v48 }
 0x58c   :  { %8642 = vmatprep.subr.mxu1 %v7161_v12  ;;  %8572 = vmatpush2.msra.mxu0 %v7032_v51  ;;  %v7380_v51 = vunpack.c.l.bf16 %v6533_v48  ;;  %v7249_v12 = vunpack.c.h.bf16 %v6467_v60 }
 0x58d   :  { %8643 = vmatpush2.msra.mxu1 %v7160_v41  ;;  %8574 = vmatmul.mubr.f32.vlgmr.msra.gmra.mxu0 %v16613_v21  ;;  %v6543_v21 = vld [vmem:[%s16363_s3 + $0xac8] sm:$0xff]  ;;  %v7248_v41 = vunpack.c.l.bf16 %v6467_v60 }
 0x58e   :  { %8645 = vmatmul.mubr.f32.vlgmr.msra.gmra.mxu1 %v16614_v23  ;;  %8651 = vmatprep.subr.mxu0 %v7285_v6  ;;  %v7405_v23 = vunpack.c.h.bf16 %v6545_v55  ;;  %v7400_v15 = vunpack.c.l.bf16 %v6543_v21  ;;  %v7377_v6 = vunpack.c.h.bf16 %v6531_v36  ;;  %v7372_v55 = vunpack.c.l.bf16 %v6529_v25 }
 0x58f   :  { %8722 = vmatprep.subr.mxu1 %v7413_v38  ;;  %8652 = vmatpush1.msra.mxu0 %v7284_v26  ;;  %v7376_v26 = vunpack.c.l.bf16 %v6531_v36  ;;  %v7245_v38 = vunpack.c.h.bf16 %v6465_v8 }
 0x590   :  { %8715 = vmatprep.mubr.f32.mxu0 %v14403_v20  ;;  %8723 = vmatpush1.msra.mxu1 %v7412_v44  ;;  %v7401_v20 = vunpack.c.h.bf16 %v6543_v21  ;;  %v7244_v44 = vunpack.c.l.bf16 %v6465_v8  ;;  %v7368_v21 = vunpack.c.l.bf16 %v6527_v56 }
 0x591   :  { %8786 = vmatprep.mubr.f32.mxu1 %v14417_v7  ;;  %8653 = vmatprep.subr.mxu0 %v7281_v53  ;;  %v6539_v7 = vld [vmem:[%s16363_s3 + $0xaa8] sm:$0xff]  ;;  %v6461_v53 = vld [vmem:[%s16363_s3 + $0x838] sm:$0xff] }
 0x592   :  { %8724 = vmatprep.subr.mxu1 %v7409_v2  ;;  %8654 = vmatpush1.msra.mxu0 %v7280_v28  ;;  %v7393_v35 = vunpack.c.h.bf16 %v6539_v7  ;;  %v7392_v39 = vunpack.c.l.bf16 %v6539_v7  ;;  %v7241_v28 = vunpack.c.h.bf16 %v6463_v43  ;;  %v6525_v2 = vld [vmem:[%s16363_s3 + $0xa38] sm:$0xff]  ;;  %v7236_v33 = vunpack.c.l.bf16 %v6461_v53 }
 0x593   :  { %8725 = vmatpush1.msra.mxu1 %v7408_v45  ;;  %8655 = vmatprep.subr.mxu0 %v7277_v31  ;;  %v7369_v45 = vunpack.c.h.bf16 %v6527_v56  ;;  %v6459_v31 = vld [vmem:[%s16363_s3 + $0x828] sm:$0xff]  ;;  %v7364_v13 = vunpack.c.l.bf16 %v6525_v2 }
 0x594   :  { %8726 = vmatprep.subr.mxu1 %v7405_v23  ;;  %8656 = vmatpush1.msra.mxu0 %v7276_v34  ;;  %v7237_v34 = vunpack.c.h.bf16 %v6461_v53  ;;  %v6523_v23 = vld [vmem:[%s16363_s3 + $0xa28] sm:$0xff]  ;;  %v7232_v27 = vunpack.c.l.bf16 %v6459_v31 }
 0x595   :  { %8727 = vmatpush1.msra.mxu1 %v7404_v18  ;;  %8657 = vmatprep.subr.mxu0 %v7273_v10  ;;  %v7365_v18 = vunpack.c.h.bf16 %v6525_v2  ;;  %v6457_v10 = vld [vmem:[%s16363_s3 + $0x818] sm:$0xff]  ;;  %v7360_v7 = vunpack.c.l.bf16 %v6523_v23 }
 0x596   :  { %8728 = vmatprep.subr.mxu1 %v7401_v20  ;;  %8658 = vmatpush1.msra.mxu0 %v7272_v52  ;;  %v7233_v52 = vunpack.c.h.bf16 %v6459_v31  ;;  %v6521_v20 = vld [vmem:[%s16363_s3 + $0xa18] sm:$0xff]  ;;  %v7228_v61 = vunpack.c.l.bf16 %v6457_v10 }
 0x597   :  { %8729 = vmatpush1.msra.mxu1 %v7400_v15  ;;  %8659 = vmatprep.subr.mxu0 %v7269_v16  ;;  %v7361_v15 = vunpack.c.h.bf16 %v6523_v23  ;;  %v6455_v16 = vld [vmem:[%s16363_s3 + $0x808] sm:$0xff]  ;;  %v7356_v1 = vunpack.c.l.bf16 %v6521_v20 }
 0x598   :  { %8730 = vmatprep.subr.mxu1 %v7397_v0  ;;  %8660 = vmatpush1.msra.mxu0 %v7268_v19  ;;  %v7229_v19 = vunpack.c.h.bf16 %v6457_v10  ;;  %v6519_v0 = vld [vmem:[%s16363_s3 + $0xa08] sm:$0xff]  ;;  %v7224_v59 = vunpack.c.l.bf16 %v6455_v16 }
 0x599   :  { %8731 = vmatpush1.msra.mxu1 %v7396_v32  ;;  %8661 = vmatprep.subr.mxu0 %v7265_v5  ;;  %v7357_v32 = vunpack.c.h.bf16 %v6521_v20  ;;  %v6517_v5 = vld [vmem:[%s16363_s3 + $0x9f8] sm:$0xff]  ;;  %v7352_v22 = vunpack.c.l.bf16 %v6519_v0 }
 0x59a   :  { %8732 = vmatprep.subr.mxu1 %v7393_v35  ;;  %8662 = vmatpush1.msra.mxu0 %v7264_v30  ;;  %v7225_v30 = vunpack.c.h.bf16 %v6455_v16  ;;  %v6581_v35 = vld [vmem:[%s16363_s3 + $0xbf8] sm:$0xff]  ;;  %v7348_v9 = vunpack.c.l.bf16 %v6517_v5 }
 0x59b   :  { %8733 = vmatpush1.msra.mxu1 %v7392_v39  ;;  %8663 = vmatprep.subr.mxu0 %v7261_v3  ;;  %v7353_v39 = vunpack.c.h.bf16 %v6519_v0  ;;  %v6515_v3 = vld [vmem:[%s16363_s3 + $0x9e8] sm:$0xff]  ;;  %v7476_v48 = vunpack.c.l.bf16 %v6581_v35 }
 0x59c   :  { %8734 = vmatprep.subr.mxu1 %v7389_v62  ;;  %8664 = vmatpush1.msra.mxu0 %v7260_v11  ;;  %v7349_v11 = vunpack.c.h.bf16 %v6517_v5  ;;  %v6579_v62 = vld [vmem:[%s16363_s3 + $0xbe8] sm:$0xff]  ;;  %v7344_v60 = vunpack.c.l.bf16 %v6515_v3 }
 0x59d   :  { %8735 = vmatpush1.msra.mxu1 %v7388_v49  ;;  %8665 = vmatprep.subr.mxu0 %v7257_v37  ;;  %v7477_v49 = vunpack.c.h.bf16 %v6581_v35  ;;  %v6513_v37 = vld [vmem:[%s16363_s3 + $0x9d8] sm:$0xff]  ;;  %v7472_v36 = vunpack.c.l.bf16 %v6579_v62 }
 0x59e   :  { %8736 = vmatprep.subr.mxu1 %v7385_v14  ;;  %8666 = vmatpush1.msra.mxu0 %v7256_v50  ;;  %v7345_v50 = vunpack.c.h.bf16 %v6515_v3  ;;  %v6577_v14 = vld [vmem:[%s16363_s3 + $0xbd8] sm:$0xff]  ;;  %v7340_v8 = vunpack.c.l.bf16 %v6513_v37 }
 0x59f   :  { %8737 = vmatpush1.msra.mxu1 %v7384_v17  ;;  %8667 = vmatprep.subr.mxu0 %v7253_v47  ;;  %v7473_v17 = vunpack.c.h.bf16 %v6579_v62  ;;  %v6511_v47 = vld [vmem:[%s16363_s3 + $0x9c8] sm:$0xff]  ;;  %v7468_v25 = vunpack.c.l.bf16 %v6577_v14 }
 0x5a0   :  { %8738 = vmatprep.subr.mxu1 %v7381_v63  ;;  %8668 = vmatpush1.msra.mxu0 %v7252_v54  ;;  %v7341_v54 = vunpack.c.h.bf16 %v6513_v37  ;;  %v6575_v63 = vld [vmem:[%s16363_s3 + $0xbc8] sm:$0xff]  ;;  %v7336_v43 = vunpack.c.l.bf16 %v6511_v47 }
 0x5a1   :  { %8739 = vmatpush1.msra.mxu1 %v7380_v51  ;;  %8669 = vmatprep.subr.mxu0 %v7249_v12  ;;  %v7469_v51 = vunpack.c.h.bf16 %v6577_v14  ;;  %v6509_v12 = vld [vmem:[%s16363_s3 + $0x9b8] sm:$0xff]  ;;  %v7464_v56 = vunpack.c.l.bf16 %v6575_v63 }
 0x5a2   :  { %8740 = vmatprep.subr.mxu1 %v7377_v6  ;;  %8670 = vmatpush1.msra.mxu0 %v7248_v41  ;;  %v7337_v41 = vunpack.c.h.bf16 %v6511_v47  ;;  %v6573_v6 = vld [vmem:[%s16363_s3 + $0xbb8] sm:$0xff]  ;;  %v7332_v53 = vunpack.c.l.bf16 %v6509_v12 }
 0x5a3   :  { %8741 = vmatpush1.msra.mxu1 %v7376_v26  ;;  %8671 = vmatprep.subr.mxu0 %v7245_v38  ;;  %v7465_v26 = vunpack.c.h.bf16 %v6575_v63  ;;  %v6507_v38 = vld [vmem:[%s16363_s3 + $0x9a8] sm:$0xff]  ;;  %v7460_v2 = vunpack.c.l.bf16 %v6573_v6 }
 0x5a4   :  { %8742 = vmatprep.subr.mxu1 %v7373_v29  ;;  %8672 = vmatpush1.msra.mxu0 %v7244_v44  ;;  %v7333_v44 = vunpack.c.h.bf16 %v6509_v12  ;;  %v6571_v29 = vld [vmem:[%s16363_s3 + $0xba8] sm:$0xff]  ;;  %v7328_v31 = vunpack.c.l.bf16 %v6507_v38 }
 0x5a5   :  { %8743 = vmatpush1.msra.mxu1 %v7372_v55  ;;  %8673 = vmatprep.subr.mxu0 %v7241_v28  ;;  %v7461_v55 = vunpack.c.h.bf16 %v6573_v6  ;;  %v6505_v28 = vld [vmem:[%s16363_s3 + $0x998] sm:$0xff]  ;;  %v7456_v23 = vunpack.c.l.bf16 %v6571_v29 }
 0x5a6   :  { %8744 = vmatprep.subr.mxu1 %v7369_v45  ;;  %8674 = vmatpush1.msra.mxu0 %v7240_v46  ;;  %v7329_v46 = vunpack.c.h.bf16 %v6507_v38  ;;  %v6569_v45 = vld [vmem:[%s16363_s3 + $0xb98] sm:$0xff]  ;;  %v7324_v10 = vunpack.c.l.bf16 %v6505_v28 }
 0x5a7   :  { %8745 = vmatpush1.msra.mxu1 %v7368_v21  ;;  %8675 = vmatprep.subr.mxu0 %v7237_v34  ;;  %v7457_v21 = vunpack.c.h.bf16 %v6571_v29  ;;  %v6503_v34 = vld [vmem:[%s16363_s3 + $0x988] sm:$0xff]  ;;  %v7452_v20 = vunpack.c.l.bf16 %v6569_v45 }
 0x5a8   :  { %8746 = vmatprep.subr.mxu1 %v7365_v18  ;;  %8676 = vmatpush1.msra.mxu0 %v7236_v33  ;;  %v7325_v33 = vunpack.c.h.bf16 %v6505_v28  ;;  %v6567_v18 = vld [vmem:[%s16363_s3 + $0xb88] sm:$0xff]  ;;  %v7320_v16 = vunpack.c.l.bf16 %v6503_v34 }
 0x5a9   :  { %8747 = vmatpush1.msra.mxu1 %v7364_v13  ;;  %8677 = vmatprep.subr.mxu0 %v7233_v52  ;;  %v7453_v13 = vunpack.c.h.bf16 %v6569_v45  ;;  %v6501_v52 = vld [vmem:[%s16363_s3 + $0x978] sm:$0xff]  ;;  %v7448_v0 = vunpack.c.l.bf16 %v6567_v18 }
 0x5aa   :  { %8748 = vmatprep.subr.mxu1 %v7361_v15  ;;  %8678 = vmatpush1.msra.mxu0 %v7232_v27  ;;  %v7321_v27 = vunpack.c.h.bf16 %v6503_v34  ;;  %v6565_v15 = vld [vmem:[%s16363_s3 + $0xb78] sm:$0xff]  ;;  %v7316_v5 = vunpack.c.l.bf16 %v6501_v52 }
 0x5ab   :  { %8749 = vmatpush1.msra.mxu1 %v7360_v7  ;;  %8679 = vmatprep.subr.mxu0 %v7229_v19  ;;  %v7449_v7 = vunpack.c.h.bf16 %v6567_v18  ;;  %v6499_v19 = vld [vmem:[%s16363_s3 + $0x968] sm:$0xff]  ;;  %v7444_v35 = vunpack.c.l.bf16 %v6565_v15 }
 0x5ac   :  { %8750 = vmatprep.subr.mxu1 %v7357_v32  ;;  %8680 = vmatpush1.msra.mxu0 %v7228_v61  ;;  %v7317_v61 = vunpack.c.h.bf16 %v6501_v52  ;;  %v6563_v32 = vld [vmem:[%s16363_s3 + $0xb68] sm:$0xff]  ;;  %v7312_v3 = vunpack.c.l.bf16 %v6499_v19 }
 0x5ad   :  { %8751 = vmatpush1.msra.mxu1 %v7356_v1  ;;  %8681 = vmatprep.subr.mxu0 %v7225_v30  ;;  %v7445_v1 = vunpack.c.h.bf16 %v6565_v15  ;;  %v6497_v30 = vld [vmem:[%s16363_s3 + $0x958] sm:$0xff]  ;;  %v7440_v62 = vunpack.c.l.bf16 %v6563_v32 }
 0x5ae   :  { %8752 = vmatprep.subr.mxu1 %v7353_v39  ;;  %8682 = vmatpush1.msra.mxu0 %v7224_v59  ;;  %v7313_v59 = vunpack.c.h.bf16 %v6499_v19  ;;  %v6561_v39 = vld [vmem:[%s16363_s3 + $0xb58] sm:$0xff]  ;;  %v7308_v37 = vunpack.c.l.bf16 %v6497_v30 }
 0x5af   :  { %8753 = vmatpush1.msra.mxu1 %v7352_v22  ;;  %8683 = vmatprep.subr.mxu0 %v7349_v11  ;;  %v7441_v22 = vunpack.c.h.bf16 %v6563_v32  ;;  %v6495_v11 = vld [vmem:[%s16363_s3 + $0x948] sm:$0xff]  ;;  %v7436_v14 = vunpack.c.l.bf16 %v6561_v39  ;;  %v6609_v15 = vld [vmem:[%s16363_s3 + $0xcd8] sm:$0xff] }
 0x5b0   :  { %8754 = vmatprep.subr.mxu1 %v7477_v49  ;;  %8684 = vmatpush2.msra.mxu0 %v7348_v9  ;;  %v7309_v9 = vunpack.c.h.bf16 %v6497_v30  ;;  %v6559_v49 = vld [vmem:[%s16363_s3 + $0xb48] sm:$0xff]  ;;  %v7304_v47 = vunpack.c.l.bf16 %v6495_v11  ;;  %v6605_v30 = vld [vmem:[%s16363_s3 + $0xcb8] sm:$0xff] }
 0x5b1   :  { %8755 = vmatpush2.msra.mxu1 %v7476_v48  ;;  %8685 = vmatprep.subr.mxu0 %v7345_v50  ;;  %v7437_v48 = vunpack.c.h.bf16 %v6561_v39  ;;  %v6493_v50 = vld [vmem:[%s16363_s3 + $0x938] sm:$0xff]  ;;  %v7432_v63 = vunpack.c.l.bf16 %v6559_v49 }
 0x5b2   :  { %8756 = vmatprep.subr.mxu1 %v7473_v17  ;;  %8686 = vmatpush2.msra.mxu0 %v7344_v60  ;;  %v7305_v60 = vunpack.c.h.bf16 %v6495_v11  ;;  %v6557_v17 = vld [vmem:[%s16363_s3 + $0xb38] sm:$0xff]  ;;  %v7300_v12 = vunpack.c.l.bf16 %v6493_v50 }
 0x5b3   :  { %8757 = vmatpush2.msra.mxu1 %v7472_v36  ;;  %8687 = vmatprep.subr.mxu0 %v7341_v54  ;;  %v7433_v36 = vunpack.c.h.bf16 %v6559_v49  ;;  %v6491_v54 = vld [vmem:[%s16363_s3 + $0x928] sm:$0xff]  ;;  %v7428_v6 = vunpack.c.l.bf16 %v6557_v17  ;;  %v6669_v39 = vld [vmem:[%s16363_s3 + $0xeb8] sm:$0xff] }
 0x5b4   :  { %8758 = vmatprep.subr.mxu1 %v7469_v51  ;;  %8688 = vmatpush2.msra.mxu0 %v7340_v8  ;;  %v7301_v8 = vunpack.c.h.bf16 %v6493_v50  ;;  %v6555_v51 = vld [vmem:[%s16363_s3 + $0xb28] sm:$0xff]  ;;  %v7296_v38 = vunpack.c.l.bf16 %v6491_v54  ;;  %v7653_v49 = vunpack.c.h.bf16 %v6669_v39 }
 0x5b5   :  { %8759 = vmatpush2.msra.mxu1 %v7468_v25  ;;  %8689 = vmatprep.subr.mxu0 %v7337_v41  ;;  %v7429_v25 = vunpack.c.h.bf16 %v6557_v17  ;;  %v6489_v41 = vld [vmem:[%s16363_s3 + $0x918] sm:$0xff]  ;;  %v7424_v29 = vunpack.c.l.bf16 %v6555_v51 }
 0x5b6   :  { %8760 = vmatprep.subr.mxu1 %v7465_v26  ;;  %8690 = vmatpush2.msra.mxu0 %v7336_v43  ;;  %v7297_v43 = vunpack.c.h.bf16 %v6491_v54  ;;  %v6553_v26 = vld [vmem:[%s16363_s3 + $0xb18] sm:$0xff]  ;;  %v7292_v28 = vunpack.c.l.bf16 %v6489_v41 }
 0x5b7   :  { %8761 = vmatpush2.msra.mxu1 %v7464_v56  ;;  %8691 = vmatprep.subr.mxu0 %v7333_v44  ;;  %v7425_v56 = vunpack.c.h.bf16 %v6555_v51  ;;  %v6487_v44 = vld [vmem:[%s16363_s3 + $0x908] sm:$0xff] }
 0x5b8   :  { %8762 = vmatprep.subr.mxu1 %v7461_v55  ;;  %8692 = vmatpush2.msra.mxu0 %v7332_v53  ;;  %v7293_v53 = vunpack.c.h.bf16 %v6489_v41  ;;  %v6551_v55 = vld [vmem:[%s16363_s3 + $0xb08] sm:$0xff]  ;;  %v7289_v45 = vunpack.c.h.bf16 %v6487_v44 }
 0x5b9   :  { %8763 = vmatpush2.msra.mxu1 %v7460_v2  ;;  %8693 = vmatprep.subr.mxu0 %v7329_v46  ;;  %v7421_v2 = vunpack.c.h.bf16 %v6553_v26  ;;  %v7420_v46 = vunpack.c.l.bf16 %v6553_v26  ;;  %v7417_v34 = vunpack.c.h.bf16 %v6551_v55 }
 0x5ba   :  { %8764 = vmatprep.subr.mxu1 %v7457_v21  ;;  %8694 = vmatpush2.msra.mxu0 %v7328_v31  ;;  %v6613_v31 = vld [vmem:[%s16363_s3 + $0xcf8] sm:$0xff]  ;;  %v7288_v21 = vunpack.c.l.bf16 %v6487_v44 }
 0x5bb   :  { %8765 = vmatpush2.msra.mxu1 %v7456_v23  ;;  %8695 = vmatprep.subr.mxu0 %v7325_v33  ;;  %v6677_v23 = vld [vmem:[%s16363_s3 + $0xef8] sm:$0xff]  ;;  %v7416_v33 = vunpack.c.l.bf16 %v6551_v55  ;;  %v7541_v18 = vunpack.c.h.bf16 %v6613_v31 }
 0x5bc   :  { %8766 = vmatprep.subr.mxu1 %v7453_v13  ;;  %8696 = vmatpush2.msra.mxu0 %v7324_v10  ;;  %v6611_v10 = vld [vmem:[%s16363_s3 + $0xce8] sm:$0xff]  ;;  %v7540_v13 = vunpack.c.l.bf16 %v6613_v31  ;;  %v7669_v52 = vunpack.c.h.bf16 %v6677_v23 }
 0x5bd   :  { %8767 = vmatpush2.msra.mxu1 %v7452_v20  ;;  %8697 = vmatprep.subr.mxu0 %v7321_v27  ;;  %v6675_v20 = vld [vmem:[%s16363_s3 + $0xee8] sm:$0xff]  ;;  %v7668_v27 = vunpack.c.l.bf16 %v6677_v23  ;;  %v7536_v19 = vunpack.c.l.bf16 %v6611_v10 }
 0x5be   :  { %8768 = vmatprep.subr.mxu1 %v7449_v7  ;;  %8698 = vmatpush2.msra.mxu0 %v7320_v16  ;;  %v7537_v16 = vunpack.c.h.bf16 %v6611_v10  ;;  %v6673_v7 = vld [vmem:[%s16363_s3 + $0xed8] sm:$0xff]  ;;  %v7664_v32 = vunpack.c.l.bf16 %v6675_v20 }
 0x5bf   :  { %8769 = vmatpush2.msra.mxu1 %v7448_v0  ;;  %8699 = vmatprep.subr.mxu0 %v7317_v61  ;;  %v7665_v0 = vunpack.c.h.bf16 %v6675_v20  ;;  %v6607_v61 = vld [vmem:[%s16363_s3 + $0xcc8] sm:$0xff] }
 0x5c0   :  { %8770 = vmatprep.subr.mxu1 %v7445_v1  ;;  %8700 = vmatpush2.msra.mxu0 %v7316_v5  ;;  %v7533_v5 = vunpack.c.h.bf16 %v6609_v15  ;;  %v7532_v1 = vunpack.c.l.bf16 %v6609_v15  ;;  %v6653_v15 = vld [vmem:[%s16363_s3 + $0xe38] sm:$0xff] }
 0x5c1   :  { %8771 = vmatpush2.msra.mxu1 %v7444_v35  ;;  %8701 = vmatprep.subr.mxu0 %v7313_v59  ;;  %v7660_v35 = vunpack.c.l.bf16 %v6673_v7  ;;  %v7529_v59 = vunpack.c.h.bf16 %v6607_v61 }
 0x5c2   :  { %8772 = vmatprep.subr.mxu1 %v7441_v22  ;;  %8702 = vmatpush2.msra.mxu0 %v7312_v3  ;;  %v7528_v3 = vunpack.c.l.bf16 %v6607_v61  ;;  %v6603_v22 = vld [vmem:[%s16363_s3 + $0xca8] sm:$0xff] }
 0x5c3   :  { %8773 = vmatpush2.msra.mxu1 %v7440_v62  ;;  %8703 = vmatprep.subr.mxu0 %v7309_v9  ;;  %v7525_v62 = vunpack.c.h.bf16 %v6605_v30  ;;  %v7524_v9 = vunpack.c.l.bf16 %v6605_v30  ;;  %v7521_v50 = vunpack.c.h.bf16 %v6603_v22 }
 0x5c4   :  { %8774 = vmatprep.subr.mxu1 %v7437_v48  ;;  %8704 = vmatpush2.msra.mxu0 %v7308_v37  ;;  %v6601_v37 = vld [vmem:[%s16363_s3 + $0xc98] sm:$0xff]  ;;  %v7652_v48 = vunpack.c.l.bf16 %v6669_v39 }
 0x5c5   :  { %8775 = vmatpush2.msra.mxu1 %v7436_v14  ;;  %8705 = vmatprep.subr.mxu0 %v7305_v60  ;;  %v6665_v14 = vld [vmem:[%s16363_s3 + $0xe98] sm:$0xff]  ;;  %v7520_v60 = vunpack.c.l.bf16 %v6603_v22  ;;  %v7517_v54 = vunpack.c.h.bf16 %v6601_v37 }
 0x5c6   :  { %8776 = vmatprep.subr.mxu1 %v7433_v36  ;;  %8706 = vmatpush2.msra.mxu0 %v7304_v47  ;;  %v6599_v47 = vld [vmem:[%s16363_s3 + $0xc88] sm:$0xff]  ;;  %v7645_v51 = vunpack.c.h.bf16 %v6665_v14 }
 0x5c7   :  { %8777 = vmatpush2.msra.mxu1 %v7432_v63  ;;  %8707 = vmatprep.subr.mxu0 %v7301_v8  ;;  %v6663_v63 = vld [vmem:[%s16363_s3 + $0xe88] sm:$0xff]  ;;  %v7516_v8 = vunpack.c.l.bf16 %v6601_v37  ;;  %v7513_v41 = vunpack.c.h.bf16 %v6599_v47 }
 0x5c8   :  { %8778 = vmatprep.subr.mxu1 %v7429_v25  ;;  %8708 = vmatpush2.msra.mxu0 %v7300_v12  ;;  %v6597_v12 = vld [vmem:[%s16363_s3 + $0xc78] sm:$0xff]  ;;  %v7644_v25 = vunpack.c.l.bf16 %v6665_v14  ;;  %v7641_v26 = vunpack.c.h.bf16 %v6663_v63 }
 0x5c9   :  { %8779 = vmatpush2.msra.mxu1 %v7428_v6  ;;  %8709 = vmatprep.subr.mxu0 %v7297_v43  ;;  %v6661_v6 = vld [vmem:[%s16363_s3 + $0xe78] sm:$0xff]  ;;  %v7512_v43 = vunpack.c.l.bf16 %v6599_v47  ;;  %v7509_v44 = vunpack.c.h.bf16 %v6597_v12 }
 0x5ca   :  { %8780 = vmatprep.subr.mxu1 %v7425_v56  ;;  %8710 = vmatpush2.msra.mxu0 %v7296_v38  ;;  %v6595_v38 = vld [vmem:[%s16363_s3 + $0xc68] sm:$0xff]  ;;  %v7640_v56 = vunpack.c.l.bf16 %v6663_v63  ;;  %v7637_v55 = vunpack.c.h.bf16 %v6661_v6 }
 0x5cb   :  { %8781 = vmatpush2.msra.mxu1 %v7424_v29  ;;  %8711 = vmatprep.subr.mxu0 %v7293_v53  ;;  %v6659_v29 = vld [vmem:[%s16363_s3 + $0xe68] sm:$0xff]  ;;  %v7508_v53 = vunpack.c.l.bf16 %v6597_v12  ;;  %v7504_v31 = vunpack.c.l.bf16 %v6595_v38 }
 0x5cc   :  { %8782 = vmatprep.subr.mxu1 %v7421_v2  ;;  %8712 = vmatpush2.msra.mxu0 %v7292_v28  ;;  %v6593_v28 = vld [vmem:[%s16363_s3 + $0xc58] sm:$0xff]  ;;  %v7636_v2 = vunpack.c.l.bf16 %v6661_v6  ;;  %v7632_v23 = vunpack.c.l.bf16 %v6659_v29 }
 0x5cd   :  { %8783 = vmatpush2.msra.mxu1 %v7420_v46  ;;  %8713 = vmatprep.subr.mxu0 %v7289_v45  ;;  %v7505_v46 = vunpack.c.h.bf16 %v6595_v38  ;;  %v6657_v45 = vld [vmem:[%s16363_s3 + $0xe58] sm:$0xff]  ;;  %v7500_v10 = vunpack.c.l.bf16 %v6593_v28 }
 0x5ce   :  { %8784 = vmatprep.subr.mxu1 %v7417_v34  ;;  %8714 = vmatpush2.msra.mxu0 %v7288_v21  ;;  %v7633_v21 = vunpack.c.h.bf16 %v6659_v29  ;;  %v6591_v34 = vld [vmem:[%s16363_s3 + $0xc48] sm:$0xff]  ;;  %v7628_v20 = vunpack.c.l.bf16 %v6657_v45 }
 0x5cf   :  { %8785 = vmatpush2.msra.mxu1 %v7416_v33  ;;  %8716 = vmatmul.mubr.f32.vlgmr.msra.gmra.mxu0 %v15071_v40  ;;  %v6671_v40 = vld [vmem:[%s16363_s3 + $0xec8] sm:$0xff]  ;;  %v7501_v33 = vunpack.c.h.bf16 %v6593_v28 }
 0x5d0   :  { %8787 = vmatmul.mubr.f32.vlgmr.msra.gmra.mxu1 %v15076_v4  ;;  %8793 = vmatprep.subr.mxu0 %v7541_v18  ;;  %v7661_v4 = vunpack.c.h.bf16 %v6673_v7  ;;  %v7656_v11 = vunpack.c.l.bf16 %v6671_v40  ;;  %v6655_v18 = vld [vmem:[%s16363_s3 + $0xe48] sm:$0xff] }
 0x5d1   :  { %8864 = vmatprep.subr.mxu1 %v7669_v52  ;;  %8794 = vmatpush1.msra.mxu0 %v7540_v13  ;;  %v7629_v13 = vunpack.c.h.bf16 %v6657_v45  ;;  %v6589_v52 = vld [vmem:[%s16363_s3 + $0xc38] sm:$0xff]  ;;  %v7625_v7 = vunpack.c.h.bf16 %v6655_v18 }
 0x5d2   :  { %8857 = vmatprep.mubr.f32.mxu0 %v15463_v42  ;;  %8865 = vmatpush1.msra.mxu1 %v7668_v27  ;;  %v7657_v42 = vunpack.c.h.bf16 %v6671_v40  ;;  %v7497_v27 = vunpack.c.h.bf16 %v6591_v34  ;;  %v7493_v61 = vunpack.c.h.bf16 %v6589_v52  ;;  %v7621_v40 = vunpack.c.h.bf16 %v6653_v15 }
 0x5d3   :  { %8928 = vmatprep.mubr.f32.mxu1 %v15472_v57  ;;  %8795 = vmatprep.subr.mxu0 %v7537_v16  ;;  %v6667_v57 = vld [vmem:[%s16363_s3 + $0xea8] sm:$0xff]  ;;  %v7496_v16 = vunpack.c.l.bf16 %v6591_v34 }
 0x5d4   :  { %8866 = vmatprep.subr.mxu1 %v7665_v0  ;;  %8796 = vmatpush1.msra.mxu0 %v7536_v19  ;;  %v7649_v17 = vunpack.c.h.bf16 %v6667_v57  ;;  %v7648_v36 = vunpack.c.l.bf16 %v6667_v57  ;;  %v6587_v19 = vld [vmem:[%s16363_s3 + $0xc28] sm:$0xff]  ;;  %v7624_v0 = vunpack.c.l.bf16 %v6655_v18 }
 0x5d5   :  { %8867 = vmatpush1.msra.mxu1 %v7664_v32  ;;  %8797 = vmatprep.subr.mxu0 %v7533_v5  ;;  %v6651_v32 = vld [vmem:[%s16363_s3 + $0xe28] sm:$0xff]  ;;  %v7492_v5 = vunpack.c.l.bf16 %v6589_v52  ;;  %v7489_v30 = vunpack.c.h.bf16 %v6587_v19 }
 0x5d6   :  { %8868 = vmatprep.subr.mxu1 %v7661_v4  ;;  %8798 = vmatpush1.msra.mxu0 %v7532_v1  ;;  %v6585_v1 = vld [vmem:[%s16363_s3 + $0xc18] sm:$0xff]  ;;  %v7620_v4 = vunpack.c.l.bf16 %v6653_v15  ;;  %v7617_v39 = vunpack.c.h.bf16 %v6651_v32 }
 0x5d7   :  { %8869 = vmatpush1.msra.mxu1 %v7660_v35  ;;  %8799 = vmatprep.subr.mxu0 %v7529_v59  ;;  %v6649_v35 = vld [vmem:[%s16363_s3 + $0xe18] sm:$0xff]  ;;  %v7488_v59 = vunpack.c.l.bf16 %v6587_v19  ;;  %v7485_v22 = vunpack.c.h.bf16 %v6585_v1 }
 0x5d8   :  { %8870 = vmatprep.subr.mxu1 %v7657_v42  ;;  %8800 = vmatpush1.msra.mxu0 %v7528_v3  ;;  %v6583_v3 = vld [vmem:[%s16363_s3 + $0xc08] sm:$0xff]  ;;  %v7616_v42 = vunpack.c.l.bf16 %v6651_v32  ;;  %v7613_v57 = vunpack.c.h.bf16 %v6649_v35 }
 0x5d9   :  { %8871 = vmatpush1.msra.mxu1 %v7656_v11  ;;  %8801 = vmatprep.subr.mxu0 %v7525_v62  ;;  %v6647_v11 = vld [vmem:[%s16363_s3 + $0xe08] sm:$0xff]  ;;  %v7484_v62 = vunpack.c.l.bf16 %v6585_v1  ;;  %v7481_v37 = vunpack.c.h.bf16 %v6583_v3 }
 0x5da   :  { %8872 = vmatprep.subr.mxu1 %v7653_v49  ;;  %8802 = vmatpush1.msra.mxu0 %v7524_v9  ;;  %v6645_v9 = vld [vmem:[%s16363_s3 + $0xdf8] sm:$0xff]  ;;  %v7612_v49 = vunpack.c.l.bf16 %v6649_v35  ;;  %v7609_v14 = vunpack.c.h.bf16 %v6647_v11 }
 0x5db   :  { %8873 = vmatpush1.msra.mxu1 %v7652_v48  ;;  %8803 = vmatprep.subr.mxu0 %v7521_v50  ;;  %v6709_v48 = vld [vmem:[%s16363_s3 + $0xff8] sm:$0xff]  ;;  %v7480_v50 = vunpack.c.l.bf16 %v6583_v3  ;;  %v7605_v47 = vunpack.c.h.bf16 %v6645_v9 }
 0x5dc   :  { %8874 = vmatprep.subr.mxu1 %v7649_v17  ;;  %8804 = vmatpush1.msra.mxu0 %v7520_v60  ;;  %v6643_v60 = vld [vmem:[%s16363_s3 + $0xde8] sm:$0xff]  ;;  %v7608_v17 = vunpack.c.l.bf16 %v6647_v11  ;;  %v7733_v63 = vunpack.c.h.bf16 %v6709_v48 }
 0x5dd   :  { %8875 = vmatpush1.msra.mxu1 %v7648_v36  ;;  %8805 = vmatprep.subr.mxu0 %v7517_v54  ;;  %v6707_v36 = vld [vmem:[%s16363_s3 + $0xfe8] sm:$0xff]  ;;  %v7604_v54 = vunpack.c.l.bf16 %v6645_v9  ;;  %v7601_v12 = vunpack.c.h.bf16 %v6643_v60 }
 0x5de   :  { %8876 = vmatprep.subr.mxu1 %v7645_v51  ;;  %8806 = vmatpush1.msra.mxu0 %v7516_v8  ;;  %v6641_v8 = vld [vmem:[%s16363_s3 + $0xdd8] sm:$0xff]  ;;  %v7732_v51 = vunpack.c.l.bf16 %v6709_v48  ;;  %v7729_v6 = vunpack.c.h.bf16 %v6707_v36 }
 0x5df   :  { %8877 = vmatpush1.msra.mxu1 %v7644_v25  ;;  %8807 = vmatprep.subr.mxu0 %v7513_v41  ;;  %v6705_v25 = vld [vmem:[%s16363_s3 + $0xfd8] sm:$0xff]  ;;  %v7600_v41 = vunpack.c.l.bf16 %v6643_v60  ;;  %v7597_v38 = vunpack.c.h.bf16 %v6641_v8 }
 0x5e0   :  { %8878 = vmatprep.subr.mxu1 %v7641_v26  ;;  %8808 = vmatpush1.msra.mxu0 %v7512_v43  ;;  %v6639_v43 = vld [vmem:[%s16363_s3 + $0xdc8] sm:$0xff]  ;;  %v7728_v26 = vunpack.c.l.bf16 %v6707_v36  ;;  %v7725_v29 = vunpack.c.h.bf16 %v6705_v25 }
 0x5e1   :  { %8879 = vmatpush1.msra.mxu1 %v7640_v56  ;;  %8809 = vmatprep.subr.mxu0 %v7509_v44  ;;  %v6703_v56 = vld [vmem:[%s16363_s3 + $0xfc8] sm:$0xff]  ;;  %v7596_v44 = vunpack.c.l.bf16 %v6641_v8  ;;  %v7593_v28 = vunpack.c.h.bf16 %v6639_v43 }
 0x5e2   :  { %8880 = vmatprep.subr.mxu1 %v7637_v55  ;;  %8810 = vmatpush1.msra.mxu0 %v7508_v53  ;;  %v6637_v53 = vld [vmem:[%s16363_s3 + $0xdb8] sm:$0xff]  ;;  %v7724_v55 = vunpack.c.l.bf16 %v6705_v25  ;;  %v7721_v45 = vunpack.c.h.bf16 %v6703_v56 }
 0x5e3   :  { %8881 = vmatpush1.msra.mxu1 %v7636_v2  ;;  %8811 = vmatprep.subr.mxu0 %v7505_v46  ;;  %v6701_v2 = vld [vmem:[%s16363_s3 + $0xfb8] sm:$0xff]  ;;  %v7592_v46 = vunpack.c.l.bf16 %v6639_v43  ;;  %v7589_v34 = vunpack.c.h.bf16 %v6637_v53 }
 0x5e4   :  { %8882 = vmatprep.subr.mxu1 %v7633_v21  ;;  %8812 = vmatpush1.msra.mxu0 %v7504_v31  ;;  %v6635_v31 = vld [vmem:[%s16363_s3 + $0xda8] sm:$0xff]  ;;  %v7720_v21 = vunpack.c.l.bf16 %v6703_v56  ;;  %v7717_v18 = vunpack.c.h.bf16 %v6701_v2 }
 0x5e5   :  { %8883 = vmatpush1.msra.mxu1 %v7632_v23  ;;  %8813 = vmatprep.subr.mxu0 %v7501_v33  ;;  %v6699_v23 = vld [vmem:[%s16363_s3 + $0xfa8] sm:$0xff]  ;;  %v7588_v33 = vunpack.c.l.bf16 %v6637_v53  ;;  %v7585_v52 = vunpack.c.h.bf16 %v6635_v31 }
 0x5e6   :  { %8884 = vmatprep.subr.mxu1 %v7629_v13  ;;  %8814 = vmatpush1.msra.mxu0 %v7500_v10  ;;  %v6633_v10 = vld [vmem:[%s16363_s3 + $0xd98] sm:$0xff]  ;;  %v7716_v13 = vunpack.c.l.bf16 %v6701_v2  ;;  %v7713_v15 = vunpack.c.h.bf16 %v6699_v23 }
 0x5e7   :  { %8885 = vmatpush1.msra.mxu1 %v7628_v20  ;;  %8815 = vmatprep.subr.mxu0 %v7497_v27  ;;  %v6697_v20 = vld [vmem:[%s16363_s3 + $0xf98] sm:$0xff]  ;;  %v7584_v27 = vunpack.c.l.bf16 %v6635_v31  ;;  %v7581_v19 = vunpack.c.h.bf16 %v6633_v10 }
 0x5e8   :  { %8886 = vmatprep.subr.mxu1 %v7625_v7  ;;  %8816 = vmatpush1.msra.mxu0 %v7496_v16  ;;  %v6631_v16 = vld [vmem:[%s16363_s3 + $0xd88] sm:$0xff]  ;;  %v7712_v7 = vunpack.c.l.bf16 %v6699_v23  ;;  %v7709_v32 = vunpack.c.h.bf16 %v6697_v20 }
 0x5e9   :  { %8887 = vmatpush1.msra.mxu1 %v7624_v0  ;;  %8817 = vmatprep.subr.mxu0 %v7493_v61  ;;  %v6695_v0 = vld [vmem:[%s16363_s3 + $0xf88] sm:$0xff]  ;;  %v7580_v61 = vunpack.c.l.bf16 %v6633_v10  ;;  %v7577_v1 = vunpack.c.h.bf16 %v6631_v16 }
 0x5ea   :  { %8888 = vmatprep.subr.mxu1 %v7621_v40  ;;  %8818 = vmatpush1.msra.mxu0 %v7492_v5  ;;  %v6629_v5 = vld [vmem:[%s16363_s3 + $0xd78] sm:$0xff]  ;;  %v7708_v40 = vunpack.c.l.bf16 %v6697_v20  ;;  %v7705_v35 = vunpack.c.h.bf16 %v6695_v0 }
 0x5eb   :  { %8889 = vmatpush1.msra.mxu1 %v7620_v4  ;;  %8819 = vmatprep.subr.mxu0 %v7489_v30  ;;  %v6693_v4 = vld [vmem:[%s16363_s3 + $0xf78] sm:$0xff]  ;;  %v7576_v30 = vunpack.c.l.bf16 %v6631_v16  ;;  %v7573_v3 = vunpack.c.h.bf16 %v6629_v5 }
 0x5ec   :  { %8890 = vmatprep.subr.mxu1 %v7617_v39  ;;  %8820 = vmatpush1.msra.mxu0 %v7488_v59  ;;  %v6627_v59 = vld [vmem:[%s16363_s3 + $0xd68] sm:$0xff]  ;;  %v7704_v39 = vunpack.c.l.bf16 %v6695_v0  ;;  %v7701_v11 = vunpack.c.h.bf16 %v6693_v4  ;;  %v9969_v20 = vld [vmem:[%s16365_s5 + $0x78] sm:$0xff]  }
 0x5ed   :  { %8891 = vmatpush1.msra.mxu1 %v7616_v42  ;;  %8821 = vmatprep.subr.mxu0 %v7485_v22  ;;  %v6691_v42 = vld [vmem:[%s16363_s3 + $0xf68] sm:$0xff]  ;;  %v7572_v22 = vunpack.c.l.bf16 %v6629_v5  ;;  %v7569_v9 = vunpack.c.h.bf16 %v6627_v59  ;;  %v9890_v16 = vunpack.c.h.bf16 %v9969_v20 }
 0x5ee   :  { %8892 = vmatprep.subr.mxu1 %v7613_v57  ;;  %8822 = vmatpush1.msra.mxu0 %v7484_v62  ;;  %v6625_v62 = vld [vmem:[%s16363_s3 + $0xd58] sm:$0xff]  ;;  %v7700_v57 = vunpack.c.l.bf16 %v6693_v4  ;;  %v7697_v48 = vunpack.c.h.bf16 %v6691_v42  ;;  %v9976_v4 = vld [vmem:[%s16365_s5 + $0xb0] sm:$0xff]  }
 0x5ef   :  { %8893 = vmatpush1.msra.mxu1 %v7612_v49  ;;  %8823 = vmatprep.subr.mxu0 %v7481_v37  ;;  %v6689_v49 = vld [vmem:[%s16363_s3 + $0xf58] sm:$0xff]  ;;  %v7568_v37 = vunpack.c.l.bf16 %v6627_v59  ;;  %v7565_v60 = vunpack.c.h.bf16 %v6625_v62 }
 0x5f0   :  { %8894 = vmatprep.subr.mxu1 %v7609_v14  ;;  %8824 = vmatpush1.msra.mxu0 %v7480_v50  ;;  %v6623_v50 = vld [vmem:[%s16363_s3 + $0xd48] sm:$0xff]  ;;  %v7696_v14 = vunpack.c.l.bf16 %v6691_v42  ;;  %v7693_v36 = vunpack.c.h.bf16 %v6689_v49 }
 0x5f1   :  { %8895 = vmatpush1.msra.mxu1 %v7608_v17  ;;  %8825 = vmatprep.subr.mxu0 %v7605_v47  ;;  %v6687_v17 = vld [vmem:[%s16363_s3 + $0xf48] sm:$0xff]  ;;  %v7564_v47 = vunpack.c.l.bf16 %v6625_v62  ;;  %v7561_v8 = vunpack.c.h.bf16 %v6623_v50 }
 0x5f2   :  { %8896 = vmatprep.subr.mxu1 %v7733_v63  ;;  %8826 = vmatpush2.msra.mxu0 %v7604_v54  ;;  %v6621_v54 = vld [vmem:[%s16363_s3 + $0xd38] sm:$0xff]  ;;  %v7692_v63 = vunpack.c.l.bf16 %v6689_v49  ;;  %v7689_v25 = vunpack.c.h.bf16 %v6687_v17 }
 0x5f3   :  { %8897 = vmatpush2.msra.mxu1 %v7732_v51  ;;  %8827 = vmatprep.subr.mxu0 %v7601_v12  ;;  %v6685_v51 = vld [vmem:[%s16363_s3 + $0xf38] sm:$0xff]  ;;  %v7560_v12 = vunpack.c.l.bf16 %v6623_v50  ;;  %v7557_v43 = vunpack.c.h.bf16 %v6621_v54  ;;  %v9983_v50 = vld [vmem:[%s16365_s5 + $0xe8] sm:$0xff]  }
 0x5f4   :  { %8898 = vmatprep.subr.mxu1 %v7729_v6  ;;  %8828 = vmatpush2.msra.mxu0 %v7600_v41  ;;  %v6619_v41 = vld [vmem:[%s16363_s3 + $0xd28] sm:$0xff]  ;;  %v7688_v6 = vunpack.c.l.bf16 %v6687_v17  ;;  %v7685_v56 = vunpack.c.h.bf16 %v6685_v51  ;;  %v9966_v17 = vld [vmem:[%s16365_s5 + $0x60] sm:$0xff]  }
 0x5f5   :  { %8899 = vmatpush2.msra.mxu1 %v7728_v26  ;;  %8829 = vmatprep.subr.mxu0 %v7597_v38  ;;  %v6683_v26 = vld [vmem:[%s16363_s3 + $0xf28] sm:$0xff]  ;;  %v7556_v38 = vunpack.c.l.bf16 %v6621_v54  ;;  %v7553_v53 = vunpack.c.h.bf16 %v6619_v41  ;;  %v9878_v54 = vunpack.c.h.bf16 %v9966_v17 }
 0x5f6   :  { %8900 = vmatprep.subr.mxu1 %v7725_v29  ;;  %8830 = vmatpush2.msra.mxu0 %v7596_v44  ;;  %v6617_v44 = vld [vmem:[%s16363_s3 + $0xd18] sm:$0xff]  ;;  %v7684_v29 = vunpack.c.l.bf16 %v6685_v51  ;;  %v7681_v2 = vunpack.c.h.bf16 %v6683_v26  ;;  %v9982_v51 = vld [vmem:[%s16365_s5 + $0xe0] sm:$0xff]  }
 0x5f7   :  { %8901 = vmatpush2.msra.mxu1 %v7724_v55  ;;  %8831 = vmatprep.subr.mxu0 %v7593_v28  ;;  %v6681_v55 = vld [vmem:[%s16363_s3 + $0xf18] sm:$0xff]  ;;  %v7552_v28 = vunpack.c.l.bf16 %v6619_v41  ;;  %v7549_v31 = vunpack.c.h.bf16 %v6617_v44 }
 0x5f8   :  { %8902 = vmatprep.subr.mxu1 %v7721_v45  ;;  %8832 = vmatpush2.msra.mxu0 %v7592_v46  ;;  %v6615_v46 = vld [vmem:[%s16363_s3 + $0xd08] sm:$0xff]  ;;  %v7680_v45 = vunpack.c.l.bf16 %v6683_v26  ;;  %v7677_v23 = vunpack.c.h.bf16 %v6681_v55  ;;  %v9957_v26 = vld [vmem:[%s16365_s5 + $0x18] sm:$0xff]  }
 0x5f9   :  { %8903 = vmatpush2.msra.mxu1 %v7720_v21  ;;  %8833 = vmatprep.subr.mxu0 %v7589_v34  ;;  %v6679_v21 = vld [vmem:[%s16363_s3 + $0xf08] sm:$0xff]  ;;  %v7548_v34 = vunpack.c.l.bf16 %v6617_v44  ;;  %v7544_v10 = vunpack.c.l.bf16 %v6615_v46 }
 0x5fa   :  { %8904 = vmatprep.subr.mxu1 %v7717_v18  ;;  %8834 = vmatpush2.msra.mxu0 %v7588_v33  ;;  %v7676_v33 = vunpack.c.l.bf16 %v6681_v55  ;;  %v7545_v18 = vunpack.c.h.bf16 %v6615_v46  ;;  %v9941_v55 = vunpack.c.l.bf16 %v9982_v51  ;;  %v9964_v46 = vld [vmem:[%s16365_s5 + $0x50] sm:$0xff]  }
 0x5fb   :  { %8905 = vmatpush2.msra.mxu1 %v7716_v13  ;;  %8835 = vmatprep.subr.mxu0 %v7585_v52  ;;  %v7673_v13 = vunpack.c.h.bf16 %v6679_v21  ;;  %v7672_v52 = vunpack.c.l.bf16 %v6679_v21  ;;  %v9956_v21 = vld [vmem:[%s16365_s5 + $0x10] sm:$0xff]  }
 0x5fc   :  { %8906 = vmatprep.subr.mxu1 %v7713_v15  ;;  %8836 = vmatpush2.msra.mxu0 %v7584_v27  ;;  %v9961_v27 = vld [vmem:[%s16365_s5 + $0x38] sm:$0xff]  }
 0x5fd   :  { %8907 = vmatpush2.msra.mxu1 %v7712_v7  ;;  %8837 = vmatprep.subr.mxu0 %v7581_v19  ;;  %v9985_v15 = vld [vmem:[%s16365_s5 + $0xf8] sm:$0xff]   ;;  %v9858_v7 = vunpack.c.h.bf16 %v9961_v27  ;;  %v9889_v19 = vunpack.c.l.bf16 %v9969_v20  ;;  %v9972_v20 = vld [vmem:[%s16365_s5 + $0x90] sm:$0xff]  }
 0x5fe   :  { %8908 = vmatprep.subr.mxu1 %v7709_v32  ;;  %8838 = vmatpush2.msra.mxu0 %v7580_v61  ;;  %v9954_v0 = vunpack.c.h.bf16 %v9985_v15  ;;  %v9960_v61 = vld [vmem:[%s16365_s5 + $0x30] sm:$0xff]   ;;  %v9857_v32 = vunpack.c.l.bf16 %v9961_v27  ;;  %v9963_v27 = vld [vmem:[%s16365_s5 + $0x48] sm:$0xff]  }
 0x5ff   :  { %8909 = vmatpush2.msra.mxu1 %v7708_v40  ;;  %8839 = vmatprep.subr.mxu0 %v7577_v1  ;;  %v9953_v40 = vunpack.c.l.bf16 %v9985_v15  ;;  %v9984_v1 = vld [vmem:[%s16365_s5 + $0xf0] sm:$0xff]  }
 0x600   :  { %8910 = vmatprep.subr.mxu1 %v7705_v35  ;;  %8840 = vmatpush2.msra.mxu0 %v7576_v30  ;;  %v9950_v59 = vunpack.c.h.bf16 %v9984_v1  ;;  %v9949_v62 = vunpack.c.l.bf16 %v9984_v1  ;;  %v9962_v1 = vld [vmem:[%s16365_s5 + $0x40] sm:$0xff]  }
 0x601   :  { %8911 = vmatpush2.msra.mxu1 %v7704_v39  ;;  %8841 = vmatprep.subr.mxu0 %v7573_v3  ;;  %v9854_v39 = vunpack.c.h.bf16 %v9960_v61  ;;  %v9918_v3 = vunpack.c.h.bf16 %v9976_v4 }
 0x602   :  { %8912 = vmatprep.subr.mxu1 %v7701_v11  ;;  %8842 = vmatpush2.msra.mxu0 %v7572_v22  ;;  %v9853_v22 = vunpack.c.l.bf16 %v9960_v61  ;;  %v9967_v11 = vld [vmem:[%s16365_s5 + $0x68] sm:$0xff]  }
 0x603   :  { %8913 = vmatpush2.msra.mxu1 %v7700_v57  ;;  %8843 = vmatprep.subr.mxu0 %v7569_v9  ;;  %v9959_v57 = vld [vmem:[%s16365_s5 + $0x28] sm:$0xff]   ;;  %v9917_v9 = vunpack.c.l.bf16 %v9976_v4  ;;  %v9882_v49 = vunpack.c.h.bf16 %v9967_v11  ;;  %v9901_v4 = vunpack.c.l.bf16 %v9972_v20 }
 0x604   :  { %8914 = vmatprep.subr.mxu1 %v7697_v48  ;;  %8844 = vmatpush2.msra.mxu0 %v7568_v37  ;;  %v9850_v37 = vunpack.c.h.bf16 %v9959_v57  ;;  %v9881_v48 = vunpack.c.l.bf16 %v9967_v11  ;;  %v9979_v61 = vld [vmem:[%s16365_s5 + $0xc8] sm:$0xff]  }
 0x605   :  { %8915 = vmatpush2.msra.mxu1 %v7696_v14  ;;  %8845 = vmatprep.subr.mxu0 %v7565_v60  ;;  %v9849_v14 = vunpack.c.l.bf16 %v9959_v57  ;;  %v9975_v60 = vld [vmem:[%s16365_s5 + $0xa8] sm:$0xff]   ;;  %v9929_v11 = vunpack.c.l.bf16 %v9979_v61  ;;  %v9970_v57 = vld [vmem:[%s16365_s5 + $0x80] sm:$0xff]  }
 0x606   :  { %8916 = vmatprep.subr.mxu1 %v7693_v36  ;;  %8846 = vmatpush2.msra.mxu0 %v7564_v47  ;;  %v9946_v47 = vunpack.c.h.bf16 %v9983_v50  ;;  %v9914_v36 = vunpack.c.h.bf16 %v9975_v60  ;;  %v9913_v41 = vunpack.c.l.bf16 %v9975_v60  ;;  %v9893_v60 = vunpack.c.l.bf16 %v9970_v57 }
 0x607   :  { %8917 = vmatpush2.msra.mxu1 %v7692_v63  ;;  %8847 = vmatprep.subr.mxu0 %v7561_v8  ;;  %v9945_v63 = vunpack.c.l.bf16 %v9983_v50  ;;  %v9958_v8 = vld [vmem:[%s16365_s5 + $0x20] sm:$0xff]   ;;  %v9894_v50 = vunpack.c.h.bf16 %v9970_v57  ;;  %v16645_v57 = vld [vmem:[#allocation8_spill] sm:$0xff] }
 0x608   :  { %8918 = vmatprep.subr.mxu1 %v7689_v25  ;;  %8848 = vmatpush2.msra.mxu0 %v7560_v12  ;;  %v9974_v12 = vld [vmem:[%s16365_s5 + $0xa0] sm:$0xff]   ;;  %v9846_v25 = vunpack.c.h.bf16 %v9958_v8 }
 0x609   :  { %8919 = vmatpush2.msra.mxu1 %v7688_v6  ;;  %8849 = vmatprep.subr.mxu0 %v7557_v43  ;;  %v9877_v6 = vunpack.c.l.bf16 %v9966_v17  ;;  %v9965_v43 = vld [vmem:[%s16365_s5 + $0x58] sm:$0xff]   ;;  %v9910_v44 = vunpack.c.h.bf16 %v9974_v12  ;;  %v7865_v17 = vpop.f32.mrf.mxu0 }
 0x60a   :  { %8920 = vmatprep.subr.mxu1 %v7685_v56  ;;  %8850 = vmatpush2.msra.mxu0 %v7556_v38  ;;  %v9942_v38 = vunpack.c.h.bf16 %v9982_v51  ;;  %v9845_v56 = vunpack.c.l.bf16 %v9958_v8 }
 0x60b   :  { %8921 = vmatpush2.msra.mxu1 %v7684_v29  ;;  %8851 = vmatprep.subr.mxu0 %v7553_v53  ;;  %v9874_v29 = vunpack.c.h.bf16 %v9965_v43  ;;  %v9981_v53 = vld [vmem:[%s16365_s5 + $0xd8] sm:$0xff]  }
 0x60c   :  { %8922 = vmatprep.subr.mxu1 %v7681_v2  ;;  %8852 = vmatpush2.msra.mxu0 %v7552_v28  ;;  %v9842_v28 = vunpack.c.h.bf16 %v9957_v26  ;;  %v9973_v2 = vld [vmem:[%s16365_s5 + $0x98] sm:$0xff]  }
 0x60d   :  { %8923 = vmatpush2.msra.mxu1 %v7680_v45  ;;  %8853 = vmatprep.subr.mxu0 %v7549_v31  ;;  %v9909_v45 = vunpack.c.l.bf16 %v9974_v12  ;;  %v9873_v31 = vunpack.c.l.bf16 %v9965_v43  ;;  %v9905_v15 = vunpack.c.l.bf16 %v9973_v2 }
 0x60e   :  { %8924 = vmatprep.subr.mxu1 %v7677_v23  ;;  %8854 = vmatpush2.msra.mxu0 %v7548_v34  ;;  %v9938_v34 = vunpack.c.h.bf16 %v9981_v53  ;;  %v9841_v23 = vunpack.c.l.bf16 %v9957_v26 }
 0x60f   :  { %8925 = vmatpush2.msra.mxu1 %v7676_v33  ;;  %8855 = vmatprep.subr.mxu0 %v7545_v18  ;;  %v9906_v33 = vunpack.c.h.bf16 %v9973_v2  ;;  %v9870_v18 = vunpack.c.h.bf16 %v9964_v46 }
 0x610   :  { %8926 = vmatprep.subr.mxu1 %v7673_v13  ;;  %8856 = vmatpush2.msra.mxu0 %v7544_v10  ;;  %v9980_v10 = vld [vmem:[%s16365_s5 + $0xd0] sm:$0xff]   ;;  %v9937_v13 = vunpack.c.l.bf16 %v9981_v53 }
 0x611   :  { %8927 = vmatpush2.msra.mxu1 %v7672_v52  ;;  %8858 = vmatmul.mubr.f32.vlgmr.msra.gmra.mxu0 %v15457_v58  ;;  %v9977_v58 = vld [vmem:[%s16365_s5 + $0xb8] sm:$0xff]   ;;  %v9838_v52 = vunpack.c.h.bf16 %v9956_v21 }
 0x612   :  { %8929 = vmatmul.mubr.f32.vlgmr.msra.gmra.mxu1 %v15466_v24  ;;  %v9968_v24 = vld [vmem:[%s16365_s5 + $0x70] sm:$0xff]   ;;  %v9922_v5 = vunpack.c.h.bf16 %v9977_v58  ;;  %9986 = vmatprep.subr.mxu0 %v9890_v16  ;;  %v9921_v35 = vunpack.c.l.bf16 %v9977_v58  ;;  %v9869_v16 = vunpack.c.l.bf16 %v9964_v46  ;;  %v9902_v58 = vunpack.c.h.bf16 %v9972_v20 }
 0x613   :  { %10021 = vmatprep.subr.mxu1 %v9954_v0  ;;  %v9886_v30 = vunpack.c.h.bf16 %v9968_v24  ;;  %9987 = vmatpush3.msra.mxu0 %v9858_v7  ;;  %v9885_v42 = vunpack.c.l.bf16 %v9968_v24  ;;  %v9955_v7 = vld [vmem:[%s16365_s5 + $0x8] sm:$0xff]   ;;  %v9837_v0 = vunpack.c.l.bf16 %v9956_v21  ;;  %v9866_v24 = vunpack.c.h.bf16 %v9963_v27 }
 0x614   :  { %10022 = vmatpush3.msra.mxu1 %v9922_v5  ;;  %9988 = vmatprep.subr.mxu0 %v9889_v19  ;;  %v9934_v19 = vunpack.c.h.bf16 %v9980_v10  ;;  %v9834_v5 = vunpack.c.h.bf16 %v9955_v7 }
 0x615   :  { %10023 = vmatprep.subr.mxu1 %v9953_v40  ;;  %9989 = vmatpush3.msra.mxu0 %v9857_v32  ;;  %v9933_v32 = vunpack.c.l.bf16 %v9980_v10  ;;  %v9971_v40 = vld [vmem:[%s16365_s5 + $0x88] sm:$0xff]  }
 0x616   :  { %10024 = vmatpush3.msra.mxu1 %v9921_v35  ;;  %9990 = vmatprep.subr.mxu0 %v9886_v30  ;;  %v9865_v30 = vunpack.c.l.bf16 %v9963_v27  ;;  %v9828_v35 = vld [vmem:[%s16365_s5] sm:$0xff]  }
 0x617   :  { %10025 = vmatprep.subr.mxu1 %v9950_v59  ;;  %9991 = vmatpush3.msra.mxu0 %v9854_v39  ;;  %v9930_v59 = vunpack.c.h.bf16 %v9979_v61  ;;  %v9833_v39 = vunpack.c.l.bf16 %v9955_v7 }
 0x618   :  { %10026 = vmatpush3.msra.mxu1 %v9918_v3  ;;  %9992 = vmatprep.subr.mxu0 %v9885_v42  ;;  %v9898_v3 = vunpack.c.h.bf16 %v9971_v40  ;;  %v9862_v42 = vunpack.c.h.bf16 %v9962_v1 }
 0x619   :  { %9993 = vmatpush3.msra.mxu0 %v9853_v22  ;;  %10027 = vmatprep.subr.mxu1 %v9949_v62  ;;  %v9978_v22 = vld [vmem:[%s16365_s5 + $0xc0] sm:$0xff]   ;;  %v9830_v62 = vunpack.c.h.bf16 %v9828_v35 }
 0x61a   :  { %9994 = vmatprep.subr.mxu0 %v9882_v49  ;;  %10028 = vmatpush3.msra.mxu1 %v9917_v9  ;;  %v9897_v9 = vunpack.c.l.bf16 %v9971_v40  ;;  %v9861_v49 = vunpack.c.l.bf16 %v9962_v1 }
 0x61b   :  { %9995 = vmatpush3.msra.mxu0 %v9850_v37  ;;  %10029 = vmatprep.subr.mxu1 %v9946_v47  ;;  %v9926_v37 = vunpack.c.h.bf16 %v9978_v22  ;;  %v7936_v47 = vpop.f32.mrf.mxu1 }
 0x61c   :  { %9996 = vmatprep.subr.mxu0 %v9881_v48  ;;  %10030 = vmatpush3.msra.mxu1 %v9914_v36  ;;  %v9829_v48 = vunpack.c.l.bf16 %v9828_v35  ;;  %v7867_v36 = vpop.f32.mrf.mxu0  ;;  %v7937_v2 = vadd.f32 %v7936_v47, %v7865_v17 }
 0x61d   :  { %9997 = vmatpush3.msra.mxu0 %v9849_v14  ;;  %10031 = vmatprep.subr.mxu1 %v9945_v63  ;;  %v9925_v14 = vunpack.c.l.bf16 %v9978_v22  ;;  %v7938_v63 = vpop.f32.mrf.mxu1 }
 0x61e   :  { %9998 = vmatprep.subr.mxu0 %v9878_v54  ;;  %10032 = vmatpush3.msra.mxu1 %v9913_v41  ;;  %v8007_v54 = vpop.f32.mrf.mxu0 }
 0x61f   :  { %9999 = vmatpush3.msra.mxu0 %v9846_v25  ;;  %10033 = vmatprep.subr.mxu1 %v9942_v38  ;;  %v8078_v8 = vpop.f32.mrf.mxu1 }
 0x620   :  { %10000 = vmatprep.subr.mxu0 %v9877_v6  ;;  %10034 = vmatpush3.msra.mxu1 %v9910_v44  ;;  %v8009_v51 = vpop.f32.mrf.mxu0 }
 0x621   :  { %10001 = vmatpush3.msra.mxu0 %v9845_v56  ;;  %10035 = vmatprep.subr.mxu1 %v9941_v55  ;;  %v8080_v25 = vpop.f32.mrf.mxu1 }
 0x622   :  { %10002 = vmatprep.subr.mxu0 %v9874_v29  ;;  %10036 = vmatpush3.msra.mxu1 %v9909_v45  ;;  %v8149_v12 = vpop.f32.mrf.mxu0 }
 0x623   :  { %10003 = vmatpush3.msra.mxu0 %v9842_v28  ;;  %10037 = vmatprep.subr.mxu1 %v9938_v34  ;;  %v8220_v41 = vpop.f32.mrf.mxu1  ;;  %v7939_v28 = vadd.f32 %v7938_v63, %v7867_v36 }
 0x624   :  { %10004 = vmatprep.subr.mxu0 %v9873_v31  ;;  %10038 = vmatpush3.msra.mxu1 %v9906_v33  ;;  %v8151_v6 = vpop.f32.mrf.mxu0  ;;  %v8008_v31 = vadd.f32 %v8007_v54, %v7937_v2 }
 0x625   :  { %10005 = vmatpush3.msra.mxu0 %v9841_v23  ;;  %10039 = vmatprep.subr.mxu1 %v9937_v13  ;;  %v8222_v26 = vpop.f32.mrf.mxu1  ;;  %v8010_v45 = vadd.f32 %v8009_v51, %v7939_v28 }
 0x626   :  { %10006 = vmatprep.subr.mxu0 %v9870_v18  ;;  %10040 = vmatpush3.msra.mxu1 %v9905_v15  ;;  %v8291_v43 = vpop.f32.mrf.mxu0 }
 0x627   :  { %10007 = vmatpush3.msra.mxu0 %v9838_v52  ;;  %10041 = vmatprep.subr.mxu1 %v9934_v19  ;;  %v8362_v38 = vpop.f32.mrf.mxu1  ;;  %v8081_v33 = vadd.f32 %v8080_v25, %v8010_v45  ;;  %v8079_v52 = vadd.f32 %v8078_v8, %v8008_v31 }
 0x628   :  { %10008 = vmatprep.subr.mxu0 %v9869_v16  ;;  %10042 = vmatpush3.msra.mxu1 %v9902_v58  ;;  %v8293_v56 = vpop.f32.mrf.mxu0 }
 0x629   :  { %10009 = vmatpush3.msra.mxu0 %v9837_v0  ;;  %10043 = vmatprep.subr.mxu1 %v9933_v32  ;;  %v8364_v29 = vpop.f32.mrf.mxu1  ;;  %v8152_v27 = vadd.f32 %v8151_v6, %v8081_v33  ;;  %v8150_v16 = vadd.f32 %v8149_v12, %v8079_v52 }
 0x62a   :  { %10010 = vmatprep.subr.mxu0 %v9866_v24  ;;  %10044 = vmatpush3.msra.mxu1 %v9901_v4  ;;  %v8433_v44 = vpop.f32.mrf.mxu0  ;;  %v10280_v4 = vmov 1983009808  }
 0x62b   :  { %10011 = vmatpush3.msra.mxu0 %v9834_v5  ;;  %10045 = vmatprep.subr.mxu1 %v9930_v59  ;;  %v8504_v53 = vpop.f32.mrf.mxu1  ;;  %v8223_v58 = vadd.f32 %v8222_v26, %v8152_v27  ;;  %v8964_v5 = vld [vmem:[%s16364_s4] sm:$0xf]  ;;  %v8221_v40 = vadd.f32 %v8220_v41, %v8150_v16 }
 0x62c   :  { %10012 = vmatprep.subr.mxu0 %v9865_v30  ;;  %10046 = vmatpush3.msra.mxu1 %v9898_v3  ;;  %v8435_v55 = vpop.f32.mrf.mxu0  ;;  %v8505_v34 = vadd.f32 %v8504_v53, %v8433_v44  ;;  %v8942_v30 = vunpack.c.l.s4 %v10280_v4  ;;  %v16647_v41 = vld [vmem:[#allocation6_spill] sm:$0xff] }
 0x62d   :  { %10013 = vmatpush3.msra.mxu0 %v9833_v39  ;;  %10047 = vmatprep.subr.mxu1 %v9929_v11  ;;  %v8506_v21 = vpop.f32.mrf.mxu1  ;;  %v8294_v1 = vadd.f32 %v8293_v56, %v8223_v58  ;;  %v8292_v59 = vadd.f32 %v8291_v43, %v8221_v40  ;;  %v16643_v39 = vld [vmem:[#allocation7_spill] sm:$0xff]  ;;  %v16644_v11 = vld [vmem:[#allocation9_spill] sm:$0xff] }
 0x62e   :  { %10014 = vmatprep.subr.mxu0 %v9862_v42  ;;  %10048 = vmatpush3.msra.mxu1 %v9897_v9  ;;  %v8507_v18 = vadd.f32 %v8506_v21, %v8435_v55  ;;  %v8969_v3 = vrot.slane %v8964_v5, %v16643_v39  ;;  %v8977_v9 = vrot.slane %v8964_v5, %v16645_v57 }
 0x62f   :  { %10015 = vmatpush3.msra.mxu0 %v9830_v62  ;;  %10049 = vmatprep.subr.mxu1 %v9926_v37  ;;  %v8973_v62 = vrot.slane %v8964_v5, %v16644_v11  ;;  %v8363_v54 = vadd.f32 %v8362_v38, %v8292_v59 }
 0x630   :  { %10016 = vmatprep.subr.mxu0 %v9861_v49  ;;  %10050 = vmatpush3.msra.mxu1 %v9894_v50  ;;  %v16646_v49 = vld [vmem:[#allocation10_spill] sm:$0xff]  ;;  %v8365_v50 = vadd.f32 %v8364_v29, %v8294_v1 }
 0x631   :  { %10017 = vmatpush3.msra.mxu0 %v9829_v48  ;;  %10051 = vmatprep.subr.mxu1 %v9925_v14  ;;  %v8981_v37 = vrot.slane %v8964_v5, %v16646_v49  ;;  %v8943_v14 = vunpack.c.0.s8 %v8942_v30  ;;  %v8982_v8 = vcombine.low %v8969_v3, %v8973_v62 }
 0x632   :  { %10052 = vmatpush3.msra.mxu1 %v9893_v60  ;;  %v8939_v25 = vcombine.low %v8363_v54, %v8365_v50 }
 0x633   :  { %v8983_v51 = vcombine.low %v8977_v9, %v8981_v37  ;;  %v8946_v6 = vsub.s32 %v8943_v14, %v16647_v41 }
 0x635   :  { %v8990_v44 = vrot.slane %v8982_v8, %v8946_v6  ;;  %v8997_v53 = vrot.slane %v8983_v51, %v8946_v6  ;;  %v8947_v55 = vrot.slane %v8939_v25, %v8946_v6 }
 0x637   :  { %v8998_v2 = vcombine.low %v8990_v44, %v8997_v53 }
 0x64d   :  { %v8575_v46 = vpop.f32.mrf.mxu0 }
 0x64e   :  { %v8576_v10 = vadd.f32 %v8575_v46, %v8505_v34  ;;  %v8646_v13 = vpop.f32.mrf.mxu1 }
 0x64f   :  { %v8577_v23 = vpop.f32.mrf.mxu0 }
 0x650   :  { %v8578_v15 = vadd.f32 %v8577_v23, %v8507_v18  ;;  %v8647_v7 = vadd.f32 %v8646_v13, %v8576_v10  ;;  %v8648_v19 = vpop.f32.mrf.mxu1  ;;  %v9826_v10 = vld [vmem:[%s16366_s6] ss:$0 sm:$0xff] }
 0x652   :  { %v8649_v24 = vadd.f32 %v8648_v19, %v8578_v15 }
 0x68f   :  { %v8717_v20 = vpop.f32.mrf.mxu0 }
 0x690   :  { %v8718_v61 = vadd.f32 %v8717_v20, %v8647_v7  ;;  %v8788_v32 = vpop.f32.mrf.mxu1 }
 0x691   :  { %v8719_v0 = vpop.f32.mrf.mxu0 }
 0x692   :  { %v8720_v35 = vadd.f32 %v8719_v0, %v8649_v24  ;;  %v8789_v42 = vadd.f32 %v8788_v32, %v8718_v61  ;;  %v8790_v22 = vpop.f32.mrf.mxu1 }
 0x694   :  { %v8791_v60 = vadd.f32 %v8790_v22, %v8720_v35 }
 0x6d1   :  { %v8859_v48 = vpop.f32.mrf.mxu0 }
 0x6d2   :  { %v8860_v17 = vadd.f32 %v8859_v48, %v8789_v42  ;;  %v8930_v47 = vpop.f32.mrf.mxu1 }
 0x6d3   :  { %v8861_v36 = vpop.f32.mrf.mxu0 }
 0x6d4   :  { %v8862_v63 = vadd.f32 %v8861_v36, %v8791_v60  ;;  %v8932_v12 = vpop.f32.mrf.mxu1  ;;  %v8931_v43 = vadd.f32 %v8930_v47, %v8860_v17 }
 0x6d6   :  { %v8933_v26 = vadd.f32 %v8932_v12, %v8862_v63 }
 0x6d8   :  { %v8940_v56 = vcombine.low %v8931_v43, %v8933_v26 }
 0x6da   :  { %v8954_v29 = vrot.slane %v8940_v56, %v8946_v6 }
 0x6dc   :  { %v8955_v28 = vcombine.low %v8947_v55, %v8954_v29 }
 0x6de   :  { %v8963_v46 = vmul.f32 0.00390625, %v8955_v28 }
 0x6e0   :  { %v9000_v45 = vadd.f32 %v8998_v2, %v8963_v46 }
 0x6e2   :  { %v9001_v31 = vmax.f32 %v9000_v45, 0.0 }
 0x6e4   :  { %v9145_v38 = vrot.slane %v9001_v31, %v8946_v6  ;;  %v9138_v21 = vcombine.high %v9001_v31, %v9001_v31 }
 0x6e6   :  { %v9153_v34 = vcombine.high %v9145_v38, %v9145_v38  ;;  %v9152_v23 = vrot.slane %v9138_v21, %v8946_v6 }
 0x6e8   :  { %9223 = vmatprep.mubr.f32.mxu0 %v9153_v34  ;;  %v9154_v33 = vcombine.high %v9152_v23, %v9152_v23 }
 0x6e9   :  { %9224 = vmatmul.mubr.f32.vlgmr.msra.gmra.mxu0 %v9145_v38 }
 0x6ea   :  { %9293 = vmatprep.mubr.f32.mxu1 %v9154_v33 }
 0x6eb   :  { %9294 = vmatmul.mubr.f32.vlgmr.msra.gmra.mxu1 %v9152_v23 }
 0x7a9   :  { %v10018_v18 = vpop.f32.mrf.mxu0 }
 0x7ab   :  { %v10019_v13 = vpop.f32.mrf.mxu0  ;;  %v10053_v52 = vpop.f32.mrf.mxu1 }
 0x7ac   :  { %v10020_v20 = vadd.f32 %v10019_v13, %v10018_v18 }
 0x7ad   :  { %v10054_v27 = vpop.f32.mrf.mxu1 }
 0x7ae   :  { %v9226_v15 = vadd.f32 %v10020_v20, %v9826_v10  ;;  %v10055_v16 = vadd.f32 %v10054_v27, %v10053_v52 }
 0x7b0   :  { %v9296_v7 = vadd.f32 %v10055_v16, %v9226_v15 }
 0x7b2   :  { %9299 = vst [vmem:[#allocation3] sm:$0x3] %v9296_v7 }
 0x7b3   :  { %10268 = shalt.err (!%p10265_p4)
}
 0x7b4   :  { %9309 = dma.vmem_to_hbm [thread:$0]  %s9307_s10, 32, %s16367_s7, [#allocation4]  }
 0x7b5   :  { %10277 = dma.done.wait [#allocation4], 32  }
 0x7b6   :  { %10278 = vsyncadd [#allocation4], 4294967264 }
 0x7b7   :  { %9313 = vsyncpa [#allocation4], 1 }

</bundles_post_ra>
